<compile_context>
chip_gen: v6e
topology: v6e:2x2x1
jax: 0.10.0
libtpu: 0.0.40
codegen_flags: <defaults>
</compile_context>

<pallas_src>
import functools

import jax
import jax.numpy as jnp
from jax import lax
from jax.experimental import pallas as pl
from jax.experimental.pallas import tpu as pltpu


# --------------------------------------------------------------------------- #
# Kernel
# --------------------------------------------------------------------------- #
def lstm_head_kernel(x_ref, tagb_ref, wih_ref, whh_ref, wl_ref, bl_ref,
                     out_ref, h_scr, c_scr, gx_scr, *, seq_len, n_split):
    """One (batch-tile, time-slab) grid step of the LSTM recurrence.

    x_ref    : (TS, BT, Dp)    bf16  time-major text-embedding slab (zero padded)
    tagb_ref : (BT, 4*Dp)      f32   per-example gate bias = emb_tag @ W_ih_tag^T + b
    wih_ref  : (Dp, 4*Dp)      bf16  text half of W_ih^T (gate blocks lane aligned)
    whh_ref  : (Dp, 4*Dp)      bf16  W_hh^T              (gate blocks lane aligned)
    wl_ref   : (1, Dp)         f32   linear weight row
    bl_ref   : (1, 1)          f32   linear bias
    out_ref  : (BT, 1)         f32   sigmoid(h_T @ wl + bl)   (written at last slab)
    h_scr/c_scr : (BT, Dp)     f32   recurrent state carried across time slabs
    gx_scr   : (TS, BT, 4*Dp)  f32   hoisted input projection for the slab
    """
    t_idx = pl.program_id(1)
    n_t = pl.num_programs(1)
    TS, BT, Dp = x_ref.shape
    G = 4 * Dp
    CH = BT // n_split
    needs_mask = (seq_len % TS) != 0        # static Python bool

    @pl.when(t_idx == 0)
    def _init():
        h_scr[...] = jnp.zeros_like(h_scr)
        c_scr[...] = jnp.zeros_like(c_scr)

    # Hoisted input projection for the whole slab: one big bf16 MXU matmul (f32 acc),
    # stored into VMEM scratch so the serial loop reads it through a ref.
    x_slab = x_ref[...].reshape(TS * BT, Dp)
    gx_scr[...] = jnp.dot(
        x_slab, wih_ref[...], preferred_element_type=jnp.float32).reshape(TS, BT, G)

    whh = whh_ref[...]                      # bf16 (Dp, 4Dp)
    tagb = tagb_ref[...]                    # f32  (BT, 4Dp)
    h0 = h_scr[...]
    c0 = c_scr[...]
    tag_chunks = [tagb[k * CH:(k + 1) * CH, :] for k in range(n_split)]

    t_base = t_idx * TS

    def step(s, carry):
        gx_s = gx_scr[s]                    # (BT, 4Dp) f32, dynamic leading index
        if needs_mask:
            m = ((t_base + s) < seq_len).astype(jnp.float32)   # scalar 0/1
        new = []
        # n_split independent chains -> the MXU push of chain k+1 overlaps the
        # EUP/VPU gate math of chain k inside each unrolled step.
        for k in range(n_split):
            h_k, c_k = carry[2 * k], carry[2 * k + 1]
            g = (gx_s[k * CH:(k + 1) * CH, :] + tag_chunks[k]
                 + jnp.dot(h_k.astype(jnp.bfloat16), whh,
                           preferred_element_type=jnp.float32))
            i_g = jax.nn.sigmoid(g[:, 0 * Dp:1 * Dp])   # lane-aligned gate slices
            f_g = jax.nn.sigmoid(g[:, 1 * Dp:2 * Dp])
            g_g = jnp.tanh(g[:, 2 * Dp:3 * Dp])
            o_g = jax.nn.sigmoid(g[:, 3 * Dp:4 * Dp])
            c_n = f_g * c_k + i_g * g_g
            h_n = o_g * jnp.tanh(c_n)
            if needs_mask:                  # padded time steps must not evolve h/c
                c_n = m * c_n + (1.0 - m) * c_k
                h_n = m * h_n + (1.0 - m) * h_k
            new.extend([h_n, c_n])
        return tuple(new)

    init = []
    for k in range(n_split):
        init.extend([h0[k * CH:(k + 1) * CH, :], c0[k * CH:(k + 1) * CH, :]])
    final = lax.fori_loop(0, TS, step, tuple(init), unroll=True)

    for k in range(n_split):
        h_scr[k * CH:(k + 1) * CH, :] = final[2 * k]
        c_scr[k * CH:(k + 1) * CH, :] = final[2 * k + 1]

    @pl.when(t_idx == n_t - 1)
    def _finalize():
        # Final linear (D -> 1) as a VPU multiply + cross-lane reduce (no N=1 matmul).
        h = h_scr[...]
        logits = jnp.sum(h * wl_ref[...], axis=-1, keepdims=True) + bl_ref[...]
        out_ref[...] = jax.nn.sigmoid(logits)


# --------------------------------------------------------------------------- #
# Wrapper
# --------------------------------------------------------------------------- #
def _round_up(x, m):
    return ((x + m - 1) // m) * m


def _pad_gate_mat(w, d, dp):
    # w: (d, 4*d) with PyTorch gate blocks [i|f|g|o] along axis 1.  Pad each gate
    # block independently so gate k occupies columns [k*dp, k*dp + d); padded
    # rows/cols are zero, so padded hidden units stay exactly zero.
    w4 = w.reshape(d, 4, d)
    w4 = jnp.pad(w4, ((0, dp - d), (0, 0), (0, dp - d)))
    return w4.reshape(dp, 4 * dp)


def arch2_forward(text_ids, tag_id, params, *, ts_max=32, bt_max=256):
    """text_ids: (B, S) int32, tag_id: (B,) int32  ->  (B, 1) f32."""
    emb = params["embedding"].astype(jnp.float32)
    D = emb.shape[1]
    B, S = text_ids.shape

    # --- embedding gather (plain JAX glue) ---
    emb_text = emb[text_ids]                               # (B, S, D)
    emb_tag = emb[tag_id]                                  # (B, D)

    # --- split W_ih into text/tag halves; fold tag projection + both biases ---
    w_ih = params["w_ih"].astype(jnp.float32)              # (4D, 2D), gates i,f,g,o
    wih_text_t = w_ih[:, :D].T                             # (D, 4D)
    wih_tag_t = w_ih[:, D:].T                              # (D, 4D)
    whh_t = params["w_hh"].astype(jnp.float32).T           # (D, 4D)
    bias = (params["b_ih"] + params["b_hh"]).astype(jnp.float32)

    tag_bias = emb_tag @ wih_tag_t + bias[None, :]         # (B, 4D), time-invariant
    wl = params["w_lin"].astype(jnp.float32)               # (1, D)
    bl = params["b_lin"].astype(jnp.float32).reshape(1, 1)

    # --- padding: per-gate hidden to 128 lanes; batch tiles multiple of 16 sublanes
    #     (bf16 x slab wants 16-row granularity) ---
    LANE, SUBB = 128, 16
    Dp = _round_up(D, LANE)

    nb = max(1, -(-B // bt_max))
    if nb == 1 and B > 128:
        nb = 2                    # keep both v7x TensorCores busy on the parallel axis
    BT = _round_up(-(-B // nb), SUBB)
    Bp = nb * BT
    n_split = 2 if (BT % 16 == 0 and BT >= 16) else 1

    # --- derive TS under a VMEM budget; vmem limit from actual tile sizes ---
    try:
        vmem_cap = int(pltpu.get_tpu_info().vmem_capacity_bytes)
    except Exception:
        vmem_cap = 64 * 1024 * 1024                        # conservative (v7x)
    budget = min(int(0.55 * vmem_cap), 72 * 1024 * 1024)

    def vmem_estimate(ts):
        x_slab = 2 * ts * BT * Dp * 2          # bf16 slab, double-buffered
        gx = 2 * ts * BT * 4 * Dp * 4          # f32 gate scratch + matmul temp
        tagb = 2 * BT * 4 * Dp * 4             # f32, double-buffered
        wts = 2 * 2 * Dp * 4 * Dp * 2          # two bf16 weight mats, worst case 2 bufs
        state = 2 * BT * Dp * 4                # h, c scratch
        return x_slab + gx + tagb + wts + state + (BT + Dp + 64) * 4

    TS = max(1, min(ts_max, S))
    while TS > 1 and vmem_estimate(TS) > budget:
        TS -= 1
    nt = -(-S // TS)
    Sp = nt * TS
    est = vmem_estimate(TS)
    vmem_limit = int(min(max(est + est // 4 + 4 * 2**20, 20 * 2**20), 110 * 2**20))

    # --- pad & cast operands (MXU operands in bf16, bias/head in f32) ---
    wih_p = _pad_gate_mat(wih_text_t, D, Dp).astype(jnp.bfloat16)     # (Dp, 4Dp)
    whh_p = _pad_gate_mat(whh_t, D, Dp).astype(jnp.bfloat16)          # (Dp, 4Dp)
    tagb_p = jnp.pad(tag_bias.reshape(B, 4, D),
                     ((0, Bp - B), (0, 0), (0, Dp - D))).reshape(Bp, 4 * Dp)
    wl_p = jnp.pad(wl, ((0, 0), (0, Dp - D)))                         # (1, Dp)

    x_tm = jnp.transpose(emb_text, (1, 0, 2))                         # (S, B, D)
    x_p = jnp.pad(x_tm, ((0, Sp - S), (0, Bp - B), (0, Dp - D))
                  ).astype(jnp.bfloat16)                              # (Sp, Bp, Dp)

    kernel = functools.partial(lstm_head_kernel, seq_len=S, n_split=n_split)

    def build_call(single_buffer_weights):
        def const_spec(shape):
            if single_buffer_weights:
                return pl.BlockSpec(shape, lambda b, t: (0, 0),
                                    pipeline_mode=pl.Buffered(1))
            return pl.BlockSpec(shape, lambda b, t: (0, 0))

        grid_spec = pltpu.PrefetchScalarGridSpec(
            num_scalar_prefetch=0,
            grid=(nb, nt),
            in_specs=[
                pl.BlockSpec((TS, BT, Dp), lambda b, t: (t, b, 0)),   # x time slab
                pl.BlockSpec((BT, 4 * Dp), lambda b, t: (b, 0)),      # tag/bias term
                const_spec((Dp, 4 * Dp)),                             # W_ih(text)^T
                const_spec((Dp, 4 * Dp)),                             # W_hh^T
                const_spec((1, Dp)),                                  # W_lin row
                const_spec((1, 1)),                                   # b_lin
            ],
            out_specs=pl.BlockSpec((BT, 1), lambda b, t: (b, 0)),
            scratch_shapes=[
                pltpu.VMEM((BT, Dp), jnp.float32),                    # h carry
                pltpu.VMEM((BT, Dp), jnp.float32),                    # c carry
                pltpu.VMEM((TS, BT, 4 * Dp), jnp.float32),            # gx slab
            ],
        )
        return pl.pallas_call(
            kernel,
            out_shape=jax.ShapeDtypeStruct((Bp, 1), jnp.float32),
            grid_spec=grid_spec,
            compiler_params=pltpu.CompilerParams(
                dimension_semantics=("parallel", "arbitrary"),
                vmem_limit_bytes=vmem_limit,
            ),
        )

    args = (x_p, tagb_p, wih_p, whh_p, wl_p, bl)
    try:
        out_p = build_call(True)(*args)
        out_p.block_until_ready()
    except Exception:
        # This jax build rejects pipeline_mode single-buffering; fall back to the
        # default double-buffered weight blocks (identical results).
        out_p = build_call(False)(*args)

    return out_p[:B]


# --------------------------------------------------------------------------- #
# Pure-JAX reference (for correctness check) and param init
# --------------------------------------------------------------------------- #
def arch2_reference(text_ids, tag_id, params):
    emb = params["embedding"].astype(jnp.float32)
    D = emb.shape[1]
    emb_text = emb[text_ids]                  # (B, S, D)
    emb_tag = emb[tag_id]                     # (B, D)
    B, S, _ = emb_text.shape
    x = jnp.concatenate(
        [emb_text, jnp.broadcast_to(emb_tag[:, None, :], (B, S, D))], axis=-1)
    w_ih = params["w_ih"].astype(jnp.float32)
    w_hh = params["w_hh"].astype(jnp.float32)
    b = (params["b_ih"] + params["b_hh"]).astype(jnp.float32)

    def step(carry, x_t):
        h, c = carry
        gates = x_t @ w_ih.T + h @ w_hh.T + b
        i_g, f_g, g_g, o_g = jnp.split(gates, 4, axis=-1)
        c = jax.nn.sigmoid(f_g) * c + jax.nn.sigmoid(i_g) * jnp.tanh(g_g)
        h = jax.nn.sigmoid(o_g) * jnp.tanh(c)
        return (h, c), None

    h0 = jnp.zeros((B, D), jnp.float32)
    (h, _), _ = lax.scan(step, (h0, h0), jnp.transpose(x, (1, 0, 2)))
    logits = h @ params["w_lin"].astype(jnp.float32).T + params["b_lin"].astype(jnp.float32)
    return jax.nn.sigmoid(logits)


def init_params(key, num_emb, dim_emb, pad_idx):
    k_emb, k_ih, k_hh, k_bih, k_bhh, k_wl, k_bl = jax.random.split(key, 7)
    scale = 1.0 / jnp.sqrt(dim_emb)
    emb = jax.random.normal(k_emb, (num_emb, dim_emb), jnp.float32)
    emb = emb.at[pad_idx].set(0.0)  # padding_idx row is zero in nn.Embedding
    return {
        "embedding": emb,
        "w_ih": jax.random.uniform(k_ih, (4 * dim_emb, 2 * dim_emb), jnp.float32, -scale, scale),
        "w_hh": jax.random.uniform(k_hh, (4 * dim_emb, dim_emb), jnp.float32, -scale, scale),
        "b_ih": jax.random.uniform(k_bih, (4 * dim_emb,), jnp.float32, -scale, scale),
        "b_hh": jax.random.uniform(k_bhh, (4 * dim_emb,), jnp.float32, -scale, scale),
        "w_lin": jax.random.uniform(k_wl, (1, dim_emb), jnp.float32, -scale, scale),
        "b_lin": jax.random.uniform(k_bl, (1,), jnp.float32, -scale, scale),
    }


if __name__ == "__main__":
    key = jax.random.PRNGKey(0)
    k_p1, k_t1, k_g1, k_p2, k_t2, k_g2 = jax.random.split(key, 6)

    # --- config 1: small shapes implied by the module ---
    NUM_EMB, DIM_EMB, PAD_IDX = 16, 32, 0
    B, S = 2, 8
    params = init_params(k_p1, NUM_EMB, DIM_EMB, PAD_IDX)
    text_ids = jax.random.randint(k_t1, (B, S), 0, NUM_EMB, dtype=jnp.int32)
    tag_id = jax.random.randint(k_g1, (B,), 0, NUM_EMB, dtype=jnp.int32)

    out = jax.block_until_ready(arch2_forward(text_ids, tag_id, params))
    ref = jax.block_until_ready(arch2_reference(text_ids, tag_id, params))
    assert out.shape == (B, 1)
    assert bool(jnp.all((out >= 0.0) & (out <= 1.0)))
    assert bool(jnp.allclose(out, ref, atol=2e-2, rtol=2e-2)), (out, ref)

    # --- config 2: exercises batch/hidden padding, the remainder time slab + mask,
    #     multi-slab h/c carry and the two-chain interleave ---
    B2, S2, D2, V2 = 30, 21, 40, 24
    params2 = init_params(k_p2, V2, D2, PAD_IDX)
    text_ids2 = jax.random.randint(k_t2, (B2, S2), 0, V2, dtype=jnp.int32)
    tag_id2 = jax.random.randint(k_g2, (B2,), 0, V2, dtype=jnp.int32)

    out2 = jax.block_until_ready(arch2_forward(text_ids2, tag_id2, params2, ts_max=8))
    ref2 = jax.block_until_ready(arch2_reference(text_ids2, tag_id2, params2))
    assert out2.shape == (B2, 1)
    assert bool(jnp.allclose(out2, ref2, atol=2e-2, rtol=2e-2)), \
        float(jnp.max(jnp.abs(out2 - ref2)))

    print("KERNEL_OK")
</pallas_src>

<mosaic_0001>
module attributes {stable_mosaic.version = 11 : i64} {
  func.func @lstm_head_kernel(%arg0: i32, %arg1: i32, %arg2: memref<8x16x128xbf16, #tpu.memory_space<vmem>>, %arg3: memref<16x512xf32, #tpu.memory_space<vmem>>, %arg4: memref<128x512xbf16, #tpu.memory_space<vmem>>, %arg5: memref<128x512xbf16, #tpu.memory_space<vmem>>, %arg6: memref<1x128xf32, #tpu.memory_space<vmem>>, %arg7: memref<1x1xf32, #tpu.memory_space<vmem>>, %arg8: memref<16x1xf32, #tpu.memory_space<vmem>>, %arg9: memref<16x128xf32, #tpu.memory_space<vmem>>, %arg10: memref<16x128xf32, #tpu.memory_space<vmem>>, %arg11: memref<8x16x512xf32, #tpu.memory_space<vmem>>) attributes {dimension_semantics = [#tpu.dimension_semantics<parallel>, #tpu.dimension_semantics<arbitrary>], iteration_bounds = array<i64: 1, 1>, scalar_prefetch = 0 : i64, scratch_operands = 3 : i64, tpu.core_type = #tpu.core_type<tc>, window_params = [{transform_indices = @transform_0, window_bounds = array<i64: 8, 16, 128>}, {transform_indices = @transform_1, window_bounds = array<i64: 16, 512>}, {pipeline_mode = #tpu.pipeline_mode<synchronous>, transform_indices = @transform_2, window_bounds = array<i64: 128, 512>}, {pipeline_mode = #tpu.pipeline_mode<synchronous>, transform_indices = @transform_3, window_bounds = array<i64: 128, 512>}, {pipeline_mode = #tpu.pipeline_mode<synchronous>, transform_indices = @transform_4, window_bounds = array<i64: 1, 128>}, {pipeline_mode = #tpu.pipeline_mode<synchronous>, transform_indices = @transform_5, window_bounds = array<i64: 1, 1>}, {transform_indices = @transform_6, window_bounds = array<i64: 16, 1>}]} {
    %c0_i32 = arith.constant 0 : i32
    %0 = arith.cmpi eq, %arg1, %c0_i32 : i32
    %1 = arith.extui %0 : i1 to i32
    %c0_i32_0 = arith.constant 0 : i32
    %2 = arith.cmpi ne, %1, %c0_i32_0 : i32
    scf.if %2 {
      %cst_106 = arith.constant 0.000000e+00 : f32
      %530 = vector.broadcast %cst_106 : f32 to vector<16x128xf32>
      %c0_107 = arith.constant 0 : index
      %c0_108 = arith.constant 0 : index
      %531 = vector.load %arg9[%c0_107, %c0_108] : memref<16x128xf32, #tpu.memory_space<vmem>>, vector<16x128xf32>
      tpu.vector_store %arg9[%c0_107, %c0_108], %530 {strides = array<i32>} : memref<16x128xf32, #tpu.memory_space<vmem>>, vector<16x128xf32>,
      %cst_109 = arith.constant 0.000000e+00 : f32
      %532 = vector.broadcast %cst_109 : f32 to vector<16x128xf32>
      %c0_110 = arith.constant 0 : index
      %c0_111 = arith.constant 0 : index
      %533 = vector.load %arg10[%c0_110, %c0_111] : memref<16x128xf32, #tpu.memory_space<vmem>>, vector<16x128xf32>
      tpu.vector_store %arg10[%c0_110, %c0_111], %532 {strides = array<i32>} : memref<16x128xf32, #tpu.memory_space<vmem>>, vector<16x128xf32>,
    } else {
    }
    %c0 = arith.constant 0 : index
    %c0_1 = arith.constant 0 : index
    %c0_2 = arith.constant 0 : index
    %3 = vector.load %arg2[%c0, %c0_1, %c0_2] : memref<8x16x128xbf16, #tpu.memory_space<vmem>>, vector<8x16x128xbf16>
    %4 = vector.shape_cast %3 : vector<8x16x128xbf16> to vector<128x128xbf16>
    %c0_3 = arith.constant 0 : index
    %c0_4 = arith.constant 0 : index
    %5 = vector.load %arg4[%c0_3, %c0_4] : memref<128x512xbf16, #tpu.memory_space<vmem>>, vector<128x512xbf16>
    %cst = arith.constant dense<0.000000e+00> : vector<128x512xf32>
    %6 = tpu.matmul %4, %5, %cst {dimension_numbers = #tpu.dot_dimension_numbers<[1], [0], [0], [1], [0, 0, 1, 1], [], []>} : vector<128x128xbf16>, vector<128x512xbf16>, vector<128x512xf32> -> vector<128x512xf32>
    %7 = vector.shape_cast %6 : vector<128x512xf32> to vector<8x16x512xf32>
    %c0_5 = arith.constant 0 : index
    %c0_6 = arith.constant 0 : index
    %c0_7 = arith.constant 0 : index
    %8 = vector.load %arg11[%c0_5, %c0_6, %c0_7] : memref<8x16x512xf32, #tpu.memory_space<vmem>>, vector<8x16x512xf32>
    tpu.vector_store %arg11[%c0_5, %c0_6, %c0_7], %7 {strides = array<i32>} : memref<8x16x512xf32, #tpu.memory_space<vmem>>, vector<8x16x512xf32>,
    %c0_8 = arith.constant 0 : index
    %c0_9 = arith.constant 0 : index
    %9 = vector.load %arg5[%c0_8, %c0_9] : memref<128x512xbf16, #tpu.memory_space<vmem>>, vector<128x512xbf16>
    %c0_10 = arith.constant 0 : index
    %c0_11 = arith.constant 0 : index
    %10 = vector.load %arg3[%c0_10, %c0_11] : memref<16x512xf32, #tpu.memory_space<vmem>>, vector<16x512xf32>
    %c0_12 = arith.constant 0 : index
    %c0_13 = arith.constant 0 : index
    %11 = vector.load %arg9[%c0_12, %c0_13] : memref<16x128xf32, #tpu.memory_space<vmem>>, vector<16x128xf32>
    %c0_14 = arith.constant 0 : index
    %c0_15 = arith.constant 0 : index
    %12 = vector.load %arg10[%c0_14, %c0_15] : memref<16x128xf32, #tpu.memory_space<vmem>>, vector<16x128xf32>
    %13 = vector.extract_strided_slice %10 {offsets = [0, 0], sizes = [8, 512], strides = [1, 1]} : vector<16x512xf32> to vector<8x512xf32>
    %14 = vector.extract_strided_slice %10 {offsets = [8, 0], sizes = [8, 512], strides = [1, 1]} : vector<16x512xf32> to vector<8x512xf32>
    %15 = vector.extract_strided_slice %11 {offsets = [0, 0], sizes = [8, 128], strides = [1, 1]} : vector<16x128xf32> to vector<8x128xf32>
    %16 = vector.extract_strided_slice %12 {offsets = [0, 0], sizes = [8, 128], strides = [1, 1]} : vector<16x128xf32> to vector<8x128xf32>
    %17 = vector.extract_strided_slice %11 {offsets = [8, 0], sizes = [8, 128], strides = [1, 1]} : vector<16x128xf32> to vector<8x128xf32>
    %18 = vector.extract_strided_slice %12 {offsets = [8, 0], sizes = [8, 128], strides = [1, 1]} : vector<16x128xf32> to vector<8x128xf32>
    %c0_i32_16 = arith.constant 0 : i32
    %19 = arith.index_cast %c0_i32_16 : i32 to index
    %c0_17 = arith.constant 0 : index
    %c0_18 = arith.constant 0 : index
    %20 = vector.load %arg11[%19, %c0_17, %c0_18] : memref<8x16x512xf32, #tpu.memory_space<vmem>>, vector<1x16x512xf32>
    %21 = vector.shape_cast %20 : vector<1x16x512xf32> to vector<16x512xf32>
    %22 = vector.extract_strided_slice %21 {offsets = [0, 0], sizes = [8, 512], strides = [1, 1]} : vector<16x512xf32> to vector<8x512xf32>
    %23 = arith.addf %22, %13 : vector<8x512xf32>
    %24 = arith.truncf %15 : vector<8x128xf32> to vector<8x128xbf16>
    %cst_19 = arith.constant dense<0.000000e+00> : vector<8x512xf32>
    %25 = tpu.matmul %24, %9, %cst_19 {dimension_numbers = #tpu.dot_dimension_numbers<[1], [0], [0], [1], [0, 0, 1, 1], [], []>} : vector<8x128xbf16>, vector<128x512xbf16>, vector<8x512xf32> -> vector<8x512xf32>
    %26 = arith.addf %23, %25 : vector<8x512xf32>
    %27 = vector.extract_strided_slice %26 {offsets = [0, 0], sizes = [8, 128], strides = [1, 1]} : vector<8x512xf32> to vector<8x128xf32>
    %28 = arith.negf %27 : vector<8x128xf32>
    %29 = math.exp %28 : vector<8x128xf32>
    %cst_20 = arith.constant 1.000000e+00 : f32
    %30 = vector.broadcast %cst_20 : f32 to vector<8x128xf32>
    %31 = arith.addf %30, %29 : vector<8x128xf32>
    %32 = arith.divf %30, %31 : vector<8x128xf32>
    %33 = vector.extract_strided_slice %26 {offsets = [0, 128], sizes = [8, 128], strides = [1, 1]} : vector<8x512xf32> to vector<8x128xf32>
    %34 = arith.negf %33 : vector<8x128xf32>
    %35 = math.exp %34 : vector<8x128xf32>
    %cst_21 = arith.constant 1.000000e+00 : f32
    %36 = vector.broadcast %cst_21 : f32 to vector<8x128xf32>
    %37 = arith.addf %36, %35 : vector<8x128xf32>
    %38 = arith.divf %36, %37 : vector<8x128xf32>
    %39 = vector.extract_strided_slice %26 {offsets = [0, 256], sizes = [8, 128], strides = [1, 1]} : vector<8x512xf32> to vector<8x128xf32>
    %40 = math.tanh %39 : vector<8x128xf32>
    %41 = vector.extract_strided_slice %26 {offsets = [0, 384], sizes = [8, 128], strides = [1, 1]} : vector<8x512xf32> to vector<8x128xf32>
    %42 = arith.negf %41 : vector<8x128xf32>
    %43 = math.exp %42 : vector<8x128xf32>
    %cst_22 = arith.constant 1.000000e+00 : f32
    %44 = vector.broadcast %cst_22 : f32 to vector<8x128xf32>
    %45 = arith.addf %44, %43 : vector<8x128xf32>
    %46 = arith.divf %44, %45 : vector<8x128xf32>
    %47 = arith.mulf %38, %16 : vector<8x128xf32>
    %48 = arith.mulf %32, %40 : vector<8x128xf32>
    %49 = arith.addf %47, %48 : vector<8x128xf32>
    %50 = math.tanh %49 : vector<8x128xf32>
    %51 = arith.mulf %46, %50 : vector<8x128xf32>
    %52 = vector.extract_strided_slice %21 {offsets = [8, 0], sizes = [8, 512], strides = [1, 1]} : vector<16x512xf32> to vector<8x512xf32>
    %53 = arith.addf %52, %14 : vector<8x512xf32>
    %54 = arith.truncf %17 : vector<8x128xf32> to vector<8x128xbf16>
    %cst_23 = arith.constant dense<0.000000e+00> : vector<8x512xf32>
    %55 = tpu.matmul %54, %9, %cst_23 {dimension_numbers = #tpu.dot_dimension_numbers<[1], [0], [0], [1], [0, 0, 1, 1], [], []>} : vector<8x128xbf16>, vector<128x512xbf16>, vector<8x512xf32> -> vector<8x512xf32>
    %56 = arith.addf %53, %55 : vector<8x512xf32>
    %57 = vector.extract_strided_slice %56 {offsets = [0, 0], sizes = [8, 128], strides = [1, 1]} : vector<8x512xf32> to vector<8x128xf32>
    %58 = arith.negf %57 : vector<8x128xf32>
    %59 = math.exp %58 : vector<8x128xf32>
    %cst_24 = arith.constant 1.000000e+00 : f32
    %60 = vector.broadcast %cst_24 : f32 to vector<8x128xf32>
    %61 = arith.addf %60, %59 : vector<8x128xf32>
    %62 = arith.divf %60, %61 : vector<8x128xf32>
    %63 = vector.extract_strided_slice %56 {offsets = [0, 128], sizes = [8, 128], strides = [1, 1]} : vector<8x512xf32> to vector<8x128xf32>
    %64 = arith.negf %63 : vector<8x128xf32>
    %65 = math.exp %64 : vector<8x128xf32>
    %cst_25 = arith.constant 1.000000e+00 : f32
    %66 = vector.broadcast %cst_25 : f32 to vector<8x128xf32>
    %67 = arith.addf %66, %65 : vector<8x128xf32>
    %68 = arith.divf %66, %67 : vector<8x128xf32>
    %69 = vector.extract_strided_slice %56 {offsets = [0, 256], sizes = [8, 128], strides = [1, 1]} : vector<8x512xf32> to vector<8x128xf32>
    %70 = math.tanh %69 : vector<8x128xf32>
    %71 = vector.extract_strided_slice %56 {offsets = [0, 384], sizes = [8, 128], strides = [1, 1]} : vector<8x512xf32> to vector<8x128xf32>
    %72 = arith.negf %71 : vector<8x128xf32>
    %73 = math.exp %72 : vector<8x128xf32>
    %cst_26 = arith.constant 1.000000e+00 : f32
    %74 = vector.broadcast %cst_26 : f32 to vector<8x128xf32>
    %75 = arith.addf %74, %73 : vector<8x128xf32>
    %76 = arith.divf %74, %75 : vector<8x128xf32>
    %77 = arith.mulf %68, %18 : vector<8x128xf32>
    %78 = arith.mulf %62, %70 : vector<8x128xf32>
    %79 = arith.addf %77, %78 : vector<8x128xf32>
    %80 = math.tanh %79 : vector<8x128xf32>
    %81 = arith.mulf %76, %80 : vector<8x128xf32>
    %c1_i32 = arith.constant 1 : i32
    %82 = arith.index_cast %c1_i32 : i32 to index
    %c0_27 = arith.constant 0 : index
    %c0_28 = arith.constant 0 : index
    %83 = vector.load %arg11[%82, %c0_27, %c0_28] : memref<8x16x512xf32, #tpu.memory_space<vmem>>, vector<1x16x512xf32>
    %84 = vector.shape_cast %83 : vector<1x16x512xf32> to vector<16x512xf32>
    %85 = vector.extract_strided_slice %84 {offsets = [0, 0], sizes = [8, 512], strides = [1, 1]} : vector<16x512xf32> to vector<8x512xf32>
    %86 = arith.addf %85, %13 : vector<8x512xf32>
    %87 = arith.truncf %51 : vector<8x128xf32> to vector<8x128xbf16>
    %cst_29 = arith.constant dense<0.000000e+00> : vector<8x512xf32>
    %88 = tpu.matmul %87, %9, %cst_29 {dimension_numbers = #tpu.dot_dimension_numbers<[1], [0], [0], [1], [0, 0, 1, 1], [], []>} : vector<8x128xbf16>, vector<128x512xbf16>, vector<8x512xf32> -> vector<8x512xf32>
    %89 = arith.addf %86, %88 : vector<8x512xf32>
    %90 = vector.extract_strided_slice %89 {offsets = [0, 0], sizes = [8, 128], strides = [1, 1]} : vector<8x512xf32> to vector<8x128xf32>
    %91 = arith.negf %90 : vector<8x128xf32>
    %92 = math.exp %91 : vector<8x128xf32>
    %cst_30 = arith.constant 1.000000e+00 : f32
    %93 = vector.broadcast %cst_30 : f32 to vector<8x128xf32>
    %94 = arith.addf %93, %92 : vector<8x128xf32>
    %95 = arith.divf %93, %94 : vector<8x128xf32>
    %96 = vector.extract_strided_slice %89 {offsets = [0, 128], sizes = [8, 128], strides = [1, 1]} : vector<8x512xf32> to vector<8x128xf32>
    %97 = arith.negf %96 : vector<8x128xf32>
    %98 = math.exp %97 : vector<8x128xf32>
    %cst_31 = arith.constant 1.000000e+00 : f32
    %99 = vector.broadcast %cst_31 : f32 to vector<8x128xf32>
    %100 = arith.addf %99, %98 : vector<8x128xf32>
    %101 = arith.divf %99, %100 : vector<8x128xf32>
    %102 = vector.extract_strided_slice %89 {offsets = [0, 256], sizes = [8, 128], strides = [1, 1]} : vector<8x512xf32> to vector<8x128xf32>
    %103 = math.tanh %102 : vector<8x128xf32>
    %104 = vector.extract_strided_slice %89 {offsets = [0, 384], sizes = [8, 128], strides = [1, 1]} : vector<8x512xf32> to vector<8x128xf32>
    %105 = arith.negf %104 : vector<8x128xf32>
    %106 = math.exp %105 : vector<8x128xf32>
    %cst_32 = arith.constant 1.000000e+00 : f32
    %107 = vector.broadcast %cst_32 : f32 to vector<8x128xf32>
    %108 = arith.addf %107, %106 : vector<8x128xf32>
    %109 = arith.divf %107, %108 : vector<8x128xf32>
    %110 = arith.mulf %101, %49 : vector<8x128xf32>
    %111 = arith.mulf %95, %103 : vector<8x128xf32>
    %112 = arith.addf %110, %111 : vector<8x128xf32>
    %113 = math.tanh %112 : vector<8x128xf32>
    %114 = arith.mulf %109, %113 : vector<8x128xf32>
    %115 = vector.extract_strided_slice %84 {offsets = [8, 0], sizes = [8, 512], strides = [1, 1]} : vector<16x512xf32> to vector<8x512xf32>
    %116 = arith.addf %115, %14 : vector<8x512xf32>
    %117 = arith.truncf %81 : vector<8x128xf32> to vector<8x128xbf16>
    %cst_33 = arith.constant dense<0.000000e+00> : vector<8x512xf32>
    %118 = tpu.matmul %117, %9, %cst_33 {dimension_numbers = #tpu.dot_dimension_numbers<[1], [0], [0], [1], [0, 0, 1, 1], [], []>} : vector<8x128xbf16>, vector<128x512xbf16>, vector<8x512xf32> -> vector<8x512xf32>
    %119 = arith.addf %116, %118 : vector<8x512xf32>
    %120 = vector.extract_strided_slice %119 {offsets = [0, 0], sizes = [8, 128], strides = [1, 1]} : vector<8x512xf32> to vector<8x128xf32>
    %121 = arith.negf %120 : vector<8x128xf32>
    %122 = math.exp %121 : vector<8x128xf32>
    %cst_34 = arith.constant 1.000000e+00 : f32
    %123 = vector.broadcast %cst_34 : f32 to vector<8x128xf32>
    %124 = arith.addf %123, %122 : vector<8x128xf32>
    %125 = arith.divf %123, %124 : vector<8x128xf32>
    %126 = vector.extract_strided_slice %119 {offsets = [0, 128], sizes = [8, 128], strides = [1, 1]} : vector<8x512xf32> to vector<8x128xf32>
    %127 = arith.negf %126 : vector<8x128xf32>
    %128 = math.exp %127 : vector<8x128xf32>
    %cst_35 = arith.constant 1.000000e+00 : f32
    %129 = vector.broadcast %cst_35 : f32 to vector<8x128xf32>
    %130 = arith.addf %129, %128 : vector<8x128xf32>
    %131 = arith.divf %129, %130 : vector<8x128xf32>
    %132 = vector.extract_strided_slice %119 {offsets = [0, 256], sizes = [8, 128], strides = [1, 1]} : vector<8x512xf32> to vector<8x128xf32>
    %133 = math.tanh %132 : vector<8x128xf32>
    %134 = vector.extract_strided_slice %119 {offsets = [0, 384], sizes = [8, 128], strides = [1, 1]} : vector<8x512xf32> to vector<8x128xf32>
    %135 = arith.negf %134 : vector<8x128xf32>
    %136 = math.exp %135 : vector<8x128xf32>
    %cst_36 = arith.constant 1.000000e+00 : f32
    %137 = vector.broadcast %cst_36 : f32 to vector<8x128xf32>
    %138 = arith.addf %137, %136 : vector<8x128xf32>
    %139 = arith.divf %137, %138 : vector<8x128xf32>
    %140 = arith.mulf %131, %79 : vector<8x128xf32>
    %141 = arith.mulf %125, %133 : vector<8x128xf32>
    %142 = arith.addf %140, %141 : vector<8x128xf32>
    %143 = math.tanh %142 : vector<8x128xf32>
    %144 = arith.mulf %139, %143 : vector<8x128xf32>
    %c2_i32 = arith.constant 2 : i32
    %145 = arith.index_cast %c2_i32 : i32 to index
    %c0_37 = arith.constant 0 : index
    %c0_38 = arith.constant 0 : index
    %146 = vector.load %arg11[%145, %c0_37, %c0_38] : memref<8x16x512xf32, #tpu.memory_space<vmem>>, vector<1x16x512xf32>
    %147 = vector.shape_cast %146 : vector<1x16x512xf32> to vector<16x512xf32>
    %148 = vector.extract_strided_slice %147 {offsets = [0, 0], sizes = [8, 512], strides = [1, 1]} : vector<16x512xf32> to vector<8x512xf32>
    %149 = arith.addf %148, %13 : vector<8x512xf32>
    %150 = arith.truncf %114 : vector<8x128xf32> to vector<8x128xbf16>
    %cst_39 = arith.constant dense<0.000000e+00> : vector<8x512xf32>
    %151 = tpu.matmul %150, %9, %cst_39 {dimension_numbers = #tpu.dot_dimension_numbers<[1], [0], [0], [1], [0, 0, 1, 1], [], []>} : vector<8x128xbf16>, vector<128x512xbf16>, vector<8x512xf32> -> vector<8x512xf32>
    %152 = arith.addf %149, %151 : vector<8x512xf32>
    %153 = vector.extract_strided_slice %152 {offsets = [0, 0], sizes = [8, 128], strides = [1, 1]} : vector<8x512xf32> to vector<8x128xf32>
    %154 = arith.negf %153 : vector<8x128xf32>
    %155 = math.exp %154 : vector<8x128xf32>
    %cst_40 = arith.constant 1.000000e+00 : f32
    %156 = vector.broadcast %cst_40 : f32 to vector<8x128xf32>
    %157 = arith.addf %156, %155 : vector<8x128xf32>
    %158 = arith.divf %156, %157 : vector<8x128xf32>
    %159 = vector.extract_strided_slice %152 {offsets = [0, 128], sizes = [8, 128], strides = [1, 1]} : vector<8x512xf32> to vector<8x128xf32>
    %160 = arith.negf %159 : vector<8x128xf32>
    %161 = math.exp %160 : vector<8x128xf32>
    %cst_41 = arith.constant 1.000000e+00 : f32
    %162 = vector.broadcast %cst_41 : f32 to vector<8x128xf32>
    %163 = arith.addf %162, %161 : vector<8x128xf32>
    %164 = arith.divf %162, %163 : vector<8x128xf32>
    %165 = vector.extract_strided_slice %152 {offsets = [0, 256], sizes = [8, 128], strides = [1, 1]} : vector<8x512xf32> to vector<8x128xf32>
    %166 = math.tanh %165 : vector<8x128xf32>
    %167 = vector.extract_strided_slice %152 {offsets = [0, 384], sizes = [8, 128], strides = [1, 1]} : vector<8x512xf32> to vector<8x128xf32>
    %168 = arith.negf %167 : vector<8x128xf32>
    %169 = math.exp %168 : vector<8x128xf32>
    %cst_42 = arith.constant 1.000000e+00 : f32
    %170 = vector.broadcast %cst_42 : f32 to vector<8x128xf32>
    %171 = arith.addf %170, %169 : vector<8x128xf32>
    %172 = arith.divf %170, %171 : vector<8x128xf32>
    %173 = arith.mulf %164, %112 : vector<8x128xf32>
    %174 = arith.mulf %158, %166 : vector<8x128xf32>
    %175 = arith.addf %173, %174 : vector<8x128xf32>
    %176 = math.tanh %175 : vector<8x128xf32>
    %177 = arith.mulf %172, %176 : vector<8x128xf32>
    %178 = vector.extract_strided_slice %147 {offsets = [8, 0], sizes = [8, 512], strides = [1, 1]} : vector<16x512xf32> to vector<8x512xf32>
    %179 = arith.addf %178, %14 : vector<8x512xf32>
    %180 = arith.truncf %144 : vector<8x128xf32> to vector<8x128xbf16>
    %cst_43 = arith.constant dense<0.000000e+00> : vector<8x512xf32>
    %181 = tpu.matmul %180, %9, %cst_43 {dimension_numbers = #tpu.dot_dimension_numbers<[1], [0], [0], [1], [0, 0, 1, 1], [], []>} : vector<8x128xbf16>, vector<128x512xbf16>, vector<8x512xf32> -> vector<8x512xf32>
    %182 = arith.addf %179, %181 : vector<8x512xf32>
    %183 = vector.extract_strided_slice %182 {offsets = [0, 0], sizes = [8, 128], strides = [1, 1]} : vector<8x512xf32> to vector<8x128xf32>
    %184 = arith.negf %183 : vector<8x128xf32>
    %185 = math.exp %184 : vector<8x128xf32>
    %cst_44 = arith.constant 1.000000e+00 : f32
    %186 = vector.broadcast %cst_44 : f32 to vector<8x128xf32>
    %187 = arith.addf %186, %185 : vector<8x128xf32>
    %188 = arith.divf %186, %187 : vector<8x128xf32>
    %189 = vector.extract_strided_slice %182 {offsets = [0, 128], sizes = [8, 128], strides = [1, 1]} : vector<8x512xf32> to vector<8x128xf32>
    %190 = arith.negf %189 : vector<8x128xf32>
    %191 = math.exp %190 : vector<8x128xf32>
    %cst_45 = arith.constant 1.000000e+00 : f32
    %192 = vector.broadcast %cst_45 : f32 to vector<8x128xf32>
    %193 = arith.addf %192, %191 : vector<8x128xf32>
    %194 = arith.divf %192, %193 : vector<8x128xf32>
    %195 = vector.extract_strided_slice %182 {offsets = [0, 256], sizes = [8, 128], strides = [1, 1]} : vector<8x512xf32> to vector<8x128xf32>
    %196 = math.tanh %195 : vector<8x128xf32>
    %197 = vector.extract_strided_slice %182 {offsets = [0, 384], sizes = [8, 128], strides = [1, 1]} : vector<8x512xf32> to vector<8x128xf32>
    %198 = arith.negf %197 : vector<8x128xf32>
    %199 = math.exp %198 : vector<8x128xf32>
    %cst_46 = arith.constant 1.000000e+00 : f32
    %200 = vector.broadcast %cst_46 : f32 to vector<8x128xf32>
    %201 = arith.addf %200, %199 : vector<8x128xf32>
    %202 = arith.divf %200, %201 : vector<8x128xf32>
    %203 = arith.mulf %194, %142 : vector<8x128xf32>
    %204 = arith.mulf %188, %196 : vector<8x128xf32>
    %205 = arith.addf %203, %204 : vector<8x128xf32>
    %206 = math.tanh %205 : vector<8x128xf32>
    %207 = arith.mulf %202, %206 : vector<8x128xf32>
    %c3_i32 = arith.constant 3 : i32
    %208 = arith.index_cast %c3_i32 : i32 to index
    %c0_47 = arith.constant 0 : index
    %c0_48 = arith.constant 0 : index
    %209 = vector.load %arg11[%208, %c0_47, %c0_48] : memref<8x16x512xf32, #tpu.memory_space<vmem>>, vector<1x16x512xf32>
    %210 = vector.shape_cast %209 : vector<1x16x512xf32> to vector<16x512xf32>
    %211 = vector.extract_strided_slice %210 {offsets = [0, 0], sizes = [8, 512], strides = [1, 1]} : vector<16x512xf32> to vector<8x512xf32>
    %212 = arith.addf %211, %13 : vector<8x512xf32>
    %213 = arith.truncf %177 : vector<8x128xf32> to vector<8x128xbf16>
    %cst_49 = arith.constant dense<0.000000e+00> : vector<8x512xf32>
    %214 = tpu.matmul %213, %9, %cst_49 {dimension_numbers = #tpu.dot_dimension_numbers<[1], [0], [0], [1], [0, 0, 1, 1], [], []>} : vector<8x128xbf16>, vector<128x512xbf16>, vector<8x512xf32> -> vector<8x512xf32>
    %215 = arith.addf %212, %214 : vector<8x512xf32>
    %216 = vector.extract_strided_slice %215 {offsets = [0, 0], sizes = [8, 128], strides = [1, 1]} : vector<8x512xf32> to vector<8x128xf32>
    %217 = arith.negf %216 : vector<8x128xf32>
    %218 = math.exp %217 : vector<8x128xf32>
    %cst_50 = arith.constant 1.000000e+00 : f32
    %219 = vector.broadcast %cst_50 : f32 to vector<8x128xf32>
    %220 = arith.addf %219, %218 : vector<8x128xf32>
    %221 = arith.divf %219, %220 : vector<8x128xf32>
    %222 = vector.extract_strided_slice %215 {offsets = [0, 128], sizes = [8, 128], strides = [1, 1]} : vector<8x512xf32> to vector<8x128xf32>
    %223 = arith.negf %222 : vector<8x128xf32>
    %224 = math.exp %223 : vector<8x128xf32>
    %cst_51 = arith.constant 1.000000e+00 : f32
    %225 = vector.broadcast %cst_51 : f32 to vector<8x128xf32>
    %226 = arith.addf %225, %224 : vector<8x128xf32>
    %227 = arith.divf %225, %226 : vector<8x128xf32>
    %228 = vector.extract_strided_slice %215 {offsets = [0, 256], sizes = [8, 128], strides = [1, 1]} : vector<8x512xf32> to vector<8x128xf32>
    %229 = math.tanh %228 : vector<8x128xf32>
    %230 = vector.extract_strided_slice %215 {offsets = [0, 384], sizes = [8, 128], strides = [1, 1]} : vector<8x512xf32> to vector<8x128xf32>
    %231 = arith.negf %230 : vector<8x128xf32>
    %232 = math.exp %231 : vector<8x128xf32>
    %cst_52 = arith.constant 1.000000e+00 : f32
    %233 = vector.broadcast %cst_52 : f32 to vector<8x128xf32>
    %234 = arith.addf %233, %232 : vector<8x128xf32>
    %235 = arith.divf %233, %234 : vector<8x128xf32>
    %236 = arith.mulf %227, %175 : vector<8x128xf32>
    %237 = arith.mulf %221, %229 : vector<8x128xf32>
    %238 = arith.addf %236, %237 : vector<8x128xf32>
    %239 = math.tanh %238 : vector<8x128xf32>
    %240 = arith.mulf %235, %239 : vector<8x128xf32>
    %241 = vector.extract_strided_slice %210 {offsets = [8, 0], sizes = [8, 512], strides = [1, 1]} : vector<16x512xf32> to vector<8x512xf32>
    %242 = arith.addf %241, %14 : vector<8x512xf32>
    %243 = arith.truncf %207 : vector<8x128xf32> to vector<8x128xbf16>
    %cst_53 = arith.constant dense<0.000000e+00> : vector<8x512xf32>
    %244 = tpu.matmul %243, %9, %cst_53 {dimension_numbers = #tpu.dot_dimension_numbers<[1], [0], [0], [1], [0, 0, 1, 1], [], []>} : vector<8x128xbf16>, vector<128x512xbf16>, vector<8x512xf32> -> vector<8x512xf32>
    %245 = arith.addf %242, %244 : vector<8x512xf32>
    %246 = vector.extract_strided_slice %245 {offsets = [0, 0], sizes = [8, 128], strides = [1, 1]} : vector<8x512xf32> to vector<8x128xf32>
    %247 = arith.negf %246 : vector<8x128xf32>
    %248 = math.exp %247 : vector<8x128xf32>
    %cst_54 = arith.constant 1.000000e+00 : f32
    %249 = vector.broadcast %cst_54 : f32 to vector<8x128xf32>
    %250 = arith.addf %249, %248 : vector<8x128xf32>
    %251 = arith.divf %249, %250 : vector<8x128xf32>
    %252 = vector.extract_strided_slice %245 {offsets = [0, 128], sizes = [8, 128], strides = [1, 1]} : vector<8x512xf32> to vector<8x128xf32>
    %253 = arith.negf %252 : vector<8x128xf32>
    %254 = math.exp %253 : vector<8x128xf32>
    %cst_55 = arith.constant 1.000000e+00 : f32
    %255 = vector.broadcast %cst_55 : f32 to vector<8x128xf32>
    %256 = arith.addf %255, %254 : vector<8x128xf32>
    %257 = arith.divf %255, %256 : vector<8x128xf32>
    %258 = vector.extract_strided_slice %245 {offsets = [0, 256], sizes = [8, 128], strides = [1, 1]} : vector<8x512xf32> to vector<8x128xf32>
    %259 = math.tanh %258 : vector<8x128xf32>
    %260 = vector.extract_strided_slice %245 {offsets = [0, 384], sizes = [8, 128], strides = [1, 1]} : vector<8x512xf32> to vector<8x128xf32>
    %261 = arith.negf %260 : vector<8x128xf32>
    %262 = math.exp %261 : vector<8x128xf32>
    %cst_56 = arith.constant 1.000000e+00 : f32
    %263 = vector.broadcast %cst_56 : f32 to vector<8x128xf32>
    %264 = arith.addf %263, %262 : vector<8x128xf32>
    %265 = arith.divf %263, %264 : vector<8x128xf32>
    %266 = arith.mulf %257, %205 : vector<8x128xf32>
    %267 = arith.mulf %251, %259 : vector<8x128xf32>
    %268 = arith.addf %266, %267 : vector<8x128xf32>
    %269 = math.tanh %268 : vector<8x128xf32>
    %270 = arith.mulf %265, %269 : vector<8x128xf32>
    %c4_i32 = arith.constant 4 : i32
    %271 = arith.index_cast %c4_i32 : i32 to index
    %c0_57 = arith.constant 0 : index
    %c0_58 = arith.constant 0 : index
    %272 = vector.load %arg11[%271, %c0_57, %c0_58] : memref<8x16x512xf32, #tpu.memory_space<vmem>>, vector<1x16x512xf32>
    %273 = vector.shape_cast %272 : vector<1x16x512xf32> to vector<16x512xf32>
    %274 = vector.extract_strided_slice %273 {offsets = [0, 0], sizes = [8, 512], strides = [1, 1]} : vector<16x512xf32> to vector<8x512xf32>
    %275 = arith.addf %274, %13 : vector<8x512xf32>
    %276 = arith.truncf %240 : vector<8x128xf32> to vector<8x128xbf16>
    %cst_59 = arith.constant dense<0.000000e+00> : vector<8x512xf32>
    %277 = tpu.matmul %276, %9, %cst_59 {dimension_numbers = #tpu.dot_dimension_numbers<[1], [0], [0], [1], [0, 0, 1, 1], [], []>} : vector<8x128xbf16>, vector<128x512xbf16>, vector<8x512xf32> -> vector<8x512xf32>
    %278 = arith.addf %275, %277 : vector<8x512xf32>
    %279 = vector.extract_strided_slice %278 {offsets = [0, 0], sizes = [8, 128], strides = [1, 1]} : vector<8x512xf32> to vector<8x128xf32>
    %280 = arith.negf %279 : vector<8x128xf32>
    %281 = math.exp %280 : vector<8x128xf32>
    %cst_60 = arith.constant 1.000000e+00 : f32
    %282 = vector.broadcast %cst_60 : f32 to vector<8x128xf32>
    %283 = arith.addf %282, %281 : vector<8x128xf32>
    %284 = arith.divf %282, %283 : vector<8x128xf32>
    %285 = vector.extract_strided_slice %278 {offsets = [0, 128], sizes = [8, 128], strides = [1, 1]} : vector<8x512xf32> to vector<8x128xf32>
    %286 = arith.negf %285 : vector<8x128xf32>
    %287 = math.exp %286 : vector<8x128xf32>
    %cst_61 = arith.constant 1.000000e+00 : f32
    %288 = vector.broadcast %cst_61 : f32 to vector<8x128xf32>
    %289 = arith.addf %288, %287 : vector<8x128xf32>
    %290 = arith.divf %288, %289 : vector<8x128xf32>
    %291 = vector.extract_strided_slice %278 {offsets = [0, 256], sizes = [8, 128], strides = [1, 1]} : vector<8x512xf32> to vector<8x128xf32>
    %292 = math.tanh %291 : vector<8x128xf32>
    %293 = vector.extract_strided_slice %278 {offsets = [0, 384], sizes = [8, 128], strides = [1, 1]} : vector<8x512xf32> to vector<8x128xf32>
    %294 = arith.negf %293 : vector<8x128xf32>
    %295 = math.exp %294 : vector<8x128xf32>
    %cst_62 = arith.constant 1.000000e+00 : f32
    %296 = vector.broadcast %cst_62 : f32 to vector<8x128xf32>
    %297 = arith.addf %296, %295 : vector<8x128xf32>
    %298 = arith.divf %296, %297 : vector<8x128xf32>
    %299 = arith.mulf %290, %238 : vector<8x128xf32>
    %300 = arith.mulf %284, %292 : vector<8x128xf32>
    %301 = arith.addf %299, %300 : vector<8x128xf32>
    %302 = math.tanh %301 : vector<8x128xf32>
    %303 = arith.mulf %298, %302 : vector<8x128xf32>
    %304 = vector.extract_strided_slice %273 {offsets = [8, 0], sizes = [8, 512], strides = [1, 1]} : vector<16x512xf32> to vector<8x512xf32>
    %305 = arith.addf %304, %14 : vector<8x512xf32>
    %306 = arith.truncf %270 : vector<8x128xf32> to vector<8x128xbf16>
    %cst_63 = arith.constant dense<0.000000e+00> : vector<8x512xf32>
    %307 = tpu.matmul %306, %9, %cst_63 {dimension_numbers = #tpu.dot_dimension_numbers<[1], [0], [0], [1], [0, 0, 1, 1], [], []>} : vector<8x128xbf16>, vector<128x512xbf16>, vector<8x512xf32> -> vector<8x512xf32>
    %308 = arith.addf %305, %307 : vector<8x512xf32>
    %309 = vector.extract_strided_slice %308 {offsets = [0, 0], sizes = [8, 128], strides = [1, 1]} : vector<8x512xf32> to vector<8x128xf32>
    %310 = arith.negf %309 : vector<8x128xf32>
    %311 = math.exp %310 : vector<8x128xf32>
    %cst_64 = arith.constant 1.000000e+00 : f32
    %312 = vector.broadcast %cst_64 : f32 to vector<8x128xf32>
    %313 = arith.addf %312, %311 : vector<8x128xf32>
    %314 = arith.divf %312, %313 : vector<8x128xf32>
    %315 = vector.extract_strided_slice %308 {offsets = [0, 128], sizes = [8, 128], strides = [1, 1]} : vector<8x512xf32> to vector<8x128xf32>
    %316 = arith.negf %315 : vector<8x128xf32>
    %317 = math.exp %316 : vector<8x128xf32>
    %cst_65 = arith.constant 1.000000e+00 : f32
    %318 = vector.broadcast %cst_65 : f32 to vector<8x128xf32>
    %319 = arith.addf %318, %317 : vector<8x128xf32>
    %320 = arith.divf %318, %319 : vector<8x128xf32>
    %321 = vector.extract_strided_slice %308 {offsets = [0, 256], sizes = [8, 128], strides = [1, 1]} : vector<8x512xf32> to vector<8x128xf32>
    %322 = math.tanh %321 : vector<8x128xf32>
    %323 = vector.extract_strided_slice %308 {offsets = [0, 384], sizes = [8, 128], strides = [1, 1]} : vector<8x512xf32> to vector<8x128xf32>
    %324 = arith.negf %323 : vector<8x128xf32>
    %325 = math.exp %324 : vector<8x128xf32>
    %cst_66 = arith.constant 1.000000e+00 : f32
    %326 = vector.broadcast %cst_66 : f32 to vector<8x128xf32>
    %327 = arith.addf %326, %325 : vector<8x128xf32>
    %328 = arith.divf %326, %327 : vector<8x128xf32>
    %329 = arith.mulf %320, %268 : vector<8x128xf32>
    %330 = arith.mulf %314, %322 : vector<8x128xf32>
    %331 = arith.addf %329, %330 : vector<8x128xf32>
    %332 = math.tanh %331 : vector<8x128xf32>
    %333 = arith.mulf %328, %332 : vector<8x128xf32>
    %c5_i32 = arith.constant 5 : i32
    %334 = arith.index_cast %c5_i32 : i32 to index
    %c0_67 = arith.constant 0 : index
    %c0_68 = arith.constant 0 : index
    %335 = vector.load %arg11[%334, %c0_67, %c0_68] : memref<8x16x512xf32, #tpu.memory_space<vmem>>, vector<1x16x512xf32>
    %336 = vector.shape_cast %335 : vector<1x16x512xf32> to vector<16x512xf32>
    %337 = vector.extract_strided_slice %336 {offsets = [0, 0], sizes = [8, 512], strides = [1, 1]} : vector<16x512xf32> to vector<8x512xf32>
    %338 = arith.addf %337, %13 : vector<8x512xf32>
    %339 = arith.truncf %303 : vector<8x128xf32> to vector<8x128xbf16>
    %cst_69 = arith.constant dense<0.000000e+00> : vector<8x512xf32>
    %340 = tpu.matmul %339, %9, %cst_69 {dimension_numbers = #tpu.dot_dimension_numbers<[1], [0], [0], [1], [0, 0, 1, 1], [], []>} : vector<8x128xbf16>, vector<128x512xbf16>, vector<8x512xf32> -> vector<8x512xf32>
    %341 = arith.addf %338, %340 : vector<8x512xf32>
    %342 = vector.extract_strided_slice %341 {offsets = [0, 0], sizes = [8, 128], strides = [1, 1]} : vector<8x512xf32> to vector<8x128xf32>
    %343 = arith.negf %342 : vector<8x128xf32>
    %344 = math.exp %343 : vector<8x128xf32>
    %cst_70 = arith.constant 1.000000e+00 : f32
    %345 = vector.broadcast %cst_70 : f32 to vector<8x128xf32>
    %346 = arith.addf %345, %344 : vector<8x128xf32>
    %347 = arith.divf %345, %346 : vector<8x128xf32>
    %348 = vector.extract_strided_slice %341 {offsets = [0, 128], sizes = [8, 128], strides = [1, 1]} : vector<8x512xf32> to vector<8x128xf32>
    %349 = arith.negf %348 : vector<8x128xf32>
    %350 = math.exp %349 : vector<8x128xf32>
    %cst_71 = arith.constant 1.000000e+00 : f32
    %351 = vector.broadcast %cst_71 : f32 to vector<8x128xf32>
    %352 = arith.addf %351, %350 : vector<8x128xf32>
    %353 = arith.divf %351, %352 : vector<8x128xf32>
    %354 = vector.extract_strided_slice %341 {offsets = [0, 256], sizes = [8, 128], strides = [1, 1]} : vector<8x512xf32> to vector<8x128xf32>
    %355 = math.tanh %354 : vector<8x128xf32>
    %356 = vector.extract_strided_slice %341 {offsets = [0, 384], sizes = [8, 128], strides = [1, 1]} : vector<8x512xf32> to vector<8x128xf32>
    %357 = arith.negf %356 : vector<8x128xf32>
    %358 = math.exp %357 : vector<8x128xf32>
    %cst_72 = arith.constant 1.000000e+00 : f32
    %359 = vector.broadcast %cst_72 : f32 to vector<8x128xf32>
    %360 = arith.addf %359, %358 : vector<8x128xf32>
    %361 = arith.divf %359, %360 : vector<8x128xf32>
    %362 = arith.mulf %353, %301 : vector<8x128xf32>
    %363 = arith.mulf %347, %355 : vector<8x128xf32>
    %364 = arith.addf %362, %363 : vector<8x128xf32>
    %365 = math.tanh %364 : vector<8x128xf32>
    %366 = arith.mulf %361, %365 : vector<8x128xf32>
    %367 = vector.extract_strided_slice %336 {offsets = [8, 0], sizes = [8, 512], strides = [1, 1]} : vector<16x512xf32> to vector<8x512xf32>
    %368 = arith.addf %367, %14 : vector<8x512xf32>
    %369 = arith.truncf %333 : vector<8x128xf32> to vector<8x128xbf16>
    %cst_73 = arith.constant dense<0.000000e+00> : vector<8x512xf32>
    %370 = tpu.matmul %369, %9, %cst_73 {dimension_numbers = #tpu.dot_dimension_numbers<[1], [0], [0], [1], [0, 0, 1, 1], [], []>} : vector<8x128xbf16>, vector<128x512xbf16>, vector<8x512xf32> -> vector<8x512xf32>
    %371 = arith.addf %368, %370 : vector<8x512xf32>
    %372 = vector.extract_strided_slice %371 {offsets = [0, 0], sizes = [8, 128], strides = [1, 1]} : vector<8x512xf32> to vector<8x128xf32>
    %373 = arith.negf %372 : vector<8x128xf32>
    %374 = math.exp %373 : vector<8x128xf32>
    %cst_74 = arith.constant 1.000000e+00 : f32
    %375 = vector.broadcast %cst_74 : f32 to vector<8x128xf32>
    %376 = arith.addf %375, %374 : vector<8x128xf32>
    %377 = arith.divf %375, %376 : vector<8x128xf32>
    %378 = vector.extract_strided_slice %371 {offsets = [0, 128], sizes = [8, 128], strides = [1, 1]} : vector<8x512xf32> to vector<8x128xf32>
    %379 = arith.negf %378 : vector<8x128xf32>
    %380 = math.exp %379 : vector<8x128xf32>
    %cst_75 = arith.constant 1.000000e+00 : f32
    %381 = vector.broadcast %cst_75 : f32 to vector<8x128xf32>
    %382 = arith.addf %381, %380 : vector<8x128xf32>
    %383 = arith.divf %381, %382 : vector<8x128xf32>
    %384 = vector.extract_strided_slice %371 {offsets = [0, 256], sizes = [8, 128], strides = [1, 1]} : vector<8x512xf32> to vector<8x128xf32>
    %385 = math.tanh %384 : vector<8x128xf32>
    %386 = vector.extract_strided_slice %371 {offsets = [0, 384], sizes = [8, 128], strides = [1, 1]} : vector<8x512xf32> to vector<8x128xf32>
    %387 = arith.negf %386 : vector<8x128xf32>
    %388 = math.exp %387 : vector<8x128xf32>
    %cst_76 = arith.constant 1.000000e+00 : f32
    %389 = vector.broadcast %cst_76 : f32 to vector<8x128xf32>
    %390 = arith.addf %389, %388 : vector<8x128xf32>
    %391 = arith.divf %389, %390 : vector<8x128xf32>
    %392 = arith.mulf %383, %331 : vector<8x128xf32>
    %393 = arith.mulf %377, %385 : vector<8x128xf32>
    %394 = arith.addf %392, %393 : vector<8x128xf32>
    %395 = math.tanh %394 : vector<8x128xf32>
    %396 = arith.mulf %391, %395 : vector<8x128xf32>
    %c6_i32 = arith.constant 6 : i32
    %397 = arith.index_cast %c6_i32 : i32 to index
    %c0_77 = arith.constant 0 : index
    %c0_78 = arith.constant 0 : index
    %398 = vector.load %arg11[%397, %c0_77, %c0_78] : memref<8x16x512xf32, #tpu.memory_space<vmem>>, vector<1x16x512xf32>
    %399 = vector.shape_cast %398 : vector<1x16x512xf32> to vector<16x512xf32>
    %400 = vector.extract_strided_slice %399 {offsets = [0, 0], sizes = [8, 512], strides = [1, 1]} : vector<16x512xf32> to vector<8x512xf32>
    %401 = arith.addf %400, %13 : vector<8x512xf32>
    %402 = arith.truncf %366 : vector<8x128xf32> to vector<8x128xbf16>
    %cst_79 = arith.constant dense<0.000000e+00> : vector<8x512xf32>
    %403 = tpu.matmul %402, %9, %cst_79 {dimension_numbers = #tpu.dot_dimension_numbers<[1], [0], [0], [1], [0, 0, 1, 1], [], []>} : vector<8x128xbf16>, vector<128x512xbf16>, vector<8x512xf32> -> vector<8x512xf32>
    %404 = arith.addf %401, %403 : vector<8x512xf32>
    %405 = vector.extract_strided_slice %404 {offsets = [0, 0], sizes = [8, 128], strides = [1, 1]} : vector<8x512xf32> to vector<8x128xf32>
    %406 = arith.negf %405 : vector<8x128xf32>
    %407 = math.exp %406 : vector<8x128xf32>
    %cst_80 = arith.constant 1.000000e+00 : f32
    %408 = vector.broadcast %cst_80 : f32 to vector<8x128xf32>
    %409 = arith.addf %408, %407 : vector<8x128xf32>
    %410 = arith.divf %408, %409 : vector<8x128xf32>
    %411 = vector.extract_strided_slice %404 {offsets = [0, 128], sizes = [8, 128], strides = [1, 1]} : vector<8x512xf32> to vector<8x128xf32>
    %412 = arith.negf %411 : vector<8x128xf32>
    %413 = math.exp %412 : vector<8x128xf32>
    %cst_81 = arith.constant 1.000000e+00 : f32
    %414 = vector.broadcast %cst_81 : f32 to vector<8x128xf32>
    %415 = arith.addf %414, %413 : vector<8x128xf32>
    %416 = arith.divf %414, %415 : vector<8x128xf32>
    %417 = vector.extract_strided_slice %404 {offsets = [0, 256], sizes = [8, 128], strides = [1, 1]} : vector<8x512xf32> to vector<8x128xf32>
    %418 = math.tanh %417 : vector<8x128xf32>
    %419 = vector.extract_strided_slice %404 {offsets = [0, 384], sizes = [8, 128], strides = [1, 1]} : vector<8x512xf32> to vector<8x128xf32>
    %420 = arith.negf %419 : vector<8x128xf32>
    %421 = math.exp %420 : vector<8x128xf32>
    %cst_82 = arith.constant 1.000000e+00 : f32
    %422 = vector.broadcast %cst_82 : f32 to vector<8x128xf32>
    %423 = arith.addf %422, %421 : vector<8x128xf32>
    %424 = arith.divf %422, %423 : vector<8x128xf32>
    %425 = arith.mulf %416, %364 : vector<8x128xf32>
    %426 = arith.mulf %410, %418 : vector<8x128xf32>
    %427 = arith.addf %425, %426 : vector<8x128xf32>
    %428 = math.tanh %427 : vector<8x128xf32>
    %429 = arith.mulf %424, %428 : vector<8x128xf32>
    %430 = vector.extract_strided_slice %399 {offsets = [8, 0], sizes = [8, 512], strides = [1, 1]} : vector<16x512xf32> to vector<8x512xf32>
    %431 = arith.addf %430, %14 : vector<8x512xf32>
    %432 = arith.truncf %396 : vector<8x128xf32> to vector<8x128xbf16>
    %cst_83 = arith.constant dense<0.000000e+00> : vector<8x512xf32>
    %433 = tpu.matmul %432, %9, %cst_83 {dimension_numbers = #tpu.dot_dimension_numbers<[1], [0], [0], [1], [0, 0, 1, 1], [], []>} : vector<8x128xbf16>, vector<128x512xbf16>, vector<8x512xf32> -> vector<8x512xf32>
    %434 = arith.addf %431, %433 : vector<8x512xf32>
    %435 = vector.extract_strided_slice %434 {offsets = [0, 0], sizes = [8, 128], strides = [1, 1]} : vector<8x512xf32> to vector<8x128xf32>
    %436 = arith.negf %435 : vector<8x128xf32>
    %437 = math.exp %436 : vector<8x128xf32>
    %cst_84 = arith.constant 1.000000e+00 : f32
    %438 = vector.broadcast %cst_84 : f32 to vector<8x128xf32>
    %439 = arith.addf %438, %437 : vector<8x128xf32>
    %440 = arith.divf %438, %439 : vector<8x128xf32>
    %441 = vector.extract_strided_slice %434 {offsets = [0, 128], sizes = [8, 128], strides = [1, 1]} : vector<8x512xf32> to vector<8x128xf32>
    %442 = arith.negf %441 : vector<8x128xf32>
    %443 = math.exp %442 : vector<8x128xf32>
    %cst_85 = arith.constant 1.000000e+00 : f32
    %444 = vector.broadcast %cst_85 : f32 to vector<8x128xf32>
    %445 = arith.addf %444, %443 : vector<8x128xf32>
    %446 = arith.divf %444, %445 : vector<8x128xf32>
    %447 = vector.extract_strided_slice %434 {offsets = [0, 256], sizes = [8, 128], strides = [1, 1]} : vector<8x512xf32> to vector<8x128xf32>
    %448 = math.tanh %447 : vector<8x128xf32>
    %449 = vector.extract_strided_slice %434 {offsets = [0, 384], sizes = [8, 128], strides = [1, 1]} : vector<8x512xf32> to vector<8x128xf32>
    %450 = arith.negf %449 : vector<8x128xf32>
    %451 = math.exp %450 : vector<8x128xf32>
    %cst_86 = arith.constant 1.000000e+00 : f32
    %452 = vector.broadcast %cst_86 : f32 to vector<8x128xf32>
    %453 = arith.addf %452, %451 : vector<8x128xf32>
    %454 = arith.divf %452, %453 : vector<8x128xf32>
    %455 = arith.mulf %446, %394 : vector<8x128xf32>
    %456 = arith.mulf %440, %448 : vector<8x128xf32>
    %457 = arith.addf %455, %456 : vector<8x128xf32>
    %458 = math.tanh %457 : vector<8x128xf32>
    %459 = arith.mulf %454, %458 : vector<8x128xf32>
    %c7_i32 = arith.constant 7 : i32
    %460 = arith.index_cast %c7_i32 : i32 to index
    %c0_87 = arith.constant 0 : index
    %c0_88 = arith.constant 0 : index
    %461 = vector.load %arg11[%460, %c0_87, %c0_88] : memref<8x16x512xf32, #tpu.memory_space<vmem>>, vector<1x16x512xf32>
    %462 = vector.shape_cast %461 : vector<1x16x512xf32> to vector<16x512xf32>
    %463 = vector.extract_strided_slice %462 {offsets = [0, 0], sizes = [8, 512], strides = [1, 1]} : vector<16x512xf32> to vector<8x512xf32>
    %464 = arith.addf %463, %13 : vector<8x512xf32>
    %465 = arith.truncf %429 : vector<8x128xf32> to vector<8x128xbf16>
    %cst_89 = arith.constant dense<0.000000e+00> : vector<8x512xf32>
    %466 = tpu.matmul %465, %9, %cst_89 {dimension_numbers = #tpu.dot_dimension_numbers<[1], [0], [0], [1], [0, 0, 1, 1], [], []>} : vector<8x128xbf16>, vector<128x512xbf16>, vector<8x512xf32> -> vector<8x512xf32>
    %467 = arith.addf %464, %466 : vector<8x512xf32>
    %468 = vector.extract_strided_slice %467 {offsets = [0, 0], sizes = [8, 128], strides = [1, 1]} : vector<8x512xf32> to vector<8x128xf32>
    %469 = arith.negf %468 : vector<8x128xf32>
    %470 = math.exp %469 : vector<8x128xf32>
    %cst_90 = arith.constant 1.000000e+00 : f32
    %471 = vector.broadcast %cst_90 : f32 to vector<8x128xf32>
    %472 = arith.addf %471, %470 : vector<8x128xf32>
    %473 = arith.divf %471, %472 : vector<8x128xf32>
    %474 = vector.extract_strided_slice %467 {offsets = [0, 128], sizes = [8, 128], strides = [1, 1]} : vector<8x512xf32> to vector<8x128xf32>
    %475 = arith.negf %474 : vector<8x128xf32>
    %476 = math.exp %475 : vector<8x128xf32>
    %cst_91 = arith.constant 1.000000e+00 : f32
    %477 = vector.broadcast %cst_91 : f32 to vector<8x128xf32>
    %478 = arith.addf %477, %476 : vector<8x128xf32>
    %479 = arith.divf %477, %478 : vector<8x128xf32>
    %480 = vector.extract_strided_slice %467 {offsets = [0, 256], sizes = [8, 128], strides = [1, 1]} : vector<8x512xf32> to vector<8x128xf32>
    %481 = math.tanh %480 : vector<8x128xf32>
    %482 = vector.extract_strided_slice %467 {offsets = [0, 384], sizes = [8, 128], strides = [1, 1]} : vector<8x512xf32> to vector<8x128xf32>
    %483 = arith.negf %482 : vector<8x128xf32>
    %484 = math.exp %483 : vector<8x128xf32>
    %cst_92 = arith.constant 1.000000e+00 : f32
    %485 = vector.broadcast %cst_92 : f32 to vector<8x128xf32>
    %486 = arith.addf %485, %484 : vector<8x128xf32>
    %487 = arith.divf %485, %486 : vector<8x128xf32>
    %488 = arith.mulf %479, %427 : vector<8x128xf32>
    %489 = arith.mulf %473, %481 : vector<8x128xf32>
    %490 = arith.addf %488, %489 : vector<8x128xf32>
    %491 = math.tanh %490 : vector<8x128xf32>
    %492 = arith.mulf %487, %491 : vector<8x128xf32>
    %493 = vector.extract_strided_slice %462 {offsets = [8, 0], sizes = [8, 512], strides = [1, 1]} : vector<16x512xf32> to vector<8x512xf32>
    %494 = arith.addf %493, %14 : vector<8x512xf32>
    %495 = arith.truncf %459 : vector<8x128xf32> to vector<8x128xbf16>
    %cst_93 = arith.constant dense<0.000000e+00> : vector<8x512xf32>
    %496 = tpu.matmul %495, %9, %cst_93 {dimension_numbers = #tpu.dot_dimension_numbers<[1], [0], [0], [1], [0, 0, 1, 1], [], []>} : vector<8x128xbf16>, vector<128x512xbf16>, vector<8x512xf32> -> vector<8x512xf32>
    %497 = arith.addf %494, %496 : vector<8x512xf32>
    %498 = vector.extract_strided_slice %497 {offsets = [0, 0], sizes = [8, 128], strides = [1, 1]} : vector<8x512xf32> to vector<8x128xf32>
    %499 = arith.negf %498 : vector<8x128xf32>
    %500 = math.exp %499 : vector<8x128xf32>
    %cst_94 = arith.constant 1.000000e+00 : f32
    %501 = vector.broadcast %cst_94 : f32 to vector<8x128xf32>
    %502 = arith.addf %501, %500 : vector<8x128xf32>
    %503 = arith.divf %501, %502 : vector<8x128xf32>
    %504 = vector.extract_strided_slice %497 {offsets = [0, 128], sizes = [8, 128], strides = [1, 1]} : vector<8x512xf32> to vector<8x128xf32>
    %505 = arith.negf %504 : vector<8x128xf32>
    %506 = math.exp %505 : vector<8x128xf32>
    %cst_95 = arith.constant 1.000000e+00 : f32
    %507 = vector.broadcast %cst_95 : f32 to vector<8x128xf32>
    %508 = arith.addf %507, %506 : vector<8x128xf32>
    %509 = arith.divf %507, %508 : vector<8x128xf32>
    %510 = vector.extract_strided_slice %497 {offsets = [0, 256], sizes = [8, 128], strides = [1, 1]} : vector<8x512xf32> to vector<8x128xf32>
    %511 = math.tanh %510 : vector<8x128xf32>
    %512 = vector.extract_strided_slice %497 {offsets = [0, 384], sizes = [8, 128], strides = [1, 1]} : vector<8x512xf32> to vector<8x128xf32>
    %513 = arith.negf %512 : vector<8x128xf32>
    %514 = math.exp %513 : vector<8x128xf32>
    %cst_96 = arith.constant 1.000000e+00 : f32
    %515 = vector.broadcast %cst_96 : f32 to vector<8x128xf32>
    %516 = arith.addf %515, %514 : vector<8x128xf32>
    %517 = arith.divf %515, %516 : vector<8x128xf32>
    %518 = arith.mulf %509, %457 : vector<8x128xf32>
    %519 = arith.mulf %503, %511 : vector<8x128xf32>
    %520 = arith.addf %518, %519 : vector<8x128xf32>
    %521 = math.tanh %520 : vector<8x128xf32>
    %522 = arith.mulf %517, %521 : vector<8x128xf32>
    %c8_i32 = arith.constant 8 : i32
    %c0_97 = arith.constant 0 : index
    %c0_98 = arith.constant 0 : index
    %523 = vector.load %arg9[%c0_97, %c0_98] : memref<16x128xf32, #tpu.memory_space<vmem>>, vector<8x128xf32>
    tpu.vector_store %arg9[%c0_97, %c0_98], %492 {strides = array<i32>} : memref<16x128xf32, #tpu.memory_space<vmem>>, vector<8x128xf32>,
    %c0_99 = arith.constant 0 : index
    %c0_100 = arith.constant 0 : index
    %524 = vector.load %arg10[%c0_99, %c0_100] : memref<16x128xf32, #tpu.memory_space<vmem>>, vector<8x128xf32>
    tpu.vector_store %arg10[%c0_99, %c0_100], %490 {strides = array<i32>} : memref<16x128xf32, #tpu.memory_space<vmem>>, vector<8x128xf32>,
    %c8 = arith.constant 8 : index
    %c0_101 = arith.constant 0 : index
    %525 = vector.load %arg9[%c8, %c0_101] : memref<16x128xf32, #tpu.memory_space<vmem>>, vector<8x128xf32>
    tpu.vector_store %arg9[%c8, %c0_101], %522 {strides = array<i32>} : memref<16x128xf32, #tpu.memory_space<vmem>>, vector<8x128xf32>,
    %c8_102 = arith.constant 8 : index
    %c0_103 = arith.constant 0 : index
    %526 = vector.load %arg10[%c8_102, %c0_103] : memref<16x128xf32, #tpu.memory_space<vmem>>, vector<8x128xf32>
    tpu.vector_store %arg10[%c8_102, %c0_103], %520 {strides = array<i32>} : memref<16x128xf32, #tpu.memory_space<vmem>>, vector<8x128xf32>,
    %c0_i32_104 = arith.constant 0 : i32
    %527 = arith.cmpi eq, %arg1, %c0_i32_104 : i32
    %528 = arith.extui %527 : i1 to i32
    %c0_i32_105 = arith.constant 0 : i32
    %529 = arith.cmpi ne, %528, %c0_i32_105 : i32
    scf.if %529 {
      %c0_106 = arith.constant 0 : index
      %c0_107 = arith.constant 0 : index
      %530 = vector.load %arg9[%c0_106, %c0_107] : memref<16x128xf32, #tpu.memory_space<vmem>>, vector<16x128xf32>
      %c0_108 = arith.constant 0 : index
      %c0_109 = arith.constant 0 : index
      %531 = vector.load %arg6[%c0_108, %c0_109] : memref<1x128xf32, #tpu.memory_space<vmem>>, vector<1x128xf32>
      %532 = vector.broadcast %531 : vector<1x128xf32> to vector<16x128xf32>
      %533 = arith.mulf %530, %532 : vector<16x128xf32>
      %cst_110 = arith.constant dense<0.000000e+00> : vector<16xf32>
      %534 = vector.multi_reduction <add>, %533, %cst_110 [1] : vector<16x128xf32> to vector<16xf32>
      %535 = vector.shape_cast %534 : vector<16xf32> to vector<16x1xf32>
      %c0_111 = arith.constant 0 : index
      %c0_112 = arith.constant 0 : index
      %536 = vector.load %arg7[%c0_111, %c0_112] : memref<1x1xf32, #tpu.memory_space<vmem>>, vector<1x1xf32>
      %537 = vector.broadcast %536 : vector<1x1xf32> to vector<16x1xf32>
      %538 = arith.addf %535, %537 : vector<16x1xf32>
      %539 = arith.negf %538 : vector<16x1xf32>
      %540 = math.exp %539 : vector<16x1xf32>
      %cst_113 = arith.constant 1.000000e+00 : f32
      %541 = vector.broadcast %cst_113 : f32 to vector<16x1xf32>
      %542 = arith.addf %541, %540 : vector<16x1xf32>
      %543 = arith.divf %541, %542 : vector<16x1xf32>
      %c0_114 = arith.constant 0 : index
      %c0_115 = arith.constant 0 : index
      %544 = vector.load %arg8[%c0_114, %c0_115] : memref<16x1xf32, #tpu.memory_space<vmem>>, vector<16x1xf32>
      tpu.vector_store %arg8[%c0_114, %c0_115], %543 {strides = array<i32>} : memref<16x1xf32, #tpu.memory_space<vmem>>, vector<16x1xf32>,
    } else {
    }
    return
  }
  func.func @transform_0(%arg0: i32, %arg1: i32) -> (i32, i32, i32) {
    %c0_i32 = arith.constant 0 : i32
    %c0_i32_0 = arith.constant 0 : i32
    return %arg1, %arg0, %c0_i32 : i32, i32, i32
  }
  func.func @transform_1(%arg0: i32, %arg1: i32) -> (i32, i32) {
    %c0_i32 = arith.constant 0 : i32
    %c0_i32_0 = arith.constant 0 : i32
    return %arg0, %c0_i32 : i32, i32
  }
  func.func @transform_2(%arg0: i32, %arg1: i32) -> (i32, i32) {
    %c0_i32 = arith.constant 0 : i32
    %c0_i32_0 = arith.constant 0 : i32
    %c0_i32_1 = arith.constant 0 : i32
    return %c0_i32, %c0_i32_0 : i32, i32
  }
  func.func @transform_3(%arg0: i32, %arg1: i32) -> (i32, i32) {
    %c0_i32 = arith.constant 0 : i32
    %c0_i32_0 = arith.constant 0 : i32
    %c0_i32_1 = arith.constant 0 : i32
    return %c0_i32, %c0_i32_0 : i32, i32
  }
  func.func @transform_4(%arg0: i32, %arg1: i32) -> (i32, i32) {
    %c0_i32 = arith.constant 0 : i32
    %c0_i32_0 = arith.constant 0 : i32
    %c0_i32_1 = arith.constant 0 : i32
    return %c0_i32, %c0_i32_0 : i32, i32
  }
  func.func @transform_5(%arg0: i32, %arg1: i32) -> (i32, i32) {
    %c0_i32 = arith.constant 0 : i32
    %c0_i32_0 = arith.constant 0 : i32
    %c0_i32_1 = arith.constant 0 : i32
    return %c0_i32, %c0_i32_0 : i32, i32
  }
  func.func @transform_6(%arg0: i32, %arg1: i32) -> (i32, i32) {
    %c0_i32 = arith.constant 0 : i32
    %c0_i32_0 = arith.constant 0 : i32
    return %arg0, %c0_i32 : i32, i32
  }
}

module attributes {stable_mosaic.version = 11 : i64} {
  func.func @lstm_head_kernel(%arg0: i32, %arg1: i32, %arg2: memref<8x16x128xbf16, #tpu.memory_space<vmem>>, %arg3: memref<16x512xf32, #tpu.memory_space<vmem>>, %arg4: memref<128x512xbf16, #tpu.memory_space<vmem>>, %arg5: memref<128x512xbf16, #tpu.memory_space<vmem>>, %arg6: memref<1x128xf32, #tpu.memory_space<vmem>>, %arg7: memref<1x1xf32, #tpu.memory_space<vmem>>, %arg8: memref<16x1xf32, #tpu.memory_space<vmem>>, %arg9: memref<16x128xf32, #tpu.memory_space<vmem>>, %arg10: memref<16x128xf32, #tpu.memory_space<vmem>>, %arg11: memref<8x16x512xf32, #tpu.memory_space<vmem>>) attributes {dimension_semantics = [#tpu.dimension_semantics<parallel>, #tpu.dimension_semantics<arbitrary>], iteration_bounds = array<i64: 1, 1>, scalar_prefetch = 0 : i64, scratch_operands = 3 : i64, tpu.core_type = #tpu.core_type<tc>, window_params = [{transform_indices = @transform_0, window_bounds = array<i64: 8, 16, 128>}, {transform_indices = @transform_1, window_bounds = array<i64: 16, 512>}, {pipeline_mode = #tpu.pipeline_mode<synchronous>, transform_indices = @transform_2, window_bounds = array<i64: 128, 512>}, {pipeline_mode = #tpu.pipeline_mode<synchronous>, transform_indices = @transform_3, window_bounds = array<i64: 128, 512>}, {pipeline_mode = #tpu.pipeline_mode<synchronous>, transform_indices = @transform_4, window_bounds = array<i64: 1, 128>}, {pipeline_mode = #tpu.pipeline_mode<synchronous>, transform_indices = @transform_5, window_bounds = array<i64: 1, 1>}, {transform_indices = @transform_6, window_bounds = array<i64: 16, 1>}]} {
    %c0_i32 = arith.constant 0 : i32
    %0 = arith.cmpi eq, %arg1, %c0_i32 : i32
    %1 = arith.extui %0 : i1 to i32
    %c0_i32_0 = arith.constant 0 : i32
    %2 = arith.cmpi ne, %1, %c0_i32_0 : i32
    scf.if %2 {
      %cst_106 = arith.constant 0.000000e+00 : f32
      %530 = vector.broadcast %cst_106 : f32 to vector<16x128xf32>
      %c0_107 = arith.constant 0 : index
      %c0_108 = arith.constant 0 : index
      %531 = vector.load %arg9[%c0_107, %c0_108] : memref<16x128xf32, #tpu.memory_space<vmem>>, vector<16x128xf32>
      tpu.vector_store %arg9[%c0_107, %c0_108], %530 {strides = array<i32>} : memref<16x128xf32, #tpu.memory_space<vmem>>, vector<16x128xf32>,
      %cst_109 = arith.constant 0.000000e+00 : f32
      %532 = vector.broadcast %cst_109 : f32 to vector<16x128xf32>
      %c0_110 = arith.constant 0 : index
      %c0_111 = arith.constant 0 : index
      %533 = vector.load %arg10[%c0_110, %c0_111] : memref<16x128xf32, #tpu.memory_space<vmem>>, vector<16x128xf32>
      tpu.vector_store %arg10[%c0_110, %c0_111], %532 {strides = array<i32>} : memref<16x128xf32, #tpu.memory_space<vmem>>, vector<16x128xf32>,
    } else {
    }
    %c0 = arith.constant 0 : index
    %c0_1 = arith.constant 0 : index
    %c0_2 = arith.constant 0 : index
    %3 = vector.load %arg2[%c0, %c0_1, %c0_2] : memref<8x16x128xbf16, #tpu.memory_space<vmem>>, vector<8x16x128xbf16>
    %4 = vector.shape_cast %3 : vector<8x16x128xbf16> to vector<128x128xbf16>
    %c0_3 = arith.constant 0 : index
    %c0_4 = arith.constant 0 : index
    %5 = vector.load %arg4[%c0_3, %c0_4] : memref<128x512xbf16, #tpu.memory_space<vmem>>, vector<128x512xbf16>
    %cst = arith.constant dense<0.000000e+00> : vector<128x512xf32>
    %6 = tpu.matmul %4, %5, %cst {dimension_numbers = #tpu.dot_dimension_numbers<[1], [0], [0], [1], [0, 0, 1, 1], [], []>} : vector<128x128xbf16>, vector<128x512xbf16>, vector<128x512xf32> -> vector<128x512xf32>
    %7 = vector.shape_cast %6 : vector<128x512xf32> to vector<8x16x512xf32>
    %c0_5 = arith.constant 0 : index
    %c0_6 = arith.constant 0 : index
    %c0_7 = arith.constant 0 : index
    %8 = vector.load %arg11[%c0_5, %c0_6, %c0_7] : memref<8x16x512xf32, #tpu.memory_space<vmem>>, vector<8x16x512xf32>
    tpu.vector_store %arg11[%c0_5, %c0_6, %c0_7], %7 {strides = array<i32>} : memref<8x16x512xf32, #tpu.memory_space<vmem>>, vector<8x16x512xf32>,
    %c0_8 = arith.constant 0 : index
    %c0_9 = arith.constant 0 : index
    %9 = vector.load %arg5[%c0_8, %c0_9] : memref<128x512xbf16, #tpu.memory_space<vmem>>, vector<128x512xbf16>
    %c0_10 = arith.constant 0 : index
    %c0_11 = arith.constant 0 : index
    %10 = vector.load %arg3[%c0_10, %c0_11] : memref<16x512xf32, #tpu.memory_space<vmem>>, vector<16x512xf32>
    %c0_12 = arith.constant 0 : index
    %c0_13 = arith.constant 0 : index
    %11 = vector.load %arg9[%c0_12, %c0_13] : memref<16x128xf32, #tpu.memory_space<vmem>>, vector<16x128xf32>
    %c0_14 = arith.constant 0 : index
    %c0_15 = arith.constant 0 : index
    %12 = vector.load %arg10[%c0_14, %c0_15] : memref<16x128xf32, #tpu.memory_space<vmem>>, vector<16x128xf32>
    %13 = vector.extract_strided_slice %10 {offsets = [0, 0], sizes = [8, 512], strides = [1, 1]} : vector<16x512xf32> to vector<8x512xf32>
    %14 = vector.extract_strided_slice %10 {offsets = [8, 0], sizes = [8, 512], strides = [1, 1]} : vector<16x512xf32> to vector<8x512xf32>
    %15 = vector.extract_strided_slice %11 {offsets = [0, 0], sizes = [8, 128], strides = [1, 1]} : vector<16x128xf32> to vector<8x128xf32>
    %16 = vector.extract_strided_slice %12 {offsets = [0, 0], sizes = [8, 128], strides = [1, 1]} : vector<16x128xf32> to vector<8x128xf32>
    %17 = vector.extract_strided_slice %11 {offsets = [8, 0], sizes = [8, 128], strides = [1, 1]} : vector<16x128xf32> to vector<8x128xf32>
    %18 = vector.extract_strided_slice %12 {offsets = [8, 0], sizes = [8, 128], strides = [1, 1]} : vector<16x128xf32> to vector<8x128xf32>
    %c0_i32_16 = arith.constant 0 : i32
    %19 = arith.index_cast %c0_i32_16 : i32 to index
    %c0_17 = arith.constant 0 : index
    %c0_18 = arith.constant 0 : index
    %20 = vector.load %arg11[%19, %c0_17, %c0_18] : memref<8x16x512xf32, #tpu.memory_space<vmem>>, vector<1x16x512xf32>
    %21 = vector.shape_cast %20 : vector<1x16x512xf32> to vector<16x512xf32>
    %22 = vector.extract_strided_slice %21 {offsets = [0, 0], sizes = [8, 512], strides = [1, 1]} : vector<16x512xf32> to vector<8x512xf32>
    %23 = arith.addf %22, %13 : vector<8x512xf32>
    %24 = arith.truncf %15 : vector<8x128xf32> to vector<8x128xbf16>
    %cst_19 = arith.constant dense<0.000000e+00> : vector<8x512xf32>
    %25 = tpu.matmul %24, %9, %cst_19 {dimension_numbers = #tpu.dot_dimension_numbers<[1], [0], [0], [1], [0, 0, 1, 1], [], []>} : vector<8x128xbf16>, vector<128x512xbf16>, vector<8x512xf32> -> vector<8x512xf32>
    %26 = arith.addf %23, %25 : vector<8x512xf32>
    %27 = vector.extract_strided_slice %26 {offsets = [0, 0], sizes = [8, 128], strides = [1, 1]} : vector<8x512xf32> to vector<8x128xf32>
    %28 = arith.negf %27 : vector<8x128xf32>
    %29 = math.exp %28 : vector<8x128xf32>
    %cst_20 = arith.constant 1.000000e+00 : f32
    %30 = vector.broadcast %cst_20 : f32 to vector<8x128xf32>
    %31 = arith.addf %30, %29 : vector<8x128xf32>
    %32 = arith.divf %30, %31 : vector<8x128xf32>
    %33 = vector.extract_strided_slice %26 {offsets = [0, 128], sizes = [8, 128], strides = [1, 1]} : vector<8x512xf32> to vector<8x128xf32>
    %34 = arith.negf %33 : vector<8x128xf32>
    %35 = math.exp %34 : vector<8x128xf32>
    %cst_21 = arith.constant 1.000000e+00 : f32
    %36 = vector.broadcast %cst_21 : f32 to vector<8x128xf32>
    %37 = arith.addf %36, %35 : vector<8x128xf32>
    %38 = arith.divf %36, %37 : vector<8x128xf32>
    %39 = vector.extract_strided_slice %26 {offsets = [0, 256], sizes = [8, 128], strides = [1, 1]} : vector<8x512xf32> to vector<8x128xf32>
    %40 = math.tanh %39 : vector<8x128xf32>
    %41 = vector.extract_strided_slice %26 {offsets = [0, 384], sizes = [8, 128], strides = [1, 1]} : vector<8x512xf32> to vector<8x128xf32>
    %42 = arith.negf %41 : vector<8x128xf32>
    %43 = math.exp %42 : vector<8x128xf32>
    %cst_22 = arith.constant 1.000000e+00 : f32
    %44 = vector.broadcast %cst_22 : f32 to vector<8x128xf32>
    %45 = arith.addf %44, %43 : vector<8x128xf32>
    %46 = arith.divf %44, %45 : vector<8x128xf32>
    %47 = arith.mulf %38, %16 : vector<8x128xf32>
    %48 = arith.mulf %32, %40 : vector<8x128xf32>
    %49 = arith.addf %47, %48 : vector<8x128xf32>
    %50 = math.tanh %49 : vector<8x128xf32>
    %51 = arith.mulf %46, %50 : vector<8x128xf32>
    %52 = vector.extract_strided_slice %21 {offsets = [8, 0], sizes = [8, 512], strides = [1, 1]} : vector<16x512xf32> to vector<8x512xf32>
    %53 = arith.addf %52, %14 : vector<8x512xf32>
    %54 = arith.truncf %17 : vector<8x128xf32> to vector<8x128xbf16>
    %cst_23 = arith.constant dense<0.000000e+00> : vector<8x512xf32>
    %55 = tpu.matmul %54, %9, %cst_23 {dimension_numbers = #tpu.dot_dimension_numbers<[1], [0], [0], [1], [0, 0, 1, 1], [], []>} : vector<8x128xbf16>, vector<128x512xbf16>, vector<8x512xf32> -> vector<8x512xf32>
    %56 = arith.addf %53, %55 : vector<8x512xf32>
    %57 = vector.extract_strided_slice %56 {offsets = [0, 0], sizes = [8, 128], strides = [1, 1]} : vector<8x512xf32> to vector<8x128xf32>
    %58 = arith.negf %57 : vector<8x128xf32>
    %59 = math.exp %58 : vector<8x128xf32>
    %cst_24 = arith.constant 1.000000e+00 : f32
    %60 = vector.broadcast %cst_24 : f32 to vector<8x128xf32>
    %61 = arith.addf %60, %59 : vector<8x128xf32>
    %62 = arith.divf %60, %61 : vector<8x128xf32>
    %63 = vector.extract_strided_slice %56 {offsets = [0, 128], sizes = [8, 128], strides = [1, 1]} : vector<8x512xf32> to vector<8x128xf32>
    %64 = arith.negf %63 : vector<8x128xf32>
    %65 = math.exp %64 : vector<8x128xf32>
    %cst_25 = arith.constant 1.000000e+00 : f32
    %66 = vector.broadcast %cst_25 : f32 to vector<8x128xf32>
    %67 = arith.addf %66, %65 : vector<8x128xf32>
    %68 = arith.divf %66, %67 : vector<8x128xf32>
    %69 = vector.extract_strided_slice %56 {offsets = [0, 256], sizes = [8, 128], strides = [1, 1]} : vector<8x512xf32> to vector<8x128xf32>
    %70 = math.tanh %69 : vector<8x128xf32>
    %71 = vector.extract_strided_slice %56 {offsets = [0, 384], sizes = [8, 128], strides = [1, 1]} : vector<8x512xf32> to vector<8x128xf32>
    %72 = arith.negf %71 : vector<8x128xf32>
    %73 = math.exp %72 : vector<8x128xf32>
    %cst_26 = arith.constant 1.000000e+00 : f32
    %74 = vector.broadcast %cst_26 : f32 to vector<8x128xf32>
    %75 = arith.addf %74, %73 : vector<8x128xf32>
    %76 = arith.divf %74, %75 : vector<8x128xf32>
    %77 = arith.mulf %68, %18 : vector<8x128xf32>
    %78 = arith.mulf %62, %70 : vector<8x128xf32>
    %79 = arith.addf %77, %78 : vector<8x128xf32>
    %80 = math.tanh %79 : vector<8x128xf32>
    %81 = arith.mulf %76, %80 : vector<8x128xf32>
    %c1_i32 = arith.constant 1 : i32
    %82 = arith.index_cast %c1_i32 : i32 to index
    %c0_27 = arith.constant 0 : index
    %c0_28 = arith.constant 0 : index
    %83 = vector.load %arg11[%82, %c0_27, %c0_28] : memref<8x16x512xf32, #tpu.memory_space<vmem>>, vector<1x16x512xf32>
    %84 = vector.shape_cast %83 : vector<1x16x512xf32> to vector<16x512xf32>
    %85 = vector.extract_strided_slice %84 {offsets = [0, 0], sizes = [8, 512], strides = [1, 1]} : vector<16x512xf32> to vector<8x512xf32>
    %86 = arith.addf %85, %13 : vector<8x512xf32>
    %87 = arith.truncf %51 : vector<8x128xf32> to vector<8x128xbf16>
    %cst_29 = arith.constant dense<0.000000e+00> : vector<8x512xf32>
    %88 = tpu.matmul %87, %9, %cst_29 {dimension_numbers = #tpu.dot_dimension_numbers<[1], [0], [0], [1], [0, 0, 1, 1], [], []>} : vector<8x128xbf16>, vector<128x512xbf16>, vector<8x512xf32> -> vector<8x512xf32>
    %89 = arith.addf %86, %88 : vector<8x512xf32>
    %90 = vector.extract_strided_slice %89 {offsets = [0, 0], sizes = [8, 128], strides = [1, 1]} : vector<8x512xf32> to vector<8x128xf32>
    %91 = arith.negf %90 : vector<8x128xf32>
    %92 = math.exp %91 : vector<8x128xf32>
    %cst_30 = arith.constant 1.000000e+00 : f32
    %93 = vector.broadcast %cst_30 : f32 to vector<8x128xf32>
    %94 = arith.addf %93, %92 : vector<8x128xf32>
    %95 = arith.divf %93, %94 : vector<8x128xf32>
    %96 = vector.extract_strided_slice %89 {offsets = [0, 128], sizes = [8, 128], strides = [1, 1]} : vector<8x512xf32> to vector<8x128xf32>
    %97 = arith.negf %96 : vector<8x128xf32>
    %98 = math.exp %97 : vector<8x128xf32>
    %cst_31 = arith.constant 1.000000e+00 : f32
    %99 = vector.broadcast %cst_31 : f32 to vector<8x128xf32>
    %100 = arith.addf %99, %98 : vector<8x128xf32>
    %101 = arith.divf %99, %100 : vector<8x128xf32>
    %102 = vector.extract_strided_slice %89 {offsets = [0, 256], sizes = [8, 128], strides = [1, 1]} : vector<8x512xf32> to vector<8x128xf32>
    %103 = math.tanh %102 : vector<8x128xf32>
    %104 = vector.extract_strided_slice %89 {offsets = [0, 384], sizes = [8, 128], strides = [1, 1]} : vector<8x512xf32> to vector<8x128xf32>
    %105 = arith.negf %104 : vector<8x128xf32>
    %106 = math.exp %105 : vector<8x128xf32>
    %cst_32 = arith.constant 1.000000e+00 : f32
    %107 = vector.broadcast %cst_32 : f32 to vector<8x128xf32>
    %108 = arith.addf %107, %106 : vector<8x128xf32>
    %109 = arith.divf %107, %108 : vector<8x128xf32>
    %110 = arith.mulf %101, %49 : vector<8x128xf32>
    %111 = arith.mulf %95, %103 : vector<8x128xf32>
    %112 = arith.addf %110, %111 : vector<8x128xf32>
    %113 = math.tanh %112 : vector<8x128xf32>
    %114 = arith.mulf %109, %113 : vector<8x128xf32>
    %115 = vector.extract_strided_slice %84 {offsets = [8, 0], sizes = [8, 512], strides = [1, 1]} : vector<16x512xf32> to vector<8x512xf32>
    %116 = arith.addf %115, %14 : vector<8x512xf32>
    %117 = arith.truncf %81 : vector<8x128xf32> to vector<8x128xbf16>
    %cst_33 = arith.constant dense<0.000000e+00> : vector<8x512xf32>
    %118 = tpu.matmul %117, %9, %cst_33 {dimension_numbers = #tpu.dot_dimension_numbers<[1], [0], [0], [1], [0, 0, 1, 1], [], []>} : vector<8x128xbf16>, vector<128x512xbf16>, vector<8x512xf32> -> vector<8x512xf32>
    %119 = arith.addf %116, %118 : vector<8x512xf32>
    %120 = vector.extract_strided_slice %119 {offsets = [0, 0], sizes = [8, 128], strides = [1, 1]} : vector<8x512xf32> to vector<8x128xf32>
    %121 = arith.negf %120 : vector<8x128xf32>
    %122 = math.exp %121 : vector<8x128xf32>
    %cst_34 = arith.constant 1.000000e+00 : f32
    %123 = vector.broadcast %cst_34 : f32 to vector<8x128xf32>
    %124 = arith.addf %123, %122 : vector<8x128xf32>
    %125 = arith.divf %123, %124 : vector<8x128xf32>
    %126 = vector.extract_strided_slice %119 {offsets = [0, 128], sizes = [8, 128], strides = [1, 1]} : vector<8x512xf32> to vector<8x128xf32>
    %127 = arith.negf %126 : vector<8x128xf32>
    %128 = math.exp %127 : vector<8x128xf32>
    %cst_35 = arith.constant 1.000000e+00 : f32
    %129 = vector.broadcast %cst_35 : f32 to vector<8x128xf32>
    %130 = arith.addf %129, %128 : vector<8x128xf32>
    %131 = arith.divf %129, %130 : vector<8x128xf32>
    %132 = vector.extract_strided_slice %119 {offsets = [0, 256], sizes = [8, 128], strides = [1, 1]} : vector<8x512xf32> to vector<8x128xf32>
    %133 = math.tanh %132 : vector<8x128xf32>
    %134 = vector.extract_strided_slice %119 {offsets = [0, 384], sizes = [8, 128], strides = [1, 1]} : vector<8x512xf32> to vector<8x128xf32>
    %135 = arith.negf %134 : vector<8x128xf32>
    %136 = math.exp %135 : vector<8x128xf32>
    %cst_36 = arith.constant 1.000000e+00 : f32
    %137 = vector.broadcast %cst_36 : f32 to vector<8x128xf32>
    %138 = arith.addf %137, %136 : vector<8x128xf32>
    %139 = arith.divf %137, %138 : vector<8x128xf32>
    %140 = arith.mulf %131, %79 : vector<8x128xf32>
    %141 = arith.mulf %125, %133 : vector<8x128xf32>
    %142 = arith.addf %140, %141 : vector<8x128xf32>
    %143 = math.tanh %142 : vector<8x128xf32>
    %144 = arith.mulf %139, %143 : vector<8x128xf32>
    %c2_i32 = arith.constant 2 : i32
    %145 = arith.index_cast %c2_i32 : i32 to index
    %c0_37 = arith.constant 0 : index
    %c0_38 = arith.constant 0 : index
    %146 = vector.load %arg11[%145, %c0_37, %c0_38] : memref<8x16x512xf32, #tpu.memory_space<vmem>>, vector<1x16x512xf32>
    %147 = vector.shape_cast %146 : vector<1x16x512xf32> to vector<16x512xf32>
    %148 = vector.extract_strided_slice %147 {offsets = [0, 0], sizes = [8, 512], strides = [1, 1]} : vector<16x512xf32> to vector<8x512xf32>
    %149 = arith.addf %148, %13 : vector<8x512xf32>
    %150 = arith.truncf %114 : vector<8x128xf32> to vector<8x128xbf16>
    %cst_39 = arith.constant dense<0.000000e+00> : vector<8x512xf32>
    %151 = tpu.matmul %150, %9, %cst_39 {dimension_numbers = #tpu.dot_dimension_numbers<[1], [0], [0], [1], [0, 0, 1, 1], [], []>} : vector<8x128xbf16>, vector<128x512xbf16>, vector<8x512xf32> -> vector<8x512xf32>
    %152 = arith.addf %149, %151 : vector<8x512xf32>
    %153 = vector.extract_strided_slice %152 {offsets = [0, 0], sizes = [8, 128], strides = [1, 1]} : vector<8x512xf32> to vector<8x128xf32>
    %154 = arith.negf %153 : vector<8x128xf32>
    %155 = math.exp %154 : vector<8x128xf32>
    %cst_40 = arith.constant 1.000000e+00 : f32
    %156 = vector.broadcast %cst_40 : f32 to vector<8x128xf32>
    %157 = arith.addf %156, %155 : vector<8x128xf32>
    %158 = arith.divf %156, %157 : vector<8x128xf32>
    %159 = vector.extract_strided_slice %152 {offsets = [0, 128], sizes = [8, 128], strides = [1, 1]} : vector<8x512xf32> to vector<8x128xf32>
    %160 = arith.negf %159 : vector<8x128xf32>
    %161 = math.exp %160 : vector<8x128xf32>
    %cst_41 = arith.constant 1.000000e+00 : f32
    %162 = vector.broadcast %cst_41 : f32 to vector<8x128xf32>
    %163 = arith.addf %162, %161 : vector<8x128xf32>
    %164 = arith.divf %162, %163 : vector<8x128xf32>
    %165 = vector.extract_strided_slice %152 {offsets = [0, 256], sizes = [8, 128], strides = [1, 1]} : vector<8x512xf32> to vector<8x128xf32>
    %166 = math.tanh %165 : vector<8x128xf32>
    %167 = vector.extract_strided_slice %152 {offsets = [0, 384], sizes = [8, 128], strides = [1, 1]} : vector<8x512xf32> to vector<8x128xf32>
    %168 = arith.negf %167 : vector<8x128xf32>
    %169 = math.exp %168 : vector<8x128xf32>
    %cst_42 = arith.constant 1.000000e+00 : f32
    %170 = vector.broadcast %cst_42 : f32 to vector<8x128xf32>
    %171 = arith.addf %170, %169 : vector<8x128xf32>
    %172 = arith.divf %170, %171 : vector<8x128xf32>
    %173 = arith.mulf %164, %112 : vector<8x128xf32>
    %174 = arith.mulf %158, %166 : vector<8x128xf32>
    %175 = arith.addf %173, %174 : vector<8x128xf32>
    %176 = math.tanh %175 : vector<8x128xf32>
    %177 = arith.mulf %172, %176 : vector<8x128xf32>
    %178 = vector.extract_strided_slice %147 {offsets = [8, 0], sizes = [8, 512], strides = [1, 1]} : vector<16x512xf32> to vector<8x512xf32>
    %179 = arith.addf %178, %14 : vector<8x512xf32>
    %180 = arith.truncf %144 : vector<8x128xf32> to vector<8x128xbf16>
    %cst_43 = arith.constant dense<0.000000e+00> : vector<8x512xf32>
    %181 = tpu.matmul %180, %9, %cst_43 {dimension_numbers = #tpu.dot_dimension_numbers<[1], [0], [0], [1], [0, 0, 1, 1], [], []>} : vector<8x128xbf16>, vector<128x512xbf16>, vector<8x512xf32> -> vector<8x512xf32>
    %182 = arith.addf %179, %181 : vector<8x512xf32>
    %183 = vector.extract_strided_slice %182 {offsets = [0, 0], sizes = [8, 128], strides = [1, 1]} : vector<8x512xf32> to vector<8x128xf32>
    %184 = arith.negf %183 : vector<8x128xf32>
    %185 = math.exp %184 : vector<8x128xf32>
    %cst_44 = arith.constant 1.000000e+00 : f32
    %186 = vector.broadcast %cst_44 : f32 to vector<8x128xf32>
    %187 = arith.addf %186, %185 : vector<8x128xf32>
    %188 = arith.divf %186, %187 : vector<8x128xf32>
    %189 = vector.extract_strided_slice %182 {offsets = [0, 128], sizes = [8, 128], strides = [1, 1]} : vector<8x512xf32> to vector<8x128xf32>
    %190 = arith.negf %189 : vector<8x128xf32>
    %191 = math.exp %190 : vector<8x128xf32>
    %cst_45 = arith.constant 1.000000e+00 : f32
    %192 = vector.broadcast %cst_45 : f32 to vector<8x128xf32>
    %193 = arith.addf %192, %191 : vector<8x128xf32>
    %194 = arith.divf %192, %193 : vector<8x128xf32>
    %195 = vector.extract_strided_slice %182 {offsets = [0, 256], sizes = [8, 128], strides = [1, 1]} : vector<8x512xf32> to vector<8x128xf32>
    %196 = math.tanh %195 : vector<8x128xf32>
    %197 = vector.extract_strided_slice %182 {offsets = [0, 384], sizes = [8, 128], strides = [1, 1]} : vector<8x512xf32> to vector<8x128xf32>
    %198 = arith.negf %197 : vector<8x128xf32>
    %199 = math.exp %198 : vector<8x128xf32>
    %cst_46 = arith.constant 1.000000e+00 : f32
    %200 = vector.broadcast %cst_46 : f32 to vector<8x128xf32>
    %201 = arith.addf %200, %199 : vector<8x128xf32>
    %202 = arith.divf %200, %201 : vector<8x128xf32>
    %203 = arith.mulf %194, %142 : vector<8x128xf32>
    %204 = arith.mulf %188, %196 : vector<8x128xf32>
    %205 = arith.addf %203, %204 : vector<8x128xf32>
    %206 = math.tanh %205 : vector<8x128xf32>
    %207 = arith.mulf %202, %206 : vector<8x128xf32>
    %c3_i32 = arith.constant 3 : i32
    %208 = arith.index_cast %c3_i32 : i32 to index
    %c0_47 = arith.constant 0 : index
    %c0_48 = arith.constant 0 : index
    %209 = vector.load %arg11[%208, %c0_47, %c0_48] : memref<8x16x512xf32, #tpu.memory_space<vmem>>, vector<1x16x512xf32>
    %210 = vector.shape_cast %209 : vector<1x16x512xf32> to vector<16x512xf32>
    %211 = vector.extract_strided_slice %210 {offsets = [0, 0], sizes = [8, 512], strides = [1, 1]} : vector<16x512xf32> to vector<8x512xf32>
    %212 = arith.addf %211, %13 : vector<8x512xf32>
    %213 = arith.truncf %177 : vector<8x128xf32> to vector<8x128xbf16>
    %cst_49 = arith.constant dense<0.000000e+00> : vector<8x512xf32>
    %214 = tpu.matmul %213, %9, %cst_49 {dimension_numbers = #tpu.dot_dimension_numbers<[1], [0], [0], [1], [0, 0, 1, 1], [], []>} : vector<8x128xbf16>, vector<128x512xbf16>, vector<8x512xf32> -> vector<8x512xf32>
    %215 = arith.addf %212, %214 : vector<8x512xf32>
    %216 = vector.extract_strided_slice %215 {offsets = [0, 0], sizes = [8, 128], strides = [1, 1]} : vector<8x512xf32> to vector<8x128xf32>
    %217 = arith.negf %216 : vector<8x128xf32>
    %218 = math.exp %217 : vector<8x128xf32>
    %cst_50 = arith.constant 1.000000e+00 : f32
    %219 = vector.broadcast %cst_50 : f32 to vector<8x128xf32>
    %220 = arith.addf %219, %218 : vector<8x128xf32>
    %221 = arith.divf %219, %220 : vector<8x128xf32>
    %222 = vector.extract_strided_slice %215 {offsets = [0, 128], sizes = [8, 128], strides = [1, 1]} : vector<8x512xf32> to vector<8x128xf32>
    %223 = arith.negf %222 : vector<8x128xf32>
    %224 = math.exp %223 : vector<8x128xf32>
    %cst_51 = arith.constant 1.000000e+00 : f32
    %225 = vector.broadcast %cst_51 : f32 to vector<8x128xf32>
    %226 = arith.addf %225, %224 : vector<8x128xf32>
    %227 = arith.divf %225, %226 : vector<8x128xf32>
    %228 = vector.extract_strided_slice %215 {offsets = [0, 256], sizes = [8, 128], strides = [1, 1]} : vector<8x512xf32> to vector<8x128xf32>
    %229 = math.tanh %228 : vector<8x128xf32>
    %230 = vector.extract_strided_slice %215 {offsets = [0, 384], sizes = [8, 128], strides = [1, 1]} : vector<8x512xf32> to vector<8x128xf32>
    %231 = arith.negf %230 : vector<8x128xf32>
    %232 = math.exp %231 : vector<8x128xf32>
    %cst_52 = arith.constant 1.000000e+00 : f32
    %233 = vector.broadcast %cst_52 : f32 to vector<8x128xf32>
    %234 = arith.addf %233, %232 : vector<8x128xf32>
    %235 = arith.divf %233, %234 : vector<8x128xf32>
    %236 = arith.mulf %227, %175 : vector<8x128xf32>
    %237 = arith.mulf %221, %229 : vector<8x128xf32>
    %238 = arith.addf %236, %237 : vector<8x128xf32>
    %239 = math.tanh %238 : vector<8x128xf32>
    %240 = arith.mulf %235, %239 : vector<8x128xf32>
    %241 = vector.extract_strided_slice %210 {offsets = [8, 0], sizes = [8, 512], strides = [1, 1]} : vector<16x512xf32> to vector<8x512xf32>
    %242 = arith.addf %241, %14 : vector<8x512xf32>
    %243 = arith.truncf %207 : vector<8x128xf32> to vector<8x128xbf16>
    %cst_53 = arith.constant dense<0.000000e+00> : vector<8x512xf32>
    %244 = tpu.matmul %243, %9, %cst_53 {dimension_numbers = #tpu.dot_dimension_numbers<[1], [0], [0], [1], [0, 0, 1, 1], [], []>} : vector<8x128xbf16>, vector<128x512xbf16>, vector<8x512xf32> -> vector<8x512xf32>
    %245 = arith.addf %242, %244 : vector<8x512xf32>
    %246 = vector.extract_strided_slice %245 {offsets = [0, 0], sizes = [8, 128], strides = [1, 1]} : vector<8x512xf32> to vector<8x128xf32>
    %247 = arith.negf %246 : vector<8x128xf32>
    %248 = math.exp %247 : vector<8x128xf32>
    %cst_54 = arith.constant 1.000000e+00 : f32
    %249 = vector.broadcast %cst_54 : f32 to vector<8x128xf32>
    %250 = arith.addf %249, %248 : vector<8x128xf32>
    %251 = arith.divf %249, %250 : vector<8x128xf32>
    %252 = vector.extract_strided_slice %245 {offsets = [0, 128], sizes = [8, 128], strides = [1, 1]} : vector<8x512xf32> to vector<8x128xf32>
    %253 = arith.negf %252 : vector<8x128xf32>
    %254 = math.exp %253 : vector<8x128xf32>
    %cst_55 = arith.constant 1.000000e+00 : f32
    %255 = vector.broadcast %cst_55 : f32 to vector<8x128xf32>
    %256 = arith.addf %255, %254 : vector<8x128xf32>
    %257 = arith.divf %255, %256 : vector<8x128xf32>
    %258 = vector.extract_strided_slice %245 {offsets = [0, 256], sizes = [8, 128], strides = [1, 1]} : vector<8x512xf32> to vector<8x128xf32>
    %259 = math.tanh %258 : vector<8x128xf32>
    %260 = vector.extract_strided_slice %245 {offsets = [0, 384], sizes = [8, 128], strides = [1, 1]} : vector<8x512xf32> to vector<8x128xf32>
    %261 = arith.negf %260 : vector<8x128xf32>
    %262 = math.exp %261 : vector<8x128xf32>
    %cst_56 = arith.constant 1.000000e+00 : f32
    %263 = vector.broadcast %cst_56 : f32 to vector<8x128xf32>
    %264 = arith.addf %263, %262 : vector<8x128xf32>
    %265 = arith.divf %263, %264 : vector<8x128xf32>
    %266 = arith.mulf %257, %205 : vector<8x128xf32>
    %267 = arith.mulf %251, %259 : vector<8x128xf32>
    %268 = arith.addf %266, %267 : vector<8x128xf32>
    %269 = math.tanh %268 : vector<8x128xf32>
    %270 = arith.mulf %265, %269 : vector<8x128xf32>
    %c4_i32 = arith.constant 4 : i32
    %271 = arith.index_cast %c4_i32 : i32 to index
    %c0_57 = arith.constant 0 : index
    %c0_58 = arith.constant 0 : index
    %272 = vector.load %arg11[%271, %c0_57, %c0_58] : memref<8x16x512xf32, #tpu.memory_space<vmem>>, vector<1x16x512xf32>
    %273 = vector.shape_cast %272 : vector<1x16x512xf32> to vector<16x512xf32>
    %274 = vector.extract_strided_slice %273 {offsets = [0, 0], sizes = [8, 512], strides = [1, 1]} : vector<16x512xf32> to vector<8x512xf32>
    %275 = arith.addf %274, %13 : vector<8x512xf32>
    %276 = arith.truncf %240 : vector<8x128xf32> to vector<8x128xbf16>
    %cst_59 = arith.constant dense<0.000000e+00> : vector<8x512xf32>
    %277 = tpu.matmul %276, %9, %cst_59 {dimension_numbers = #tpu.dot_dimension_numbers<[1], [0], [0], [1], [0, 0, 1, 1], [], []>} : vector<8x128xbf16>, vector<128x512xbf16>, vector<8x512xf32> -> vector<8x512xf32>
    %278 = arith.addf %275, %277 : vector<8x512xf32>
    %279 = vector.extract_strided_slice %278 {offsets = [0, 0], sizes = [8, 128], strides = [1, 1]} : vector<8x512xf32> to vector<8x128xf32>
    %280 = arith.negf %279 : vector<8x128xf32>
    %281 = math.exp %280 : vector<8x128xf32>
    %cst_60 = arith.constant 1.000000e+00 : f32
    %282 = vector.broadcast %cst_60 : f32 to vector<8x128xf32>
    %283 = arith.addf %282, %281 : vector<8x128xf32>
    %284 = arith.divf %282, %283 : vector<8x128xf32>
    %285 = vector.extract_strided_slice %278 {offsets = [0, 128], sizes = [8, 128], strides = [1, 1]} : vector<8x512xf32> to vector<8x128xf32>
    %286 = arith.negf %285 : vector<8x128xf32>
    %287 = math.exp %286 : vector<8x128xf32>
    %cst_61 = arith.constant 1.000000e+00 : f32
    %288 = vector.broadcast %cst_61 : f32 to vector<8x128xf32>
    %289 = arith.addf %288, %287 : vector<8x128xf32>
    %290 = arith.divf %288, %289 : vector<8x128xf32>
    %291 = vector.extract_strided_slice %278 {offsets = [0, 256], sizes = [8, 128], strides = [1, 1]} : vector<8x512xf32> to vector<8x128xf32>
    %292 = math.tanh %291 : vector<8x128xf32>
    %293 = vector.extract_strided_slice %278 {offsets = [0, 384], sizes = [8, 128], strides = [1, 1]} : vector<8x512xf32> to vector<8x128xf32>
    %294 = arith.negf %293 : vector<8x128xf32>
    %295 = math.exp %294 : vector<8x128xf32>
    %cst_62 = arith.constant 1.000000e+00 : f32
    %296 = vector.broadcast %cst_62 : f32 to vector<8x128xf32>
    %297 = arith.addf %296, %295 : vector<8x128xf32>
    %298 = arith.divf %296, %297 : vector<8x128xf32>
    %299 = arith.mulf %290, %238 : vector<8x128xf32>
    %300 = arith.mulf %284, %292 : vector<8x128xf32>
    %301 = arith.addf %299, %300 : vector<8x128xf32>
    %302 = math.tanh %301 : vector<8x128xf32>
    %303 = arith.mulf %298, %302 : vector<8x128xf32>
    %304 = vector.extract_strided_slice %273 {offsets = [8, 0], sizes = [8, 512], strides = [1, 1]} : vector<16x512xf32> to vector<8x512xf32>
    %305 = arith.addf %304, %14 : vector<8x512xf32>
    %306 = arith.truncf %270 : vector<8x128xf32> to vector<8x128xbf16>
    %cst_63 = arith.constant dense<0.000000e+00> : vector<8x512xf32>
    %307 = tpu.matmul %306, %9, %cst_63 {dimension_numbers = #tpu.dot_dimension_numbers<[1], [0], [0], [1], [0, 0, 1, 1], [], []>} : vector<8x128xbf16>, vector<128x512xbf16>, vector<8x512xf32> -> vector<8x512xf32>
    %308 = arith.addf %305, %307 : vector<8x512xf32>
    %309 = vector.extract_strided_slice %308 {offsets = [0, 0], sizes = [8, 128], strides = [1, 1]} : vector<8x512xf32> to vector<8x128xf32>
    %310 = arith.negf %309 : vector<8x128xf32>
    %311 = math.exp %310 : vector<8x128xf32>
    %cst_64 = arith.constant 1.000000e+00 : f32
    %312 = vector.broadcast %cst_64 : f32 to vector<8x128xf32>
    %313 = arith.addf %312, %311 : vector<8x128xf32>
    %314 = arith.divf %312, %313 : vector<8x128xf32>
    %315 = vector.extract_strided_slice %308 {offsets = [0, 128], sizes = [8, 128], strides = [1, 1]} : vector<8x512xf32> to vector<8x128xf32>
    %316 = arith.negf %315 : vector<8x128xf32>
    %317 = math.exp %316 : vector<8x128xf32>
    %cst_65 = arith.constant 1.000000e+00 : f32
    %318 = vector.broadcast %cst_65 : f32 to vector<8x128xf32>
    %319 = arith.addf %318, %317 : vector<8x128xf32>
    %320 = arith.divf %318, %319 : vector<8x128xf32>
    %321 = vector.extract_strided_slice %308 {offsets = [0, 256], sizes = [8, 128], strides = [1, 1]} : vector<8x512xf32> to vector<8x128xf32>
    %322 = math.tanh %321 : vector<8x128xf32>
    %323 = vector.extract_strided_slice %308 {offsets = [0, 384], sizes = [8, 128], strides = [1, 1]} : vector<8x512xf32> to vector<8x128xf32>
    %324 = arith.negf %323 : vector<8x128xf32>
    %325 = math.exp %324 : vector<8x128xf32>
    %cst_66 = arith.constant 1.000000e+00 : f32
    %326 = vector.broadcast %cst_66 : f32 to vector<8x128xf32>
    %327 = arith.addf %326, %325 : vector<8x128xf32>
    %328 = arith.divf %326, %327 : vector<8x128xf32>
    %329 = arith.mulf %320, %268 : vector<8x128xf32>
    %330 = arith.mulf %314, %322 : vector<8x128xf32>
    %331 = arith.addf %329, %330 : vector<8x128xf32>
    %332 = math.tanh %331 : vector<8x128xf32>
    %333 = arith.mulf %328, %332 : vector<8x128xf32>
    %c5_i32 = arith.constant 5 : i32
    %334 = arith.index_cast %c5_i32 : i32 to index
    %c0_67 = arith.constant 0 : index
    %c0_68 = arith.constant 0 : index
    %335 = vector.load %arg11[%334, %c0_67, %c0_68] : memref<8x16x512xf32, #tpu.memory_space<vmem>>, vector<1x16x512xf32>
    %336 = vector.shape_cast %335 : vector<1x16x512xf32> to vector<16x512xf32>
    %337 = vector.extract_strided_slice %336 {offsets = [0, 0], sizes = [8, 512], strides = [1, 1]} : vector<16x512xf32> to vector<8x512xf32>
    %338 = arith.addf %337, %13 : vector<8x512xf32>
    %339 = arith.truncf %303 : vector<8x128xf32> to vector<8x128xbf16>
    %cst_69 = arith.constant dense<0.000000e+00> : vector<8x512xf32>
    %340 = tpu.matmul %339, %9, %cst_69 {dimension_numbers = #tpu.dot_dimension_numbers<[1], [0], [0], [1], [0, 0, 1, 1], [], []>} : vector<8x128xbf16>, vector<128x512xbf16>, vector<8x512xf32> -> vector<8x512xf32>
    %341 = arith.addf %338, %340 : vector<8x512xf32>
    %342 = vector.extract_strided_slice %341 {offsets = [0, 0], sizes = [8, 128], strides = [1, 1]} : vector<8x512xf32> to vector<8x128xf32>
    %343 = arith.negf %342 : vector<8x128xf32>
    %344 = math.exp %343 : vector<8x128xf32>
    %cst_70 = arith.constant 1.000000e+00 : f32
    %345 = vector.broadcast %cst_70 : f32 to vector<8x128xf32>
    %346 = arith.addf %345, %344 : vector<8x128xf32>
    %347 = arith.divf %345, %346 : vector<8x128xf32>
    %348 = vector.extract_strided_slice %341 {offsets = [0, 128], sizes = [8, 128], strides = [1, 1]} : vector<8x512xf32> to vector<8x128xf32>
    %349 = arith.negf %348 : vector<8x128xf32>
    %350 = math.exp %349 : vector<8x128xf32>
    %cst_71 = arith.constant 1.000000e+00 : f32
    %351 = vector.broadcast %cst_71 : f32 to vector<8x128xf32>
    %352 = arith.addf %351, %350 : vector<8x128xf32>
    %353 = arith.divf %351, %352 : vector<8x128xf32>
    %354 = vector.extract_strided_slice %341 {offsets = [0, 256], sizes = [8, 128], strides = [1, 1]} : vector<8x512xf32> to vector<8x128xf32>
    %355 = math.tanh %354 : vector<8x128xf32>
    %356 = vector.extract_strided_slice %341 {offsets = [0, 384], sizes = [8, 128], strides = [1, 1]} : vector<8x512xf32> to vector<8x128xf32>
    %357 = arith.negf %356 : vector<8x128xf32>
    %358 = math.exp %357 : vector<8x128xf32>
    %cst_72 = arith.constant 1.000000e+00 : f32
    %359 = vector.broadcast %cst_72 : f32 to vector<8x128xf32>
    %360 = arith.addf %359, %358 : vector<8x128xf32>
    %361 = arith.divf %359, %360 : vector<8x128xf32>
    %362 = arith.mulf %353, %301 : vector<8x128xf32>
    %363 = arith.mulf %347, %355 : vector<8x128xf32>
    %364 = arith.addf %362, %363 : vector<8x128xf32>
    %365 = math.tanh %364 : vector<8x128xf32>
    %366 = arith.mulf %361, %365 : vector<8x128xf32>
    %367 = vector.extract_strided_slice %336 {offsets = [8, 0], sizes = [8, 512], strides = [1, 1]} : vector<16x512xf32> to vector<8x512xf32>
    %368 = arith.addf %367, %14 : vector<8x512xf32>
    %369 = arith.truncf %333 : vector<8x128xf32> to vector<8x128xbf16>
    %cst_73 = arith.constant dense<0.000000e+00> : vector<8x512xf32>
    %370 = tpu.matmul %369, %9, %cst_73 {dimension_numbers = #tpu.dot_dimension_numbers<[1], [0], [0], [1], [0, 0, 1, 1], [], []>} : vector<8x128xbf16>, vector<128x512xbf16>, vector<8x512xf32> -> vector<8x512xf32>
    %371 = arith.addf %368, %370 : vector<8x512xf32>
    %372 = vector.extract_strided_slice %371 {offsets = [0, 0], sizes = [8, 128], strides = [1, 1]} : vector<8x512xf32> to vector<8x128xf32>
    %373 = arith.negf %372 : vector<8x128xf32>
    %374 = math.exp %373 : vector<8x128xf32>
    %cst_74 = arith.constant 1.000000e+00 : f32
    %375 = vector.broadcast %cst_74 : f32 to vector<8x128xf32>
    %376 = arith.addf %375, %374 : vector<8x128xf32>
    %377 = arith.divf %375, %376 : vector<8x128xf32>
    %378 = vector.extract_strided_slice %371 {offsets = [0, 128], sizes = [8, 128], strides = [1, 1]} : vector<8x512xf32> to vector<8x128xf32>
    %379 = arith.negf %378 : vector<8x128xf32>
    %380 = math.exp %379 : vector<8x128xf32>
    %cst_75 = arith.constant 1.000000e+00 : f32
    %381 = vector.broadcast %cst_75 : f32 to vector<8x128xf32>
    %382 = arith.addf %381, %380 : vector<8x128xf32>
    %383 = arith.divf %381, %382 : vector<8x128xf32>
    %384 = vector.extract_strided_slice %371 {offsets = [0, 256], sizes = [8, 128], strides = [1, 1]} : vector<8x512xf32> to vector<8x128xf32>
    %385 = math.tanh %384 : vector<8x128xf32>
    %386 = vector.extract_strided_slice %371 {offsets = [0, 384], sizes = [8, 128], strides = [1, 1]} : vector<8x512xf32> to vector<8x128xf32>
    %387 = arith.negf %386 : vector<8x128xf32>
    %388 = math.exp %387 : vector<8x128xf32>
    %cst_76 = arith.constant 1.000000e+00 : f32
    %389 = vector.broadcast %cst_76 : f32 to vector<8x128xf32>
    %390 = arith.addf %389, %388 : vector<8x128xf32>
    %391 = arith.divf %389, %390 : vector<8x128xf32>
    %392 = arith.mulf %383, %331 : vector<8x128xf32>
    %393 = arith.mulf %377, %385 : vector<8x128xf32>
    %394 = arith.addf %392, %393 : vector<8x128xf32>
    %395 = math.tanh %394 : vector<8x128xf32>
    %396 = arith.mulf %391, %395 : vector<8x128xf32>
    %c6_i32 = arith.constant 6 : i32
    %397 = arith.index_cast %c6_i32 : i32 to index
    %c0_77 = arith.constant 0 : index
    %c0_78 = arith.constant 0 : index
    %398 = vector.load %arg11[%397, %c0_77, %c0_78] : memref<8x16x512xf32, #tpu.memory_space<vmem>>, vector<1x16x512xf32>
    %399 = vector.shape_cast %398 : vector<1x16x512xf32> to vector<16x512xf32>
    %400 = vector.extract_strided_slice %399 {offsets = [0, 0], sizes = [8, 512], strides = [1, 1]} : vector<16x512xf32> to vector<8x512xf32>
    %401 = arith.addf %400, %13 : vector<8x512xf32>
    %402 = arith.truncf %366 : vector<8x128xf32> to vector<8x128xbf16>
    %cst_79 = arith.constant dense<0.000000e+00> : vector<8x512xf32>
    %403 = tpu.matmul %402, %9, %cst_79 {dimension_numbers = #tpu.dot_dimension_numbers<[1], [0], [0], [1], [0, 0, 1, 1], [], []>} : vector<8x128xbf16>, vector<128x512xbf16>, vector<8x512xf32> -> vector<8x512xf32>
    %404 = arith.addf %401, %403 : vector<8x512xf32>
    %405 = vector.extract_strided_slice %404 {offsets = [0, 0], sizes = [8, 128], strides = [1, 1]} : vector<8x512xf32> to vector<8x128xf32>
    %406 = arith.negf %405 : vector<8x128xf32>
    %407 = math.exp %406 : vector<8x128xf32>
    %cst_80 = arith.constant 1.000000e+00 : f32
    %408 = vector.broadcast %cst_80 : f32 to vector<8x128xf32>
    %409 = arith.addf %408, %407 : vector<8x128xf32>
    %410 = arith.divf %408, %409 : vector<8x128xf32>
    %411 = vector.extract_strided_slice %404 {offsets = [0, 128], sizes = [8, 128], strides = [1, 1]} : vector<8x512xf32> to vector<8x128xf32>
    %412 = arith.negf %411 : vector<8x128xf32>
    %413 = math.exp %412 : vector<8x128xf32>
    %cst_81 = arith.constant 1.000000e+00 : f32
    %414 = vector.broadcast %cst_81 : f32 to vector<8x128xf32>
    %415 = arith.addf %414, %413 : vector<8x128xf32>
    %416 = arith.divf %414, %415 : vector<8x128xf32>
    %417 = vector.extract_strided_slice %404 {offsets = [0, 256], sizes = [8, 128], strides = [1, 1]} : vector<8x512xf32> to vector<8x128xf32>
    %418 = math.tanh %417 : vector<8x128xf32>
    %419 = vector.extract_strided_slice %404 {offsets = [0, 384], sizes = [8, 128], strides = [1, 1]} : vector<8x512xf32> to vector<8x128xf32>
    %420 = arith.negf %419 : vector<8x128xf32>
    %421 = math.exp %420 : vector<8x128xf32>
    %cst_82 = arith.constant 1.000000e+00 : f32
    %422 = vector.broadcast %cst_82 : f32 to vector<8x128xf32>
    %423 = arith.addf %422, %421 : vector<8x128xf32>
    %424 = arith.divf %422, %423 : vector<8x128xf32>
    %425 = arith.mulf %416, %364 : vector<8x128xf32>
    %426 = arith.mulf %410, %418 : vector<8x128xf32>
    %427 = arith.addf %425, %426 : vector<8x128xf32>
    %428 = math.tanh %427 : vector<8x128xf32>
    %429 = arith.mulf %424, %428 : vector<8x128xf32>
    %430 = vector.extract_strided_slice %399 {offsets = [8, 0], sizes = [8, 512], strides = [1, 1]} : vector<16x512xf32> to vector<8x512xf32>
    %431 = arith.addf %430, %14 : vector<8x512xf32>
    %432 = arith.truncf %396 : vector<8x128xf32> to vector<8x128xbf16>
    %cst_83 = arith.constant dense<0.000000e+00> : vector<8x512xf32>
    %433 = tpu.matmul %432, %9, %cst_83 {dimension_numbers = #tpu.dot_dimension_numbers<[1], [0], [0], [1], [0, 0, 1, 1], [], []>} : vector<8x128xbf16>, vector<128x512xbf16>, vector<8x512xf32> -> vector<8x512xf32>
    %434 = arith.addf %431, %433 : vector<8x512xf32>
    %435 = vector.extract_strided_slice %434 {offsets = [0, 0], sizes = [8, 128], strides = [1, 1]} : vector<8x512xf32> to vector<8x128xf32>
    %436 = arith.negf %435 : vector<8x128xf32>
    %437 = math.exp %436 : vector<8x128xf32>
    %cst_84 = arith.constant 1.000000e+00 : f32
    %438 = vector.broadcast %cst_84 : f32 to vector<8x128xf32>
    %439 = arith.addf %438, %437 : vector<8x128xf32>
    %440 = arith.divf %438, %439 : vector<8x128xf32>
    %441 = vector.extract_strided_slice %434 {offsets = [0, 128], sizes = [8, 128], strides = [1, 1]} : vector<8x512xf32> to vector<8x128xf32>
    %442 = arith.negf %441 : vector<8x128xf32>
    %443 = math.exp %442 : vector<8x128xf32>
    %cst_85 = arith.constant 1.000000e+00 : f32
    %444 = vector.broadcast %cst_85 : f32 to vector<8x128xf32>
    %445 = arith.addf %444, %443 : vector<8x128xf32>
    %446 = arith.divf %444, %445 : vector<8x128xf32>
    %447 = vector.extract_strided_slice %434 {offsets = [0, 256], sizes = [8, 128], strides = [1, 1]} : vector<8x512xf32> to vector<8x128xf32>
    %448 = math.tanh %447 : vector<8x128xf32>
    %449 = vector.extract_strided_slice %434 {offsets = [0, 384], sizes = [8, 128], strides = [1, 1]} : vector<8x512xf32> to vector<8x128xf32>
    %450 = arith.negf %449 : vector<8x128xf32>
    %451 = math.exp %450 : vector<8x128xf32>
    %cst_86 = arith.constant 1.000000e+00 : f32
    %452 = vector.broadcast %cst_86 : f32 to vector<8x128xf32>
    %453 = arith.addf %452, %451 : vector<8x128xf32>
    %454 = arith.divf %452, %453 : vector<8x128xf32>
    %455 = arith.mulf %446, %394 : vector<8x128xf32>
    %456 = arith.mulf %440, %448 : vector<8x128xf32>
    %457 = arith.addf %455, %456 : vector<8x128xf32>
    %458 = math.tanh %457 : vector<8x128xf32>
    %459 = arith.mulf %454, %458 : vector<8x128xf32>
    %c7_i32 = arith.constant 7 : i32
    %460 = arith.index_cast %c7_i32 : i32 to index
    %c0_87 = arith.constant 0 : index
    %c0_88 = arith.constant 0 : index
    %461 = vector.load %arg11[%460, %c0_87, %c0_88] : memref<8x16x512xf32, #tpu.memory_space<vmem>>, vector<1x16x512xf32>
    %462 = vector.shape_cast %461 : vector<1x16x512xf32> to vector<16x512xf32>
    %463 = vector.extract_strided_slice %462 {offsets = [0, 0], sizes = [8, 512], strides = [1, 1]} : vector<16x512xf32> to vector<8x512xf32>
    %464 = arith.addf %463, %13 : vector<8x512xf32>
    %465 = arith.truncf %429 : vector<8x128xf32> to vector<8x128xbf16>
    %cst_89 = arith.constant dense<0.000000e+00> : vector<8x512xf32>
    %466 = tpu.matmul %465, %9, %cst_89 {dimension_numbers = #tpu.dot_dimension_numbers<[1], [0], [0], [1], [0, 0, 1, 1], [], []>} : vector<8x128xbf16>, vector<128x512xbf16>, vector<8x512xf32> -> vector<8x512xf32>
    %467 = arith.addf %464, %466 : vector<8x512xf32>
    %468 = vector.extract_strided_slice %467 {offsets = [0, 0], sizes = [8, 128], strides = [1, 1]} : vector<8x512xf32> to vector<8x128xf32>
    %469 = arith.negf %468 : vector<8x128xf32>
    %470 = math.exp %469 : vector<8x128xf32>
    %cst_90 = arith.constant 1.000000e+00 : f32
    %471 = vector.broadcast %cst_90 : f32 to vector<8x128xf32>
    %472 = arith.addf %471, %470 : vector<8x128xf32>
    %473 = arith.divf %471, %472 : vector<8x128xf32>
    %474 = vector.extract_strided_slice %467 {offsets = [0, 128], sizes = [8, 128], strides = [1, 1]} : vector<8x512xf32> to vector<8x128xf32>
    %475 = arith.negf %474 : vector<8x128xf32>
    %476 = math.exp %475 : vector<8x128xf32>
    %cst_91 = arith.constant 1.000000e+00 : f32
    %477 = vector.broadcast %cst_91 : f32 to vector<8x128xf32>
    %478 = arith.addf %477, %476 : vector<8x128xf32>
    %479 = arith.divf %477, %478 : vector<8x128xf32>
    %480 = vector.extract_strided_slice %467 {offsets = [0, 256], sizes = [8, 128], strides = [1, 1]} : vector<8x512xf32> to vector<8x128xf32>
    %481 = math.tanh %480 : vector<8x128xf32>
    %482 = vector.extract_strided_slice %467 {offsets = [0, 384], sizes = [8, 128], strides = [1, 1]} : vector<8x512xf32> to vector<8x128xf32>
    %483 = arith.negf %482 : vector<8x128xf32>
    %484 = math.exp %483 : vector<8x128xf32>
    %cst_92 = arith.constant 1.000000e+00 : f32
    %485 = vector.broadcast %cst_92 : f32 to vector<8x128xf32>
    %486 = arith.addf %485, %484 : vector<8x128xf32>
    %487 = arith.divf %485, %486 : vector<8x128xf32>
    %488 = arith.mulf %479, %427 : vector<8x128xf32>
    %489 = arith.mulf %473, %481 : vector<8x128xf32>
    %490 = arith.addf %488, %489 : vector<8x128xf32>
    %491 = math.tanh %490 : vector<8x128xf32>
    %492 = arith.mulf %487, %491 : vector<8x128xf32>
    %493 = vector.extract_strided_slice %462 {offsets = [8, 0], sizes = [8, 512], strides = [1, 1]} : vector<16x512xf32> to vector<8x512xf32>
    %494 = arith.addf %493, %14 : vector<8x512xf32>
    %495 = arith.truncf %459 : vector<8x128xf32> to vector<8x128xbf16>
    %cst_93 = arith.constant dense<0.000000e+00> : vector<8x512xf32>
    %496 = tpu.matmul %495, %9, %cst_93 {dimension_numbers = #tpu.dot_dimension_numbers<[1], [0], [0], [1], [0, 0, 1, 1], [], []>} : vector<8x128xbf16>, vector<128x512xbf16>, vector<8x512xf32> -> vector<8x512xf32>
    %497 = arith.addf %494, %496 : vector<8x512xf32>
    %498 = vector.extract_strided_slice %497 {offsets = [0, 0], sizes = [8, 128], strides = [1, 1]} : vector<8x512xf32> to vector<8x128xf32>
    %499 = arith.negf %498 : vector<8x128xf32>
    %500 = math.exp %499 : vector<8x128xf32>
    %cst_94 = arith.constant 1.000000e+00 : f32
    %501 = vector.broadcast %cst_94 : f32 to vector<8x128xf32>
    %502 = arith.addf %501, %500 : vector<8x128xf32>
    %503 = arith.divf %501, %502 : vector<8x128xf32>
    %504 = vector.extract_strided_slice %497 {offsets = [0, 128], sizes = [8, 128], strides = [1, 1]} : vector<8x512xf32> to vector<8x128xf32>
    %505 = arith.negf %504 : vector<8x128xf32>
    %506 = math.exp %505 : vector<8x128xf32>
    %cst_95 = arith.constant 1.000000e+00 : f32
    %507 = vector.broadcast %cst_95 : f32 to vector<8x128xf32>
    %508 = arith.addf %507, %506 : vector<8x128xf32>
    %509 = arith.divf %507, %508 : vector<8x128xf32>
    %510 = vector.extract_strided_slice %497 {offsets = [0, 256], sizes = [8, 128], strides = [1, 1]} : vector<8x512xf32> to vector<8x128xf32>
    %511 = math.tanh %510 : vector<8x128xf32>
    %512 = vector.extract_strided_slice %497 {offsets = [0, 384], sizes = [8, 128], strides = [1, 1]} : vector<8x512xf32> to vector<8x128xf32>
    %513 = arith.negf %512 : vector<8x128xf32>
    %514 = math.exp %513 : vector<8x128xf32>
    %cst_96 = arith.constant 1.000000e+00 : f32
    %515 = vector.broadcast %cst_96 : f32 to vector<8x128xf32>
    %516 = arith.addf %515, %514 : vector<8x128xf32>
    %517 = arith.divf %515, %516 : vector<8x128xf32>
    %518 = arith.mulf %509, %457 : vector<8x128xf32>
    %519 = arith.mulf %503, %511 : vector<8x128xf32>
    %520 = arith.addf %518, %519 : vector<8x128xf32>
    %521 = math.tanh %520 : vector<8x128xf32>
    %522 = arith.mulf %517, %521 : vector<8x128xf32>
    %c8_i32 = arith.constant 8 : i32
    %c0_97 = arith.constant 0 : index
    %c0_98 = arith.constant 0 : index
    %523 = vector.load %arg9[%c0_97, %c0_98] : memref<16x128xf32, #tpu.memory_space<vmem>>, vector<8x128xf32>
    tpu.vector_store %arg9[%c0_97, %c0_98], %492 {strides = array<i32>} : memref<16x128xf32, #tpu.memory_space<vmem>>, vector<8x128xf32>,
    %c0_99 = arith.constant 0 : index
    %c0_100 = arith.constant 0 : index
    %524 = vector.load %arg10[%c0_99, %c0_100] : memref<16x128xf32, #tpu.memory_space<vmem>>, vector<8x128xf32>
    tpu.vector_store %arg10[%c0_99, %c0_100], %490 {strides = array<i32>} : memref<16x128xf32, #tpu.memory_space<vmem>>, vector<8x128xf32>,
    %c8 = arith.constant 8 : index
    %c0_101 = arith.constant 0 : index
    %525 = vector.load %arg9[%c8, %c0_101] : memref<16x128xf32, #tpu.memory_space<vmem>>, vector<8x128xf32>
    tpu.vector_store %arg9[%c8, %c0_101], %522 {strides = array<i32>} : memref<16x128xf32, #tpu.memory_space<vmem>>, vector<8x128xf32>,
    %c8_102 = arith.constant 8 : index
    %c0_103 = arith.constant 0 : index
    %526 = vector.load %arg10[%c8_102, %c0_103] : memref<16x128xf32, #tpu.memory_space<vmem>>, vector<8x128xf32>
    tpu.vector_store %arg10[%c8_102, %c0_103], %520 {strides = array<i32>} : memref<16x128xf32, #tpu.memory_space<vmem>>, vector<8x128xf32>,
    %c0_i32_104 = arith.constant 0 : i32
    %527 = arith.cmpi eq, %arg1, %c0_i32_104 : i32
    %528 = arith.extui %527 : i1 to i32
    %c0_i32_105 = arith.constant 0 : i32
    %529 = arith.cmpi ne, %528, %c0_i32_105 : i32
    scf.if %529 {
      %c0_106 = arith.constant 0 : index
      %c0_107 = arith.constant 0 : index
      %530 = vector.load %arg9[%c0_106, %c0_107] : memref<16x128xf32, #tpu.memory_space<vmem>>, vector<16x128xf32>
      %c0_108 = arith.constant 0 : index
      %c0_109 = arith.constant 0 : index
      %531 = vector.load %arg6[%c0_108, %c0_109] : memref<1x128xf32, #tpu.memory_space<vmem>>, vector<1x128xf32>
      %532 = vector.broadcast %531 : vector<1x128xf32> to vector<16x128xf32>
      %533 = arith.mulf %530, %532 : vector<16x128xf32>
      %cst_110 = arith.constant dense<0.000000e+00> : vector<16xf32>
      %534 = vector.multi_reduction <add>, %533, %cst_110 [1] : vector<16x128xf32> to vector<16xf32>
      %535 = vector.shape_cast %534 : vector<16xf32> to vector<16x1xf32>
      %c0_111 = arith.constant 0 : index
      %c0_112 = arith.constant 0 : index
      %536 = vector.load %arg7[%c0_111, %c0_112] : memref<1x1xf32, #tpu.memory_space<vmem>>, vector<1x1xf32>
      %537 = vector.broadcast %536 : vector<1x1xf32> to vector<16x1xf32>
      %538 = arith.addf %535, %537 : vector<16x1xf32>
      %539 = arith.negf %538 : vector<16x1xf32>
      %540 = math.exp %539 : vector<16x1xf32>
      %cst_113 = arith.constant 1.000000e+00 : f32
      %541 = vector.broadcast %cst_113 : f32 to vector<16x1xf32>
      %542 = arith.addf %541, %540 : vector<16x1xf32>
      %543 = arith.divf %541, %542 : vector<16x1xf32>
      %c0_114 = arith.constant 0 : index
      %c0_115 = arith.constant 0 : index
      %544 = vector.load %arg8[%c0_114, %c0_115] : memref<16x1xf32, #tpu.memory_space<vmem>>, vector<16x1xf32>
      tpu.vector_store %arg8[%c0_114, %c0_115], %543 {strides = array<i32>} : memref<16x1xf32, #tpu.memory_space<vmem>>, vector<16x1xf32>,
    } else {
    }
    return
  }
  func.func @transform_0(%arg0: i32, %arg1: i32) -> (i32, i32, i32) {
    %c0_i32 = arith.constant 0 : i32
    %c0_i32_0 = arith.constant 0 : i32
    return %arg1, %arg0, %c0_i32 : i32, i32, i32
  }
  func.func @transform_1(%arg0: i32, %arg1: i32) -> (i32, i32) {
    %c0_i32 = arith.constant 0 : i32
    %c0_i32_0 = arith.constant 0 : i32
    return %arg0, %c0_i32 : i32, i32
  }
  func.func @transform_2(%arg0: i32, %arg1: i32) -> (i32, i32) {
    %c0_i32 = arith.constant 0 : i32
    %c0_i32_0 = arith.constant 0 : i32
    %c0_i32_1 = arith.constant 0 : i32
    return %c0_i32, %c0_i32_0 : i32, i32
  }
  func.func @transform_3(%arg0: i32, %arg1: i32) -> (i32, i32) {
    %c0_i32 = arith.constant 0 : i32
    %c0_i32_0 = arith.constant 0 : i32
    %c0_i32_1 = arith.constant 0 : i32
    return %c0_i32, %c0_i32_0 : i32, i32
  }
  func.func @transform_4(%arg0: i32, %arg1: i32) -> (i32, i32) {
    %c0_i32 = arith.constant 0 : i32
    %c0_i32_0 = arith.constant 0 : i32
    %c0_i32_1 = arith.constant 0 : i32
    return %c0_i32, %c0_i32_0 : i32, i32
  }
  func.func @transform_5(%arg0: i32, %arg1: i32) -> (i32, i32) {
    %c0_i32 = arith.constant 0 : i32
    %c0_i32_0 = arith.constant 0 : i32
    %c0_i32_1 = arith.constant 0 : i32
    return %c0_i32, %c0_i32_0 : i32, i32
  }
  func.func @transform_6(%arg0: i32, %arg1: i32) -> (i32, i32) {
    %c0_i32 = arith.constant 0 : i32
    %c0_i32_0 = arith.constant 0 : i32
    return %arg0, %c0_i32 : i32, i32
  }
}

</mosaic_0001>

<bundles_post_ra>
// kernel: tpu_custom_call.1
= control target key start
LH: loop header
LB: loop body
LE: loop exit
PB: predicated region body
PF: predicated region fallthrough
CT: control target
= control target key end

     0   :  { %s4600_s0 = inlined_call_operand.hbm [shape: bf16[8,16,128], index: 0, kind: input, shape index: {}]   ;;  %s4601_s1 = inlined_call_operand.hbm [shape: f32[16,512], index: 1, kind: input, shape index: {}]   ;;  %s4602_s2 = inlined_call_operand.hbm [shape: bf16[128,512], index: 2, kind: input, shape index: {}]   ;;  %s4603_s3 = inlined_call_operand.hbm [shape: bf16[128,512], index: 3, kind: input, shape index: {}]   ;;  %s4604_s4 = inlined_call_operand.vmem [shape: f32[1,128], index: 4, kind: input, shape index: {}]   ;;  %s4605_s5 = inlined_call_operand.<no memory space> [shape: f32[1,1], index: 5, kind: input, shape index: {}]   ;;  %s4606_s6 = inlined_call_operand.vmem [shape: f32[16,1], index: 6, kind: output, shape index: {}]  }
   0x1   :  { %v11_v0 = vstv %s4605_s5 }
   0x2   :  { %12 = vst [vmem:[#allocation5] sm:$0x1] %v11_v0 }
   0x3   :  { %13 = vsyncpa [#allocation7], 0 }
   0x4   :  { %14 = vsyncpa [#allocation9], 0 }
   0x5   :  { %15 = vsyncpa [#allocation12], 0  ;;  %s3457_s23 = smov [#allocation8]  }
   0x6   :  { %s33_s24 = sshll.u32 %s3457_s23, 4  ;;  %s34_s24 = int_to_ptr.vmem [resolvable:$true] %s33_s24 }
   0x7   :  { %s3379_s25 = scalar_lea.vmem %s34_s24, 1024  ;;  %p3384_p1 = scmp.lt.s32.totalorder %s34_s24, %s34_s24 }
   0x8   :  { %p3380_p0 = scmp.ne.s32.totalorder %s34_s24, %s3379_s25  ;;  %p3385_p2 = scmp.lt.s32.totalorder %s3379_s25, %s3379_s25 }
   0xa   :  { %p3386_p3 = por %p3385_p2, %p3384_p1 }
   0xc   :  { %p3387_p4 = pnand %p3386_p3, %p3380_p0 }
   0xe   :  { %3390 = shalt.err (!%p3387_p4)
}
   0xf   :  { %s3458_s26 = smov 512   ;;  %s3459_s27 = smov 32  }
  0x10   :  { %39 = dma.hbm_to_vmem [thread:$0]  %s4601_s1, 1024, %s34_s24, [#allocation9], %s3458_s26, %s3458_s26, %s3459_s27  }
  0x11   :  { %s3460_s5 = smov [#allocation6]  }
  0x12   :  { %s21_s30 = sshll.u32 %s3460_s5, 4  ;;  %s22_s30 = int_to_ptr.vmem [resolvable:$true] %s21_s30 }
  0x13   :  { %s3399_s7 = scalar_lea.vmem %s22_s30, 1024  ;;  %p3404_p6 = scmp.lt.s32.totalorder %s22_s30, %s22_s30 }
  0x14   :  { %p3400_p5 = scmp.ne.s32.totalorder %s22_s30, %s3399_s7  ;;  %p3405_p7 = scmp.lt.s32.totalorder %s3399_s7, %s3399_s7 }
  0x16   :  { %p3406_p8 = por %p3405_p7, %p3404_p6 }
  0x18   :  { %p3407_p9 = pnand %p3406_p8, %p3400_p5 }
  0x1a   :  { %3410 = shalt.err (!%p3407_p9)
}
  0x1b   :  { %s3461_s8 = smov 64   ;;  %s3462_s9 = smov 4  }
  0x1c   :  { %27 = dma.hbm_to_vmem [thread:$0]  %s4600_s0, 1024, %s22_s30, [#allocation7], %s3461_s8, %s3461_s8, %s3462_s9  }
  0x1d   :  { %s3463_s12 = smov [#allocation10]  }
  0x1e   :  { %s45_s13 = sshll.u32 %s3463_s12, 4  ;;  %s46_s13 = int_to_ptr.vmem [resolvable:$true] %s45_s13 }
  0x1f   :  { %s3419_s1 = scalar_lea.vmem %s46_s13, 4096  ;;  %p3424_p11 = scmp.lt.s32.totalorder %s46_s13, %s46_s13 }
  0x20   :  { %p3420_p10 = scmp.ne.s32.totalorder %s46_s13, %s3419_s1  ;;  %p3425_p12 = scmp.lt.s32.totalorder %s3419_s1, %s3419_s1 }
  0x22   :  { %p3426_p13 = por %p3425_p12, %p3424_p11 }
  0x24   :  { %p3427_p0 = pnand %p3426_p13, %p3420_p10 }
  0x26   :  { %3430 = shalt.err (!%p3427_p0)
}
  0x27   :  { %s3464_s14 = smov 256   ;;  %s3465_s15 = smov 16  }
  0x28   :  { %51 = dma.hbm_to_vmem [thread:$0]  %s4602_s2, 4096, %s46_s13, [#allocation9], %s3464_s14, %s3464_s14, %s3465_s15  }
  0x29   :  { %s3466_s18 = smov [#allocation11]  }
  0x2a   :  { %s57_s19 = sshll.u32 %s3466_s18, 4  ;;  %s58_s19 = int_to_ptr.vmem [resolvable:$true] %s57_s19 }
  0x2b   :  { %s3439_s0 = scalar_lea.vmem %s58_s19, 4096  ;;  %p3444_p2 = scmp.lt.s32.totalorder %s58_s19, %s58_s19 }
  0x2c   :  { %p3440_p1 = scmp.ne.s32.totalorder %s58_s19, %s3439_s0  ;;  %p3445_p3 = scmp.lt.s32.totalorder %s3439_s0, %s3439_s0 }
  0x2e   :  { %p3446_p4 = por %p3445_p3, %p3444_p2 }
  0x30   :  { %p3447_p5 = pnand %p3446_p4, %p3440_p1 }
  0x32   :  { %3450 = shalt.err (!%p3447_p5)
}
  0x33   :  { %63 = dma.hbm_to_vmem [thread:$0]  %s4603_s3, 4096, %s58_s19, [#allocation12], %s3464_s14, %s3464_s14, %s3465_s15  }
  0x34   :  { %3451 = dma.done.wait [#allocation7], 1024  }
  0x35   :  { %3452 = vsyncadd [#allocation7], 4294966272 }
  0x36   :  { %3453 = dma.done.wait [#allocation9], 5120  }
  0x37   :  { %3454 = vsyncadd [#allocation9], 4294962176 }
  0x38   :  { %3455 = dma.done.wait [#allocation12], 4096  }
  0x39   :  { %3456 = vsyncadd [#allocation12], 4294963200  ;;  %v4607_v1 = vmov 0   ;;  %v2939_v2 = vld [vmem:[#allocation10 + $0xe4] ss:$16 sps:$4 sm:$0xff]   ;;  %v2991_v44 = vld [vmem:[#allocation6 + $0x8] sm:$0xff]  }
  0x3a   :  { %377 = vmatprep.mubr.bf16.mxu0 %v4607_v1  ;;  %490 = vmatprep.mubr.bf16.mxu1 %v4607_v1  ;;  %v2941_v3 = vld [vmem:[#allocation10 + $0xec] ss:$16 sps:$4 sm:$0xff]   ;;  %v2943_v4 = vld [vmem:[#allocation10 + $0xe0] ss:$16 sps:$4 sm:$0xff]   ;;  %v2944_v5 = vld [vmem:[#allocation10 + $0xe8] ss:$16 sps:$4 sm:$0xff]  }
  0x3b   :  { %345 = vmatprep.subr.bf16.mxu0 %v2939_v2  ;;  %458 = vmatprep.subr.bf16.mxu1 %v2941_v3  ;;  %v2945_v6 = vld [vmem:[#allocation10 + $0xc4] ss:$16 sps:$4 sm:$0xff]   ;;  %v2947_v7 = vld [vmem:[#allocation10 + $0xcc] ss:$16 sps:$4 sm:$0xff]   ;;  %v2949_v8 = vld [vmem:[#allocation10 + $0xc0] ss:$16 sps:$4 sm:$0xff]  }
  0x3c   :  { %346 = vmatpush1.bf16.msra.mxu0 %v2943_v4  ;;  %459 = vmatpush1.bf16.msra.mxu1 %v2944_v5  ;;  %v2950_v9 = vld [vmem:[#allocation10 + $0xc8] ss:$16 sps:$4 sm:$0xff]   ;;  %v2951_v10 = vld [vmem:[#allocation10 + $0xa4] ss:$16 sps:$4 sm:$0xff]   ;;  %v2953_v11 = vld [vmem:[#allocation10 + $0xac] ss:$16 sps:$4 sm:$0xff]  }
  0x3d   :  { %347 = vmatprep.subr.bf16.mxu0 %v2945_v6  ;;  %460 = vmatprep.subr.bf16.mxu1 %v2947_v7  ;;  %v2955_v12 = vld [vmem:[#allocation10 + $0xa0] ss:$16 sps:$4 sm:$0xff]   ;;  %v2956_v13 = vld [vmem:[#allocation10 + $0xa8] ss:$16 sps:$4 sm:$0xff]   ;;  %v2957_v14 = vld [vmem:[#allocation10 + $0x84] ss:$16 sps:$4 sm:$0xff]  }
  0x3e   :  { %v2959_v15 = vld [vmem:[#allocation10 + $0x8c] ss:$16 sps:$4 sm:$0xff]   ;;  %v2961_v16 = vld [vmem:[#allocation10 + $0x80] ss:$16 sps:$4 sm:$0xff]   ;;  %v2962_v17 = vld [vmem:[#allocation10 + $0x88] ss:$16 sps:$4 sm:$0xff]  }
  0x3f   :  { %v2963_v18 = vld [vmem:[#allocation10 + $0x64] ss:$16 sps:$4 sm:$0xff]   ;;  %v2965_v19 = vld [vmem:[#allocation10 + $0x6c] ss:$16 sps:$4 sm:$0xff]   ;;  %v2967_v20 = vld [vmem:[#allocation10 + $0x60] ss:$16 sps:$4 sm:$0xff]  }
  0x40   :  { %348 = vmatpush1.bf16.msra.mxu0 %v2949_v8  ;;  %461 = vmatpush1.bf16.msra.mxu1 %v2950_v9  ;;  %v2968_v21 = vld [vmem:[#allocation10 + $0x68] ss:$16 sps:$4 sm:$0xff]   ;;  %v2969_v22 = vld [vmem:[#allocation10 + $0x44] ss:$16 sps:$4 sm:$0xff]   ;;  %v2971_v23 = vld [vmem:[#allocation10 + $0x4c] ss:$16 sps:$4 sm:$0xff]  }
  0x41   :  { %349 = vmatprep.subr.bf16.mxu0 %v2951_v10  ;;  %462 = vmatprep.subr.bf16.mxu1 %v2953_v11  ;;  %v2973_v24 = vld [vmem:[#allocation10 + $0x40] ss:$16 sps:$4 sm:$0xff]   ;;  %v2974_v25 = vld [vmem:[#allocation10 + $0x48] ss:$16 sps:$4 sm:$0xff]   ;;  %v2975_v26 = vld [vmem:[#allocation10 + $0x24] ss:$16 sps:$4 sm:$0xff]  }
  0x42   :  { %v2977_v27 = vld [vmem:[#allocation10 + $0x2c] ss:$16 sps:$4 sm:$0xff]   ;;  %v2979_v28 = vld [vmem:[#allocation10 + $0x20] ss:$16 sps:$4 sm:$0xff]   ;;  %v2980_v29 = vld [vmem:[#allocation10 + $0x28] ss:$16 sps:$4 sm:$0xff]  }
  0x43   :  { %v2981_v30 = vld [vmem:[#allocation10 + $0x4] ss:$16 sps:$4 sm:$0xff]   ;;  %v2983_v31 = vld [vmem:[#allocation10 + $0xc] ss:$16 sps:$4 sm:$0xff]   ;;  %v2985_v32 = vld [vmem:[#allocation10] ss:$16 sps:$4 sm:$0xff]  }
  0x44   :  { %350 = vmatpush1.bf16.msra.mxu0 %v2955_v12  ;;  %463 = vmatpush1.bf16.msra.mxu1 %v2956_v13  ;;  %v2986_v33 = vld [vmem:[#allocation10 + $0x8] ss:$16 sps:$4 sm:$0xff]   ;;  %v3521_v34 = vld [vmem:[#allocation11 + $0xe4] ss:$16 sps:$4 sm:$0xff]   ;;  %v3523_v35 = vld [vmem:[#allocation11 + $0xec] ss:$16 sps:$4 sm:$0xff]  }
  0x45   :  { %351 = vmatprep.subr.bf16.mxu0 %v2957_v14  ;;  %464 = vmatprep.subr.bf16.mxu1 %v2959_v15  ;;  %v2987_v36 = vld [vmem:[#allocation6] sm:$0xff]   ;;  %v3531_v39 = vld [vmem:[#allocation11 + $0xe8] ss:$16 sps:$4 sm:$0xff]   ;;  %v3533_v40 = vld [vmem:[#allocation11 + $0xcc] ss:$16 sps:$4 sm:$0xff]   ;;  %v3468_v11 = vmov 0.0|0.0  }
  0x46   :  { %v3525_v37 = vld [vmem:[#allocation11 + $0xe0] ss:$16 sps:$4 sm:$0xff]   ;;  %v3528_v38 = vld [vmem:[#allocation11 + $0xc4] ss:$16 sps:$4 sm:$0xff]   ;;  %v3544_v43 = vld [vmem:[#allocation11 + $0xc8] ss:$16 sps:$4 sm:$0xff]  }
  0x47   :  { %v3537_v41 = vld [vmem:[#allocation11 + $0xc0] ss:$16 sps:$4 sm:$0xff]   ;;  %v3541_v42 = vld [vmem:[#allocation11 + $0xa4] ss:$16 sps:$4 sm:$0xff]   ;;  %v3553_v47 = vld [vmem:[#allocation11 + $0xac] ss:$16 sps:$4 sm:$0xff]  }
  0x48   :  { %352 = vmatpush1.bf16.msra.mxu0 %v2961_v16  ;;  %465 = vmatpush1.bf16.msra.mxu1 %v2962_v17  ;;  %v3548_v45 = vld [vmem:[#allocation11 + $0xa0] ss:$16 sps:$4 sm:$0xff]   ;;  %v3550_v46 = vld [vmem:[#allocation11 + $0x84] ss:$16 sps:$4 sm:$0xff]   ;;  %v3556_v48 = vld [vmem:[#allocation11 + $0xa8] ss:$16 sps:$4 sm:$0xff]  }
  0x49   :  { %353 = vmatprep.subr.bf16.mxu0 %v2963_v18  ;;  %466 = vmatprep.subr.bf16.mxu1 %v2965_v19  ;;  %v3558_v49 = vld [vmem:[#allocation11 + $0x8c] ss:$16 sps:$4 sm:$0xff]   ;;  %v3563_v50 = vld [vmem:[#allocation11 + $0x80] ss:$16 sps:$4 sm:$0xff]   ;;  %v3565_v51 = vld [vmem:[#allocation11 + $0x64] ss:$16 sps:$4 sm:$0xff]  }
  0x4a   :  { %v3570_v52 = vld [vmem:[#allocation11 + $0x88] ss:$16 sps:$4 sm:$0xff]   ;;  %v2995_v53 = vld [vmem:[#allocation6 + $0x10] sm:$0xff]   ;;  %v3576_v55 = vld [vmem:[#allocation11 + $0x6c] ss:$16 sps:$4 sm:$0xff]   ;;  %vm2793_vm0 = vcmask 7168  }
  0x4b   :  { %v3573_v54 = vld [vmem:[#allocation11 + $0x60] ss:$16 sps:$4 sm:$0xff]   ;;  %v3579_v56 = vld [vmem:[#allocation11 + $0x44] ss:$16 sps:$4 sm:$0xff]   ;;  %v3582_v57 = vld [vmem:[#allocation11 + $0x68] ss:$16 sps:$4 sm:$0xff]  }
  0x4c   :  { %354 = vmatpush1.bf16.msra.mxu0 %v2967_v20  ;;  %467 = vmatpush1.bf16.msra.mxu1 %v2968_v21  ;;  %v3584_v58 = vld [vmem:[#allocation11 + $0x4c] ss:$16 sps:$4 sm:$0xff]   ;;  %v3589_v59 = vld [vmem:[#allocation11 + $0x40] ss:$16 sps:$4 sm:$0xff]   ;;  %v3593_v60 = vld [vmem:[#allocation11 + $0x24] ss:$16 sps:$4 sm:$0xff]  }
  0x4d   :  { %355 = vmatprep.subr.bf16.mxu0 %v2969_v22  ;;  %468 = vmatprep.subr.bf16.mxu1 %v2971_v23  ;;  %v3596_v61 = vld [vmem:[#allocation11 + $0x48] ss:$16 sps:$4 sm:$0xff]   ;;  %v3600_v63 = vld [vmem:[#allocation11 + $0x20] ss:$16 sps:$4 sm:$0xff]   ;;  %v3602_v0 = vld [vmem:[#allocation11 + $0x2c] ss:$16 sps:$4 sm:$0xff]  }
  0x4e   :  { %v3002_v62 = vld [vmem:[#allocation6 + $0x18] sm:$0xff]   ;;  %v3606_v2 = vld [vmem:[#allocation11 + $0x4] ss:$16 sps:$4 sm:$0xff]   ;;  %v3616_v5 = vld [vmem:[#allocation11] ss:$16 sps:$4 sm:$0xff]  }
  0x4f   :  { %v3608_v3 = vld [vmem:[#allocation11 + $0x28] ss:$16 sps:$4 sm:$0xff]   ;;  %v3610_v4 = vld [vmem:[#allocation11 + $0xc] ss:$16 sps:$4 sm:$0xff]   ;;  %v3009_v7 = vld [vmem:[#allocation6 + $0x20] sm:$0xff]  }
  0x50   :  { %356 = vmatpush1.bf16.msra.mxu0 %v2973_v24  ;;  %469 = vmatpush1.bf16.msra.mxu1 %v2974_v25  ;;  %v3620_v6 = vld [vmem:[#allocation11 + $0x8] ss:$16 sps:$4 sm:$0xff]   ;;  %v3025_v9 = vld [vmem:[#allocation6 + $0x30] sm:$0xff]   ;;  %v3719_v20 = vld [vmem:[#allocation8] sm:$0xff] }
  0x51   :  { %357 = vmatprep.subr.bf16.mxu0 %v2975_v26  ;;  %470 = vmatprep.subr.bf16.mxu1 %v2977_v27  ;;  %v3016_v8 = vld [vmem:[#allocation6 + $0x28] sm:$0xff]   ;;  %v3035_v10 = vld [vmem:[#allocation6 + $0x38] sm:$0xff]   ;;  %v3721_v21 = vld [vmem:[#allocation8 + $0x10] sm:$0xff] }
  0x52   :  { %v3729_v26 = vld [vmem:[#allocation8 + $0x8] sm:$0xff]  ;;  %v3731_v27 = vld [vmem:[#allocation8 + $0x18] sm:$0xff] }
  0x54   :  { %358 = vmatpush1.bf16.msra.mxu0 %v2979_v28  ;;  %471 = vmatpush1.bf16.msra.mxu1 %v2980_v29 }
  0x55   :  { %359 = vmatprep.subr.bf16.mxu0 %v2981_v30  ;;  %472 = vmatprep.subr.bf16.mxu1 %v2983_v31 }
  0x58   :  { %360 = vmatpush1.bf16.msra.mxu0 %v2985_v32  ;;  %473 = vmatpush1.bf16.msra.mxu1 %v2986_v33  ;;  %v3739_v32 = vld [vmem:[#allocation8 + $0x20] sm:$0xff]  ;;  %v3741_v33 = vld [vmem:[#allocation8 + $0x30] sm:$0xff] }
  0x59   :  { %852 = vmatprep.subr.bf16.mxu0 %v3521_v34  ;;  %893 = vmatprep.subr.bf16.mxu1 %v3523_v35 }
  0x5b   :  { %378 = vmatmul.mubr.bf16.vlgmr.msra.gmra.mxu0 %v2987_v36  ;;  %491 = vmatmul.mubr.bf16.vlgmr.msra.gmra.mxu1 %v2987_v36 }
  0x5c   :  { %853 = vmatpush1.bf16.msra.mxu0 %v3525_v37  ;;  %387 = vmatprep.mubr.bf16.mxu0 %v4607_v1 }
  0x5d   :  { %500 = vmatprep.mubr.bf16.mxu1 %v4607_v1  ;;  %854 = vmatprep.subr.bf16.mxu0 %v3528_v38 }
  0x5e   :  { %894 = vmatpush1.bf16.msra.mxu1 %v3531_v39 }
  0x5f   :  { %895 = vmatprep.subr.bf16.mxu1 %v3533_v40 }
  0x60   :  { %855 = vmatpush1.bf16.msra.mxu0 %v3537_v41 }
  0x61   :  { %856 = vmatprep.subr.bf16.mxu0 %v3541_v42 }
  0x62   :  { %896 = vmatpush1.bf16.msra.mxu1 %v3544_v43 }
  0x63   :  { %388 = vmatmul.mubr.bf16.gmra.mxu0 %v2991_v44  ;;  %501 = vmatmul.mubr.bf16.gmra.mxu1 %v2991_v44 }
  0x64   :  { %397 = vmatprep.mubr.bf16.mxu0 %v4607_v1  ;;  %510 = vmatprep.mubr.bf16.mxu1 %v4607_v1 }
  0x65   :  { %857 = vmatpush1.bf16.msra.mxu0 %v3548_v45  ;;  %897 = vmatprep.subr.bf16.mxu1 %v3553_v47 }
  0x66   :  { %858 = vmatprep.subr.bf16.mxu0 %v3550_v46  ;;  %898 = vmatpush1.bf16.msra.mxu1 %v3556_v48 }
  0x67   :  { %899 = vmatprep.subr.bf16.mxu1 %v3558_v49 }
  0x69   :  { %859 = vmatpush1.bf16.msra.mxu0 %v3563_v50 }
  0x6a   :  { %860 = vmatprep.subr.bf16.mxu0 %v3565_v51  ;;  %900 = vmatpush1.bf16.msra.mxu1 %v3570_v52 }
  0x6b   :  { %398 = vmatmul.mubr.bf16.gmra.mxu0 %v2995_v53  ;;  %511 = vmatmul.mubr.bf16.gmra.mxu1 %v2995_v53 }
  0x6c   :  { %407 = vmatprep.mubr.bf16.mxu0 %v4607_v1  ;;  %520 = vmatprep.mubr.bf16.mxu1 %v4607_v1 }
  0x6d   :  { %861 = vmatpush1.bf16.msra.mxu0 %v3573_v54  ;;  %901 = vmatprep.subr.bf16.mxu1 %v3576_v55 }
  0x6e   :  { %862 = vmatprep.subr.bf16.mxu0 %v3579_v56  ;;  %902 = vmatpush1.bf16.msra.mxu1 %v3582_v57 }
  0x6f   :  { %903 = vmatprep.subr.bf16.mxu1 %v3584_v58 }
  0x71   :  { %863 = vmatpush1.bf16.msra.mxu0 %v3589_v59 }
  0x72   :  { %864 = vmatprep.subr.bf16.mxu0 %v3593_v60  ;;  %904 = vmatpush1.bf16.msra.mxu1 %v3596_v61 }
  0x73   :  { %408 = vmatmul.mubr.bf16.gmra.mxu0 %v3002_v62  ;;  %521 = vmatmul.mubr.bf16.gmra.mxu1 %v3002_v62 }
  0x74   :  { %417 = vmatprep.mubr.bf16.mxu0 %v4607_v1  ;;  %530 = vmatprep.mubr.bf16.mxu1 %v4607_v1 }
  0x75   :  { %865 = vmatpush1.bf16.msra.mxu0 %v3600_v63  ;;  %905 = vmatprep.subr.bf16.mxu1 %v3602_v0 }
  0x76   :  { %866 = vmatprep.subr.bf16.mxu0 %v3606_v2  ;;  %906 = vmatpush1.bf16.msra.mxu1 %v3608_v3 }
  0x77   :  { %907 = vmatprep.subr.bf16.mxu1 %v3610_v4 }
  0x79   :  { %867 = vmatpush1.bf16.msra.mxu0 %v3616_v5 }
  0x7a   :  { %908 = vmatpush1.bf16.msra.mxu1 %v3620_v6  ;;  %967 = vmatprep.subr.bf16.mxu0 %v3521_v34 }
  0x7b   :  { %418 = vmatmul.mubr.bf16.gmra.mxu0 %v3009_v7  ;;  %531 = vmatmul.mubr.bf16.gmra.mxu1 %v3009_v7  ;;  %v3749_v7 = vld [vmem:[#allocation8 + $0x28] sm:$0xff] }
  0x7c   :  { %427 = vmatprep.mubr.bf16.mxu0 %v4607_v1  ;;  %540 = vmatprep.mubr.bf16.mxu1 %v4607_v1 }
  0x7d   :  { %1008 = vmatprep.subr.bf16.mxu1 %v3523_v35 }
  0x83   :  { %428 = vmatmul.mubr.bf16.gmra.mxu0 %v3016_v8  ;;  %541 = vmatmul.mubr.bf16.gmra.mxu1 %v3016_v8  ;;  %v3751_v8 = vld [vmem:[#allocation8 + $0x38] sm:$0xff] }
  0x84   :  { %437 = vmatprep.mubr.bf16.mxu0 %v4607_v1  ;;  %550 = vmatprep.mubr.bf16.mxu1 %v4607_v1 }
  0x8b   :  { %438 = vmatmul.mubr.bf16.gmra.mxu0 %v3025_v9  ;;  %551 = vmatmul.mubr.bf16.gmra.mxu1 %v3025_v9 }
  0x8c   :  { %447 = vmatprep.mubr.bf16.mxu0 %v4607_v1  ;;  %560 = vmatprep.mubr.bf16.mxu1 %v4607_v1 }
  0x93   :  { %448 = vmatmul.mubr.bf16.gmra.mxu0 %v3035_v10  ;;  %561 = vmatmul.mubr.bf16.gmra.mxu1 %v3035_v10 }
  0x94   :  { %884 = vmatprep.mubr.bf16.mxu0 %v4607_v1  ;;  %925 = vmatprep.mubr.bf16.mxu1 %v4607_v1 }
  0x9b   :  { %885 = vmatmul.mubr.bf16.vlgmr.msra.gmra.mxu0 %v3468_v11  ;;  %926 = vmatmul.mubr.bf16.vlgmr.msra.gmra.mxu1 %v3468_v11 }
  0x9c   :  { %968 = vmatpush1.bf16.msra.mxu0 %v3525_v37  ;;  %1009 = vmatpush1.bf16.msra.mxu1 %v3531_v39 }
  0x9d   :  { %969 = vmatprep.subr.bf16.mxu0 %v3528_v38  ;;  %1010 = vmatprep.subr.bf16.mxu1 %v3533_v40 }
  0x9e   :  { %999 = vmatprep.mubr.bf16.mxu0 %v4607_v1  ;;  %1040 = vmatprep.mubr.bf16.mxu1 %v4607_v1 }
  0xa0   :  { %970 = vmatpush1.bf16.msra.mxu0 %v3537_v41  ;;  %1011 = vmatpush1.bf16.msra.mxu1 %v3544_v43 }
  0xa1   :  { %971 = vmatprep.subr.bf16.mxu0 %v3541_v42  ;;  %1012 = vmatprep.subr.bf16.mxu1 %v3553_v47 }
  0xa4   :  { %972 = vmatpush1.bf16.msra.mxu0 %v3548_v45  ;;  %1013 = vmatpush1.bf16.msra.mxu1 %v3556_v48 }
  0xa5   :  { %973 = vmatprep.subr.bf16.mxu0 %v3550_v46  ;;  %1014 = vmatprep.subr.bf16.mxu1 %v3558_v49 }
  0xa8   :  { %974 = vmatpush1.bf16.msra.mxu0 %v3563_v50  ;;  %1015 = vmatpush1.bf16.msra.mxu1 %v3570_v52 }
  0xa9   :  { %975 = vmatprep.subr.bf16.mxu0 %v3565_v51  ;;  %1016 = vmatprep.subr.bf16.mxu1 %v3576_v55 }
  0xac   :  { %976 = vmatpush1.bf16.msra.mxu0 %v3573_v54  ;;  %1017 = vmatpush1.bf16.msra.mxu1 %v3582_v57 }
  0xad   :  { %977 = vmatprep.subr.bf16.mxu0 %v3579_v56  ;;  %1018 = vmatprep.subr.bf16.mxu1 %v3584_v58 }
  0xb0   :  { %978 = vmatpush1.bf16.msra.mxu0 %v3589_v59  ;;  %1019 = vmatpush1.bf16.msra.mxu1 %v3596_v61 }
  0xb1   :  { %979 = vmatprep.subr.bf16.mxu0 %v3593_v60  ;;  %1020 = vmatprep.subr.bf16.mxu1 %v3602_v0 }
  0xb4   :  { %980 = vmatpush1.bf16.msra.mxu0 %v3600_v63  ;;  %1021 = vmatpush1.bf16.msra.mxu1 %v3608_v3 }
  0xb5   :  { %981 = vmatprep.subr.bf16.mxu0 %v3606_v2  ;;  %1022 = vmatprep.subr.bf16.mxu1 %v3610_v4 }
  0xb8   :  { %982 = vmatpush1.bf16.msra.mxu0 %v3616_v5  ;;  %1023 = vmatpush1.bf16.msra.mxu1 %v3620_v6 }
  0xb9   :  { %1091 = vmatprep.subr.bf16.mxu0 %v3521_v34  ;;  %1132 = vmatprep.subr.bf16.mxu1 %v3523_v35 }
  0xbb   :  { %1000 = vmatmul.mubr.bf16.vlgmr.msra.gmra.mxu0 %v3468_v11  ;;  %1041 = vmatmul.mubr.bf16.vlgmr.msra.gmra.mxu1 %v3468_v11 }
  0xbc   :  { %1092 = vmatpush1.bf16.msra.mxu0 %v3525_v37  ;;  %1133 = vmatpush1.bf16.msra.mxu1 %v3531_v39 }
  0xbd   :  { %1093 = vmatprep.subr.bf16.mxu0 %v3528_v38  ;;  %1134 = vmatprep.subr.bf16.mxu1 %v3533_v40 }
  0xbe   :  { %1123 = vmatprep.mubr.bf16.mxu0 %v4607_v1  ;;  %1164 = vmatprep.mubr.bf16.mxu1 %v4607_v1 }
  0xc0   :  { %1094 = vmatpush1.bf16.msra.mxu0 %v3537_v41  ;;  %1135 = vmatpush1.bf16.msra.mxu1 %v3544_v43 }
  0xc1   :  { %1095 = vmatprep.subr.bf16.mxu0 %v3541_v42  ;;  %1136 = vmatprep.subr.bf16.mxu1 %v3553_v47 }
  0xc4   :  { %1096 = vmatpush1.bf16.msra.mxu0 %v3548_v45  ;;  %1137 = vmatpush1.bf16.msra.mxu1 %v3556_v48 }
  0xc5   :  { %1097 = vmatprep.subr.bf16.mxu0 %v3550_v46  ;;  %1138 = vmatprep.subr.bf16.mxu1 %v3558_v49 }
  0xc8   :  { %1098 = vmatpush1.bf16.msra.mxu0 %v3563_v50  ;;  %1139 = vmatpush1.bf16.msra.mxu1 %v3570_v52 }
  0xc9   :  { %1099 = vmatprep.subr.bf16.mxu0 %v3565_v51  ;;  %1140 = vmatprep.subr.bf16.mxu1 %v3576_v55 }
  0xcc   :  { %1100 = vmatpush1.bf16.msra.mxu0 %v3573_v54  ;;  %1141 = vmatpush1.bf16.msra.mxu1 %v3582_v57 }
  0xcd   :  { %1101 = vmatprep.subr.bf16.mxu0 %v3579_v56  ;;  %1142 = vmatprep.subr.bf16.mxu1 %v3584_v58 }
  0xd0   :  { %1102 = vmatpush1.bf16.msra.mxu0 %v3589_v59  ;;  %1143 = vmatpush1.bf16.msra.mxu1 %v3596_v61 }
  0xd1   :  { %1103 = vmatprep.subr.bf16.mxu0 %v3593_v60  ;;  %1144 = vmatprep.subr.bf16.mxu1 %v3602_v0 }
  0xd4   :  { %1104 = vmatpush1.bf16.msra.mxu0 %v3600_v63  ;;  %1145 = vmatpush1.bf16.msra.mxu1 %v3608_v3 }
  0xd5   :  { %1105 = vmatprep.subr.bf16.mxu0 %v3606_v2  ;;  %1146 = vmatprep.subr.bf16.mxu1 %v3610_v4 }
  0xd8   :  { %1106 = vmatpush1.bf16.msra.mxu0 %v3616_v5  ;;  %1147 = vmatpush1.bf16.msra.mxu1 %v3620_v6 }
  0xd9   :  { %1206 = vmatprep.subr.bf16.mxu0 %v3521_v34  ;;  %1247 = vmatprep.subr.bf16.mxu1 %v3523_v35 }
 0x11b   :  { %v3703_v12 = vpop.f32.mrf.mxu0  ;;  %v3705_v13 = vpop.f32.mrf.mxu1 }
 0x11d   :  { %v3707_v14 = vpop.f32.mrf.mxu0  ;;  %v3709_v15 = vpop.f32.mrf.mxu1 }
 0x11f   :  { %v3711_v16 = vpop.f32.mrf.mxu0  ;;  %v3713_v17 = vpop.f32.mrf.mxu1 }
 0x121   :  { %v3715_v18 = vpop.f32.mrf.mxu0  ;;  %v3717_v19 = vpop.f32.mrf.mxu1 }
 0x123   :  { %v389_v22 = vpop.f32.mrf.mxu0  ;;  %v502_v23 = vpop.f32.mrf.mxu1 }
 0x124   :  { %v3724_v24 = vadd.f32 %v3719_v20, %v389_v22  ;;  %v3727_v25 = vadd.f32 %v3721_v21, %v502_v23 }
 0x125   :  { %v391_v28 = vpop.f32.mrf.mxu0  ;;  %v504_v29 = vpop.f32.mrf.mxu1 }
 0x126   :  { %4609 = vst [vmem:[#allocation16_spill] sm:$0xff] %v3727_v25  ;;  %v3734_v30 = vadd.f32 %v3729_v26, %v391_v28  ;;  %v3737_v31 = vadd.f32 %v3731_v27, %v504_v29 }
 0x127   :  { %v393_v36 = vpop.f32.mrf.mxu0  ;;  %v506_v44 = vpop.f32.mrf.mxu1 }
 0x128   :  { %4610 = vst [vmem:[#allocation17_spill] sm:$0xff] %v3734_v30  ;;  %4611 = vst [vmem:[#allocation18_spill] sm:$0xff] %v3737_v31  ;;  %v3744_v53 = vadd.f32 %v3739_v32, %v393_v36  ;;  %v3747_v62 = vadd.f32 %v3741_v33, %v506_v44 }
 0x129   :  { %v395_v9 = vpop.f32.mrf.mxu0  ;;  %v508_v10 = vpop.f32.mrf.mxu1 }
 0x12a   :  { %4612 = vst [vmem:[#allocation19_spill] sm:$0xff] %v3744_v53  ;;  %4613 = vst [vmem:[#allocation20_spill] sm:$0xff] %v3747_v62  ;;  %v3754_v11 = vadd.f32 %v3749_v7, %v395_v9  ;;  %v3757_v22 = vadd.f32 %v3751_v8, %v508_v10 }
 0x12b   :  { %v399_v23 = vpop.f32.mrf.mxu0  ;;  %v512_v28 = vpop.f32.mrf.mxu1 }
 0x12c   :  { %4614 = vst [vmem:[#allocation21_spill] sm:$0xff] %v3754_v11  ;;  %4615 = vst [vmem:[#allocation22_spill] sm:$0xff] %v3757_v22  ;;  %v3760_v29 = vadd.f32 %v3719_v20, %v399_v23  ;;  %v3763_v36 = vadd.f32 %v3721_v21, %v512_v28 }
 0x12d   :  { %v401_v44 = vpop.f32.mrf.mxu0  ;;  %v514_v1 = vpop.f32.mrf.mxu1 }
 0x12e   :  { %4616 = vst [vmem:[#allocation23_spill] sm:$0xff] %v3760_v29  ;;  %4617 = vst [vmem:[#allocation24_spill] sm:$0xff] %v3763_v36  ;;  %v3766_v62 = vadd.f32 %v3729_v26, %v401_v44  ;;  %v3769_v53 = vadd.f32 %v3731_v27, %v514_v1 }
 0x12f   :  { %v403_v9 = vpop.f32.mrf.mxu0  ;;  %v516_v11 = vpop.f32.mrf.mxu1 }
 0x130   :  { %4618 = vst [vmem:[#allocation25_spill] sm:$0xff] %v3766_v62  ;;  %4619 = vst [vmem:[#allocation26_spill] sm:$0xff] %v3769_v53  ;;  %v3772_v10 = vadd.f32 %v3739_v32, %v403_v9  ;;  %v3775_v22 = vadd.f32 %v3741_v33, %v516_v11 }
 0x131   :  { %v405_v23 = vpop.f32.mrf.mxu0  ;;  %v518_v29 = vpop.f32.mrf.mxu1 }
 0x132   :  { %4620 = vst [vmem:[#allocation27_spill] sm:$0xff] %v3772_v10  ;;  %4621 = vst [vmem:[#allocation28_spill] sm:$0xff] %v3775_v22  ;;  %v3778_v28 = vadd.f32 %v3749_v7, %v405_v23  ;;  %v3781_v36 = vadd.f32 %v3751_v8, %v518_v29 }
 0x133   :  { %v409_v44 = vpop.f32.mrf.mxu0  ;;  %v522_v62 = vpop.f32.mrf.mxu1 }
 0x134   :  { %4622 = vst [vmem:[#allocation29_spill] sm:$0xff] %v3778_v28  ;;  %4623 = vst [vmem:[#allocation30_spill] sm:$0xff] %v3781_v36  ;;  %v3784_v1 = vadd.f32 %v3719_v20, %v409_v44  ;;  %v3787_v53 = vadd.f32 %v3721_v21, %v522_v62 }
 0x135   :  { %v411_v9 = vpop.f32.mrf.mxu0  ;;  %v524_v10 = vpop.f32.mrf.mxu1 }
 0x136   :  { %4624 = vst [vmem:[#allocation31_spill] sm:$0xff] %v3784_v1  ;;  %4625 = vst [vmem:[#allocation32_spill] sm:$0xff] %v3787_v53  ;;  %v3790_v11 = vadd.f32 %v3729_v26, %v411_v9  ;;  %v3793_v22 = vadd.f32 %v3731_v27, %v524_v10 }
 0x137   :  { %v413_v23 = vpop.f32.mrf.mxu0  ;;  %v526_v28 = vpop.f32.mrf.mxu1 }
 0x138   :  { %4626 = vst [vmem:[#allocation33_spill] sm:$0xff] %v3790_v11  ;;  %4627 = vst [vmem:[#allocation34_spill] sm:$0xff] %v3793_v22  ;;  %v3796_v29 = vadd.f32 %v3739_v32, %v413_v23  ;;  %v3799_v36 = vadd.f32 %v3741_v33, %v526_v28 }
 0x139   :  { %v415_v44 = vpop.f32.mrf.mxu0  ;;  %v528_v1 = vpop.f32.mrf.mxu1 }
 0x13a   :  { %4628 = vst [vmem:[#allocation35_spill] sm:$0xff] %v3796_v29  ;;  %4629 = vst [vmem:[#allocation36_spill] sm:$0xff] %v3799_v36  ;;  %v3802_v62 = vadd.f32 %v3749_v7, %v415_v44  ;;  %v3805_v53 = vadd.f32 %v3751_v8, %v528_v1 }
 0x13b   :  { %v419_v9 = vpop.f32.mrf.mxu0  ;;  %v532_v11 = vpop.f32.mrf.mxu1 }
 0x13c   :  { %4630 = vst [vmem:[#allocation37_spill] sm:$0xff] %v3802_v62  ;;  %4631 = vst [vmem:[#allocation38_spill] sm:$0xff] %v3805_v53  ;;  %v3808_v10 = vadd.f32 %v3719_v20, %v419_v9  ;;  %v3811_v22 = vadd.f32 %v3721_v21, %v532_v11 }
 0x13d   :  { %v421_v23 = vpop.f32.mrf.mxu0  ;;  %v534_v29 = vpop.f32.mrf.mxu1 }
 0x13e   :  { %4632 = vst [vmem:[#allocation39_spill] sm:$0xff] %v3808_v10  ;;  %4633 = vst [vmem:[#allocation40_spill] sm:$0xff] %v3811_v22  ;;  %v3814_v28 = vadd.f32 %v3729_v26, %v421_v23  ;;  %v3817_v36 = vadd.f32 %v3731_v27, %v534_v29 }
 0x13f   :  { %v423_v44 = vpop.f32.mrf.mxu0  ;;  %v536_v62 = vpop.f32.mrf.mxu1 }
 0x140   :  { %4634 = vst [vmem:[#allocation41_spill] sm:$0xff] %v3814_v28  ;;  %4635 = vst [vmem:[#allocation42_spill] sm:$0xff] %v3817_v36  ;;  %v3820_v1 = vadd.f32 %v3739_v32, %v423_v44  ;;  %v3823_v53 = vadd.f32 %v3741_v33, %v536_v62 }
 0x141   :  { %v425_v9 = vpop.f32.mrf.mxu0  ;;  %v538_v10 = vpop.f32.mrf.mxu1 }
 0x142   :  { %4636 = vst [vmem:[#allocation43_spill] sm:$0xff] %v3820_v1  ;;  %4637 = vst [vmem:[#allocation44_spill] sm:$0xff] %v3823_v53  ;;  %v3826_v11 = vadd.f32 %v3749_v7, %v425_v9  ;;  %v3829_v22 = vadd.f32 %v3751_v8, %v538_v10 }
 0x143   :  { %v429_v23 = vpop.f32.mrf.mxu0  ;;  %v542_v28 = vpop.f32.mrf.mxu1 }
 0x144   :  { %4638 = vst [vmem:[#allocation45_spill] sm:$0xff] %v3826_v11  ;;  %4639 = vst [vmem:[#allocation46_spill] sm:$0xff] %v3829_v22  ;;  %v3832_v29 = vadd.f32 %v3719_v20, %v429_v23  ;;  %v3835_v36 = vadd.f32 %v3721_v21, %v542_v28 }
 0x145   :  { %v431_v44 = vpop.f32.mrf.mxu0  ;;  %v544_v1 = vpop.f32.mrf.mxu1 }
 0x146   :  { %4640 = vst [vmem:[#allocation47_spill] sm:$0xff] %v3832_v29  ;;  %4641 = vst [vmem:[#allocation48_spill] sm:$0xff] %v3835_v36  ;;  %v3838_v62 = vadd.f32 %v3729_v26, %v431_v44  ;;  %v3841_v53 = vadd.f32 %v3731_v27, %v544_v1 }
 0x147   :  { %v433_v9 = vpop.f32.mrf.mxu0  ;;  %v546_v11 = vpop.f32.mrf.mxu1 }
 0x148   :  { %4642 = vst [vmem:[#allocation49_spill] sm:$0xff] %v3838_v62  ;;  %4643 = vst [vmem:[#allocation50_spill] sm:$0xff] %v3841_v53  ;;  %v3844_v10 = vadd.f32 %v3739_v32, %v433_v9  ;;  %v3847_v22 = vadd.f32 %v3741_v33, %v546_v11 }
 0x149   :  { %v435_v23 = vpop.f32.mrf.mxu0  ;;  %v548_v29 = vpop.f32.mrf.mxu1 }
 0x14a   :  { %4644 = vst [vmem:[#allocation51_spill] sm:$0xff] %v3844_v10  ;;  %4645 = vst [vmem:[#allocation52_spill] sm:$0xff] %v3847_v22  ;;  %v3850_v28 = vadd.f32 %v3749_v7, %v435_v23  ;;  %v3853_v36 = vadd.f32 %v3751_v8, %v548_v29 }
 0x14b   :  { %v439_v44 = vpop.f32.mrf.mxu0  ;;  %v552_v62 = vpop.f32.mrf.mxu1 }
 0x14c   :  { %4646 = vst [vmem:[#allocation53_spill] sm:$0xff] %v3850_v28  ;;  %4647 = vst [vmem:[#allocation54_spill] sm:$0xff] %v3853_v36  ;;  %v3856_v1 = vadd.f32 %v3719_v20, %v439_v44  ;;  %v3859_v53 = vadd.f32 %v3721_v21, %v552_v62 }
 0x14d   :  { %v441_v9 = vpop.f32.mrf.mxu0  ;;  %v554_v10 = vpop.f32.mrf.mxu1 }
 0x14e   :  { %4648 = vst [vmem:[#allocation55_spill] sm:$0xff] %v3856_v1  ;;  %4649 = vst [vmem:[#allocation56_spill] sm:$0xff] %v3859_v53  ;;  %v3862_v11 = vadd.f32 %v3729_v26, %v441_v9  ;;  %v3865_v22 = vadd.f32 %v3731_v27, %v554_v10 }
 0x14f   :  { %v443_v23 = vpop.f32.mrf.mxu0  ;;  %v556_v28 = vpop.f32.mrf.mxu1 }
 0x150   :  { %4650 = vst [vmem:[#allocation57_spill] sm:$0xff] %v3862_v11  ;;  %4651 = vst [vmem:[#allocation58_spill] sm:$0xff] %v3865_v22  ;;  %v3868_v29 = vadd.f32 %v3739_v32, %v443_v23  ;;  %v3871_v36 = vadd.f32 %v3741_v33, %v556_v28 }
 0x151   :  { %v445_v44 = vpop.f32.mrf.mxu0  ;;  %v558_v1 = vpop.f32.mrf.mxu1 }
 0x152   :  { %4652 = vst [vmem:[#allocation59_spill] sm:$0xff] %v3868_v29  ;;  %4653 = vst [vmem:[#allocation60_spill] sm:$0xff] %v3871_v36  ;;  %v3874_v62 = vadd.f32 %v3749_v7, %v445_v44  ;;  %v3877_v53 = vadd.f32 %v3751_v8, %v558_v1 }
 0x153   :  { %v449_v9 = vpop.f32.mrf.mxu0  ;;  %v562_v11 = vpop.f32.mrf.mxu1 }
 0x154   :  { %4654 = vst [vmem:[#allocation61_spill] sm:$0xff] %v3874_v62  ;;  %4655 = vst [vmem:[#allocation62_spill] sm:$0xff] %v3877_v53  ;;  %v3880_v10 = vadd.f32 %v3719_v20, %v449_v9  ;;  %v3883_v22 = vadd.f32 %v3721_v21, %v562_v11  ;;  %v687_v11 = vadd.f32 %v3719_v20, %v3703_v12 }
 0x155   :  { %v451_v23 = vpop.f32.mrf.mxu0  ;;  %v564_v29 = vpop.f32.mrf.mxu1 }
 0x156   :  { %4656 = vst [vmem:[#allocation63_spill] sm:$0xff] %v3880_v10  ;;  %4657 = vst [vmem:[#allocation64_spill] sm:$0xff] %v3883_v22  ;;  %v3886_v28 = vadd.f32 %v3729_v26, %v451_v23  ;;  %v3889_v36 = vadd.f32 %v3731_v27, %v564_v29 }
 0x157   :  { %v453_v44 = vpop.f32.mrf.mxu0  ;;  %v566_v62 = vpop.f32.mrf.mxu1 }
 0x158   :  { %4658 = vst [vmem:[#allocation65_spill] sm:$0xff] %v3886_v28  ;;  %4659 = vst [vmem:[#allocation66_spill] sm:$0xff] %v3889_v36  ;;  %v3892_v1 = vadd.f32 %v3739_v32, %v453_v44  ;;  %v3895_v53 = vadd.f32 %v3741_v33, %v566_v62  ;;  %v688_v44 = vadd.f32 %v3729_v26, %v3707_v14 }
 0x159   :  { %v455_v9 = vpop.f32.mrf.mxu0  ;;  %v568_v10 = vpop.f32.mrf.mxu1 }
 0x15a   :  { %4660 = vst [vmem:[#allocation67_spill] sm:$0xff] %v3892_v1  ;;  %4661 = vst [vmem:[#allocation68_spill] sm:$0xff] %v3895_v53  ;;  %v3900_v22 = vadd.f32 %v3749_v7, %v455_v9  ;;  %v3903_v23 = vadd.f32 %v3751_v8, %v568_v10  ;;  %v690_v10 = vadd.f32 %v3731_v27, %v3709_v15 }
 0x15b   :  { %v886_v29 = vpop.f32.mrf.mxu0  ;;  %v927_v36 = vpop.f32.mrf.mxu1 }
 0x15c   :  { %4662 = vst [vmem:[#allocation69_spill] sm:$0xff] %v3900_v22  ;;  %4663 = vst [vmem:[#allocation70_spill] sm:$0xff] %v3903_v23  ;;  %v934_v1 = vadd.f32 %v886_v29, %v687_v11  ;;  %v689_v22 = vadd.f32 %v3721_v21, %v3705_v13  ;;  %v963_v13 = vadd.f32 %v3749_v7, %v3715_v18 }
 0x15d   :  { %v888_v28 = vpop.f32.mrf.mxu0  ;;  %v929_v62 = vpop.f32.mrf.mxu1  ;;  %v965_v18 = vadd.f32 %v3751_v8, %v3717_v19 }
 0x15e   :  { %v2875_v53 = vmul.f32 -1.442695, %v934_v1  ;;  %v935_v25 = vadd.f32 %v888_v28, %v688_v44  ;;  %v937_v23 = vadd.f32 %v929_v62, %v690_v10  ;;  %v936_v14 = vadd.f32 %v927_v36, %v689_v22 }
 0x15f   :  { %v890_v31 = vpop.f32.mrf.mxu0  ;;  %v931_v30 = vpop.f32.mrf.mxu1 }
 0x160   :  { %3043 = vpow2.f32 %v2875_v53  ;;  %v2876_v12 = vmul.f32 -1.442695, %v935_v25  ;;  %v2877_v26 = vmul.f32 -1.442695, %v937_v23  ;;  %v962_v25 = vadd.f32 %v3739_v32, %v3711_v16 }
 0x161   :  { %v891_v20 = vpop.f32.mrf.mxu0  ;;  %v932_v9 = vpop.f32.mrf.mxu1 }
 0x162   :  { %3045 = vpow2.f32 %v2876_v12 }
 0x163   :  { %3047 = vtanh.f32 %v936_v14 }
 0x164   :  { %3049 = vpow2.f32 %v2877_v26 }
 0x16d   :  { %v3044_v11 = vpop.eup %3043 }
 0x16e   :  { %v941_v29 = vadd.f32 1.0, %v3044_v11 }
 0x16f   :  { %v3046_v28 = vpop.eup %3045 }
 0x170   :  { %3051 = vrcp.f32 %v941_v29  ;;  %v947_v30 = vadd.f32 1.0, %v3046_v28  ;;  %v3048_v31 = vpop.eup %3047  ;;  %v964_v29 = vadd.f32 %v3741_v33, %v3713_v17  ;;  %v4664_v17 = vmov 0  }
 0x171   :  { %v3050_v27 = vpop.eup %3049 }
 0x172   :  { %3053 = vrcp.f32 %v947_v30  ;;  %v954_v20 = vadd.f32 1.0, %v3050_v27 }
 0x17b   :  { %v1001_v53 = vpop.f32.mrf.mxu0  ;;  %v1042_v15 = vpop.f32.mrf.mxu1 }
 0x17c   :  { %v1049_v21 = vadd.f32 %v1001_v53, %v962_v25  ;;  %v1051_v28 = vadd.f32 %v1042_v15, %v964_v29 }
 0x17d   :  { %v3052_v22 = vpop.eup %3051  ;;  %v1003_v36 = vpop.f32.mrf.mxu0 }
 0x17e   :  { %v1044_v1 = vpop.f32.mrf.mxu1  ;;  %v958_v23 = vmul.f32 %v3052_v22, %v3048_v31  ;;  %v2878_v44 = vmul.f32 -1.442695, %v1049_v21  ;;  %v1050_v62 = vadd.f32 %v1003_v36, %v963_v13 }
 0x17f   :  { %v3054_v12 = vpop.eup %3053  ;;  %v1005_v9 = vpop.f32.mrf.mxu0  ;;  %v1052_v7 = vadd.f32 %v1044_v1, %v965_v18  ;;  %v4668_v18 = vld [vmem:[#allocation19_spill] sm:$0xff] }
 0x180   :  { %v1046_v10 = vpop.f32.mrf.mxu1  ;;  %v957_v14 = vmul.f32 0.0, %v3054_v12  ;;  %3055 = vpow2.f32 %v2878_v44  ;;  %v2879_v16 = vmul.f32 -1.442695, %v1050_v62 }
 0x181   :  { %v1006_v32 = vpop.f32.mrf.mxu0  ;;  %v2880_v30 = vmul.f32 -1.442695, %v1052_v7 }
 0x182   :  { %v1047_v26 = vpop.f32.mrf.mxu1  ;;  %v3915_v11 = vadd.f32 %v958_v23, %v957_v14  ;;  %3057 = vpow2.f32 %v2879_v16 }
 0x183   :  { %3059 = vrcp.f32 %v954_v20 }
 0x184   :  { %3061 = vtanh.f32 %v3915_v11 }
 0x185   :  { %3063 = vtanh.f32 %v1051_v28 }
 0x186   :  { %3065 = vpow2.f32 %v2880_v30 }
 0x18d   :  { %v3056_v25 = vpop.eup %3055 }
 0x18e   :  { %v1056_v31 = vadd.f32 1.0, %v3056_v25 }
 0x18f   :  { %v3058_v53 = vpop.eup %3057 }
 0x190   :  { %v3060_v27 = vpop.eup %3059  ;;  %3067 = vrcp.f32 %v1056_v31  ;;  %v1062_v13 = vadd.f32 1.0, %v3058_v53  ;;  %v4669_v53 = vld [vmem:[#allocation21_spill] sm:$0xff] }
 0x191   :  { %v3062_v21 = vpop.eup %3061 }
 0x192   :  { %3069 = vrcp.f32 %v1062_v13  ;;  %v961_v22 = vmul.f32 %v3062_v21, %v3060_v27  ;;  %v3064_v19 = vpop.eup %3063 }
 0x193   :  { %v3066_v33 = vpop.eup %3065 }
 0x194   :  { %v1090_v36 = vpack.c.bf16 %v961_v22, %v961_v22  ;;  %v1069_v23 = vadd.f32 1.0, %v3066_v33 }
 0x196   :  { %1124 = vmatmul.mubr.bf16.vlgmr.msra.gmra.mxu0 %v1090_v36  ;;  %1165 = vmatmul.mubr.bf16.vlgmr.msra.gmra.mxu1 %v1090_v36  ;;  %3071 = vrcp.f32 %v1069_v23  ;;  %v4670_v23 = vld [vmem:[#allocation22_spill] sm:$0xff] }
 0x197   :  { %1207 = vmatpush1.bf16.msra.mxu0 %v3525_v37  ;;  %1248 = vmatpush1.bf16.msra.mxu1 %v3531_v39 }
 0x198   :  { %1208 = vmatprep.subr.bf16.mxu0 %v3528_v38  ;;  %1249 = vmatprep.subr.bf16.mxu1 %v3533_v40 }
 0x199   :  { %1238 = vmatprep.mubr.bf16.mxu0 %v4664_v17  ;;  %1279 = vmatprep.mubr.bf16.mxu1 %v4664_v17 }
 0x19b   :  { %1209 = vmatpush1.bf16.msra.mxu0 %v3537_v41  ;;  %1250 = vmatpush1.bf16.msra.mxu1 %v3544_v43 }
 0x19c   :  { %1210 = vmatprep.subr.bf16.mxu0 %v3541_v42  ;;  %1251 = vmatprep.subr.bf16.mxu1 %v3553_v47 }
 0x19d   :  { %v3068_v8 = vpop.eup %3067 }
 0x19e   :  { %v1073_v15 = vmul.f32 %v3068_v8, %v3064_v19 }
 0x19f   :  { %v3070_v1 = vpop.eup %3069  ;;  %1211 = vmatpush1.bf16.msra.mxu0 %v3548_v45  ;;  %1252 = vmatpush1.bf16.msra.mxu1 %v3556_v48 }
 0x1a0   :  { %v1072_v44 = vmul.f32 0.0, %v3070_v1  ;;  %1212 = vmatprep.subr.bf16.mxu0 %v3550_v46  ;;  %1253 = vmatprep.subr.bf16.mxu1 %v3558_v49 }
 0x1a2   :  { %v3936_v62 = vadd.f32 %v1073_v15, %v1072_v44 }
 0x1a3   :  { %1213 = vmatpush1.bf16.msra.mxu0 %v3563_v50  ;;  %1254 = vmatpush1.bf16.msra.mxu1 %v3570_v52  ;;  %v3072_v12 = vpop.eup %3071 }
 0x1a4   :  { %3073 = vtanh.f32 %v3936_v62  ;;  %1214 = vmatprep.subr.bf16.mxu0 %v3565_v51  ;;  %1255 = vmatprep.subr.bf16.mxu1 %v3576_v55 }
 0x1a7   :  { %1215 = vmatpush1.bf16.msra.mxu0 %v3573_v54  ;;  %1256 = vmatpush1.bf16.msra.mxu1 %v3582_v57 }
 0x1a8   :  { %1216 = vmatprep.subr.bf16.mxu0 %v3579_v56  ;;  %1257 = vmatprep.subr.bf16.mxu1 %v3584_v58 }
 0x1ab   :  { %1217 = vmatpush1.bf16.msra.mxu0 %v3589_v59  ;;  %1258 = vmatpush1.bf16.msra.mxu1 %v3596_v61 }
 0x1ac   :  { %1218 = vmatprep.subr.bf16.mxu0 %v3593_v60  ;;  %1259 = vmatprep.subr.bf16.mxu1 %v3602_v0 }
 0x1af   :  { %1219 = vmatpush1.bf16.msra.mxu0 %v3600_v63  ;;  %1260 = vmatpush1.bf16.msra.mxu1 %v3608_v3 }
 0x1b0   :  { %1220 = vmatprep.subr.bf16.mxu0 %v3606_v2  ;;  %1261 = vmatprep.subr.bf16.mxu1 %v3610_v4 }
 0x1b1   :  { %v3074_v20 = vpop.eup %3073 }
 0x1b2   :  { %v1076_v9 = vmul.f32 %v3074_v20, %v3072_v12  ;;  %v4671_v12 = vld [vmem:[#allocation20_spill] sm:$0xff] }
 0x1b3   :  { %1221 = vmatpush1.bf16.msra.mxu0 %v3616_v5  ;;  %1262 = vmatpush1.bf16.msra.mxu1 %v3620_v6 }
 0x1b4   :  { %v1205_v10 = vpack.c.bf16 %v1076_v9, %v1076_v9  ;;  %1330 = vmatprep.subr.bf16.mxu0 %v3521_v34  ;;  %1371 = vmatprep.subr.bf16.mxu1 %v3523_v35 }
 0x1b6   :  { %1239 = vmatmul.mubr.bf16.vlgmr.msra.gmra.mxu0 %v1205_v10  ;;  %1280 = vmatmul.mubr.bf16.vlgmr.msra.gmra.mxu1 %v1205_v10 }
 0x1b7   :  { %1331 = vmatpush1.bf16.msra.mxu0 %v3525_v37  ;;  %1372 = vmatpush1.bf16.msra.mxu1 %v3531_v39 }
 0x1b8   :  { %1332 = vmatprep.subr.bf16.mxu0 %v3528_v38  ;;  %1373 = vmatprep.subr.bf16.mxu1 %v3533_v40 }
 0x1b9   :  { %1362 = vmatprep.mubr.bf16.mxu0 %v4664_v17  ;;  %1403 = vmatprep.mubr.bf16.mxu1 %v4664_v17 }
 0x1bb   :  { %1333 = vmatpush1.bf16.msra.mxu0 %v3537_v41  ;;  %1374 = vmatpush1.bf16.msra.mxu1 %v3544_v43  ;;  %v4665_v43 = vld [vmem:[#allocation17_spill] sm:$0xff] }
 0x1bc   :  { %1334 = vmatprep.subr.bf16.mxu0 %v3541_v42  ;;  %1375 = vmatprep.subr.bf16.mxu1 %v3553_v47 }
 0x1bf   :  { %1335 = vmatpush1.bf16.msra.mxu0 %v3548_v45  ;;  %1376 = vmatpush1.bf16.msra.mxu1 %v3556_v48 }
 0x1c0   :  { %1336 = vmatprep.subr.bf16.mxu0 %v3550_v46  ;;  %1377 = vmatprep.subr.bf16.mxu1 %v3558_v49 }
 0x1c3   :  { %1337 = vmatpush1.bf16.msra.mxu0 %v3563_v50  ;;  %1378 = vmatpush1.bf16.msra.mxu1 %v3570_v52  ;;  %v4667_v52 = vld [vmem:[#allocation16_spill] sm:$0xff] }
 0x1c4   :  { %1338 = vmatprep.subr.bf16.mxu0 %v3565_v51  ;;  %1379 = vmatprep.subr.bf16.mxu1 %v3576_v55  ;;  %v4666_v51 = vld [vmem:[#allocation18_spill] sm:$0xff] }
 0x1c7   :  { %1339 = vmatpush1.bf16.msra.mxu0 %v3573_v54  ;;  %1380 = vmatpush1.bf16.msra.mxu1 %v3582_v57 }
 0x1c8   :  { %1340 = vmatprep.subr.bf16.mxu0 %v3579_v56  ;;  %1381 = vmatprep.subr.bf16.mxu1 %v3584_v58 }
 0x1cb   :  { %1341 = vmatpush1.bf16.msra.mxu0 %v3589_v59  ;;  %1382 = vmatpush1.bf16.msra.mxu1 %v3596_v61 }
 0x1cc   :  { %1342 = vmatprep.subr.bf16.mxu0 %v3593_v60  ;;  %1383 = vmatprep.subr.bf16.mxu1 %v3602_v0 }
 0x1cf   :  { %1343 = vmatpush1.bf16.msra.mxu0 %v3600_v63  ;;  %1384 = vmatpush1.bf16.msra.mxu1 %v3608_v3 }
 0x1d0   :  { %1344 = vmatprep.subr.bf16.mxu0 %v3606_v2  ;;  %1385 = vmatprep.subr.bf16.mxu1 %v3610_v4 }
 0x1d3   :  { %1345 = vmatpush1.bf16.msra.mxu0 %v3616_v5  ;;  %1386 = vmatpush1.bf16.msra.mxu1 %v3620_v6 }
 0x1d4   :  { %1445 = vmatprep.subr.bf16.mxu0 %v3521_v34  ;;  %1486 = vmatprep.subr.bf16.mxu1 %v3523_v35 }
 0x256   :  { %v1125_v37 = vpop.f32.mrf.mxu0  ;;  %v1166_v38 = vpop.f32.mrf.mxu1 }
 0x257   :  { %v1173_v39 = vadd.f32 %v1125_v37, %v3724_v24  ;;  %v1175_v35 = vadd.f32 %v1166_v38, %v4667_v52  ;;  %v4028_v52 = vld [vmem:[#allocation11 + $0xac] ss:$16 sps:$4 sm:$0xff]  }
 0x258   :  { %v1127_v40 = vpop.f32.mrf.mxu0  ;;  %v1168_v41 = vpop.f32.mrf.mxu1 }
 0x259   :  { %v2881_v42 = vmul.f32 -1.442695, %v1173_v39  ;;  %v1174_v45 = vadd.f32 %v1127_v40, %v4665_v43  ;;  %v1176_v34 = vadd.f32 %v1168_v41, %v4666_v51  ;;  %v4005_v43 = vld [vmem:[#allocation11 + $0xe0] ss:$16 sps:$4 sm:$0xff]  }
 0x25a   :  { %v1129_v46 = vpop.f32.mrf.mxu0  ;;  %v1170_v47 = vpop.f32.mrf.mxu1 }
 0x25b   :  { %3075 = vpow2.f32 %v2881_v42  ;;  %v2882_v48 = vmul.f32 -1.442695, %v1174_v45  ;;  %v2883_v54 = vmul.f32 -1.442695, %v1176_v34  ;;  %v4008_v45 = vld [vmem:[#allocation11 + $0xe8] ss:$16 sps:$4 sm:$0xff]  }
 0x25c   :  { %v1130_v49 = vpop.f32.mrf.mxu0  ;;  %v1171_v50 = vpop.f32.mrf.mxu1  ;;  %v4011_v46 = vld [vmem:[#allocation11 + $0xc4] ss:$16 sps:$4 sm:$0xff]   ;;  %v4014_v47 = vld [vmem:[#allocation11 + $0xcc] ss:$16 sps:$4 sm:$0xff]  }
 0x25d   :  { %3077 = vpow2.f32 %v2882_v48  ;;  %v4019_v49 = vld [vmem:[#allocation11 + $0xc0] ss:$16 sps:$4 sm:$0xff]   ;;  %v4022_v50 = vld [vmem:[#allocation11 + $0xc8] ss:$16 sps:$4 sm:$0xff]   ;;  %v4025_v34 = vld [vmem:[#allocation11 + $0xa4] ss:$16 sps:$4 sm:$0xff]  }
 0x25e   :  { %3079 = vtanh.f32 %v1175_v35 }
 0x25f   :  { %3081 = vpow2.f32 %v2883_v54 }
 0x268   :  { %v3076_v55 = vpop.eup %3075 }
 0x269   :  { %v1180_v56 = vadd.f32 1.0, %v3076_v55 }
 0x26a   :  { %v3078_v57 = vpop.eup %3077 }
 0x26b   :  { %3083 = vrcp.f32 %v1180_v56  ;;  %v1186_v24 = vadd.f32 1.0, %v3078_v57  ;;  %v3080_v14 = vpop.eup %3079  ;;  %v4031_v57 = vld [vmem:[#allocation11 + $0xa0] ss:$16 sps:$4 sm:$0xff]  }
 0x26c   :  { %v3082_v26 = vpop.eup %3081 }
 0x26d   :  { %3085 = vrcp.f32 %v1186_v24  ;;  %v1193_v21 = vadd.f32 1.0, %v3082_v26  ;;  %v4034_v24 = vld [vmem:[#allocation11 + $0xa8] ss:$16 sps:$4 sm:$0xff]  }
 0x276   :  { %v1240_v16 = vpop.f32.mrf.mxu0  ;;  %v1281_v32 = vpop.f32.mrf.mxu1 }
 0x277   :  { %v1288_v7 = vadd.f32 %v1240_v16, %v4668_v18  ;;  %v1290_v20 = vadd.f32 %v1281_v32, %v4671_v12  ;;  %v4038_v16 = vld [vmem:[#allocation11 + $0x84] ss:$16 sps:$4 sm:$0xff]   ;;  %v4041_v32 = vld [vmem:[#allocation11 + $0x8c] ss:$16 sps:$4 sm:$0xff]   ;;  %v4046_v18 = vld [vmem:[#allocation11 + $0x80] ss:$16 sps:$4 sm:$0xff]  }
 0x278   :  { %v3084_v29 = vpop.eup %3083  ;;  %v1242_v28 = vpop.f32.mrf.mxu0  ;;  %v4673_v12 = vld [vmem:[#allocation25_spill] sm:$0xff] }
 0x279   :  { %v1283_v30 = vpop.f32.mrf.mxu1  ;;  %v1197_v25 = vmul.f32 %v3084_v29, %v3080_v14  ;;  %v2884_v31 = vmul.f32 -1.442695, %v1288_v7  ;;  %v1289_v27 = vadd.f32 %v1242_v28, %v4669_v53  ;;  %v4049_v7 = vld [vmem:[#allocation11 + $0x88] ss:$16 sps:$4 sm:$0xff]   ;;  %v4055_v29 = vld [vmem:[#allocation11 + $0x6c] ss:$16 sps:$4 sm:$0xff]  }
 0x27a   :  { %v3086_v13 = vpop.eup %3085  ;;  %v1244_v22 = vpop.f32.mrf.mxu0  ;;  %v1291_v44 = vadd.f32 %v1283_v30, %v4670_v23  ;;  %v4059_v28 = vld [vmem:[#allocation11 + $0x60] ss:$16 sps:$4 sm:$0xff]   ;;  %v4062_v30 = vld [vmem:[#allocation11 + $0x68] ss:$16 sps:$4 sm:$0xff]  }
 0x27b   :  { %v1285_v36 = vpop.f32.mrf.mxu1  ;;  %v1196_v19 = vmul.f32 %v3086_v13, %v3915_v11  ;;  %3087 = vpow2.f32 %v2884_v31  ;;  %v2885_v33 = vmul.f32 -1.442695, %v1289_v27  ;;  %v4130_v13 = vld [vmem:[#allocation11 + $0xc] ss:$16 sps:$4 sm:$0xff]   ;;  %v4136_v22 = vld [vmem:[#allocation11 + $0x8] ss:$16 sps:$4 sm:$0xff]  }
 0x27c   :  { %v1245_v8 = vpop.f32.mrf.mxu0  ;;  %v2886_v9 = vmul.f32 -1.442695, %v1291_v44 }
 0x27d   :  { %v1286_v15 = vpop.f32.mrf.mxu1  ;;  %v4000_v1 = vadd.f32 %v1197_v25, %v1196_v19  ;;  %3089 = vpow2.f32 %v2885_v33  ;;  %v4065_v25 = vld [vmem:[#allocation11 + $0x44] ss:$16 sps:$4 sm:$0xff]   ;;  %v4672_v33 = vld [vmem:[#allocation23_spill] sm:$0xff] }
 0x27e   :  { %3091 = vrcp.f32 %v1193_v21  ;;  %v4133_v21 = vld [vmem:[#allocation11] ss:$16 sps:$4 sm:$0xff]  }
 0x27f   :  { %3093 = vtanh.f32 %v4000_v1 }
 0x280   :  { %3095 = vtanh.f32 %v1290_v20 }
 0x281   :  { %3097 = vpow2.f32 %v2886_v9 }
 0x288   :  { %v3088_v10 = vpop.eup %3087 }
 0x289   :  { %v1295_v37 = vadd.f32 1.0, %v3088_v10 }
 0x28a   :  { %v3090_v38 = vpop.eup %3089 }
 0x28b   :  { %v3092_v11 = vpop.eup %3091  ;;  %3099 = vrcp.f32 %v1295_v37  ;;  %v1301_v39 = vadd.f32 1.0, %v3090_v38 }
 0x28c   :  { %v3094_v40 = vpop.eup %3093 }
 0x28d   :  { %3101 = vrcp.f32 %v1301_v39  ;;  %v1200_v41 = vmul.f32 %v3094_v40, %v3092_v11  ;;  %v3096_v48 = vpop.eup %3095  ;;  %v4674_v39 = vld [vmem:[#allocation26_spill] sm:$0xff] }
 0x28e   :  { %v3098_v51 = vpop.eup %3097 }
 0x28f   :  { %v1329_v42 = vpack.c.bf16 %v1200_v41, %v1200_v41  ;;  %v1308_v56 = vadd.f32 1.0, %v3098_v51  ;;  %v4675_v41 = vld [vmem:[#allocation24_spill] sm:$0xff] }
 0x291   :  { %1363 = vmatmul.mubr.bf16.vlgmr.msra.gmra.mxu0 %v1329_v42  ;;  %1404 = vmatmul.mubr.bf16.vlgmr.msra.gmra.mxu1 %v1329_v42  ;;  %3103 = vrcp.f32 %v1308_v56 }
 0x292   :  { %1446 = vmatpush1.bf16.msra.mxu0 %v4005_v43  ;;  %1487 = vmatpush1.bf16.msra.mxu1 %v4008_v45 }
 0x293   :  { %1447 = vmatprep.subr.bf16.mxu0 %v4011_v46  ;;  %1488 = vmatprep.subr.bf16.mxu1 %v4014_v47 }
 0x294   :  { %1477 = vmatprep.mubr.bf16.mxu0 %v4664_v17  ;;  %1518 = vmatprep.mubr.bf16.mxu1 %v4664_v17 }
 0x296   :  { %1448 = vmatpush1.bf16.msra.mxu0 %v4019_v49  ;;  %1489 = vmatpush1.bf16.msra.mxu1 %v4022_v50 }
 0x297   :  { %1449 = vmatprep.subr.bf16.mxu0 %v4025_v34  ;;  %1490 = vmatprep.subr.bf16.mxu1 %v4028_v52 }
 0x298   :  { %v3100_v35 = vpop.eup %3099 }
 0x299   :  { %v1312_v54 = vmul.f32 %v3100_v35, %v3096_v48 }
 0x29a   :  { %v3102_v55 = vpop.eup %3101  ;;  %1450 = vmatpush1.bf16.msra.mxu0 %v4031_v57  ;;  %1491 = vmatpush1.bf16.msra.mxu1 %v4034_v24 }
 0x29b   :  { %v1311_v14 = vmul.f32 %v3102_v55, %v3936_v62  ;;  %1451 = vmatprep.subr.bf16.mxu0 %v4038_v16  ;;  %1492 = vmatprep.subr.bf16.mxu1 %v4041_v32  ;;  %v4052_v62 = vld [vmem:[#allocation11 + $0x64] ss:$16 sps:$4 sm:$0xff]  }
 0x29d   :  { %v4044_v26 = vadd.f32 %v1312_v54, %v1311_v14 }
 0x29e   :  { %1452 = vmatpush1.bf16.msra.mxu0 %v4046_v18  ;;  %1493 = vmatpush1.bf16.msra.mxu1 %v4049_v7  ;;  %v3104_v31 = vpop.eup %3103 }
 0x29f   :  { %1453 = vmatprep.subr.bf16.mxu0 %v4052_v62  ;;  %1494 = vmatprep.subr.bf16.mxu1 %v4055_v29  ;;  %3105 = vtanh.f32 %v4044_v26 }
 0x2a2   :  { %1454 = vmatpush1.bf16.msra.mxu0 %v4059_v28  ;;  %1495 = vmatpush1.bf16.msra.mxu1 %v4062_v30 }
 0x2a3   :  { %1455 = vmatprep.subr.bf16.mxu0 %v4065_v25  ;;  %1496 = vmatprep.subr.bf16.mxu1 %v3584_v58 }
 0x2a6   :  { %1456 = vmatpush1.bf16.msra.mxu0 %v3589_v59  ;;  %1497 = vmatpush1.bf16.msra.mxu1 %v3596_v61  ;;  %v4079_v59 = vld [vmem:[#allocation11 + $0xe4] ss:$16 sps:$4 sm:$0xff]   ;;  %v4106_v61 = vld [vmem:[#allocation11 + $0x4c] ss:$16 sps:$4 sm:$0xff]  }
 0x2a7   :  { %1457 = vmatprep.subr.bf16.mxu0 %v3593_v60  ;;  %1498 = vmatprep.subr.bf16.mxu1 %v3602_v0  ;;  %v4082_v60 = vld [vmem:[#allocation11 + $0xec] ss:$16 sps:$4 sm:$0xff]   ;;  %v4112_v0 = vld [vmem:[#allocation11 + $0x48] ss:$16 sps:$4 sm:$0xff]  }
 0x2aa   :  { %1458 = vmatpush1.bf16.msra.mxu0 %v3600_v63  ;;  %1499 = vmatpush1.bf16.msra.mxu1 %v3608_v3  ;;  %v4109_v63 = vld [vmem:[#allocation11 + $0x40] ss:$16 sps:$4 sm:$0xff]   ;;  %v4118_v3 = vld [vmem:[#allocation11 + $0x2c] ss:$16 sps:$4 sm:$0xff]  }
 0x2ab   :  { %1459 = vmatprep.subr.bf16.mxu0 %v3606_v2  ;;  %1500 = vmatprep.subr.bf16.mxu1 %v3610_v4  ;;  %v4115_v2 = vld [vmem:[#allocation11 + $0x24] ss:$16 sps:$4 sm:$0xff]   ;;  %v4121_v4 = vld [vmem:[#allocation11 + $0x20] ss:$16 sps:$4 sm:$0xff]  }
 0x2ac   :  { %v3106_v53 = vpop.eup %3105 }
 0x2ad   :  { %v1315_v27 = vmul.f32 %v3106_v53, %v3104_v31 }
 0x2ae   :  { %1460 = vmatpush1.bf16.msra.mxu0 %v3616_v5  ;;  %1501 = vmatpush1.bf16.msra.mxu1 %v3620_v6  ;;  %v4124_v5 = vld [vmem:[#allocation11 + $0x28] ss:$16 sps:$4 sm:$0xff]   ;;  %v4127_v6 = vld [vmem:[#allocation11 + $0x4] ss:$16 sps:$4 sm:$0xff]  }
 0x2af   :  { %v1444_v58 = vpack.c.bf16 %v1315_v27, %v1315_v27  ;;  %1569 = vmatprep.subr.bf16.mxu0 %v4079_v59  ;;  %1610 = vmatprep.subr.bf16.mxu1 %v4082_v60  ;;  %v4676_v27 = vld [vmem:[#allocation27_spill] sm:$0xff] }
 0x2b1   :  { %1478 = vmatmul.mubr.bf16.vlgmr.msra.gmra.mxu0 %v1444_v58  ;;  %1519 = vmatmul.mubr.bf16.vlgmr.msra.gmra.mxu1 %v1444_v58 }
 0x2b2   :  { %1570 = vmatpush1.bf16.msra.mxu0 %v4005_v43  ;;  %1611 = vmatpush1.bf16.msra.mxu1 %v4008_v45 }
 0x2b3   :  { %1571 = vmatprep.subr.bf16.mxu0 %v4011_v46  ;;  %1612 = vmatprep.subr.bf16.mxu1 %v4014_v47 }
 0x2b4   :  { %1601 = vmatprep.mubr.bf16.mxu0 %v4664_v17  ;;  %1642 = vmatprep.mubr.bf16.mxu1 %v4664_v17 }
 0x2b6   :  { %1572 = vmatpush1.bf16.msra.mxu0 %v4019_v49  ;;  %1613 = vmatpush1.bf16.msra.mxu1 %v4022_v50 }
 0x2b7   :  { %1573 = vmatprep.subr.bf16.mxu0 %v4025_v34  ;;  %1614 = vmatprep.subr.bf16.mxu1 %v4028_v52 }
 0x2ba   :  { %1574 = vmatpush1.bf16.msra.mxu0 %v4031_v57  ;;  %1615 = vmatpush1.bf16.msra.mxu1 %v4034_v24 }
 0x2bb   :  { %1575 = vmatprep.subr.bf16.mxu0 %v4038_v16  ;;  %1616 = vmatprep.subr.bf16.mxu1 %v4041_v32 }
 0x2be   :  { %1576 = vmatpush1.bf16.msra.mxu0 %v4046_v18  ;;  %1617 = vmatpush1.bf16.msra.mxu1 %v4049_v7 }
 0x2bf   :  { %1577 = vmatprep.subr.bf16.mxu0 %v4052_v62  ;;  %1618 = vmatprep.subr.bf16.mxu1 %v4055_v29 }
 0x2c2   :  { %1578 = vmatpush1.bf16.msra.mxu0 %v4059_v28  ;;  %1619 = vmatpush1.bf16.msra.mxu1 %v4062_v30 }
 0x2c3   :  { %1579 = vmatprep.subr.bf16.mxu0 %v4065_v25  ;;  %1620 = vmatprep.subr.bf16.mxu1 %v4106_v61 }
 0x2c6   :  { %1580 = vmatpush1.bf16.msra.mxu0 %v4109_v63  ;;  %1621 = vmatpush1.bf16.msra.mxu1 %v4112_v0 }
 0x2c7   :  { %1581 = vmatprep.subr.bf16.mxu0 %v4115_v2  ;;  %1622 = vmatprep.subr.bf16.mxu1 %v4118_v3 }
 0x2ca   :  { %1582 = vmatpush1.bf16.msra.mxu0 %v4121_v4  ;;  %1623 = vmatpush1.bf16.msra.mxu1 %v4124_v5 }
 0x2cb   :  { %1583 = vmatprep.subr.bf16.mxu0 %v4127_v6  ;;  %1624 = vmatprep.subr.bf16.mxu1 %v4130_v13 }
 0x2ce   :  { %1584 = vmatpush1.bf16.msra.mxu0 %v4133_v21  ;;  %1625 = vmatpush1.bf16.msra.mxu1 %v4136_v22 }
 0x2cf   :  { %1684 = vmatprep.subr.bf16.mxu0 %v4079_v59  ;;  %1725 = vmatprep.subr.bf16.mxu1 %v4082_v60 }
 0x351   :  { %v1364_v36 = vpop.f32.mrf.mxu0  ;;  %v1405_v19 = vpop.f32.mrf.mxu1 }
 0x352   :  { %v1412_v8 = vadd.f32 %v1364_v36, %v4672_v33  ;;  %v1414_v42 = vadd.f32 %v1405_v19, %v4675_v41  ;;  %v4678_v41 = vld [vmem:[#allocation30_spill] sm:$0xff] }
 0x353   :  { %v1366_v15 = vpop.f32.mrf.mxu0  ;;  %v1407_v23 = vpop.f32.mrf.mxu1 }
 0x354   :  { %v2887_v44 = vmul.f32 -1.442695, %v1412_v8  ;;  %v1413_v20 = vadd.f32 %v1366_v15, %v4673_v12  ;;  %v1415_v40 = vadd.f32 %v1407_v23, %v4674_v39  ;;  %v4677_v23 = vld [vmem:[#allocation29_spill] sm:$0xff] }
 0x355   :  { %v1368_v9 = vpop.f32.mrf.mxu0  ;;  %v1409_v10 = vpop.f32.mrf.mxu1 }
 0x356   :  { %3107 = vpow2.f32 %v2887_v44  ;;  %v2888_v37 = vmul.f32 -1.442695, %v1413_v20  ;;  %v2889_v48 = vmul.f32 -1.442695, %v1415_v40 }
 0x357   :  { %v1369_v38 = vpop.f32.mrf.mxu0  ;;  %v1410_v11 = vpop.f32.mrf.mxu1 }
 0x358   :  { %3109 = vpow2.f32 %v2888_v37 }
 0x359   :  { %3111 = vtanh.f32 %v1414_v42 }
 0x35a   :  { %3113 = vpow2.f32 %v2889_v48  ;;  %v4679_v48 = vld [vmem:[#allocation28_spill] sm:$0xff] }
 0x363   :  { %v3108_v51 = vpop.eup %3107 }
 0x364   :  { %v1419_v35 = vadd.f32 1.0, %v3108_v51 }
 0x365   :  { %v3110_v54 = vpop.eup %3109 }
 0x366   :  { %3115 = vrcp.f32 %v1419_v35  ;;  %v1425_v55 = vadd.f32 1.0, %v3110_v54  ;;  %v3112_v56 = vpop.eup %3111 }
 0x367   :  { %v3114_v53 = vpop.eup %3113 }
 0x368   :  { %3117 = vrcp.f32 %v1425_v55  ;;  %v1432_v20 = vadd.f32 1.0, %v3114_v53 }
 0x371   :  { %v1479_v14 = vpop.f32.mrf.mxu0  ;;  %v1520_v31 = vpop.f32.mrf.mxu1 }
 0x372   :  { %v1527_v58 = vadd.f32 %v1479_v14, %v4676_v27  ;;  %v1529_v51 = vadd.f32 %v1520_v31, %v4679_v48  ;;  %v4681_v48 = vld [vmem:[#allocation33_spill] sm:$0xff] }
 0x373   :  { %v3116_v36 = vpop.eup %3115  ;;  %v1481_v33 = vpop.f32.mrf.mxu0 }
 0x374   :  { %v1522_v8 = vpop.f32.mrf.mxu1  ;;  %v1436_v15 = vmul.f32 %v3116_v36, %v3112_v56  ;;  %v2890_v19 = vmul.f32 -1.442695, %v1527_v58  ;;  %v1528_v44 = vadd.f32 %v1481_v33, %v4677_v23 }
 0x375   :  { %v3118_v12 = vpop.eup %3117  ;;  %v1483_v9 = vpop.f32.mrf.mxu0  ;;  %v1530_v42 = vadd.f32 %v1522_v8, %v4678_v41 }
 0x376   :  { %v1524_v10 = vpop.f32.mrf.mxu1  ;;  %v1435_v37 = vmul.f32 %v3118_v12, %v4000_v1  ;;  %3119 = vpow2.f32 %v2890_v19  ;;  %v2891_v38 = vmul.f32 -1.442695, %v1528_v44 }
 0x377   :  { %v1484_v11 = vpop.f32.mrf.mxu0  ;;  %v2892_v35 = vmul.f32 -1.442695, %v1530_v42 }
 0x378   :  { %v1525_v39 = vpop.f32.mrf.mxu1  ;;  %v4148_v40 = vadd.f32 %v1436_v15, %v1435_v37  ;;  %3121 = vpow2.f32 %v2891_v38  ;;  %v4680_v38 = vld [vmem:[#allocation31_spill] sm:$0xff] }
 0x379   :  { %3123 = vrcp.f32 %v1432_v20 }
 0x37a   :  { %3125 = vtanh.f32 %v4148_v40 }
 0x37b   :  { %3127 = vtanh.f32 %v1529_v51 }
 0x37c   :  { %3129 = vpow2.f32 %v2892_v35 }
 0x383   :  { %v3120_v54 = vpop.eup %3119 }
 0x384   :  { %v1534_v55 = vadd.f32 1.0, %v3120_v54 }
 0x385   :  { %v3122_v56 = vpop.eup %3121 }
 0x386   :  { %v3124_v1 = vpop.eup %3123  ;;  %3131 = vrcp.f32 %v1534_v55  ;;  %v1540_v14 = vadd.f32 1.0, %v3122_v56 }
 0x387   :  { %v3126_v53 = vpop.eup %3125 }
 0x388   :  { %3133 = vrcp.f32 %v1540_v14  ;;  %v1439_v27 = vmul.f32 %v3126_v53, %v3124_v1  ;;  %v3128_v31 = vpop.eup %3127  ;;  %v4682_v14 = vld [vmem:[#allocation34_spill] sm:$0xff] }
 0x389   :  { %v3130_v36 = vpop.eup %3129 }
 0x38a   :  { %v1568_v58 = vpack.c.bf16 %v1439_v27, %v1439_v27  ;;  %v1547_v19 = vadd.f32 1.0, %v3130_v36  ;;  %v4683_v27 = vld [vmem:[#allocation32_spill] sm:$0xff] }
 0x38c   :  { %1602 = vmatmul.mubr.bf16.vlgmr.msra.gmra.mxu0 %v1568_v58  ;;  %1643 = vmatmul.mubr.bf16.vlgmr.msra.gmra.mxu1 %v1568_v58  ;;  %3135 = vrcp.f32 %v1547_v19 }
 0x38d   :  { %1685 = vmatpush1.bf16.msra.mxu0 %v4005_v43  ;;  %1726 = vmatpush1.bf16.msra.mxu1 %v4008_v45 }
 0x38e   :  { %1686 = vmatprep.subr.bf16.mxu0 %v4011_v46  ;;  %1727 = vmatprep.subr.bf16.mxu1 %v4014_v47 }
 0x38f   :  { %1716 = vmatprep.mubr.bf16.mxu0 %v4664_v17  ;;  %1757 = vmatprep.mubr.bf16.mxu1 %v4664_v17 }
 0x391   :  { %1687 = vmatpush1.bf16.msra.mxu0 %v4019_v49  ;;  %1728 = vmatpush1.bf16.msra.mxu1 %v4022_v50 }
 0x392   :  { %1688 = vmatprep.subr.bf16.mxu0 %v4025_v34  ;;  %1729 = vmatprep.subr.bf16.mxu1 %v4028_v52 }
 0x393   :  { %v3132_v33 = vpop.eup %3131 }
 0x394   :  { %v1551_v8 = vmul.f32 %v3132_v33, %v3128_v31 }
 0x395   :  { %v3134_v15 = vpop.eup %3133  ;;  %1689 = vmatpush1.bf16.msra.mxu0 %v4031_v57  ;;  %1730 = vmatpush1.bf16.msra.mxu1 %v4034_v24 }
 0x396   :  { %v1550_v23 = vmul.f32 %v3134_v15, %v4044_v26  ;;  %1690 = vmatprep.subr.bf16.mxu0 %v4038_v16  ;;  %1731 = vmatprep.subr.bf16.mxu1 %v4041_v32 }
 0x398   :  { %v4168_v44 = vadd.f32 %v1551_v8, %v1550_v23 }
 0x399   :  { %1691 = vmatpush1.bf16.msra.mxu0 %v4046_v18  ;;  %1732 = vmatpush1.bf16.msra.mxu1 %v4049_v7  ;;  %v3136_v26 = vpop.eup %3135 }
 0x39a   :  { %1692 = vmatprep.subr.bf16.mxu0 %v4052_v62  ;;  %1733 = vmatprep.subr.bf16.mxu1 %v4055_v29  ;;  %3137 = vtanh.f32 %v4168_v44 }
 0x39d   :  { %1693 = vmatpush1.bf16.msra.mxu0 %v4059_v28  ;;  %1734 = vmatpush1.bf16.msra.mxu1 %v4062_v30 }
 0x39e   :  { %1694 = vmatprep.subr.bf16.mxu0 %v4065_v25  ;;  %1735 = vmatprep.subr.bf16.mxu1 %v4106_v61 }
 0x3a1   :  { %1695 = vmatpush1.bf16.msra.mxu0 %v4109_v63  ;;  %1736 = vmatpush1.bf16.msra.mxu1 %v4112_v0 }
 0x3a2   :  { %1696 = vmatprep.subr.bf16.mxu0 %v4115_v2  ;;  %1737 = vmatprep.subr.bf16.mxu1 %v4118_v3 }
 0x3a5   :  { %1697 = vmatpush1.bf16.msra.mxu0 %v4121_v4  ;;  %1738 = vmatpush1.bf16.msra.mxu1 %v4124_v5 }
 0x3a6   :  { %1698 = vmatprep.subr.bf16.mxu0 %v4127_v6  ;;  %1739 = vmatprep.subr.bf16.mxu1 %v4130_v13 }
 0x3a7   :  { %v3138_v12 = vpop.eup %3137 }
 0x3a8   :  { %v1554_v20 = vmul.f32 %v3138_v12, %v3136_v26 }
 0x3a9   :  { %1699 = vmatpush1.bf16.msra.mxu0 %v4133_v21  ;;  %1740 = vmatpush1.bf16.msra.mxu1 %v4136_v22 }
 0x3aa   :  { %v1683_v9 = vpack.c.bf16 %v1554_v20, %v1554_v20  ;;  %1808 = vmatprep.subr.bf16.mxu0 %v4079_v59  ;;  %1849 = vmatprep.subr.bf16.mxu1 %v4082_v60  ;;  %v4684_v20 = vld [vmem:[#allocation35_spill] sm:$0xff] }
 0x3ac   :  { %1717 = vmatmul.mubr.bf16.vlgmr.msra.gmra.mxu0 %v1683_v9  ;;  %1758 = vmatmul.mubr.bf16.vlgmr.msra.gmra.mxu1 %v1683_v9 }
 0x3ad   :  { %1809 = vmatpush1.bf16.msra.mxu0 %v4005_v43  ;;  %1850 = vmatpush1.bf16.msra.mxu1 %v4008_v45 }
 0x3ae   :  { %1810 = vmatprep.subr.bf16.mxu0 %v4011_v46  ;;  %1851 = vmatprep.subr.bf16.mxu1 %v4014_v47 }
 0x3af   :  { %1840 = vmatprep.mubr.bf16.mxu0 %v4664_v17  ;;  %1881 = vmatprep.mubr.bf16.mxu1 %v4664_v17 }
 0x3b1   :  { %1811 = vmatpush1.bf16.msra.mxu0 %v4019_v49  ;;  %1852 = vmatpush1.bf16.msra.mxu1 %v4022_v50 }
 0x3b2   :  { %1812 = vmatprep.subr.bf16.mxu0 %v4025_v34  ;;  %1853 = vmatprep.subr.bf16.mxu1 %v4028_v52 }
 0x3b5   :  { %1813 = vmatpush1.bf16.msra.mxu0 %v4031_v57  ;;  %1854 = vmatpush1.bf16.msra.mxu1 %v4034_v24 }
 0x3b6   :  { %1814 = vmatprep.subr.bf16.mxu0 %v4038_v16  ;;  %1855 = vmatprep.subr.bf16.mxu1 %v4041_v32 }
 0x3b9   :  { %1815 = vmatpush1.bf16.msra.mxu0 %v4046_v18  ;;  %1856 = vmatpush1.bf16.msra.mxu1 %v4049_v7 }
 0x3ba   :  { %1816 = vmatprep.subr.bf16.mxu0 %v4052_v62  ;;  %1857 = vmatprep.subr.bf16.mxu1 %v4055_v29 }
 0x3bd   :  { %1817 = vmatpush1.bf16.msra.mxu0 %v4059_v28  ;;  %1858 = vmatpush1.bf16.msra.mxu1 %v4062_v30 }
 0x3be   :  { %1818 = vmatprep.subr.bf16.mxu0 %v4065_v25  ;;  %1859 = vmatprep.subr.bf16.mxu1 %v4106_v61 }
 0x3c1   :  { %1819 = vmatpush1.bf16.msra.mxu0 %v4109_v63  ;;  %1860 = vmatpush1.bf16.msra.mxu1 %v4112_v0 }
 0x3c2   :  { %1820 = vmatprep.subr.bf16.mxu0 %v4115_v2  ;;  %1861 = vmatprep.subr.bf16.mxu1 %v4118_v3 }
 0x3c5   :  { %1821 = vmatpush1.bf16.msra.mxu0 %v4121_v4  ;;  %1862 = vmatpush1.bf16.msra.mxu1 %v4124_v5 }
 0x3c6   :  { %1822 = vmatprep.subr.bf16.mxu0 %v4127_v6  ;;  %1863 = vmatprep.subr.bf16.mxu1 %v4130_v13 }
 0x3c9   :  { %1823 = vmatpush1.bf16.msra.mxu0 %v4133_v21  ;;  %1864 = vmatpush1.bf16.msra.mxu1 %v4136_v22 }
 0x3ca   :  { %1923 = vmatprep.subr.bf16.mxu0 %v4079_v59  ;;  %1964 = vmatprep.subr.bf16.mxu1 %v4082_v60 }
 0x44c   :  { %v1603_v10 = vpop.f32.mrf.mxu0  ;;  %v1644_v37 = vpop.f32.mrf.mxu1 }
 0x44d   :  { %v1651_v11 = vadd.f32 %v1603_v10, %v4680_v38  ;;  %v1653_v58 = vadd.f32 %v1644_v37, %v4683_v27  ;;  %v4686_v27 = vld [vmem:[#allocation38_spill] sm:$0xff] }
 0x44e   :  { %v1605_v39 = vpop.f32.mrf.mxu0  ;;  %v1646_v41 = vpop.f32.mrf.mxu1 }
 0x44f   :  { %v2893_v42 = vmul.f32 -1.442695, %v1651_v11  ;;  %v1652_v51 = vadd.f32 %v1605_v39, %v4681_v48  ;;  %v1654_v53 = vadd.f32 %v1646_v41, %v4682_v14  ;;  %v4685_v41 = vld [vmem:[#allocation37_spill] sm:$0xff] }
 0x450   :  { %v1607_v35 = vpop.f32.mrf.mxu0  ;;  %v1648_v54 = vpop.f32.mrf.mxu1 }
 0x451   :  { %3139 = vpow2.f32 %v2893_v42  ;;  %v2894_v55 = vmul.f32 -1.442695, %v1652_v51  ;;  %v2895_v31 = vmul.f32 -1.442695, %v1654_v53 }
 0x452   :  { %v1608_v56 = vpop.f32.mrf.mxu0  ;;  %v1649_v1 = vpop.f32.mrf.mxu1 }
 0x453   :  { %3141 = vpow2.f32 %v2894_v55 }
 0x454   :  { %3143 = vtanh.f32 %v1653_v58 }
 0x455   :  { %3145 = vpow2.f32 %v2895_v31  ;;  %v4687_v31 = vld [vmem:[#allocation36_spill] sm:$0xff] }
 0x45e   :  { %v3140_v36 = vpop.eup %3139 }
 0x45f   :  { %v1658_v33 = vadd.f32 1.0, %v3140_v36 }
 0x460   :  { %v3142_v8 = vpop.eup %3141 }
 0x461   :  { %3147 = vrcp.f32 %v1658_v33  ;;  %v1664_v15 = vadd.f32 1.0, %v3142_v8  ;;  %v3144_v19 = vpop.eup %3143 }
 0x462   :  { %v3146_v12 = vpop.eup %3145 }
 0x463   :  { %3149 = vrcp.f32 %v1664_v15  ;;  %v1671_v51 = vadd.f32 1.0, %v3146_v12 }
 0x46c   :  { %v1718_v23 = vpop.f32.mrf.mxu0  ;;  %v1759_v26 = vpop.f32.mrf.mxu1 }
 0x46d   :  { %v1766_v9 = vadd.f32 %v1718_v23, %v4684_v20  ;;  %v1768_v36 = vadd.f32 %v1759_v26, %v4687_v31  ;;  %v4689_v31 = vld [vmem:[#allocation41_spill] sm:$0xff] }
 0x46e   :  { %v3148_v10 = vpop.eup %3147  ;;  %v1720_v38 = vpop.f32.mrf.mxu0 }
 0x46f   :  { %v1761_v11 = vpop.f32.mrf.mxu1  ;;  %v1675_v39 = vmul.f32 %v3148_v10, %v3144_v19  ;;  %v2896_v37 = vmul.f32 -1.442695, %v1766_v9  ;;  %v1767_v42 = vadd.f32 %v1720_v38, %v4685_v41 }
 0x470   :  { %v3150_v48 = vpop.eup %3149  ;;  %v1722_v35 = vpop.f32.mrf.mxu0  ;;  %v1769_v58 = vadd.f32 %v1761_v11, %v4686_v27 }
 0x471   :  { %v1763_v54 = vpop.f32.mrf.mxu1  ;;  %v1674_v55 = vmul.f32 %v3150_v48, %v4148_v40  ;;  %3151 = vpow2.f32 %v2896_v37  ;;  %v2897_v56 = vmul.f32 -1.442695, %v1767_v42 }
 0x472   :  { %v1723_v1 = vpop.f32.mrf.mxu0  ;;  %v2898_v33 = vmul.f32 -1.442695, %v1769_v58 }
 0x473   :  { %v1764_v14 = vpop.f32.mrf.mxu1  ;;  %v4232_v53 = vadd.f32 %v1675_v39, %v1674_v55  ;;  %3153 = vpow2.f32 %v2897_v56  ;;  %v4688_v56 = vld [vmem:[#allocation39_spill] sm:$0xff] }
 0x474   :  { %3155 = vrcp.f32 %v1671_v51 }
 0x475   :  { %3157 = vtanh.f32 %v4232_v53 }
 0x476   :  { %3159 = vtanh.f32 %v1768_v36 }
 0x477   :  { %3161 = vpow2.f32 %v2898_v33 }
 0x47e   :  { %v3152_v8 = vpop.eup %3151 }
 0x47f   :  { %v1773_v15 = vadd.f32 1.0, %v3152_v8 }
 0x480   :  { %v3154_v19 = vpop.eup %3153 }
 0x481   :  { %v3156_v40 = vpop.eup %3155  ;;  %3163 = vrcp.f32 %v1773_v15  ;;  %v1779_v23 = vadd.f32 1.0, %v3154_v19 }
 0x482   :  { %v3158_v12 = vpop.eup %3157 }
 0x483   :  { %3165 = vrcp.f32 %v1779_v23  ;;  %v1678_v20 = vmul.f32 %v3158_v12, %v3156_v40  ;;  %v3160_v26 = vpop.eup %3159  ;;  %v4690_v23 = vld [vmem:[#allocation42_spill] sm:$0xff] }
 0x484   :  { %v3162_v10 = vpop.eup %3161 }
 0x485   :  { %v1807_v9 = vpack.c.bf16 %v1678_v20, %v1678_v20  ;;  %v1786_v37 = vadd.f32 1.0, %v3162_v10  ;;  %v4691_v20 = vld [vmem:[#allocation40_spill] sm:$0xff] }
 0x487   :  { %1841 = vmatmul.mubr.bf16.vlgmr.msra.gmra.mxu0 %v1807_v9  ;;  %1882 = vmatmul.mubr.bf16.vlgmr.msra.gmra.mxu1 %v1807_v9  ;;  %3167 = vrcp.f32 %v1786_v37 }
 0x488   :  { %1924 = vmatpush1.bf16.msra.mxu0 %v4005_v43  ;;  %1965 = vmatpush1.bf16.msra.mxu1 %v4008_v45 }
 0x489   :  { %1925 = vmatprep.subr.bf16.mxu0 %v4011_v46  ;;  %1966 = vmatprep.subr.bf16.mxu1 %v4014_v47 }
 0x48a   :  { %1955 = vmatprep.mubr.bf16.mxu0 %v4664_v17  ;;  %1996 = vmatprep.mubr.bf16.mxu1 %v4664_v17 }
 0x48c   :  { %1926 = vmatpush1.bf16.msra.mxu0 %v4019_v49  ;;  %1967 = vmatpush1.bf16.msra.mxu1 %v4022_v50 }
 0x48d   :  { %1927 = vmatprep.subr.bf16.mxu0 %v4025_v34  ;;  %1968 = vmatprep.subr.bf16.mxu1 %v4028_v52 }
 0x48e   :  { %v3164_v38 = vpop.eup %3163 }
 0x48f   :  { %v1790_v11 = vmul.f32 %v3164_v38, %v3160_v26 }
 0x490   :  { %v3166_v39 = vpop.eup %3165  ;;  %1928 = vmatpush1.bf16.msra.mxu0 %v4031_v57  ;;  %1969 = vmatpush1.bf16.msra.mxu1 %v4034_v24 }
 0x491   :  { %v1789_v41 = vmul.f32 %v3166_v39, %v4168_v44  ;;  %1929 = vmatprep.subr.bf16.mxu0 %v4038_v16  ;;  %1970 = vmatprep.subr.bf16.mxu1 %v4041_v32 }
 0x493   :  { %v4252_v42 = vadd.f32 %v1790_v11, %v1789_v41 }
 0x494   :  { %1930 = vmatpush1.bf16.msra.mxu0 %v4046_v18  ;;  %1971 = vmatpush1.bf16.msra.mxu1 %v4049_v7  ;;  %v3168_v44 = vpop.eup %3167 }
 0x495   :  { %1931 = vmatprep.subr.bf16.mxu0 %v4052_v62  ;;  %1972 = vmatprep.subr.bf16.mxu1 %v4055_v29  ;;  %3169 = vtanh.f32 %v4252_v42 }
 0x498   :  { %1932 = vmatpush1.bf16.msra.mxu0 %v4059_v28  ;;  %1973 = vmatpush1.bf16.msra.mxu1 %v4062_v30 }
 0x499   :  { %1933 = vmatprep.subr.bf16.mxu0 %v4065_v25  ;;  %1974 = vmatprep.subr.bf16.mxu1 %v4106_v61 }
 0x49c   :  { %1934 = vmatpush1.bf16.msra.mxu0 %v4109_v63  ;;  %1975 = vmatpush1.bf16.msra.mxu1 %v4112_v0 }
 0x49d   :  { %1935 = vmatprep.subr.bf16.mxu0 %v4115_v2  ;;  %1976 = vmatprep.subr.bf16.mxu1 %v4118_v3 }
 0x4a0   :  { %1936 = vmatpush1.bf16.msra.mxu0 %v4121_v4  ;;  %1977 = vmatpush1.bf16.msra.mxu1 %v4124_v5 }
 0x4a1   :  { %1937 = vmatprep.subr.bf16.mxu0 %v4127_v6  ;;  %1978 = vmatprep.subr.bf16.mxu1 %v4130_v13 }
 0x4a2   :  { %v3170_v48 = vpop.eup %3169 }
 0x4a3   :  { %v1793_v51 = vmul.f32 %v3170_v48, %v3168_v44 }
 0x4a4   :  { %1938 = vmatpush1.bf16.msra.mxu0 %v4133_v21  ;;  %1979 = vmatpush1.bf16.msra.mxu1 %v4136_v22 }
 0x4a5   :  { %v1922_v35 = vpack.c.bf16 %v1793_v51, %v1793_v51  ;;  %2047 = vmatprep.subr.bf16.mxu0 %v4079_v59  ;;  %2088 = vmatprep.subr.bf16.mxu1 %v4082_v60  ;;  %v4692_v51 = vld [vmem:[#allocation43_spill] sm:$0xff] }
 0x4a7   :  { %1956 = vmatmul.mubr.bf16.vlgmr.msra.gmra.mxu0 %v1922_v35  ;;  %1997 = vmatmul.mubr.bf16.vlgmr.msra.gmra.mxu1 %v1922_v35 }
 0x4a8   :  { %2048 = vmatpush1.bf16.msra.mxu0 %v4005_v43  ;;  %2089 = vmatpush1.bf16.msra.mxu1 %v4008_v45 }
 0x4a9   :  { %2049 = vmatprep.subr.bf16.mxu0 %v4011_v46  ;;  %2090 = vmatprep.subr.bf16.mxu1 %v4014_v47 }
 0x4aa   :  { %2079 = vmatprep.mubr.bf16.mxu0 %v4664_v17  ;;  %2120 = vmatprep.mubr.bf16.mxu1 %v4664_v17 }
 0x4ac   :  { %2050 = vmatpush1.bf16.msra.mxu0 %v4019_v49  ;;  %2091 = vmatpush1.bf16.msra.mxu1 %v4022_v50 }
 0x4ad   :  { %2051 = vmatprep.subr.bf16.mxu0 %v4025_v34  ;;  %2092 = vmatprep.subr.bf16.mxu1 %v4028_v52 }
 0x4b0   :  { %2052 = vmatpush1.bf16.msra.mxu0 %v4031_v57  ;;  %2093 = vmatpush1.bf16.msra.mxu1 %v4034_v24 }
 0x4b1   :  { %2053 = vmatprep.subr.bf16.mxu0 %v4038_v16  ;;  %2094 = vmatprep.subr.bf16.mxu1 %v4041_v32 }
 0x4b4   :  { %2054 = vmatpush1.bf16.msra.mxu0 %v4046_v18  ;;  %2095 = vmatpush1.bf16.msra.mxu1 %v4049_v7 }
 0x4b5   :  { %2055 = vmatprep.subr.bf16.mxu0 %v4052_v62  ;;  %2096 = vmatprep.subr.bf16.mxu1 %v4055_v29 }
 0x4b8   :  { %2056 = vmatpush1.bf16.msra.mxu0 %v4059_v28  ;;  %2097 = vmatpush1.bf16.msra.mxu1 %v4062_v30 }
 0x4b9   :  { %2057 = vmatprep.subr.bf16.mxu0 %v4065_v25  ;;  %2098 = vmatprep.subr.bf16.mxu1 %v4106_v61 }
 0x4bc   :  { %2058 = vmatpush1.bf16.msra.mxu0 %v4109_v63  ;;  %2099 = vmatpush1.bf16.msra.mxu1 %v4112_v0 }
 0x4bd   :  { %2059 = vmatprep.subr.bf16.mxu0 %v4115_v2  ;;  %2100 = vmatprep.subr.bf16.mxu1 %v4118_v3 }
 0x4c0   :  { %2060 = vmatpush1.bf16.msra.mxu0 %v4121_v4  ;;  %2101 = vmatpush1.bf16.msra.mxu1 %v4124_v5 }
 0x4c1   :  { %2061 = vmatprep.subr.bf16.mxu0 %v4127_v6  ;;  %2102 = vmatprep.subr.bf16.mxu1 %v4130_v13 }
 0x4c4   :  { %2062 = vmatpush1.bf16.msra.mxu0 %v4133_v21  ;;  %2103 = vmatpush1.bf16.msra.mxu1 %v4136_v22 }
 0x4c5   :  { %2162 = vmatprep.subr.bf16.mxu0 %v4079_v59  ;;  %2203 = vmatprep.subr.bf16.mxu1 %v4082_v60 }
 0x547   :  { %v1842_v54 = vpop.f32.mrf.mxu0  ;;  %v1883_v55 = vpop.f32.mrf.mxu1 }
 0x548   :  { %v1890_v1 = vadd.f32 %v1842_v54, %v4688_v56  ;;  %v1892_v9 = vadd.f32 %v1883_v55, %v4691_v20  ;;  %v4694_v20 = vld [vmem:[#allocation46_spill] sm:$0xff] }
 0x549   :  { %v1844_v14 = vpop.f32.mrf.mxu0  ;;  %v1885_v27 = vpop.f32.mrf.mxu1 }
 0x54a   :  { %v2899_v58 = vmul.f32 -1.442695, %v1890_v1  ;;  %v1891_v36 = vadd.f32 %v1844_v14, %v4689_v31  ;;  %v1893_v12 = vadd.f32 %v1885_v27, %v4690_v23  ;;  %v4693_v27 = vld [vmem:[#allocation45_spill] sm:$0xff] }
 0x54b   :  { %v1846_v33 = vpop.f32.mrf.mxu0  ;;  %v1887_v8 = vpop.f32.mrf.mxu1 }
 0x54c   :  { %3171 = vpow2.f32 %v2899_v58  ;;  %v2900_v15 = vmul.f32 -1.442695, %v1891_v36  ;;  %v2901_v26 = vmul.f32 -1.442695, %v1893_v12 }
 0x54d   :  { %v1847_v19 = vpop.f32.mrf.mxu0  ;;  %v1888_v40 = vpop.f32.mrf.mxu1 }
 0x54e   :  { %3173 = vpow2.f32 %v2900_v15 }
 0x54f   :  { %3175 = vtanh.f32 %v1892_v9 }
 0x550   :  { %3177 = vpow2.f32 %v2901_v26  ;;  %v4695_v26 = vld [vmem:[#allocation44_spill] sm:$0xff] }
 0x559   :  { %v3172_v10 = vpop.eup %3171 }
 0x55a   :  { %v1897_v38 = vadd.f32 1.0, %v3172_v10 }
 0x55b   :  { %v3174_v11 = vpop.eup %3173 }
 0x55c   :  { %3179 = vrcp.f32 %v1897_v38  ;;  %v1903_v39 = vadd.f32 1.0, %v3174_v11  ;;  %v3176_v37 = vpop.eup %3175 }
 0x55d   :  { %v3178_v48 = vpop.eup %3177 }
 0x55e   :  { %3181 = vrcp.f32 %v1903_v39  ;;  %v1910_v36 = vadd.f32 1.0, %v3178_v48 }
 0x567   :  { %v1957_v41 = vpop.f32.mrf.mxu0  ;;  %v1998_v44 = vpop.f32.mrf.mxu1 }
 0x568   :  { %v2005_v35 = vadd.f32 %v1957_v41, %v4692_v51  ;;  %v2007_v10 = vadd.f32 %v1998_v44, %v4695_v26 }
 0x569   :  { %v3180_v54 = vpop.eup %3179  ;;  %v1959_v56 = vpop.f32.mrf.mxu0 }
 0x56a   :  { %v2000_v1 = vpop.f32.mrf.mxu1  ;;  %v1914_v14 = vmul.f32 %v3180_v54, %v3176_v37  ;;  %v2902_v55 = vmul.f32 -1.442695, %v2005_v35  ;;  %v2006_v58 = vadd.f32 %v1959_v56, %v4693_v27 }
 0x56b   :  { %v3182_v31 = vpop.eup %3181  ;;  %v1961_v33 = vpop.f32.mrf.mxu0  ;;  %v2008_v9 = vadd.f32 %v2000_v1, %v4694_v20 }
 0x56c   :  { %v2002_v8 = vpop.f32.mrf.mxu1  ;;  %v1913_v15 = vmul.f32 %v3182_v31, %v4232_v53  ;;  %3183 = vpow2.f32 %v2902_v55  ;;  %v2903_v19 = vmul.f32 -1.442695, %v2006_v58 }
 0x56d   :  { %v1962_v40 = vpop.f32.mrf.mxu0  ;;  %v2904_v38 = vmul.f32 -1.442695, %v2008_v9 }
 0x56e   :  { %v2003_v23 = vpop.f32.mrf.mxu1  ;;  %v4316_v12 = vadd.f32 %v1914_v14, %v1913_v15  ;;  %3185 = vpow2.f32 %v2903_v19  ;;  %v4701_v19 = vld [vmem:[#allocation53_spill] sm:$0xff] }
 0x56f   :  { %3187 = vrcp.f32 %v1910_v36 }
 0x570   :  { %3189 = vtanh.f32 %v4316_v12 }
 0x571   :  { %3191 = vtanh.f32 %v2007_v10 }
 0x572   :  { %3193 = vpow2.f32 %v2904_v38 }
 0x579   :  { %v3184_v11 = vpop.eup %3183 }
 0x57a   :  { %v2012_v39 = vadd.f32 1.0, %v3184_v11 }
 0x57b   :  { %v3186_v37 = vpop.eup %3185 }
 0x57c   :  { %v3188_v53 = vpop.eup %3187  ;;  %3195 = vrcp.f32 %v2012_v39  ;;  %v2018_v41 = vadd.f32 1.0, %v3186_v37 }
 0x57d   :  { %v3190_v48 = vpop.eup %3189 }
 0x57e   :  { %3197 = vrcp.f32 %v2018_v41  ;;  %v1917_v51 = vmul.f32 %v3190_v48, %v3188_v53  ;;  %v3192_v44 = vpop.eup %3191  ;;  %v4702_v53 = vld [vmem:[#allocation54_spill] sm:$0xff]  ;;  %v4703_v48 = vld [vmem:[#allocation52_spill] sm:$0xff] }
 0x57f   :  { %v3194_v54 = vpop.eup %3193 }
 0x580   :  { %v2046_v35 = vpack.c.bf16 %v1917_v51, %v1917_v51  ;;  %v2025_v55 = vadd.f32 1.0, %v3194_v54 }
 0x582   :  { %2080 = vmatmul.mubr.bf16.vlgmr.msra.gmra.mxu0 %v2046_v35  ;;  %2121 = vmatmul.mubr.bf16.vlgmr.msra.gmra.mxu1 %v2046_v35  ;;  %3199 = vrcp.f32 %v2025_v55 }
 0x583   :  { %2163 = vmatpush1.bf16.msra.mxu0 %v4005_v43  ;;  %2204 = vmatpush1.bf16.msra.mxu1 %v4008_v45 }
 0x584   :  { %2164 = vmatprep.subr.bf16.mxu0 %v4011_v46  ;;  %2205 = vmatprep.subr.bf16.mxu1 %v4014_v47 }
 0x585   :  { %2194 = vmatprep.mubr.bf16.mxu0 %v4664_v17  ;;  %2235 = vmatprep.mubr.bf16.mxu1 %v4664_v17 }
 0x587   :  { %2165 = vmatpush1.bf16.msra.mxu0 %v4019_v49  ;;  %2206 = vmatpush1.bf16.msra.mxu1 %v4022_v50 }
 0x588   :  { %2166 = vmatprep.subr.bf16.mxu0 %v4025_v34  ;;  %2207 = vmatprep.subr.bf16.mxu1 %v4028_v52 }
 0x589   :  { %v3196_v56 = vpop.eup %3195 }
 0x58a   :  { %v2029_v1 = vmul.f32 %v3196_v56, %v3192_v44 }
 0x58b   :  { %v3198_v14 = vpop.eup %3197  ;;  %2167 = vmatpush1.bf16.msra.mxu0 %v4031_v57  ;;  %2208 = vmatpush1.bf16.msra.mxu1 %v4034_v24 }
 0x58c   :  { %v2028_v27 = vmul.f32 %v3198_v14, %v4252_v42  ;;  %2168 = vmatprep.subr.bf16.mxu0 %v4038_v16  ;;  %2209 = vmatprep.subr.bf16.mxu1 %v4041_v32 }
 0x58e   :  { %v4336_v58 = vadd.f32 %v2029_v1, %v2028_v27 }
 0x58f   :  { %2169 = vmatpush1.bf16.msra.mxu0 %v4046_v18  ;;  %2210 = vmatpush1.bf16.msra.mxu1 %v4049_v7  ;;  %v3200_v42 = vpop.eup %3199 }
 0x590   :  { %2170 = vmatprep.subr.bf16.mxu0 %v4052_v62  ;;  %2211 = vmatprep.subr.bf16.mxu1 %v4055_v29  ;;  %3201 = vtanh.f32 %v4336_v58 }
 0x593   :  { %2171 = vmatpush1.bf16.msra.mxu0 %v4059_v28  ;;  %2212 = vmatpush1.bf16.msra.mxu1 %v4062_v30 }
 0x594   :  { %2172 = vmatprep.subr.bf16.mxu0 %v4065_v25  ;;  %2213 = vmatprep.subr.bf16.mxu1 %v4106_v61 }
 0x597   :  { %2173 = vmatpush1.bf16.msra.mxu0 %v4109_v63  ;;  %2214 = vmatpush1.bf16.msra.mxu1 %v4112_v0 }
 0x598   :  { %2174 = vmatprep.subr.bf16.mxu0 %v4115_v2  ;;  %2215 = vmatprep.subr.bf16.mxu1 %v4118_v3 }
 0x59b   :  { %2175 = vmatpush1.bf16.msra.mxu0 %v4121_v4  ;;  %2216 = vmatpush1.bf16.msra.mxu1 %v4124_v5 }
 0x59c   :  { %2176 = vmatprep.subr.bf16.mxu0 %v4127_v6  ;;  %2217 = vmatprep.subr.bf16.mxu1 %v4130_v13 }
 0x59d   :  { %v3202_v31 = vpop.eup %3201 }
 0x59e   :  { %v2032_v36 = vmul.f32 %v3202_v31, %v3200_v42  ;;  %v4405_v42 = vld [vmem:[#allocation11 + $0xe0] ss:$16 sps:$4 sm:$0xff]   ;;  %v4408_v31 = vld [vmem:[#allocation11 + $0xe8] ss:$16 sps:$4 sm:$0xff]  }
 0x59f   :  { %2177 = vmatpush1.bf16.msra.mxu0 %v4133_v21  ;;  %2218 = vmatpush1.bf16.msra.mxu1 %v4136_v22 }
 0x5a0   :  { %v2161_v33 = vpack.c.bf16 %v2032_v36, %v2032_v36  ;;  %2286 = vmatprep.subr.bf16.mxu0 %v4079_v59  ;;  %2327 = vmatprep.subr.bf16.mxu1 %v4082_v60  ;;  %v4411_v36 = vld [vmem:[#allocation11 + $0xc4] ss:$16 sps:$4 sm:$0xff]  }
 0x5a2   :  { %2195 = vmatmul.mubr.bf16.vlgmr.msra.gmra.mxu0 %v2161_v33  ;;  %2236 = vmatmul.mubr.bf16.vlgmr.msra.gmra.mxu1 %v2161_v33  ;;  %v4414_v33 = vld [vmem:[#allocation11 + $0xcc] ss:$16 sps:$4 sm:$0xff]  }
 0x5a3   :  { %2287 = vmatpush1.bf16.msra.mxu0 %v4005_v43  ;;  %2328 = vmatpush1.bf16.msra.mxu1 %v4008_v45 }
 0x5a4   :  { %2288 = vmatprep.subr.bf16.mxu0 %v4011_v46  ;;  %2329 = vmatprep.subr.bf16.mxu1 %v4014_v47  ;;  %v4696_v46 = vld [vmem:[#allocation47_spill] sm:$0xff] }
 0x5a5   :  { %2318 = vmatprep.mubr.bf16.mxu0 %v4664_v17  ;;  %2359 = vmatprep.mubr.bf16.mxu1 %v4664_v17 }
 0x5a7   :  { %2289 = vmatpush1.bf16.msra.mxu0 %v4019_v49  ;;  %2330 = vmatpush1.bf16.msra.mxu1 %v4022_v50 }
 0x5a8   :  { %2290 = vmatprep.subr.bf16.mxu0 %v4025_v34  ;;  %2331 = vmatprep.subr.bf16.mxu1 %v4028_v52  ;;  %v4697_v52 = vld [vmem:[#allocation49_spill] sm:$0xff] }
 0x5ab   :  { %2291 = vmatpush1.bf16.msra.mxu0 %v4031_v57  ;;  %2332 = vmatpush1.bf16.msra.mxu1 %v4034_v24 }
 0x5ac   :  { %2292 = vmatprep.subr.bf16.mxu0 %v4038_v16  ;;  %2333 = vmatprep.subr.bf16.mxu1 %v4041_v32 }
 0x5af   :  { %2293 = vmatpush1.bf16.msra.mxu0 %v4046_v18  ;;  %2334 = vmatpush1.bf16.msra.mxu1 %v4049_v7 }
 0x5b0   :  { %2294 = vmatprep.subr.bf16.mxu0 %v4052_v62  ;;  %2335 = vmatprep.subr.bf16.mxu1 %v4055_v29  ;;  %v4698_v62 = vld [vmem:[#allocation50_spill] sm:$0xff] }
 0x5b3   :  { %2295 = vmatpush1.bf16.msra.mxu0 %v4059_v28  ;;  %2336 = vmatpush1.bf16.msra.mxu1 %v4062_v30  ;;  %v4699_v28 = vld [vmem:[#allocation48_spill] sm:$0xff] }
 0x5b4   :  { %2296 = vmatprep.subr.bf16.mxu0 %v4065_v25  ;;  %2337 = vmatprep.subr.bf16.mxu1 %v4106_v61 }
 0x5b7   :  { %2297 = vmatpush1.bf16.msra.mxu0 %v4109_v63  ;;  %2338 = vmatpush1.bf16.msra.mxu1 %v4112_v0 }
 0x5b8   :  { %2298 = vmatprep.subr.bf16.mxu0 %v4115_v2  ;;  %2339 = vmatprep.subr.bf16.mxu1 %v4118_v3 }
 0x5bb   :  { %2299 = vmatpush1.bf16.msra.mxu0 %v4121_v4  ;;  %2340 = vmatpush1.bf16.msra.mxu1 %v4124_v5  ;;  %v4700_v5 = vld [vmem:[#allocation51_spill] sm:$0xff] }
 0x5bc   :  { %2300 = vmatprep.subr.bf16.mxu0 %v4127_v6  ;;  %2341 = vmatprep.subr.bf16.mxu1 %v4130_v13 }
 0x5bf   :  { %2301 = vmatpush1.bf16.msra.mxu0 %v4133_v21  ;;  %2342 = vmatpush1.bf16.msra.mxu1 %v4136_v22 }
 0x5c0   :  { %2401 = vmatprep.subr.bf16.mxu0 %v4079_v59  ;;  %2442 = vmatprep.subr.bf16.mxu1 %v4082_v60 }
 0x642   :  { %v2081_v43 = vpop.f32.mrf.mxu0  ;;  %v2122_v45 = vpop.f32.mrf.mxu1 }
 0x643   :  { %v2129_v47 = vadd.f32 %v2081_v43, %v4696_v46  ;;  %v2131_v30 = vadd.f32 %v2122_v45, %v4699_v28  ;;  %v4419_v45 = vld [vmem:[#allocation11 + $0xc0] ss:$16 sps:$4 sm:$0xff]   ;;  %v4422_v46 = vld [vmem:[#allocation11 + $0xc8] ss:$16 sps:$4 sm:$0xff]  }
 0x644   :  { %v2083_v49 = vpop.f32.mrf.mxu0  ;;  %v2124_v50 = vpop.f32.mrf.mxu1  ;;  %v4446_v28 = vld [vmem:[#allocation11 + $0x80] ss:$16 sps:$4 sm:$0xff]  }
 0x645   :  { %v2905_v34 = vmul.f32 -1.442695, %v2129_v47  ;;  %v2130_v57 = vadd.f32 %v2083_v49, %v4697_v52  ;;  %v2132_v29 = vadd.f32 %v2124_v50, %v4698_v62  ;;  %v4425_v49 = vld [vmem:[#allocation11 + $0xa4] ss:$16 sps:$4 sm:$0xff]   ;;  %v4428_v50 = vld [vmem:[#allocation11 + $0xac] ss:$16 sps:$4 sm:$0xff]  }
 0x646   :  { %v2085_v24 = vpop.f32.mrf.mxu0  ;;  %v2126_v16 = vpop.f32.mrf.mxu1  ;;  %v4441_v62 = vld [vmem:[#allocation11 + $0x8c] ss:$16 sps:$4 sm:$0xff]  }
 0x647   :  { %3203 = vpow2.f32 %v2905_v34  ;;  %v2906_v32 = vmul.f32 -1.442695, %v2130_v57  ;;  %v2907_v25 = vmul.f32 -1.442695, %v2132_v29  ;;  %v4431_v16 = vld [vmem:[#allocation11 + $0xa0] ss:$16 sps:$4 sm:$0xff]  }
 0x648   :  { %v2086_v18 = vpop.f32.mrf.mxu0  ;;  %v2127_v7 = vpop.f32.mrf.mxu1 }
 0x649   :  { %3205 = vpow2.f32 %v2906_v32  ;;  %v4434_v32 = vld [vmem:[#allocation11 + $0xa8] ss:$16 sps:$4 sm:$0xff]   ;;  %v4438_v7 = vld [vmem:[#allocation11 + $0x84] ss:$16 sps:$4 sm:$0xff]  }
 0x64a   :  { %3207 = vtanh.f32 %v2131_v30  ;;  %v4449_v30 = vld [vmem:[#allocation11 + $0x88] ss:$16 sps:$4 sm:$0xff]  }
 0x64b   :  { %3209 = vpow2.f32 %v2907_v25  ;;  %v4455_v25 = vld [vmem:[#allocation11 + $0x6c] ss:$16 sps:$4 sm:$0xff]  }
 0x654   :  { %v3204_v59 = vpop.eup %3203 }
 0x655   :  { %v2136_v60 = vadd.f32 1.0, %v3204_v59  ;;  %v4459_v59 = vld [vmem:[#allocation11 + $0x60] ss:$16 sps:$4 sm:$0xff]  }
 0x656   :  { %v3206_v61 = vpop.eup %3205 }
 0x657   :  { %3211 = vrcp.f32 %v2136_v60  ;;  %v2142_v63 = vadd.f32 1.0, %v3206_v61  ;;  %v3208_v0 = vpop.eup %3207  ;;  %v4462_v60 = vld [vmem:[#allocation11 + $0x68] ss:$16 sps:$4 sm:$0xff]   ;;  %v4465_v61 = vld [vmem:[#allocation11 + $0x44] ss:$16 sps:$4 sm:$0xff]  }
 0x658   :  { %v3210_v4 = vpop.eup %3209 }
 0x659   :  { %3213 = vrcp.f32 %v2142_v63  ;;  %v2149_v20 = vadd.f32 1.0, %v3210_v4  ;;  %v4468_v63 = vld [vmem:[#allocation11 + $0x4c] ss:$16 sps:$4 sm:$0xff]  }
 0x65a   :  { %v4480_v4 = vld [vmem:[#allocation11 + $0x2c] ss:$16 sps:$4 sm:$0xff]  }
 0x662   :  { %v2196_v2 = vpop.f32.mrf.mxu0  ;;  %v2237_v3 = vpop.f32.mrf.mxu1 }
 0x663   :  { %v2244_v6 = vadd.f32 %v2196_v2, %v4700_v5  ;;  %v2246_v51 = vadd.f32 %v2237_v3, %v4703_v48  ;;  %v4474_v2 = vld [vmem:[#allocation11 + $0x48] ss:$16 sps:$4 sm:$0xff]   ;;  %v4477_v3 = vld [vmem:[#allocation11 + $0x24] ss:$16 sps:$4 sm:$0xff]   ;;  %v4483_v5 = vld [vmem:[#allocation11 + $0x20] ss:$16 sps:$4 sm:$0xff]  }
 0x664   :  { %v3212_v13 = vpop.eup %3211  ;;  %v2198_v21 = vpop.f32.mrf.mxu0  ;;  %v4705_v48 = vld [vmem:[#allocation57_spill] sm:$0xff] }
 0x665   :  { %v2239_v22 = vpop.f32.mrf.mxu1  ;;  %v2153_v8 = vmul.f32 %v3212_v13, %v3208_v0  ;;  %v2908_v15 = vmul.f32 -1.442695, %v2244_v6  ;;  %v2245_v40 = vadd.f32 %v2198_v21, %v4701_v19  ;;  %v4471_v0 = vld [vmem:[#allocation11 + $0x40] ss:$16 sps:$4 sm:$0xff]   ;;  %v4486_v6 = vld [vmem:[#allocation11 + $0x28] ss:$16 sps:$4 sm:$0xff]  }
 0x666   :  { %v3214_v23 = vpop.eup %3213  ;;  %v2200_v9 = vpop.f32.mrf.mxu0  ;;  %v2247_v41 = vadd.f32 %v2239_v22, %v4702_v53  ;;  %v4489_v21 = vld [vmem:[#allocation11 + $0x4] ss:$16 sps:$4 sm:$0xff]   ;;  %v4492_v22 = vld [vmem:[#allocation11 + $0xc] ss:$16 sps:$4 sm:$0xff]   ;;  %v4495_v19 = vld [vmem:[#allocation11] ss:$16 sps:$4 sm:$0xff]  }
 0x667   :  { %v2241_v26 = vpop.f32.mrf.mxu1  ;;  %v2152_v10 = vmul.f32 %v3214_v23, %v4316_v12  ;;  %3215 = vpow2.f32 %v2908_v15  ;;  %v2909_v38 = vmul.f32 -1.442695, %v2245_v40  ;;  %v4498_v40 = vld [vmem:[#allocation11 + $0x8] ss:$16 sps:$4 sm:$0xff]   ;;  %v3370_v9 = vld [vmem:[#allocation11 + $0xec] ss:$16 sps:$4 sm:$0xff]  }
 0x668   :  { %v2201_v11 = vpop.f32.mrf.mxu0  ;;  %v2910_v35 = vmul.f32 -1.442695, %v2247_v41 }
 0x669   :  { %v2242_v39 = vpop.f32.mrf.mxu1  ;;  %v4400_v37 = vadd.f32 %v2153_v8, %v2152_v10  ;;  %3217 = vpow2.f32 %v2909_v38  ;;  %v4704_v38 = vld [vmem:[#allocation55_spill] sm:$0xff] }
 0x66a   :  { %3219 = vrcp.f32 %v2149_v20  ;;  %v3369_v20 = vld [vmem:[#allocation11 + $0xe4] ss:$16 sps:$4 sm:$0xff]  }
 0x66b   :  { %3221 = vtanh.f32 %v4400_v37 }
 0x66c   :  { %3223 = vtanh.f32 %v2246_v51 }
 0x66d   :  { %3225 = vpow2.f32 %v2910_v35 }
 0x674   :  { %v3216_v44 = vpop.eup %3215 }
 0x675   :  { %v2251_v54 = vadd.f32 1.0, %v3216_v44 }
 0x676   :  { %v3218_v56 = vpop.eup %3217 }
 0x677   :  { %v3220_v12 = vpop.eup %3219  ;;  %3227 = vrcp.f32 %v2251_v54  ;;  %v2257_v1 = vadd.f32 1.0, %v3218_v56 }
 0x678   :  { %v3222_v14 = vpop.eup %3221 }
 0x679   :  { %3229 = vrcp.f32 %v2257_v1  ;;  %v2156_v55 = vmul.f32 %v3222_v14, %v3220_v12  ;;  %v3224_v43 = vpop.eup %3223  ;;  %v4706_v1 = vld [vmem:[#allocation58_spill] sm:$0xff] }
 0x67a   :  { %v3226_v47 = vpop.eup %3225 }
 0x67b   :  { %v2285_v27 = vpack.c.bf16 %v2156_v55, %v2156_v55  ;;  %v2264_v24 = vadd.f32 1.0, %v3226_v47  ;;  %v4707_v55 = vld [vmem:[#allocation56_spill] sm:$0xff] }
 0x67d   :  { %2319 = vmatmul.mubr.bf16.vlgmr.msra.gmra.mxu0 %v2285_v27  ;;  %2360 = vmatmul.mubr.bf16.vlgmr.msra.gmra.mxu1 %v2285_v27  ;;  %3231 = vrcp.f32 %v2264_v24 }
 0x67e   :  { %2402 = vmatpush1.bf16.msra.mxu0 %v4405_v42  ;;  %2443 = vmatpush1.bf16.msra.mxu1 %v4408_v31 }
 0x67f   :  { %2403 = vmatprep.subr.bf16.mxu0 %v4411_v36  ;;  %2444 = vmatprep.subr.bf16.mxu1 %v4414_v33 }
 0x680   :  { %2433 = vmatprep.mubr.bf16.mxu0 %v4664_v17  ;;  %2474 = vmatprep.mubr.bf16.mxu1 %v4664_v17 }
 0x682   :  { %2404 = vmatpush1.bf16.msra.mxu0 %v4419_v45  ;;  %2445 = vmatpush1.bf16.msra.mxu1 %v4422_v46 }
 0x683   :  { %2405 = vmatprep.subr.bf16.mxu0 %v4425_v49  ;;  %2446 = vmatprep.subr.bf16.mxu1 %v4428_v50 }
 0x684   :  { %v3228_v34 = vpop.eup %3227 }
 0x685   :  { %v2268_v52 = vmul.f32 %v3228_v34, %v3224_v43 }
 0x686   :  { %v3230_v57 = vpop.eup %3229  ;;  %2406 = vmatpush1.bf16.msra.mxu0 %v4431_v16  ;;  %2447 = vmatpush1.bf16.msra.mxu1 %v4434_v32 }
 0x687   :  { %v2267_v18 = vmul.f32 %v3230_v57, %v4336_v58  ;;  %2407 = vmatprep.subr.bf16.mxu0 %v4438_v7  ;;  %2448 = vmatprep.subr.bf16.mxu1 %v4441_v62  ;;  %v4452_v58 = vld [vmem:[#allocation11 + $0x64] ss:$16 sps:$4 sm:$0xff]  }
 0x689   :  { %v4444_v29 = vadd.f32 %v2268_v52, %v2267_v18 }
 0x68a   :  { %2408 = vmatpush1.bf16.msra.mxu0 %v4446_v28  ;;  %2449 = vmatpush1.bf16.msra.mxu1 %v4449_v30  ;;  %v3232_v13 = vpop.eup %3231 }
 0x68b   :  { %2409 = vmatprep.subr.bf16.mxu0 %v4452_v58  ;;  %2450 = vmatprep.subr.bf16.mxu1 %v4455_v25  ;;  %3233 = vtanh.f32 %v4444_v29 }
 0x68e   :  { %2410 = vmatpush1.bf16.msra.mxu0 %v4459_v59  ;;  %2451 = vmatpush1.bf16.msra.mxu1 %v4462_v60 }
 0x68f   :  { %2411 = vmatprep.subr.bf16.mxu0 %v4465_v61  ;;  %2452 = vmatprep.subr.bf16.mxu1 %v4468_v63 }
 0x692   :  { %2412 = vmatpush1.bf16.msra.mxu0 %v4471_v0  ;;  %2453 = vmatpush1.bf16.msra.mxu1 %v4474_v2 }
 0x693   :  { %2413 = vmatprep.subr.bf16.mxu0 %v4477_v3  ;;  %2454 = vmatprep.subr.bf16.mxu1 %v4480_v4 }
 0x696   :  { %2414 = vmatpush1.bf16.msra.mxu0 %v4483_v5  ;;  %2455 = vmatpush1.bf16.msra.mxu1 %v4486_v6 }
 0x697   :  { %2415 = vmatprep.subr.bf16.mxu0 %v4489_v21  ;;  %2456 = vmatprep.subr.bf16.mxu1 %v4492_v22 }
 0x698   :  { %v3234_v8 = vpop.eup %3233 }
 0x699   :  { %v2271_v15 = vmul.f32 %v3234_v8, %v3232_v13 }
 0x69a   :  { %2416 = vmatpush1.bf16.msra.mxu0 %v4495_v19  ;;  %2457 = vmatpush1.bf16.msra.mxu1 %v4498_v40 }
 0x69b   :  { %v2400_v23 = vpack.c.bf16 %v2271_v15, %v2271_v15  ;;  %2525 = vmatprep.subr.bf16.mxu0 %v3369_v20  ;;  %2566 = vmatprep.subr.bf16.mxu1 %v3370_v9  ;;  %v4708_v15 = vld [vmem:[#allocation59_spill] sm:$0xff] }
 0x69d   :  { %2434 = vmatmul.mubr.bf16.vlgmr.msra.gmra.mxu0 %v2400_v23  ;;  %2475 = vmatmul.mubr.bf16.vlgmr.msra.gmra.mxu1 %v2400_v23 }
 0x69e   :  { %2526 = vmatpush1.bf16.msra.mxu0 %v4405_v42  ;;  %2567 = vmatpush1.bf16.msra.mxu1 %v4408_v31 }
 0x69f   :  { %2527 = vmatprep.subr.bf16.mxu0 %v4411_v36  ;;  %2568 = vmatprep.subr.bf16.mxu1 %v4414_v33 }
 0x6a0   :  { %2557 = vmatprep.mubr.bf16.mxu0 %v4664_v17  ;;  %2598 = vmatprep.mubr.bf16.mxu1 %v4664_v17 }
 0x6a2   :  { %2528 = vmatpush1.bf16.msra.mxu0 %v4419_v45  ;;  %2569 = vmatpush1.bf16.msra.mxu1 %v4422_v46 }
 0x6a3   :  { %2529 = vmatprep.subr.bf16.mxu0 %v4425_v49  ;;  %2570 = vmatprep.subr.bf16.mxu1 %v4428_v50 }
 0x6a6   :  { %2530 = vmatpush1.bf16.msra.mxu0 %v4431_v16  ;;  %2571 = vmatpush1.bf16.msra.mxu1 %v4434_v32 }
 0x6a7   :  { %2531 = vmatprep.subr.bf16.mxu0 %v4438_v7  ;;  %2572 = vmatprep.subr.bf16.mxu1 %v4441_v62 }
 0x6aa   :  { %2532 = vmatpush1.bf16.msra.mxu0 %v4446_v28  ;;  %2573 = vmatpush1.bf16.msra.mxu1 %v4449_v30 }
 0x6ab   :  { %2533 = vmatprep.subr.bf16.mxu0 %v4452_v58  ;;  %2574 = vmatprep.subr.bf16.mxu1 %v4455_v25 }
 0x6ae   :  { %2534 = vmatpush1.bf16.msra.mxu0 %v4459_v59  ;;  %2575 = vmatpush1.bf16.msra.mxu1 %v4462_v60 }
 0x6af   :  { %2535 = vmatprep.subr.bf16.mxu0 %v4465_v61  ;;  %2576 = vmatprep.subr.bf16.mxu1 %v4468_v63 }
 0x6b2   :  { %2536 = vmatpush1.bf16.msra.mxu0 %v4471_v0  ;;  %2577 = vmatpush1.bf16.msra.mxu1 %v4474_v2 }
 0x6b3   :  { %2537 = vmatprep.subr.bf16.mxu0 %v4477_v3  ;;  %2578 = vmatprep.subr.bf16.mxu1 %v4480_v4 }
 0x6b6   :  { %2538 = vmatpush1.bf16.msra.mxu0 %v4483_v5  ;;  %2579 = vmatpush1.bf16.msra.mxu1 %v4486_v6 }
 0x6b7   :  { %2539 = vmatprep.subr.bf16.mxu0 %v4489_v21  ;;  %2580 = vmatprep.subr.bf16.mxu1 %v4492_v22 }
 0x6ba   :  { %2540 = vmatpush1.bf16.msra.mxu0 %v4495_v19  ;;  %2581 = vmatpush1.bf16.msra.mxu1 %v4498_v40 }
 0x6bb   :  { %2640 = vmatprep.subr.bf16.mxu0 %v3369_v20  ;;  %2681 = vmatprep.subr.bf16.mxu1 %v3370_v9 }
 0x73d   :  { %v2320_v26 = vpop.f32.mrf.mxu0  ;;  %v2361_v10 = vpop.f32.mrf.mxu1 }
 0x73e   :  { %v2368_v11 = vadd.f32 %v2320_v26, %v4704_v38  ;;  %v2370_v27 = vadd.f32 %v2361_v10, %v4707_v55  ;;  %v4711_v55 = vld [vmem:[#allocation60_spill] sm:$0xff] }
 0x73f   :  { %v2322_v39 = vpop.f32.mrf.mxu0  ;;  %v2363_v53 = vpop.f32.mrf.mxu1 }
 0x740   :  { %v2911_v41 = vmul.f32 -1.442695, %v2368_v11  ;;  %v2369_v51 = vadd.f32 %v2322_v39, %v4705_v48  ;;  %v2371_v14 = vadd.f32 %v2363_v53, %v4706_v1  ;;  %v4709_v11 = vld [vmem:[#allocation61_spill] sm:$0xff]  ;;  %v4710_v1 = vld [vmem:[#allocation62_spill] sm:$0xff] }
 0x741   :  { %v2324_v35 = vpop.f32.mrf.mxu0  ;;  %v2365_v44 = vpop.f32.mrf.mxu1 }
 0x742   :  { %3235 = vpow2.f32 %v2911_v41  ;;  %v2912_v54 = vmul.f32 -1.442695, %v2369_v51  ;;  %v2913_v43 = vmul.f32 -1.442695, %v2371_v14 }
 0x743   :  { %v2325_v56 = vpop.f32.mrf.mxu0  ;;  %v2366_v12 = vpop.f32.mrf.mxu1 }
 0x744   :  { %3237 = vpow2.f32 %v2912_v54 }
 0x745   :  { %3239 = vtanh.f32 %v2370_v27 }
 0x746   :  { %3241 = vpow2.f32 %v2913_v43 }
 0x74f   :  { %v3236_v47 = vpop.eup %3235 }
 0x750   :  { %v2375_v34 = vadd.f32 1.0, %v3236_v47 }
 0x751   :  { %v3238_v52 = vpop.eup %3237 }
 0x752   :  { %3243 = vrcp.f32 %v2375_v34  ;;  %v2381_v57 = vadd.f32 1.0, %v3238_v52  ;;  %v3240_v24 = vpop.eup %3239 }
 0x753   :  { %v3242_v8 = vpop.eup %3241 }
 0x754   :  { %3245 = vrcp.f32 %v2381_v57  ;;  %v2388_v41 = vadd.f32 1.0, %v3242_v8 }
 0x75d   :  { %v2435_v18 = vpop.f32.mrf.mxu0  ;;  %v2476_v13 = vpop.f32.mrf.mxu1 }
 0x75e   :  { %v2483_v23 = vadd.f32 %v2435_v18, %v4708_v15  ;;  %v2485_v27 = vadd.f32 %v2476_v13, %v4711_v55 }
 0x75f   :  { %v3244_v20 = vpop.eup %3243  ;;  %v2437_v9 = vpop.f32.mrf.mxu0 }
 0x760   :  { %v2478_v26 = vpop.f32.mrf.mxu1  ;;  %v2392_v38 = vmul.f32 %v3244_v20, %v3240_v24  ;;  %v2914_v10 = vmul.f32 -1.442695, %v2483_v23  ;;  %v2484_v39 = vadd.f32 %v2437_v9, %v4709_v11 }
 0x761   :  { %v3246_v53 = vpop.eup %3245  ;;  %v2439_v48 = vpop.f32.mrf.mxu0  ;;  %v2486_v14 = vadd.f32 %v2478_v26, %v4710_v1 }
 0x762   :  { %v2480_v51 = vpop.f32.mrf.mxu1  ;;  %v2391_v35 = vmul.f32 %v3246_v53, %v4400_v37  ;;  %3247 = vpow2.f32 %v2914_v10  ;;  %v2915_v44 = vmul.f32 -1.442695, %v2484_v39  ;;  %v4716_v10 = vld [vmem:[#allocation67_spill] sm:$0xff] }
 0x763   :  { %v2440_v54 = vpop.f32.mrf.mxu0  ;;  %v2916_v43 = vmul.f32 -1.442695, %v2486_v14 }
 0x764   :  { %v2481_v56 = vpop.f32.mrf.mxu1  ;;  %v4540_v12 = vadd.f32 %v2392_v38, %v2391_v35  ;;  %3249 = vpow2.f32 %v2915_v44  ;;  %v4717_v35 = vld [vmem:[#allocation69_spill] sm:$0xff] }
 0x765   :  { %3251 = vrcp.f32 %v2388_v41 }
 0x766   :  { %3253 = vtanh.f32 %v4540_v12 }
 0x767   :  { %3255 = vtanh.f32 %v2485_v27 }
 0x768   :  { %3257 = vpow2.f32 %v2916_v43 }
 0x76f   :  { %v3248_v47 = vpop.eup %3247 }
 0x770   :  { %v2490_v34 = vadd.f32 1.0, %v3248_v47 }
 0x771   :  { %v3250_v52 = vpop.eup %3249 }
 0x772   :  { %v3252_v37 = vpop.eup %3251  ;;  %3259 = vrcp.f32 %v2490_v34  ;;  %v2496_v57 = vadd.f32 1.0, %v3250_v52  ;;  %v4718_v52 = vld [vmem:[#allocation70_spill] sm:$0xff] }
 0x773   :  { %v3254_v24 = vpop.eup %3253 }
 0x774   :  { %3261 = vrcp.f32 %v2496_v57  ;;  %v2395_v18 = vmul.f32 %v3254_v24, %v3252_v37  ;;  %v3256_v13 = vpop.eup %3255  ;;  %v4719_v57 = vld [vmem:[#allocation68_spill] sm:$0xff] }
 0x775   :  { %v3258_v15 = vpop.eup %3257 }
 0x776   :  { %v2524_v8 = vpack.c.bf16 %v2395_v18, %v2395_v18 }
 0x778   :  { %2558 = vmatmul.mubr.bf16.vlgmr.msra.gmra.mxu0 %v2524_v8  ;;  %2599 = vmatmul.mubr.bf16.vlgmr.msra.gmra.mxu1 %v2524_v8 }
 0x779   :  { %2641 = vmatpush1.bf16.msra.mxu0 %v4405_v42  ;;  %2682 = vmatpush1.bf16.msra.mxu1 %v4408_v31 }
 0x77a   :  { %2642 = vmatprep.subr.bf16.mxu0 %v4411_v36  ;;  %2683 = vmatprep.subr.bf16.mxu1 %v4414_v33  ;;  %v2503_v36 = vadd.f32 1.0, %v3258_v15 }
 0x77b   :  { %2672 = vmatprep.mubr.bf16.mxu0 %v4664_v17  ;;  %2713 = vmatprep.mubr.bf16.mxu1 %v4664_v17 }
 0x77c   :  { %3263 = vrcp.f32 %v2503_v36 }
 0x77d   :  { %2643 = vmatpush1.bf16.msra.mxu0 %v4419_v45  ;;  %2684 = vmatpush1.bf16.msra.mxu1 %v4422_v46 }
 0x77e   :  { %2644 = vmatprep.subr.bf16.mxu0 %v4425_v49  ;;  %2685 = vmatprep.subr.bf16.mxu1 %v4428_v50 }
 0x77f   :  { %v3260_v42 = vpop.eup %3259 }
 0x780   :  { %v2507_v31 = vmul.f32 %v3260_v42, %v3256_v13 }
 0x781   :  { %v3262_v23 = vpop.eup %3261  ;;  %2645 = vmatpush1.bf16.msra.mxu0 %v4431_v16  ;;  %2686 = vmatpush1.bf16.msra.mxu1 %v4434_v32 }
 0x782   :  { %v2506_v17 = vmul.f32 %v3262_v23, %v4444_v29  ;;  %2646 = vmatprep.subr.bf16.mxu0 %v4438_v7  ;;  %2687 = vmatprep.subr.bf16.mxu1 %v4441_v62  ;;  %v4712_v7 = vld [vmem:[#allocation63_spill] sm:$0xff] }
 0x783   :  { %v2923_v23 = vld [vmem:[%s4604_s4] ss:$0 sm:$0xff] }
 0x784   :  { %v4560_v33 = vadd.f32 %v2507_v31, %v2506_v17 }
 0x785   :  { %2647 = vmatpush1.bf16.msra.mxu0 %v4446_v28  ;;  %2688 = vmatpush1.bf16.msra.mxu1 %v4449_v30 }
 0x786   :  { %2648 = vmatprep.subr.bf16.mxu0 %v4452_v58  ;;  %2689 = vmatprep.subr.bf16.mxu1 %v4455_v25  ;;  %3265 = vtanh.f32 %v4560_v33  ;;  %v4713_v58 = vld [vmem:[#allocation65_spill] sm:$0xff] }
 0x789   :  { %2649 = vmatpush1.bf16.msra.mxu0 %v4459_v59  ;;  %2690 = vmatpush1.bf16.msra.mxu1 %v4462_v60  ;;  %v3264_v45 = vpop.eup %3263 }
 0x78a   :  { %2650 = vmatprep.subr.bf16.mxu0 %v4465_v61  ;;  %2691 = vmatprep.subr.bf16.mxu1 %v4468_v63 }
 0x78d   :  { %2651 = vmatpush1.bf16.msra.mxu0 %v4471_v0  ;;  %2692 = vmatpush1.bf16.msra.mxu1 %v4474_v2  ;;  %v4714_v2 = vld [vmem:[#allocation66_spill] sm:$0xff] }
 0x78e   :  { %2652 = vmatprep.subr.bf16.mxu0 %v4477_v3  ;;  %2693 = vmatprep.subr.bf16.mxu1 %v4480_v4  ;;  %v4715_v4 = vld [vmem:[#allocation64_spill] sm:$0xff] }
 0x791   :  { %2653 = vmatpush1.bf16.msra.mxu0 %v4483_v5  ;;  %2694 = vmatpush1.bf16.msra.mxu1 %v4486_v6 }
 0x792   :  { %2654 = vmatprep.subr.bf16.mxu0 %v4489_v21  ;;  %2695 = vmatprep.subr.bf16.mxu1 %v4492_v22 }
 0x793   :  { %v3266_v46 = vpop.eup %3265 }
 0x794   :  { %v2510_v49 = vmul.f32 %v3266_v46, %v3264_v45 }
 0x795   :  { %2655 = vmatpush1.bf16.msra.mxu0 %v4495_v19  ;;  %2696 = vmatpush1.bf16.msra.mxu1 %v4498_v40 }
 0x796   :  { %v2639_v50 = vpack.c.bf16 %v2510_v49, %v2510_v49 }
 0x798   :  { %2673 = vmatmul.mubr.bf16.vlgmr.msra.gmra.mxu0 %v2639_v50  ;;  %2714 = vmatmul.mubr.bf16.vlgmr.msra.gmra.mxu1 %v2639_v50 }
 0x838   :  { %v2559_v16 = vpop.f32.mrf.mxu0  ;;  %v2600_v32 = vpop.f32.mrf.mxu1 }
 0x839   :  { %v2607_v62 = vadd.f32 %v2559_v16, %v4712_v7  ;;  %v2609_v5 = vadd.f32 %v2600_v32, %v4715_v4 }
 0x83a   :  { %v2561_v29 = vpop.f32.mrf.mxu0  ;;  %v2602_v28 = vpop.f32.mrf.mxu1 }
 0x83b   :  { %v2917_v30 = vmul.f32 -1.442695, %v2607_v62  ;;  %v2608_v25 = vadd.f32 %v2561_v29, %v4713_v58  ;;  %v2610_v3 = vadd.f32 %v2602_v28, %v4714_v2 }
 0x83c   :  { %v2563_v59 = vpop.f32.mrf.mxu0  ;;  %v2604_v60 = vpop.f32.mrf.mxu1 }
 0x83d   :  { %3267 = vpow2.f32 %v2917_v30  ;;  %v2918_v61 = vmul.f32 -1.442695, %v2608_v25  ;;  %v2919_v6 = vmul.f32 -1.442695, %v2610_v3  ;;  %v2924_v25 = vld [vmem:[#allocation5] ss:$0 sm:$0xff] }
 0x83e   :  { %v2564_v63 = vpop.f32.mrf.mxu0  ;;  %v2605_v0 = vpop.f32.mrf.mxu1 }
 0x83f   :  { %3269 = vpow2.f32 %v2918_v61 }
 0x840   :  { %3271 = vtanh.f32 %v2609_v5 }
 0x841   :  { %3273 = vpow2.f32 %v2919_v6 }
 0x84a   :  { %v3268_v21 = vpop.eup %3267 }
 0x84b   :  { %v2614_v22 = vadd.f32 1.0, %v3268_v21 }
 0x84c   :  { %v3270_v19 = vpop.eup %3269 }
 0x84d   :  { %3275 = vrcp.f32 %v2614_v22  ;;  %v2620_v40 = vadd.f32 1.0, %v3270_v19  ;;  %v3272_v20 = vpop.eup %3271 }
 0x84e   :  { %v3274_v38 = vpop.eup %3273 }
 0x84f   :  { %3277 = vrcp.f32 %v2620_v40  ;;  %v2627_v56 = vadd.f32 1.0, %v3274_v38 }
 0x858   :  { %v2674_v9 = vpop.f32.mrf.mxu0  ;;  %v2715_v26 = vpop.f32.mrf.mxu1 }
 0x859   :  { %v2722_v11 = vadd.f32 %v2674_v9, %v4716_v10  ;;  %v2724_v24 = vadd.f32 %v2715_v26, %v4719_v57 }
 0x85a   :  { %v3276_v39 = vpop.eup %3275  ;;  %v2676_v53 = vpop.f32.mrf.mxu0 }
 0x85b   :  { %v2717_v41 = vpop.f32.mrf.mxu1  ;;  %v2631_v48 = vmul.f32 %v3276_v39, %v3272_v20  ;;  %v2920_v51 = vmul.f32 -1.442695, %v2722_v11  ;;  %v2723_v44 = vadd.f32 %v2676_v53, %v4717_v35 }
 0x85c   :  { %v3278_v54 = vpop.eup %3277  ;;  %v2678_v1 = vpop.f32.mrf.mxu0  ;;  %v2725_v37 = vadd.f32 %v2717_v41, %v4718_v52 }
 0x85d   :  { %v2719_v14 = vpop.f32.mrf.mxu1  ;;  %3279 = vpow2.f32 %v2920_v51  ;;  %v2921_v55 = vmul.f32 -1.442695, %v2723_v44  ;;  %v2630_v27 = vmul.f32 %v3278_v54, %v4540_v12 }
 0x85e   :  { %v2679_v43 = vpop.f32.mrf.mxu0  ;;  %v2922_v18 = vmul.f32 -1.442695, %v2725_v37 }
 0x85f   :  { %v2720_v47 = vpop.f32.mrf.mxu1  ;;  %3281 = vpow2.f32 %v2921_v55  ;;  %v2632_v34 = vadd.f32 %v2631_v48, %v2630_v27 }
 0x860   :  { %3283 = vrcp.f32 %v2627_v56 }
 0x861   :  { %3285 = vtanh.f32 %v2632_v34 }
 0x862   :  { %3287 = vtanh.f32 %v2724_v24 }
 0x863   :  { %3289 = vpow2.f32 %v2922_v18 }
 0x86a   :  { %v3280_v8 = vpop.eup %3279 }
 0x86b   :  { %v2729_v13 = vadd.f32 1.0, %v3280_v8 }
 0x86c   :  { %v3282_v15 = vpop.eup %3281 }
 0x86d   :  { %v3284_v42 = vpop.eup %3283  ;;  %3291 = vrcp.f32 %v2729_v13  ;;  %v2735_v31 = vadd.f32 1.0, %v3282_v15 }
 0x86e   :  { %v3286_v12 = vpop.eup %3285 }
 0x86f   :  { %3293 = vrcp.f32 %v2735_v31  ;;  %v2634_v36 = vmul.f32 %v3286_v12, %v3284_v42  ;;  %v3288_v45 = vpop.eup %3287 }
 0x870   :  { %v3290_v46 = vpop.eup %3289 }
 0x871   :  { %v2766_v17 = vmul.f32 %v2923_v23, %v2634_v36  ;;  %v2742_v32 = vadd.f32 1.0, %v3290_v46 }
 0x873   :  { %2768 = vadd.xlane.f32.xlu0 %v2766_v17  ;;  %3295 = vrcp.f32 %v2742_v32 }
 0x87a   :  { %v3292_v49 = vpop.eup %3291 }
 0x87b   :  { %v2746_v50 = vmul.f32 %v3292_v49, %v3288_v45 }
 0x87c   :  { %v3294_v16 = vpop.eup %3293 }
 0x87d   :  { %v2745_v7 = vmul.f32 %v3294_v16, %v4560_v33 }
 0x87f   :  { %v2747_v62 = vadd.f32 %v2746_v50, %v2745_v7 }
 0x880   :  { %v3296_v29 = vpop.eup %3295 }
 0x881   :  { %3297 = vtanh.f32 %v2747_v62 }
 0x88e   :  { %v3298_v28 = vpop.eup %3297 }
 0x88f   :  { %v2749_v30 = vmul.f32 %v3298_v28, %v3296_v29 }
 0x891   :  { %v2767_v58 = vmul.f32 %v2923_v23, %v2749_v30 }
 0x893   :  { %2770 = vadd.xlane.f32.xlu0 %v2767_v58 }
 0x8fc   :  { %v2769_v59 = vpop.xlane.xlu0 %2768 }
 0x8fd   :  { %v2779_v60 = vadd.f32 %v2924_v25, %v2769_v59 }
 0x8ff   :  { %v2925_v61 = vmul.f32 -1.442695, %v2779_v60 }
 0x901   :  { %3299 = vpow2.f32 %v2925_v61 }
 0x90e   :  { %v3300_v63 = vpop.eup %3299 }
 0x90f   :  { %v2787_v0 = vadd.f32 1.0, %v3300_v63 }
 0x911   :  { %3301 = vrcp.f32 %v2787_v0 }
 0x91c   :  { %v2771_v2 = vpop.xlane.xlu0 %2770 }
 0x91d   :  { %v2780_v3 = vadd.f32 %v2924_v25, %v2771_v2 }
 0x91e   :  { %v3302_v33 = vpop.eup %3301 }
 0x91f   :  { %2794 = vst.msk [vmem:[%s4606_s6] sm:$0xff] %vm2793_vm0, %v3302_v33  ;;  %v2926_v4 = vmul.f32 -1.442695, %v2780_v3 }
 0x921   :  { %3303 = vpow2.f32 %v2926_v4 }
 0x92e   :  { %v3304_v5 = vpop.eup %3303 }
 0x92f   :  { %v2788_v6 = vadd.f32 1.0, %v3304_v5 }
 0x931   :  { %3305 = vrcp.f32 %v2788_v6 }
 0x93e   :  { %v3306_v21 = vpop.eup %3305 }
 0x93f   :  { %2795 = vst.msk [vmem:[%s4606_s6 + $0x8] sm:$0xff] %vm2793_vm0, %v3306_v21 }
 0x940   :  { %2800 = vsyncpa [#allocation7], 1 }
 0x941   :  { %2801 = vsyncpa [#allocation9], 1 }
 0x942   :  { %2802 = vsyncpa [#allocation12], 1 }

// kernel: tpu_custom_call.1
= control target key start
LH: loop header
LB: loop body
LE: loop exit
PB: predicated region body
PF: predicated region fallthrough
CT: control target
= control target key end

     0   :  { %s4600_s0 = inlined_call_operand.hbm [shape: bf16[8,16,128], index: 0, kind: input, shape index: {}]   ;;  %s4601_s1 = inlined_call_operand.hbm [shape: f32[16,512], index: 1, kind: input, shape index: {}]   ;;  %s4602_s2 = inlined_call_operand.hbm [shape: bf16[128,512], index: 2, kind: input, shape index: {}]   ;;  %s4603_s3 = inlined_call_operand.hbm [shape: bf16[128,512], index: 3, kind: input, shape index: {}]   ;;  %s4604_s4 = inlined_call_operand.vmem [shape: f32[1,128], index: 4, kind: input, shape index: {}]   ;;  %s4605_s5 = inlined_call_operand.<no memory space> [shape: f32[1,1], index: 5, kind: input, shape index: {}]   ;;  %s4606_s6 = inlined_call_operand.vmem [shape: f32[16,1], index: 6, kind: output, shape index: {}]  }
   0x1   :  { %v11_v0 = vstv %s4605_s5 }
   0x2   :  { %12 = vst [vmem:[#allocation5] sm:$0x1] %v11_v0 }
   0x3   :  { %13 = vsyncpa [#allocation7], 0 }
   0x4   :  { %14 = vsyncpa [#allocation9], 0 }
   0x5   :  { %15 = vsyncpa [#allocation12], 0  ;;  %s3457_s23 = smov [#allocation8]  }
   0x6   :  { %s33_s24 = sshll.u32 %s3457_s23, 4  ;;  %s34_s24 = int_to_ptr.vmem [resolvable:$true] %s33_s24 }
   0x7   :  { %s3379_s25 = scalar_lea.vmem %s34_s24, 1024  ;;  %p3384_p1 = scmp.lt.s32.totalorder %s34_s24, %s34_s24 }
   0x8   :  { %p3380_p0 = scmp.ne.s32.totalorder %s34_s24, %s3379_s25  ;;  %p3385_p2 = scmp.lt.s32.totalorder %s3379_s25, %s3379_s25 }
   0xa   :  { %p3386_p3 = por %p3385_p2, %p3384_p1 }
   0xc   :  { %p3387_p4 = pnand %p3386_p3, %p3380_p0 }
   0xe   :  { %3390 = shalt.err (!%p3387_p4)
}
   0xf   :  { %s3458_s26 = smov 512   ;;  %s3459_s27 = smov 32  }
  0x10   :  { %39 = dma.hbm_to_vmem [thread:$0]  %s4601_s1, 1024, %s34_s24, [#allocation9], %s3458_s26, %s3458_s26, %s3459_s27  }
  0x11   :  { %s3460_s5 = smov [#allocation6]  }
  0x12   :  { %s21_s30 = sshll.u32 %s3460_s5, 4  ;;  %s22_s30 = int_to_ptr.vmem [resolvable:$true] %s21_s30 }
  0x13   :  { %s3399_s7 = scalar_lea.vmem %s22_s30, 1024  ;;  %p3404_p6 = scmp.lt.s32.totalorder %s22_s30, %s22_s30 }
  0x14   :  { %p3400_p5 = scmp.ne.s32.totalorder %s22_s30, %s3399_s7  ;;  %p3405_p7 = scmp.lt.s32.totalorder %s3399_s7, %s3399_s7 }
  0x16   :  { %p3406_p8 = por %p3405_p7, %p3404_p6 }
  0x18   :  { %p3407_p9 = pnand %p3406_p8, %p3400_p5 }
  0x1a   :  { %3410 = shalt.err (!%p3407_p9)
}
  0x1b   :  { %s3461_s8 = smov 64   ;;  %s3462_s9 = smov 4  }
  0x1c   :  { %27 = dma.hbm_to_vmem [thread:$0]  %s4600_s0, 1024, %s22_s30, [#allocation7], %s3461_s8, %s3461_s8, %s3462_s9  }
  0x1d   :  { %s3463_s12 = smov [#allocation10]  }
  0x1e   :  { %s45_s13 = sshll.u32 %s3463_s12, 4  ;;  %s46_s13 = int_to_ptr.vmem [resolvable:$true] %s45_s13 }
  0x1f   :  { %s3419_s1 = scalar_lea.vmem %s46_s13, 4096  ;;  %p3424_p11 = scmp.lt.s32.totalorder %s46_s13, %s46_s13 }
  0x20   :  { %p3420_p10 = scmp.ne.s32.totalorder %s46_s13, %s3419_s1  ;;  %p3425_p12 = scmp.lt.s32.totalorder %s3419_s1, %s3419_s1 }
  0x22   :  { %p3426_p13 = por %p3425_p12, %p3424_p11 }
  0x24   :  { %p3427_p0 = pnand %p3426_p13, %p3420_p10 }
  0x26   :  { %3430 = shalt.err (!%p3427_p0)
}
  0x27   :  { %s3464_s14 = smov 256   ;;  %s3465_s15 = smov 16  }
  0x28   :  { %51 = dma.hbm_to_vmem [thread:$0]  %s4602_s2, 4096, %s46_s13, [#allocation9], %s3464_s14, %s3464_s14, %s3465_s15  }
  0x29   :  { %s3466_s18 = smov [#allocation11]  }
  0x2a   :  { %s57_s19 = sshll.u32 %s3466_s18, 4  ;;  %s58_s19 = int_to_ptr.vmem [resolvable:$true] %s57_s19 }
  0x2b   :  { %s3439_s0 = scalar_lea.vmem %s58_s19, 4096  ;;  %p3444_p2 = scmp.lt.s32.totalorder %s58_s19, %s58_s19 }
  0x2c   :  { %p3440_p1 = scmp.ne.s32.totalorder %s58_s19, %s3439_s0  ;;  %p3445_p3 = scmp.lt.s32.totalorder %s3439_s0, %s3439_s0 }
  0x2e   :  { %p3446_p4 = por %p3445_p3, %p3444_p2 }
  0x30   :  { %p3447_p5 = pnand %p3446_p4, %p3440_p1 }
  0x32   :  { %3450 = shalt.err (!%p3447_p5)
}
  0x33   :  { %63 = dma.hbm_to_vmem [thread:$0]  %s4603_s3, 4096, %s58_s19, [#allocation12], %s3464_s14, %s3464_s14, %s3465_s15  }
  0x34   :  { %3451 = dma.done.wait [#allocation7], 1024  }
  0x35   :  { %3452 = vsyncadd [#allocation7], 4294966272 }
  0x36   :  { %3453 = dma.done.wait [#allocation9], 5120  }
  0x37   :  { %3454 = vsyncadd [#allocation9], 4294962176 }
  0x38   :  { %3455 = dma.done.wait [#allocation12], 4096  }
  0x39   :  { %3456 = vsyncadd [#allocation12], 4294963200  ;;  %v4607_v1 = vmov 0   ;;  %v2939_v2 = vld [vmem:[#allocation10 + $0xe4] ss:$16 sps:$4 sm:$0xff]   ;;  %v2991_v44 = vld [vmem:[#allocation6 + $0x8] sm:$0xff]  }
  0x3a   :  { %377 = vmatprep.mubr.bf16.mxu0 %v4607_v1  ;;  %490 = vmatprep.mubr.bf16.mxu1 %v4607_v1  ;;  %v2941_v3 = vld [vmem:[#allocation10 + $0xec] ss:$16 sps:$4 sm:$0xff]   ;;  %v2943_v4 = vld [vmem:[#allocation10 + $0xe0] ss:$16 sps:$4 sm:$0xff]   ;;  %v2944_v5 = vld [vmem:[#allocation10 + $0xe8] ss:$16 sps:$4 sm:$0xff]  }
  0x3b   :  { %345 = vmatprep.subr.bf16.mxu0 %v2939_v2  ;;  %458 = vmatprep.subr.bf16.mxu1 %v2941_v3  ;;  %v2945_v6 = vld [vmem:[#allocation10 + $0xc4] ss:$16 sps:$4 sm:$0xff]   ;;  %v2947_v7 = vld [vmem:[#allocation10 + $0xcc] ss:$16 sps:$4 sm:$0xff]   ;;  %v2949_v8 = vld [vmem:[#allocation10 + $0xc0] ss:$16 sps:$4 sm:$0xff]  }
  0x3c   :  { %346 = vmatpush1.bf16.msra.mxu0 %v2943_v4  ;;  %459 = vmatpush1.bf16.msra.mxu1 %v2944_v5  ;;  %v2950_v9 = vld [vmem:[#allocation10 + $0xc8] ss:$16 sps:$4 sm:$0xff]   ;;  %v2951_v10 = vld [vmem:[#allocation10 + $0xa4] ss:$16 sps:$4 sm:$0xff]   ;;  %v2953_v11 = vld [vmem:[#allocation10 + $0xac] ss:$16 sps:$4 sm:$0xff]  }
  0x3d   :  { %347 = vmatprep.subr.bf16.mxu0 %v2945_v6  ;;  %460 = vmatprep.subr.bf16.mxu1 %v2947_v7  ;;  %v2955_v12 = vld [vmem:[#allocation10 + $0xa0] ss:$16 sps:$4 sm:$0xff]   ;;  %v2956_v13 = vld [vmem:[#allocation10 + $0xa8] ss:$16 sps:$4 sm:$0xff]   ;;  %v2957_v14 = vld [vmem:[#allocation10 + $0x84] ss:$16 sps:$4 sm:$0xff]  }
  0x3e   :  { %v2959_v15 = vld [vmem:[#allocation10 + $0x8c] ss:$16 sps:$4 sm:$0xff]   ;;  %v2961_v16 = vld [vmem:[#allocation10 + $0x80] ss:$16 sps:$4 sm:$0xff]   ;;  %v2962_v17 = vld [vmem:[#allocation10 + $0x88] ss:$16 sps:$4 sm:$0xff]  }
  0x3f   :  { %v2963_v18 = vld [vmem:[#allocation10 + $0x64] ss:$16 sps:$4 sm:$0xff]   ;;  %v2965_v19 = vld [vmem:[#allocation10 + $0x6c] ss:$16 sps:$4 sm:$0xff]   ;;  %v2967_v20 = vld [vmem:[#allocation10 + $0x60] ss:$16 sps:$4 sm:$0xff]  }
  0x40   :  { %348 = vmatpush1.bf16.msra.mxu0 %v2949_v8  ;;  %461 = vmatpush1.bf16.msra.mxu1 %v2950_v9  ;;  %v2968_v21 = vld [vmem:[#allocation10 + $0x68] ss:$16 sps:$4 sm:$0xff]   ;;  %v2969_v22 = vld [vmem:[#allocation10 + $0x44] ss:$16 sps:$4 sm:$0xff]   ;;  %v2971_v23 = vld [vmem:[#allocation10 + $0x4c] ss:$16 sps:$4 sm:$0xff]  }
  0x41   :  { %349 = vmatprep.subr.bf16.mxu0 %v2951_v10  ;;  %462 = vmatprep.subr.bf16.mxu1 %v2953_v11  ;;  %v2973_v24 = vld [vmem:[#allocation10 + $0x40] ss:$16 sps:$4 sm:$0xff]   ;;  %v2974_v25 = vld [vmem:[#allocation10 + $0x48] ss:$16 sps:$4 sm:$0xff]   ;;  %v2975_v26 = vld [vmem:[#allocation10 + $0x24] ss:$16 sps:$4 sm:$0xff]  }
  0x42   :  { %v2977_v27 = vld [vmem:[#allocation10 + $0x2c] ss:$16 sps:$4 sm:$0xff]   ;;  %v2979_v28 = vld [vmem:[#allocation10 + $0x20] ss:$16 sps:$4 sm:$0xff]   ;;  %v2980_v29 = vld [vmem:[#allocation10 + $0x28] ss:$16 sps:$4 sm:$0xff]  }
  0x43   :  { %v2981_v30 = vld [vmem:[#allocation10 + $0x4] ss:$16 sps:$4 sm:$0xff]   ;;  %v2983_v31 = vld [vmem:[#allocation10 + $0xc] ss:$16 sps:$4 sm:$0xff]   ;;  %v2985_v32 = vld [vmem:[#allocation10] ss:$16 sps:$4 sm:$0xff]  }
  0x44   :  { %350 = vmatpush1.bf16.msra.mxu0 %v2955_v12  ;;  %463 = vmatpush1.bf16.msra.mxu1 %v2956_v13  ;;  %v2986_v33 = vld [vmem:[#allocation10 + $0x8] ss:$16 sps:$4 sm:$0xff]   ;;  %v3521_v34 = vld [vmem:[#allocation11 + $0xe4] ss:$16 sps:$4 sm:$0xff]   ;;  %v3523_v35 = vld [vmem:[#allocation11 + $0xec] ss:$16 sps:$4 sm:$0xff]  }
  0x45   :  { %351 = vmatprep.subr.bf16.mxu0 %v2957_v14  ;;  %464 = vmatprep.subr.bf16.mxu1 %v2959_v15  ;;  %v2987_v36 = vld [vmem:[#allocation6] sm:$0xff]   ;;  %v3531_v39 = vld [vmem:[#allocation11 + $0xe8] ss:$16 sps:$4 sm:$0xff]   ;;  %v3533_v40 = vld [vmem:[#allocation11 + $0xcc] ss:$16 sps:$4 sm:$0xff]   ;;  %v3468_v11 = vmov 0.0|0.0  }
  0x46   :  { %v3525_v37 = vld [vmem:[#allocation11 + $0xe0] ss:$16 sps:$4 sm:$0xff]   ;;  %v3528_v38 = vld [vmem:[#allocation11 + $0xc4] ss:$16 sps:$4 sm:$0xff]   ;;  %v3544_v43 = vld [vmem:[#allocation11 + $0xc8] ss:$16 sps:$4 sm:$0xff]  }
  0x47   :  { %v3537_v41 = vld [vmem:[#allocation11 + $0xc0] ss:$16 sps:$4 sm:$0xff]   ;;  %v3541_v42 = vld [vmem:[#allocation11 + $0xa4] ss:$16 sps:$4 sm:$0xff]   ;;  %v3553_v47 = vld [vmem:[#allocation11 + $0xac] ss:$16 sps:$4 sm:$0xff]  }
  0x48   :  { %352 = vmatpush1.bf16.msra.mxu0 %v2961_v16  ;;  %465 = vmatpush1.bf16.msra.mxu1 %v2962_v17  ;;  %v3548_v45 = vld [vmem:[#allocation11 + $0xa0] ss:$16 sps:$4 sm:$0xff]   ;;  %v3550_v46 = vld [vmem:[#allocation11 + $0x84] ss:$16 sps:$4 sm:$0xff]   ;;  %v3556_v48 = vld [vmem:[#allocation11 + $0xa8] ss:$16 sps:$4 sm:$0xff]  }
  0x49   :  { %353 = vmatprep.subr.bf16.mxu0 %v2963_v18  ;;  %466 = vmatprep.subr.bf16.mxu1 %v2965_v19  ;;  %v3558_v49 = vld [vmem:[#allocation11 + $0x8c] ss:$16 sps:$4 sm:$0xff]   ;;  %v3563_v50 = vld [vmem:[#allocation11 + $0x80] ss:$16 sps:$4 sm:$0xff]   ;;  %v3565_v51 = vld [vmem:[#allocation11 + $0x64] ss:$16 sps:$4 sm:$0xff]  }
  0x4a   :  { %v3570_v52 = vld [vmem:[#allocation11 + $0x88] ss:$16 sps:$4 sm:$0xff]   ;;  %v2995_v53 = vld [vmem:[#allocation6 + $0x10] sm:$0xff]   ;;  %v3576_v55 = vld [vmem:[#allocation11 + $0x6c] ss:$16 sps:$4 sm:$0xff]   ;;  %vm2793_vm0 = vcmask 7168  }
  0x4b   :  { %v3573_v54 = vld [vmem:[#allocation11 + $0x60] ss:$16 sps:$4 sm:$0xff]   ;;  %v3579_v56 = vld [vmem:[#allocation11 + $0x44] ss:$16 sps:$4 sm:$0xff]   ;;  %v3582_v57 = vld [vmem:[#allocation11 + $0x68] ss:$16 sps:$4 sm:$0xff]  }
  0x4c   :  { %354 = vmatpush1.bf16.msra.mxu0 %v2967_v20  ;;  %467 = vmatpush1.bf16.msra.mxu1 %v2968_v21  ;;  %v3584_v58 = vld [vmem:[#allocation11 + $0x4c] ss:$16 sps:$4 sm:$0xff]   ;;  %v3589_v59 = vld [vmem:[#allocation11 + $0x40] ss:$16 sps:$4 sm:$0xff]   ;;  %v3593_v60 = vld [vmem:[#allocation11 + $0x24] ss:$16 sps:$4 sm:$0xff]  }
  0x4d   :  { %355 = vmatprep.subr.bf16.mxu0 %v2969_v22  ;;  %468 = vmatprep.subr.bf16.mxu1 %v2971_v23  ;;  %v3596_v61 = vld [vmem:[#allocation11 + $0x48] ss:$16 sps:$4 sm:$0xff]   ;;  %v3600_v63 = vld [vmem:[#allocation11 + $0x20] ss:$16 sps:$4 sm:$0xff]   ;;  %v3602_v0 = vld [vmem:[#allocation11 + $0x2c] ss:$16 sps:$4 sm:$0xff]  }
  0x4e   :  { %v3002_v62 = vld [vmem:[#allocation6 + $0x18] sm:$0xff]   ;;  %v3606_v2 = vld [vmem:[#allocation11 + $0x4] ss:$16 sps:$4 sm:$0xff]   ;;  %v3616_v5 = vld [vmem:[#allocation11] ss:$16 sps:$4 sm:$0xff]  }
  0x4f   :  { %v3608_v3 = vld [vmem:[#allocation11 + $0x28] ss:$16 sps:$4 sm:$0xff]   ;;  %v3610_v4 = vld [vmem:[#allocation11 + $0xc] ss:$16 sps:$4 sm:$0xff]   ;;  %v3009_v7 = vld [vmem:[#allocation6 + $0x20] sm:$0xff]  }
  0x50   :  { %356 = vmatpush1.bf16.msra.mxu0 %v2973_v24  ;;  %469 = vmatpush1.bf16.msra.mxu1 %v2974_v25  ;;  %v3620_v6 = vld [vmem:[#allocation11 + $0x8] ss:$16 sps:$4 sm:$0xff]   ;;  %v3025_v9 = vld [vmem:[#allocation6 + $0x30] sm:$0xff]   ;;  %v3719_v20 = vld [vmem:[#allocation8] sm:$0xff] }
  0x51   :  { %357 = vmatprep.subr.bf16.mxu0 %v2975_v26  ;;  %470 = vmatprep.subr.bf16.mxu1 %v2977_v27  ;;  %v3016_v8 = vld [vmem:[#allocation6 + $0x28] sm:$0xff]   ;;  %v3035_v10 = vld [vmem:[#allocation6 + $0x38] sm:$0xff]   ;;  %v3721_v21 = vld [vmem:[#allocation8 + $0x10] sm:$0xff] }
  0x52   :  { %v3729_v26 = vld [vmem:[#allocation8 + $0x8] sm:$0xff]  ;;  %v3731_v27 = vld [vmem:[#allocation8 + $0x18] sm:$0xff] }
  0x54   :  { %358 = vmatpush1.bf16.msra.mxu0 %v2979_v28  ;;  %471 = vmatpush1.bf16.msra.mxu1 %v2980_v29 }
  0x55   :  { %359 = vmatprep.subr.bf16.mxu0 %v2981_v30  ;;  %472 = vmatprep.subr.bf16.mxu1 %v2983_v31 }
  0x58   :  { %360 = vmatpush1.bf16.msra.mxu0 %v2985_v32  ;;  %473 = vmatpush1.bf16.msra.mxu1 %v2986_v33  ;;  %v3739_v32 = vld [vmem:[#allocation8 + $0x20] sm:$0xff]  ;;  %v3741_v33 = vld [vmem:[#allocation8 + $0x30] sm:$0xff] }
  0x59   :  { %852 = vmatprep.subr.bf16.mxu0 %v3521_v34  ;;  %893 = vmatprep.subr.bf16.mxu1 %v3523_v35 }
  0x5b   :  { %378 = vmatmul.mubr.bf16.vlgmr.msra.gmra.mxu0 %v2987_v36  ;;  %491 = vmatmul.mubr.bf16.vlgmr.msra.gmra.mxu1 %v2987_v36 }
  0x5c   :  { %853 = vmatpush1.bf16.msra.mxu0 %v3525_v37  ;;  %387 = vmatprep.mubr.bf16.mxu0 %v4607_v1 }
  0x5d   :  { %500 = vmatprep.mubr.bf16.mxu1 %v4607_v1  ;;  %854 = vmatprep.subr.bf16.mxu0 %v3528_v38 }
  0x5e   :  { %894 = vmatpush1.bf16.msra.mxu1 %v3531_v39 }
  0x5f   :  { %895 = vmatprep.subr.bf16.mxu1 %v3533_v40 }
  0x60   :  { %855 = vmatpush1.bf16.msra.mxu0 %v3537_v41 }
  0x61   :  { %856 = vmatprep.subr.bf16.mxu0 %v3541_v42 }
  0x62   :  { %896 = vmatpush1.bf16.msra.mxu1 %v3544_v43 }
  0x63   :  { %388 = vmatmul.mubr.bf16.gmra.mxu0 %v2991_v44  ;;  %501 = vmatmul.mubr.bf16.gmra.mxu1 %v2991_v44 }
  0x64   :  { %397 = vmatprep.mubr.bf16.mxu0 %v4607_v1  ;;  %510 = vmatprep.mubr.bf16.mxu1 %v4607_v1 }
  0x65   :  { %857 = vmatpush1.bf16.msra.mxu0 %v3548_v45  ;;  %897 = vmatprep.subr.bf16.mxu1 %v3553_v47 }
  0x66   :  { %858 = vmatprep.subr.bf16.mxu0 %v3550_v46  ;;  %898 = vmatpush1.bf16.msra.mxu1 %v3556_v48 }
  0x67   :  { %899 = vmatprep.subr.bf16.mxu1 %v3558_v49 }
  0x69   :  { %859 = vmatpush1.bf16.msra.mxu0 %v3563_v50 }
  0x6a   :  { %860 = vmatprep.subr.bf16.mxu0 %v3565_v51  ;;  %900 = vmatpush1.bf16.msra.mxu1 %v3570_v52 }
  0x6b   :  { %398 = vmatmul.mubr.bf16.gmra.mxu0 %v2995_v53  ;;  %511 = vmatmul.mubr.bf16.gmra.mxu1 %v2995_v53 }
  0x6c   :  { %407 = vmatprep.mubr.bf16.mxu0 %v4607_v1  ;;  %520 = vmatprep.mubr.bf16.mxu1 %v4607_v1 }
  0x6d   :  { %861 = vmatpush1.bf16.msra.mxu0 %v3573_v54  ;;  %901 = vmatprep.subr.bf16.mxu1 %v3576_v55 }
  0x6e   :  { %862 = vmatprep.subr.bf16.mxu0 %v3579_v56  ;;  %902 = vmatpush1.bf16.msra.mxu1 %v3582_v57 }
  0x6f   :  { %903 = vmatprep.subr.bf16.mxu1 %v3584_v58 }
  0x71   :  { %863 = vmatpush1.bf16.msra.mxu0 %v3589_v59 }
  0x72   :  { %864 = vmatprep.subr.bf16.mxu0 %v3593_v60  ;;  %904 = vmatpush1.bf16.msra.mxu1 %v3596_v61 }
  0x73   :  { %408 = vmatmul.mubr.bf16.gmra.mxu0 %v3002_v62  ;;  %521 = vmatmul.mubr.bf16.gmra.mxu1 %v3002_v62 }
  0x74   :  { %417 = vmatprep.mubr.bf16.mxu0 %v4607_v1  ;;  %530 = vmatprep.mubr.bf16.mxu1 %v4607_v1 }
  0x75   :  { %865 = vmatpush1.bf16.msra.mxu0 %v3600_v63  ;;  %905 = vmatprep.subr.bf16.mxu1 %v3602_v0 }
  0x76   :  { %866 = vmatprep.subr.bf16.mxu0 %v3606_v2  ;;  %906 = vmatpush1.bf16.msra.mxu1 %v3608_v3 }
  0x77   :  { %907 = vmatprep.subr.bf16.mxu1 %v3610_v4 }
  0x79   :  { %867 = vmatpush1.bf16.msra.mxu0 %v3616_v5 }
  0x7a   :  { %908 = vmatpush1.bf16.msra.mxu1 %v3620_v6  ;;  %967 = vmatprep.subr.bf16.mxu0 %v3521_v34 }
  0x7b   :  { %418 = vmatmul.mubr.bf16.gmra.mxu0 %v3009_v7  ;;  %531 = vmatmul.mubr.bf16.gmra.mxu1 %v3009_v7  ;;  %v3749_v7 = vld [vmem:[#allocation8 + $0x28] sm:$0xff] }
  0x7c   :  { %427 = vmatprep.mubr.bf16.mxu0 %v4607_v1  ;;  %540 = vmatprep.mubr.bf16.mxu1 %v4607_v1 }
  0x7d   :  { %1008 = vmatprep.subr.bf16.mxu1 %v3523_v35 }
  0x83   :  { %428 = vmatmul.mubr.bf16.gmra.mxu0 %v3016_v8  ;;  %541 = vmatmul.mubr.bf16.gmra.mxu1 %v3016_v8  ;;  %v3751_v8 = vld [vmem:[#allocation8 + $0x38] sm:$0xff] }
  0x84   :  { %437 = vmatprep.mubr.bf16.mxu0 %v4607_v1  ;;  %550 = vmatprep.mubr.bf16.mxu1 %v4607_v1 }
  0x8b   :  { %438 = vmatmul.mubr.bf16.gmra.mxu0 %v3025_v9  ;;  %551 = vmatmul.mubr.bf16.gmra.mxu1 %v3025_v9 }
  0x8c   :  { %447 = vmatprep.mubr.bf16.mxu0 %v4607_v1  ;;  %560 = vmatprep.mubr.bf16.mxu1 %v4607_v1 }
  0x93   :  { %448 = vmatmul.mubr.bf16.gmra.mxu0 %v3035_v10  ;;  %561 = vmatmul.mubr.bf16.gmra.mxu1 %v3035_v10 }
  0x94   :  { %884 = vmatprep.mubr.bf16.mxu0 %v4607_v1  ;;  %925 = vmatprep.mubr.bf16.mxu1 %v4607_v1 }
  0x9b   :  { %885 = vmatmul.mubr.bf16.vlgmr.msra.gmra.mxu0 %v3468_v11  ;;  %926 = vmatmul.mubr.bf16.vlgmr.msra.gmra.mxu1 %v3468_v11 }
  0x9c   :  { %968 = vmatpush1.bf16.msra.mxu0 %v3525_v37  ;;  %1009 = vmatpush1.bf16.msra.mxu1 %v3531_v39 }
  0x9d   :  { %969 = vmatprep.subr.bf16.mxu0 %v3528_v38  ;;  %1010 = vmatprep.subr.bf16.mxu1 %v3533_v40 }
  0x9e   :  { %999 = vmatprep.mubr.bf16.mxu0 %v4607_v1  ;;  %1040 = vmatprep.mubr.bf16.mxu1 %v4607_v1 }
  0xa0   :  { %970 = vmatpush1.bf16.msra.mxu0 %v3537_v41  ;;  %1011 = vmatpush1.bf16.msra.mxu1 %v3544_v43 }
  0xa1   :  { %971 = vmatprep.subr.bf16.mxu0 %v3541_v42  ;;  %1012 = vmatprep.subr.bf16.mxu1 %v3553_v47 }
  0xa4   :  { %972 = vmatpush1.bf16.msra.mxu0 %v3548_v45  ;;  %1013 = vmatpush1.bf16.msra.mxu1 %v3556_v48 }
  0xa5   :  { %973 = vmatprep.subr.bf16.mxu0 %v3550_v46  ;;  %1014 = vmatprep.subr.bf16.mxu1 %v3558_v49 }
  0xa8   :  { %974 = vmatpush1.bf16.msra.mxu0 %v3563_v50  ;;  %1015 = vmatpush1.bf16.msra.mxu1 %v3570_v52 }
  0xa9   :  { %975 = vmatprep.subr.bf16.mxu0 %v3565_v51  ;;  %1016 = vmatprep.subr.bf16.mxu1 %v3576_v55 }
  0xac   :  { %976 = vmatpush1.bf16.msra.mxu0 %v3573_v54  ;;  %1017 = vmatpush1.bf16.msra.mxu1 %v3582_v57 }
  0xad   :  { %977 = vmatprep.subr.bf16.mxu0 %v3579_v56  ;;  %1018 = vmatprep.subr.bf16.mxu1 %v3584_v58 }
  0xb0   :  { %978 = vmatpush1.bf16.msra.mxu0 %v3589_v59  ;;  %1019 = vmatpush1.bf16.msra.mxu1 %v3596_v61 }
  0xb1   :  { %979 = vmatprep.subr.bf16.mxu0 %v3593_v60  ;;  %1020 = vmatprep.subr.bf16.mxu1 %v3602_v0 }
  0xb4   :  { %980 = vmatpush1.bf16.msra.mxu0 %v3600_v63  ;;  %1021 = vmatpush1.bf16.msra.mxu1 %v3608_v3 }
  0xb5   :  { %981 = vmatprep.subr.bf16.mxu0 %v3606_v2  ;;  %1022 = vmatprep.subr.bf16.mxu1 %v3610_v4 }
  0xb8   :  { %982 = vmatpush1.bf16.msra.mxu0 %v3616_v5  ;;  %1023 = vmatpush1.bf16.msra.mxu1 %v3620_v6 }
  0xb9   :  { %1091 = vmatprep.subr.bf16.mxu0 %v3521_v34  ;;  %1132 = vmatprep.subr.bf16.mxu1 %v3523_v35 }
  0xbb   :  { %1000 = vmatmul.mubr.bf16.vlgmr.msra.gmra.mxu0 %v3468_v11  ;;  %1041 = vmatmul.mubr.bf16.vlgmr.msra.gmra.mxu1 %v3468_v11 }
  0xbc   :  { %1092 = vmatpush1.bf16.msra.mxu0 %v3525_v37  ;;  %1133 = vmatpush1.bf16.msra.mxu1 %v3531_v39 }
  0xbd   :  { %1093 = vmatprep.subr.bf16.mxu0 %v3528_v38  ;;  %1134 = vmatprep.subr.bf16.mxu1 %v3533_v40 }
  0xbe   :  { %1123 = vmatprep.mubr.bf16.mxu0 %v4607_v1  ;;  %1164 = vmatprep.mubr.bf16.mxu1 %v4607_v1 }
  0xc0   :  { %1094 = vmatpush1.bf16.msra.mxu0 %v3537_v41  ;;  %1135 = vmatpush1.bf16.msra.mxu1 %v3544_v43 }
  0xc1   :  { %1095 = vmatprep.subr.bf16.mxu0 %v3541_v42  ;;  %1136 = vmatprep.subr.bf16.mxu1 %v3553_v47 }
  0xc4   :  { %1096 = vmatpush1.bf16.msra.mxu0 %v3548_v45  ;;  %1137 = vmatpush1.bf16.msra.mxu1 %v3556_v48 }
  0xc5   :  { %1097 = vmatprep.subr.bf16.mxu0 %v3550_v46  ;;  %1138 = vmatprep.subr.bf16.mxu1 %v3558_v49 }
  0xc8   :  { %1098 = vmatpush1.bf16.msra.mxu0 %v3563_v50  ;;  %1139 = vmatpush1.bf16.msra.mxu1 %v3570_v52 }
  0xc9   :  { %1099 = vmatprep.subr.bf16.mxu0 %v3565_v51  ;;  %1140 = vmatprep.subr.bf16.mxu1 %v3576_v55 }
  0xcc   :  { %1100 = vmatpush1.bf16.msra.mxu0 %v3573_v54  ;;  %1141 = vmatpush1.bf16.msra.mxu1 %v3582_v57 }
  0xcd   :  { %1101 = vmatprep.subr.bf16.mxu0 %v3579_v56  ;;  %1142 = vmatprep.subr.bf16.mxu1 %v3584_v58 }
  0xd0   :  { %1102 = vmatpush1.bf16.msra.mxu0 %v3589_v59  ;;  %1143 = vmatpush1.bf16.msra.mxu1 %v3596_v61 }
  0xd1   :  { %1103 = vmatprep.subr.bf16.mxu0 %v3593_v60  ;;  %1144 = vmatprep.subr.bf16.mxu1 %v3602_v0 }
  0xd4   :  { %1104 = vmatpush1.bf16.msra.mxu0 %v3600_v63  ;;  %1145 = vmatpush1.bf16.msra.mxu1 %v3608_v3 }
  0xd5   :  { %1105 = vmatprep.subr.bf16.mxu0 %v3606_v2  ;;  %1146 = vmatprep.subr.bf16.mxu1 %v3610_v4 }
  0xd8   :  { %1106 = vmatpush1.bf16.msra.mxu0 %v3616_v5  ;;  %1147 = vmatpush1.bf16.msra.mxu1 %v3620_v6 }
  0xd9   :  { %1206 = vmatprep.subr.bf16.mxu0 %v3521_v34  ;;  %1247 = vmatprep.subr.bf16.mxu1 %v3523_v35 }
 0x11b   :  { %v3703_v12 = vpop.f32.mrf.mxu0  ;;  %v3705_v13 = vpop.f32.mrf.mxu1 }
 0x11d   :  { %v3707_v14 = vpop.f32.mrf.mxu0  ;;  %v3709_v15 = vpop.f32.mrf.mxu1 }
 0x11f   :  { %v3711_v16 = vpop.f32.mrf.mxu0  ;;  %v3713_v17 = vpop.f32.mrf.mxu1 }
 0x121   :  { %v3715_v18 = vpop.f32.mrf.mxu0  ;;  %v3717_v19 = vpop.f32.mrf.mxu1 }
 0x123   :  { %v389_v22 = vpop.f32.mrf.mxu0  ;;  %v502_v23 = vpop.f32.mrf.mxu1 }
 0x124   :  { %v3724_v24 = vadd.f32 %v3719_v20, %v389_v22  ;;  %v3727_v25 = vadd.f32 %v3721_v21, %v502_v23 }
 0x125   :  { %v391_v28 = vpop.f32.mrf.mxu0  ;;  %v504_v29 = vpop.f32.mrf.mxu1 }
 0x126   :  { %4609 = vst [vmem:[#allocation16_spill] sm:$0xff] %v3727_v25  ;;  %v3734_v30 = vadd.f32 %v3729_v26, %v391_v28  ;;  %v3737_v31 = vadd.f32 %v3731_v27, %v504_v29 }
 0x127   :  { %v393_v36 = vpop.f32.mrf.mxu0  ;;  %v506_v44 = vpop.f32.mrf.mxu1 }
 0x128   :  { %4610 = vst [vmem:[#allocation17_spill] sm:$0xff] %v3734_v30  ;;  %4611 = vst [vmem:[#allocation18_spill] sm:$0xff] %v3737_v31  ;;  %v3744_v53 = vadd.f32 %v3739_v32, %v393_v36  ;;  %v3747_v62 = vadd.f32 %v3741_v33, %v506_v44 }
 0x129   :  { %v395_v9 = vpop.f32.mrf.mxu0  ;;  %v508_v10 = vpop.f32.mrf.mxu1 }
 0x12a   :  { %4612 = vst [vmem:[#allocation19_spill] sm:$0xff] %v3744_v53  ;;  %4613 = vst [vmem:[#allocation20_spill] sm:$0xff] %v3747_v62  ;;  %v3754_v11 = vadd.f32 %v3749_v7, %v395_v9  ;;  %v3757_v22 = vadd.f32 %v3751_v8, %v508_v10 }
 0x12b   :  { %v399_v23 = vpop.f32.mrf.mxu0  ;;  %v512_v28 = vpop.f32.mrf.mxu1 }
 0x12c   :  { %4614 = vst [vmem:[#allocation21_spill] sm:$0xff] %v3754_v11  ;;  %4615 = vst [vmem:[#allocation22_spill] sm:$0xff] %v3757_v22  ;;  %v3760_v29 = vadd.f32 %v3719_v20, %v399_v23  ;;  %v3763_v36 = vadd.f32 %v3721_v21, %v512_v28 }
 0x12d   :  { %v401_v44 = vpop.f32.mrf.mxu0  ;;  %v514_v1 = vpop.f32.mrf.mxu1 }
 0x12e   :  { %4616 = vst [vmem:[#allocation23_spill] sm:$0xff] %v3760_v29  ;;  %4617 = vst [vmem:[#allocation24_spill] sm:$0xff] %v3763_v36  ;;  %v3766_v62 = vadd.f32 %v3729_v26, %v401_v44  ;;  %v3769_v53 = vadd.f32 %v3731_v27, %v514_v1 }
 0x12f   :  { %v403_v9 = vpop.f32.mrf.mxu0  ;;  %v516_v11 = vpop.f32.mrf.mxu1 }
 0x130   :  { %4618 = vst [vmem:[#allocation25_spill] sm:$0xff] %v3766_v62  ;;  %4619 = vst [vmem:[#allocation26_spill] sm:$0xff] %v3769_v53  ;;  %v3772_v10 = vadd.f32 %v3739_v32, %v403_v9  ;;  %v3775_v22 = vadd.f32 %v3741_v33, %v516_v11 }
 0x131   :  { %v405_v23 = vpop.f32.mrf.mxu0  ;;  %v518_v29 = vpop.f32.mrf.mxu1 }
 0x132   :  { %4620 = vst [vmem:[#allocation27_spill] sm:$0xff] %v3772_v10  ;;  %4621 = vst [vmem:[#allocation28_spill] sm:$0xff] %v3775_v22  ;;  %v3778_v28 = vadd.f32 %v3749_v7, %v405_v23  ;;  %v3781_v36 = vadd.f32 %v3751_v8, %v518_v29 }
 0x133   :  { %v409_v44 = vpop.f32.mrf.mxu0  ;;  %v522_v62 = vpop.f32.mrf.mxu1 }
 0x134   :  { %4622 = vst [vmem:[#allocation29_spill] sm:$0xff] %v3778_v28  ;;  %4623 = vst [vmem:[#allocation30_spill] sm:$0xff] %v3781_v36  ;;  %v3784_v1 = vadd.f32 %v3719_v20, %v409_v44  ;;  %v3787_v53 = vadd.f32 %v3721_v21, %v522_v62 }
 0x135   :  { %v411_v9 = vpop.f32.mrf.mxu0  ;;  %v524_v10 = vpop.f32.mrf.mxu1 }
 0x136   :  { %4624 = vst [vmem:[#allocation31_spill] sm:$0xff] %v3784_v1  ;;  %4625 = vst [vmem:[#allocation32_spill] sm:$0xff] %v3787_v53  ;;  %v3790_v11 = vadd.f32 %v3729_v26, %v411_v9  ;;  %v3793_v22 = vadd.f32 %v3731_v27, %v524_v10 }
 0x137   :  { %v413_v23 = vpop.f32.mrf.mxu0  ;;  %v526_v28 = vpop.f32.mrf.mxu1 }
 0x138   :  { %4626 = vst [vmem:[#allocation33_spill] sm:$0xff] %v3790_v11  ;;  %4627 = vst [vmem:[#allocation34_spill] sm:$0xff] %v3793_v22  ;;  %v3796_v29 = vadd.f32 %v3739_v32, %v413_v23  ;;  %v3799_v36 = vadd.f32 %v3741_v33, %v526_v28 }
 0x139   :  { %v415_v44 = vpop.f32.mrf.mxu0  ;;  %v528_v1 = vpop.f32.mrf.mxu1 }
 0x13a   :  { %4628 = vst [vmem:[#allocation35_spill] sm:$0xff] %v3796_v29  ;;  %4629 = vst [vmem:[#allocation36_spill] sm:$0xff] %v3799_v36  ;;  %v3802_v62 = vadd.f32 %v3749_v7, %v415_v44  ;;  %v3805_v53 = vadd.f32 %v3751_v8, %v528_v1 }
 0x13b   :  { %v419_v9 = vpop.f32.mrf.mxu0  ;;  %v532_v11 = vpop.f32.mrf.mxu1 }
 0x13c   :  { %4630 = vst [vmem:[#allocation37_spill] sm:$0xff] %v3802_v62  ;;  %4631 = vst [vmem:[#allocation38_spill] sm:$0xff] %v3805_v53  ;;  %v3808_v10 = vadd.f32 %v3719_v20, %v419_v9  ;;  %v3811_v22 = vadd.f32 %v3721_v21, %v532_v11 }
 0x13d   :  { %v421_v23 = vpop.f32.mrf.mxu0  ;;  %v534_v29 = vpop.f32.mrf.mxu1 }
 0x13e   :  { %4632 = vst [vmem:[#allocation39_spill] sm:$0xff] %v3808_v10  ;;  %4633 = vst [vmem:[#allocation40_spill] sm:$0xff] %v3811_v22  ;;  %v3814_v28 = vadd.f32 %v3729_v26, %v421_v23  ;;  %v3817_v36 = vadd.f32 %v3731_v27, %v534_v29 }
 0x13f   :  { %v423_v44 = vpop.f32.mrf.mxu0  ;;  %v536_v62 = vpop.f32.mrf.mxu1 }
 0x140   :  { %4634 = vst [vmem:[#allocation41_spill] sm:$0xff] %v3814_v28  ;;  %4635 = vst [vmem:[#allocation42_spill] sm:$0xff] %v3817_v36  ;;  %v3820_v1 = vadd.f32 %v3739_v32, %v423_v44  ;;  %v3823_v53 = vadd.f32 %v3741_v33, %v536_v62 }
 0x141   :  { %v425_v9 = vpop.f32.mrf.mxu0  ;;  %v538_v10 = vpop.f32.mrf.mxu1 }
 0x142   :  { %4636 = vst [vmem:[#allocation43_spill] sm:$0xff] %v3820_v1  ;;  %4637 = vst [vmem:[#allocation44_spill] sm:$0xff] %v3823_v53  ;;  %v3826_v11 = vadd.f32 %v3749_v7, %v425_v9  ;;  %v3829_v22 = vadd.f32 %v3751_v8, %v538_v10 }
 0x143   :  { %v429_v23 = vpop.f32.mrf.mxu0  ;;  %v542_v28 = vpop.f32.mrf.mxu1 }
 0x144   :  { %4638 = vst [vmem:[#allocation45_spill] sm:$0xff] %v3826_v11  ;;  %4639 = vst [vmem:[#allocation46_spill] sm:$0xff] %v3829_v22  ;;  %v3832_v29 = vadd.f32 %v3719_v20, %v429_v23  ;;  %v3835_v36 = vadd.f32 %v3721_v21, %v542_v28 }
 0x145   :  { %v431_v44 = vpop.f32.mrf.mxu0  ;;  %v544_v1 = vpop.f32.mrf.mxu1 }
 0x146   :  { %4640 = vst [vmem:[#allocation47_spill] sm:$0xff] %v3832_v29  ;;  %4641 = vst [vmem:[#allocation48_spill] sm:$0xff] %v3835_v36  ;;  %v3838_v62 = vadd.f32 %v3729_v26, %v431_v44  ;;  %v3841_v53 = vadd.f32 %v3731_v27, %v544_v1 }
 0x147   :  { %v433_v9 = vpop.f32.mrf.mxu0  ;;  %v546_v11 = vpop.f32.mrf.mxu1 }
 0x148   :  { %4642 = vst [vmem:[#allocation49_spill] sm:$0xff] %v3838_v62  ;;  %4643 = vst [vmem:[#allocation50_spill] sm:$0xff] %v3841_v53  ;;  %v3844_v10 = vadd.f32 %v3739_v32, %v433_v9  ;;  %v3847_v22 = vadd.f32 %v3741_v33, %v546_v11 }
 0x149   :  { %v435_v23 = vpop.f32.mrf.mxu0  ;;  %v548_v29 = vpop.f32.mrf.mxu1 }
 0x14a   :  { %4644 = vst [vmem:[#allocation51_spill] sm:$0xff] %v3844_v10  ;;  %4645 = vst [vmem:[#allocation52_spill] sm:$0xff] %v3847_v22  ;;  %v3850_v28 = vadd.f32 %v3749_v7, %v435_v23  ;;  %v3853_v36 = vadd.f32 %v3751_v8, %v548_v29 }
 0x14b   :  { %v439_v44 = vpop.f32.mrf.mxu0  ;;  %v552_v62 = vpop.f32.mrf.mxu1 }
 0x14c   :  { %4646 = vst [vmem:[#allocation53_spill] sm:$0xff] %v3850_v28  ;;  %4647 = vst [vmem:[#allocation54_spill] sm:$0xff] %v3853_v36  ;;  %v3856_v1 = vadd.f32 %v3719_v20, %v439_v44  ;;  %v3859_v53 = vadd.f32 %v3721_v21, %v552_v62 }
 0x14d   :  { %v441_v9 = vpop.f32.mrf.mxu0  ;;  %v554_v10 = vpop.f32.mrf.mxu1 }
 0x14e   :  { %4648 = vst [vmem:[#allocation55_spill] sm:$0xff] %v3856_v1  ;;  %4649 = vst [vmem:[#allocation56_spill] sm:$0xff] %v3859_v53  ;;  %v3862_v11 = vadd.f32 %v3729_v26, %v441_v9  ;;  %v3865_v22 = vadd.f32 %v3731_v27, %v554_v10 }
 0x14f   :  { %v443_v23 = vpop.f32.mrf.mxu0  ;;  %v556_v28 = vpop.f32.mrf.mxu1 }
 0x150   :  { %4650 = vst [vmem:[#allocation57_spill] sm:$0xff] %v3862_v11  ;;  %4651 = vst [vmem:[#allocation58_spill] sm:$0xff] %v3865_v22  ;;  %v3868_v29 = vadd.f32 %v3739_v32, %v443_v23  ;;  %v3871_v36 = vadd.f32 %v3741_v33, %v556_v28 }
 0x151   :  { %v445_v44 = vpop.f32.mrf.mxu0  ;;  %v558_v1 = vpop.f32.mrf.mxu1 }
 0x152   :  { %4652 = vst [vmem:[#allocation59_spill] sm:$0xff] %v3868_v29  ;;  %4653 = vst [vmem:[#allocation60_spill] sm:$0xff] %v3871_v36  ;;  %v3874_v62 = vadd.f32 %v3749_v7, %v445_v44  ;;  %v3877_v53 = vadd.f32 %v3751_v8, %v558_v1 }
 0x153   :  { %v449_v9 = vpop.f32.mrf.mxu0  ;;  %v562_v11 = vpop.f32.mrf.mxu1 }
 0x154   :  { %4654 = vst [vmem:[#allocation61_spill] sm:$0xff] %v3874_v62  ;;  %4655 = vst [vmem:[#allocation62_spill] sm:$0xff] %v3877_v53  ;;  %v3880_v10 = vadd.f32 %v3719_v20, %v449_v9  ;;  %v3883_v22 = vadd.f32 %v3721_v21, %v562_v11  ;;  %v687_v11 = vadd.f32 %v3719_v20, %v3703_v12 }
 0x155   :  { %v451_v23 = vpop.f32.mrf.mxu0  ;;  %v564_v29 = vpop.f32.mrf.mxu1 }
 0x156   :  { %4656 = vst [vmem:[#allocation63_spill] sm:$0xff] %v3880_v10  ;;  %4657 = vst [vmem:[#allocation64_spill] sm:$0xff] %v3883_v22  ;;  %v3886_v28 = vadd.f32 %v3729_v26, %v451_v23  ;;  %v3889_v36 = vadd.f32 %v3731_v27, %v564_v29 }
 0x157   :  { %v453_v44 = vpop.f32.mrf.mxu0  ;;  %v566_v62 = vpop.f32.mrf.mxu1 }
 0x158   :  { %4658 = vst [vmem:[#allocation65_spill] sm:$0xff] %v3886_v28  ;;  %4659 = vst [vmem:[#allocation66_spill] sm:$0xff] %v3889_v36  ;;  %v3892_v1 = vadd.f32 %v3739_v32, %v453_v44  ;;  %v3895_v53 = vadd.f32 %v3741_v33, %v566_v62  ;;  %v688_v44 = vadd.f32 %v3729_v26, %v3707_v14 }
 0x159   :  { %v455_v9 = vpop.f32.mrf.mxu0  ;;  %v568_v10 = vpop.f32.mrf.mxu1 }
 0x15a   :  { %4660 = vst [vmem:[#allocation67_spill] sm:$0xff] %v3892_v1  ;;  %4661 = vst [vmem:[#allocation68_spill] sm:$0xff] %v3895_v53  ;;  %v3900_v22 = vadd.f32 %v3749_v7, %v455_v9  ;;  %v3903_v23 = vadd.f32 %v3751_v8, %v568_v10  ;;  %v690_v10 = vadd.f32 %v3731_v27, %v3709_v15 }
 0x15b   :  { %v886_v29 = vpop.f32.mrf.mxu0  ;;  %v927_v36 = vpop.f32.mrf.mxu1 }
 0x15c   :  { %4662 = vst [vmem:[#allocation69_spill] sm:$0xff] %v3900_v22  ;;  %4663 = vst [vmem:[#allocation70_spill] sm:$0xff] %v3903_v23  ;;  %v934_v1 = vadd.f32 %v886_v29, %v687_v11  ;;  %v689_v22 = vadd.f32 %v3721_v21, %v3705_v13  ;;  %v963_v13 = vadd.f32 %v3749_v7, %v3715_v18 }
 0x15d   :  { %v888_v28 = vpop.f32.mrf.mxu0  ;;  %v929_v62 = vpop.f32.mrf.mxu1  ;;  %v965_v18 = vadd.f32 %v3751_v8, %v3717_v19 }
 0x15e   :  { %v2875_v53 = vmul.f32 -1.442695, %v934_v1  ;;  %v935_v25 = vadd.f32 %v888_v28, %v688_v44  ;;  %v937_v23 = vadd.f32 %v929_v62, %v690_v10  ;;  %v936_v14 = vadd.f32 %v927_v36, %v689_v22 }
 0x15f   :  { %v890_v31 = vpop.f32.mrf.mxu0  ;;  %v931_v30 = vpop.f32.mrf.mxu1 }
 0x160   :  { %3043 = vpow2.f32 %v2875_v53  ;;  %v2876_v12 = vmul.f32 -1.442695, %v935_v25  ;;  %v2877_v26 = vmul.f32 -1.442695, %v937_v23  ;;  %v962_v25 = vadd.f32 %v3739_v32, %v3711_v16 }
 0x161   :  { %v891_v20 = vpop.f32.mrf.mxu0  ;;  %v932_v9 = vpop.f32.mrf.mxu1 }
 0x162   :  { %3045 = vpow2.f32 %v2876_v12 }
 0x163   :  { %3047 = vtanh.f32 %v936_v14 }
 0x164   :  { %3049 = vpow2.f32 %v2877_v26 }
 0x16d   :  { %v3044_v11 = vpop.eup %3043 }
 0x16e   :  { %v941_v29 = vadd.f32 1.0, %v3044_v11 }
 0x16f   :  { %v3046_v28 = vpop.eup %3045 }
 0x170   :  { %3051 = vrcp.f32 %v941_v29  ;;  %v947_v30 = vadd.f32 1.0, %v3046_v28  ;;  %v3048_v31 = vpop.eup %3047  ;;  %v964_v29 = vadd.f32 %v3741_v33, %v3713_v17  ;;  %v4664_v17 = vmov 0  }
 0x171   :  { %v3050_v27 = vpop.eup %3049 }
 0x172   :  { %3053 = vrcp.f32 %v947_v30  ;;  %v954_v20 = vadd.f32 1.0, %v3050_v27 }
 0x17b   :  { %v1001_v53 = vpop.f32.mrf.mxu0  ;;  %v1042_v15 = vpop.f32.mrf.mxu1 }
 0x17c   :  { %v1049_v21 = vadd.f32 %v1001_v53, %v962_v25  ;;  %v1051_v28 = vadd.f32 %v1042_v15, %v964_v29 }
 0x17d   :  { %v3052_v22 = vpop.eup %3051  ;;  %v1003_v36 = vpop.f32.mrf.mxu0 }
 0x17e   :  { %v1044_v1 = vpop.f32.mrf.mxu1  ;;  %v958_v23 = vmul.f32 %v3052_v22, %v3048_v31  ;;  %v2878_v44 = vmul.f32 -1.442695, %v1049_v21  ;;  %v1050_v62 = vadd.f32 %v1003_v36, %v963_v13 }
 0x17f   :  { %v3054_v12 = vpop.eup %3053  ;;  %v1005_v9 = vpop.f32.mrf.mxu0  ;;  %v1052_v7 = vadd.f32 %v1044_v1, %v965_v18  ;;  %v4668_v18 = vld [vmem:[#allocation19_spill] sm:$0xff] }
 0x180   :  { %v1046_v10 = vpop.f32.mrf.mxu1  ;;  %v957_v14 = vmul.f32 0.0, %v3054_v12  ;;  %3055 = vpow2.f32 %v2878_v44  ;;  %v2879_v16 = vmul.f32 -1.442695, %v1050_v62 }
 0x181   :  { %v1006_v32 = vpop.f32.mrf.mxu0  ;;  %v2880_v30 = vmul.f32 -1.442695, %v1052_v7 }
 0x182   :  { %v1047_v26 = vpop.f32.mrf.mxu1  ;;  %v3915_v11 = vadd.f32 %v958_v23, %v957_v14  ;;  %3057 = vpow2.f32 %v2879_v16 }
 0x183   :  { %3059 = vrcp.f32 %v954_v20 }
 0x184   :  { %3061 = vtanh.f32 %v3915_v11 }
 0x185   :  { %3063 = vtanh.f32 %v1051_v28 }
 0x186   :  { %3065 = vpow2.f32 %v2880_v30 }
 0x18d   :  { %v3056_v25 = vpop.eup %3055 }
 0x18e   :  { %v1056_v31 = vadd.f32 1.0, %v3056_v25 }
 0x18f   :  { %v3058_v53 = vpop.eup %3057 }
 0x190   :  { %v3060_v27 = vpop.eup %3059  ;;  %3067 = vrcp.f32 %v1056_v31  ;;  %v1062_v13 = vadd.f32 1.0, %v3058_v53  ;;  %v4669_v53 = vld [vmem:[#allocation21_spill] sm:$0xff] }
 0x191   :  { %v3062_v21 = vpop.eup %3061 }
 0x192   :  { %3069 = vrcp.f32 %v1062_v13  ;;  %v961_v22 = vmul.f32 %v3062_v21, %v3060_v27  ;;  %v3064_v19 = vpop.eup %3063 }
 0x193   :  { %v3066_v33 = vpop.eup %3065 }
 0x194   :  { %v1090_v36 = vpack.c.bf16 %v961_v22, %v961_v22  ;;  %v1069_v23 = vadd.f32 1.0, %v3066_v33 }
 0x196   :  { %1124 = vmatmul.mubr.bf16.vlgmr.msra.gmra.mxu0 %v1090_v36  ;;  %1165 = vmatmul.mubr.bf16.vlgmr.msra.gmra.mxu1 %v1090_v36  ;;  %3071 = vrcp.f32 %v1069_v23  ;;  %v4670_v23 = vld [vmem:[#allocation22_spill] sm:$0xff] }
 0x197   :  { %1207 = vmatpush1.bf16.msra.mxu0 %v3525_v37  ;;  %1248 = vmatpush1.bf16.msra.mxu1 %v3531_v39 }
 0x198   :  { %1208 = vmatprep.subr.bf16.mxu0 %v3528_v38  ;;  %1249 = vmatprep.subr.bf16.mxu1 %v3533_v40 }
 0x199   :  { %1238 = vmatprep.mubr.bf16.mxu0 %v4664_v17  ;;  %1279 = vmatprep.mubr.bf16.mxu1 %v4664_v17 }
 0x19b   :  { %1209 = vmatpush1.bf16.msra.mxu0 %v3537_v41  ;;  %1250 = vmatpush1.bf16.msra.mxu1 %v3544_v43 }
 0x19c   :  { %1210 = vmatprep.subr.bf16.mxu0 %v3541_v42  ;;  %1251 = vmatprep.subr.bf16.mxu1 %v3553_v47 }
 0x19d   :  { %v3068_v8 = vpop.eup %3067 }
 0x19e   :  { %v1073_v15 = vmul.f32 %v3068_v8, %v3064_v19 }
 0x19f   :  { %v3070_v1 = vpop.eup %3069  ;;  %1211 = vmatpush1.bf16.msra.mxu0 %v3548_v45  ;;  %1252 = vmatpush1.bf16.msra.mxu1 %v3556_v48 }
 0x1a0   :  { %v1072_v44 = vmul.f32 0.0, %v3070_v1  ;;  %1212 = vmatprep.subr.bf16.mxu0 %v3550_v46  ;;  %1253 = vmatprep.subr.bf16.mxu1 %v3558_v49 }
 0x1a2   :  { %v3936_v62 = vadd.f32 %v1073_v15, %v1072_v44 }
 0x1a3   :  { %1213 = vmatpush1.bf16.msra.mxu0 %v3563_v50  ;;  %1254 = vmatpush1.bf16.msra.mxu1 %v3570_v52  ;;  %v3072_v12 = vpop.eup %3071 }
 0x1a4   :  { %3073 = vtanh.f32 %v3936_v62  ;;  %1214 = vmatprep.subr.bf16.mxu0 %v3565_v51  ;;  %1255 = vmatprep.subr.bf16.mxu1 %v3576_v55 }
 0x1a7   :  { %1215 = vmatpush1.bf16.msra.mxu0 %v3573_v54  ;;  %1256 = vmatpush1.bf16.msra.mxu1 %v3582_v57 }
 0x1a8   :  { %1216 = vmatprep.subr.bf16.mxu0 %v3579_v56  ;;  %1257 = vmatprep.subr.bf16.mxu1 %v3584_v58 }
 0x1ab   :  { %1217 = vmatpush1.bf16.msra.mxu0 %v3589_v59  ;;  %1258 = vmatpush1.bf16.msra.mxu1 %v3596_v61 }
 0x1ac   :  { %1218 = vmatprep.subr.bf16.mxu0 %v3593_v60  ;;  %1259 = vmatprep.subr.bf16.mxu1 %v3602_v0 }
 0x1af   :  { %1219 = vmatpush1.bf16.msra.mxu0 %v3600_v63  ;;  %1260 = vmatpush1.bf16.msra.mxu1 %v3608_v3 }
 0x1b0   :  { %1220 = vmatprep.subr.bf16.mxu0 %v3606_v2  ;;  %1261 = vmatprep.subr.bf16.mxu1 %v3610_v4 }
 0x1b1   :  { %v3074_v20 = vpop.eup %3073 }
 0x1b2   :  { %v1076_v9 = vmul.f32 %v3074_v20, %v3072_v12  ;;  %v4671_v12 = vld [vmem:[#allocation20_spill] sm:$0xff] }
 0x1b3   :  { %1221 = vmatpush1.bf16.msra.mxu0 %v3616_v5  ;;  %1262 = vmatpush1.bf16.msra.mxu1 %v3620_v6 }
 0x1b4   :  { %v1205_v10 = vpack.c.bf16 %v1076_v9, %v1076_v9  ;;  %1330 = vmatprep.subr.bf16.mxu0 %v3521_v34  ;;  %1371 = vmatprep.subr.bf16.mxu1 %v3523_v35 }
 0x1b6   :  { %1239 = vmatmul.mubr.bf16.vlgmr.msra.gmra.mxu0 %v1205_v10  ;;  %1280 = vmatmul.mubr.bf16.vlgmr.msra.gmra.mxu1 %v1205_v10 }
 0x1b7   :  { %1331 = vmatpush1.bf16.msra.mxu0 %v3525_v37  ;;  %1372 = vmatpush1.bf16.msra.mxu1 %v3531_v39 }
 0x1b8   :  { %1332 = vmatprep.subr.bf16.mxu0 %v3528_v38  ;;  %1373 = vmatprep.subr.bf16.mxu1 %v3533_v40 }
 0x1b9   :  { %1362 = vmatprep.mubr.bf16.mxu0 %v4664_v17  ;;  %1403 = vmatprep.mubr.bf16.mxu1 %v4664_v17 }
 0x1bb   :  { %1333 = vmatpush1.bf16.msra.mxu0 %v3537_v41  ;;  %1374 = vmatpush1.bf16.msra.mxu1 %v3544_v43  ;;  %v4665_v43 = vld [vmem:[#allocation17_spill] sm:$0xff] }
 0x1bc   :  { %1334 = vmatprep.subr.bf16.mxu0 %v3541_v42  ;;  %1375 = vmatprep.subr.bf16.mxu1 %v3553_v47 }
 0x1bf   :  { %1335 = vmatpush1.bf16.msra.mxu0 %v3548_v45  ;;  %1376 = vmatpush1.bf16.msra.mxu1 %v3556_v48 }
 0x1c0   :  { %1336 = vmatprep.subr.bf16.mxu0 %v3550_v46  ;;  %1377 = vmatprep.subr.bf16.mxu1 %v3558_v49 }
 0x1c3   :  { %1337 = vmatpush1.bf16.msra.mxu0 %v3563_v50  ;;  %1378 = vmatpush1.bf16.msra.mxu1 %v3570_v52  ;;  %v4667_v52 = vld [vmem:[#allocation16_spill] sm:$0xff] }
 0x1c4   :  { %1338 = vmatprep.subr.bf16.mxu0 %v3565_v51  ;;  %1379 = vmatprep.subr.bf16.mxu1 %v3576_v55  ;;  %v4666_v51 = vld [vmem:[#allocation18_spill] sm:$0xff] }
 0x1c7   :  { %1339 = vmatpush1.bf16.msra.mxu0 %v3573_v54  ;;  %1380 = vmatpush1.bf16.msra.mxu1 %v3582_v57 }
 0x1c8   :  { %1340 = vmatprep.subr.bf16.mxu0 %v3579_v56  ;;  %1381 = vmatprep.subr.bf16.mxu1 %v3584_v58 }
 0x1cb   :  { %1341 = vmatpush1.bf16.msra.mxu0 %v3589_v59  ;;  %1382 = vmatpush1.bf16.msra.mxu1 %v3596_v61 }
 0x1cc   :  { %1342 = vmatprep.subr.bf16.mxu0 %v3593_v60  ;;  %1383 = vmatprep.subr.bf16.mxu1 %v3602_v0 }
 0x1cf   :  { %1343 = vmatpush1.bf16.msra.mxu0 %v3600_v63  ;;  %1384 = vmatpush1.bf16.msra.mxu1 %v3608_v3 }
 0x1d0   :  { %1344 = vmatprep.subr.bf16.mxu0 %v3606_v2  ;;  %1385 = vmatprep.subr.bf16.mxu1 %v3610_v4 }
 0x1d3   :  { %1345 = vmatpush1.bf16.msra.mxu0 %v3616_v5  ;;  %1386 = vmatpush1.bf16.msra.mxu1 %v3620_v6 }
 0x1d4   :  { %1445 = vmatprep.subr.bf16.mxu0 %v3521_v34  ;;  %1486 = vmatprep.subr.bf16.mxu1 %v3523_v35 }
 0x256   :  { %v1125_v37 = vpop.f32.mrf.mxu0  ;;  %v1166_v38 = vpop.f32.mrf.mxu1 }
 0x257   :  { %v1173_v39 = vadd.f32 %v1125_v37, %v3724_v24  ;;  %v1175_v35 = vadd.f32 %v1166_v38, %v4667_v52  ;;  %v4028_v52 = vld [vmem:[#allocation11 + $0xac] ss:$16 sps:$4 sm:$0xff]  }
 0x258   :  { %v1127_v40 = vpop.f32.mrf.mxu0  ;;  %v1168_v41 = vpop.f32.mrf.mxu1 }
 0x259   :  { %v2881_v42 = vmul.f32 -1.442695, %v1173_v39  ;;  %v1174_v45 = vadd.f32 %v1127_v40, %v4665_v43  ;;  %v1176_v34 = vadd.f32 %v1168_v41, %v4666_v51  ;;  %v4005_v43 = vld [vmem:[#allocation11 + $0xe0] ss:$16 sps:$4 sm:$0xff]  }
 0x25a   :  { %v1129_v46 = vpop.f32.mrf.mxu0  ;;  %v1170_v47 = vpop.f32.mrf.mxu1 }
 0x25b   :  { %3075 = vpow2.f32 %v2881_v42  ;;  %v2882_v48 = vmul.f32 -1.442695, %v1174_v45  ;;  %v2883_v54 = vmul.f32 -1.442695, %v1176_v34  ;;  %v4008_v45 = vld [vmem:[#allocation11 + $0xe8] ss:$16 sps:$4 sm:$0xff]  }
 0x25c   :  { %v1130_v49 = vpop.f32.mrf.mxu0  ;;  %v1171_v50 = vpop.f32.mrf.mxu1  ;;  %v4011_v46 = vld [vmem:[#allocation11 + $0xc4] ss:$16 sps:$4 sm:$0xff]   ;;  %v4014_v47 = vld [vmem:[#allocation11 + $0xcc] ss:$16 sps:$4 sm:$0xff]  }
 0x25d   :  { %3077 = vpow2.f32 %v2882_v48  ;;  %v4019_v49 = vld [vmem:[#allocation11 + $0xc0] ss:$16 sps:$4 sm:$0xff]   ;;  %v4022_v50 = vld [vmem:[#allocation11 + $0xc8] ss:$16 sps:$4 sm:$0xff]   ;;  %v4025_v34 = vld [vmem:[#allocation11 + $0xa4] ss:$16 sps:$4 sm:$0xff]  }
 0x25e   :  { %3079 = vtanh.f32 %v1175_v35 }
 0x25f   :  { %3081 = vpow2.f32 %v2883_v54 }
 0x268   :  { %v3076_v55 = vpop.eup %3075 }
 0x269   :  { %v1180_v56 = vadd.f32 1.0, %v3076_v55 }
 0x26a   :  { %v3078_v57 = vpop.eup %3077 }
 0x26b   :  { %3083 = vrcp.f32 %v1180_v56  ;;  %v1186_v24 = vadd.f32 1.0, %v3078_v57  ;;  %v3080_v14 = vpop.eup %3079  ;;  %v4031_v57 = vld [vmem:[#allocation11 + $0xa0] ss:$16 sps:$4 sm:$0xff]  }
 0x26c   :  { %v3082_v26 = vpop.eup %3081 }
 0x26d   :  { %3085 = vrcp.f32 %v1186_v24  ;;  %v1193_v21 = vadd.f32 1.0, %v3082_v26  ;;  %v4034_v24 = vld [vmem:[#allocation11 + $0xa8] ss:$16 sps:$4 sm:$0xff]  }
 0x276   :  { %v1240_v16 = vpop.f32.mrf.mxu0  ;;  %v1281_v32 = vpop.f32.mrf.mxu1 }
 0x277   :  { %v1288_v7 = vadd.f32 %v1240_v16, %v4668_v18  ;;  %v1290_v20 = vadd.f32 %v1281_v32, %v4671_v12  ;;  %v4038_v16 = vld [vmem:[#allocation11 + $0x84] ss:$16 sps:$4 sm:$0xff]   ;;  %v4041_v32 = vld [vmem:[#allocation11 + $0x8c] ss:$16 sps:$4 sm:$0xff]   ;;  %v4046_v18 = vld [vmem:[#allocation11 + $0x80] ss:$16 sps:$4 sm:$0xff]  }
 0x278   :  { %v3084_v29 = vpop.eup %3083  ;;  %v1242_v28 = vpop.f32.mrf.mxu0  ;;  %v4673_v12 = vld [vmem:[#allocation25_spill] sm:$0xff] }
 0x279   :  { %v1283_v30 = vpop.f32.mrf.mxu1  ;;  %v1197_v25 = vmul.f32 %v3084_v29, %v3080_v14  ;;  %v2884_v31 = vmul.f32 -1.442695, %v1288_v7  ;;  %v1289_v27 = vadd.f32 %v1242_v28, %v4669_v53  ;;  %v4049_v7 = vld [vmem:[#allocation11 + $0x88] ss:$16 sps:$4 sm:$0xff]   ;;  %v4055_v29 = vld [vmem:[#allocation11 + $0x6c] ss:$16 sps:$4 sm:$0xff]  }
 0x27a   :  { %v3086_v13 = vpop.eup %3085  ;;  %v1244_v22 = vpop.f32.mrf.mxu0  ;;  %v1291_v44 = vadd.f32 %v1283_v30, %v4670_v23  ;;  %v4059_v28 = vld [vmem:[#allocation11 + $0x60] ss:$16 sps:$4 sm:$0xff]   ;;  %v4062_v30 = vld [vmem:[#allocation11 + $0x68] ss:$16 sps:$4 sm:$0xff]  }
 0x27b   :  { %v1285_v36 = vpop.f32.mrf.mxu1  ;;  %v1196_v19 = vmul.f32 %v3086_v13, %v3915_v11  ;;  %3087 = vpow2.f32 %v2884_v31  ;;  %v2885_v33 = vmul.f32 -1.442695, %v1289_v27  ;;  %v4130_v13 = vld [vmem:[#allocation11 + $0xc] ss:$16 sps:$4 sm:$0xff]   ;;  %v4136_v22 = vld [vmem:[#allocation11 + $0x8] ss:$16 sps:$4 sm:$0xff]  }
 0x27c   :  { %v1245_v8 = vpop.f32.mrf.mxu0  ;;  %v2886_v9 = vmul.f32 -1.442695, %v1291_v44 }
 0x27d   :  { %v1286_v15 = vpop.f32.mrf.mxu1  ;;  %v4000_v1 = vadd.f32 %v1197_v25, %v1196_v19  ;;  %3089 = vpow2.f32 %v2885_v33  ;;  %v4065_v25 = vld [vmem:[#allocation11 + $0x44] ss:$16 sps:$4 sm:$0xff]   ;;  %v4672_v33 = vld [vmem:[#allocation23_spill] sm:$0xff] }
 0x27e   :  { %3091 = vrcp.f32 %v1193_v21  ;;  %v4133_v21 = vld [vmem:[#allocation11] ss:$16 sps:$4 sm:$0xff]  }
 0x27f   :  { %3093 = vtanh.f32 %v4000_v1 }
 0x280   :  { %3095 = vtanh.f32 %v1290_v20 }
 0x281   :  { %3097 = vpow2.f32 %v2886_v9 }
 0x288   :  { %v3088_v10 = vpop.eup %3087 }
 0x289   :  { %v1295_v37 = vadd.f32 1.0, %v3088_v10 }
 0x28a   :  { %v3090_v38 = vpop.eup %3089 }
 0x28b   :  { %v3092_v11 = vpop.eup %3091  ;;  %3099 = vrcp.f32 %v1295_v37  ;;  %v1301_v39 = vadd.f32 1.0, %v3090_v38 }
 0x28c   :  { %v3094_v40 = vpop.eup %3093 }
 0x28d   :  { %3101 = vrcp.f32 %v1301_v39  ;;  %v1200_v41 = vmul.f32 %v3094_v40, %v3092_v11  ;;  %v3096_v48 = vpop.eup %3095  ;;  %v4674_v39 = vld [vmem:[#allocation26_spill] sm:$0xff] }
 0x28e   :  { %v3098_v51 = vpop.eup %3097 }
 0x28f   :  { %v1329_v42 = vpack.c.bf16 %v1200_v41, %v1200_v41  ;;  %v1308_v56 = vadd.f32 1.0, %v3098_v51  ;;  %v4675_v41 = vld [vmem:[#allocation24_spill] sm:$0xff] }
 0x291   :  { %1363 = vmatmul.mubr.bf16.vlgmr.msra.gmra.mxu0 %v1329_v42  ;;  %1404 = vmatmul.mubr.bf16.vlgmr.msra.gmra.mxu1 %v1329_v42  ;;  %3103 = vrcp.f32 %v1308_v56 }
 0x292   :  { %1446 = vmatpush1.bf16.msra.mxu0 %v4005_v43  ;;  %1487 = vmatpush1.bf16.msra.mxu1 %v4008_v45 }
 0x293   :  { %1447 = vmatprep.subr.bf16.mxu0 %v4011_v46  ;;  %1488 = vmatprep.subr.bf16.mxu1 %v4014_v47 }
 0x294   :  { %1477 = vmatprep.mubr.bf16.mxu0 %v4664_v17  ;;  %1518 = vmatprep.mubr.bf16.mxu1 %v4664_v17 }
 0x296   :  { %1448 = vmatpush1.bf16.msra.mxu0 %v4019_v49  ;;  %1489 = vmatpush1.bf16.msra.mxu1 %v4022_v50 }
 0x297   :  { %1449 = vmatprep.subr.bf16.mxu0 %v4025_v34  ;;  %1490 = vmatprep.subr.bf16.mxu1 %v4028_v52 }
 0x298   :  { %v3100_v35 = vpop.eup %3099 }
 0x299   :  { %v1312_v54 = vmul.f32 %v3100_v35, %v3096_v48 }
 0x29a   :  { %v3102_v55 = vpop.eup %3101  ;;  %1450 = vmatpush1.bf16.msra.mxu0 %v4031_v57  ;;  %1491 = vmatpush1.bf16.msra.mxu1 %v4034_v24 }
 0x29b   :  { %v1311_v14 = vmul.f32 %v3102_v55, %v3936_v62  ;;  %1451 = vmatprep.subr.bf16.mxu0 %v4038_v16  ;;  %1492 = vmatprep.subr.bf16.mxu1 %v4041_v32  ;;  %v4052_v62 = vld [vmem:[#allocation11 + $0x64] ss:$16 sps:$4 sm:$0xff]  }
 0x29d   :  { %v4044_v26 = vadd.f32 %v1312_v54, %v1311_v14 }
 0x29e   :  { %1452 = vmatpush1.bf16.msra.mxu0 %v4046_v18  ;;  %1493 = vmatpush1.bf16.msra.mxu1 %v4049_v7  ;;  %v3104_v31 = vpop.eup %3103 }
 0x29f   :  { %1453 = vmatprep.subr.bf16.mxu0 %v4052_v62  ;;  %1494 = vmatprep.subr.bf16.mxu1 %v4055_v29  ;;  %3105 = vtanh.f32 %v4044_v26 }
 0x2a2   :  { %1454 = vmatpush1.bf16.msra.mxu0 %v4059_v28  ;;  %1495 = vmatpush1.bf16.msra.mxu1 %v4062_v30 }
 0x2a3   :  { %1455 = vmatprep.subr.bf16.mxu0 %v4065_v25  ;;  %1496 = vmatprep.subr.bf16.mxu1 %v3584_v58 }
 0x2a6   :  { %1456 = vmatpush1.bf16.msra.mxu0 %v3589_v59  ;;  %1497 = vmatpush1.bf16.msra.mxu1 %v3596_v61  ;;  %v4079_v59 = vld [vmem:[#allocation11 + $0xe4] ss:$16 sps:$4 sm:$0xff]   ;;  %v4106_v61 = vld [vmem:[#allocation11 + $0x4c] ss:$16 sps:$4 sm:$0xff]  }
 0x2a7   :  { %1457 = vmatprep.subr.bf16.mxu0 %v3593_v60  ;;  %1498 = vmatprep.subr.bf16.mxu1 %v3602_v0  ;;  %v4082_v60 = vld [vmem:[#allocation11 + $0xec] ss:$16 sps:$4 sm:$0xff]   ;;  %v4112_v0 = vld [vmem:[#allocation11 + $0x48] ss:$16 sps:$4 sm:$0xff]  }
 0x2aa   :  { %1458 = vmatpush1.bf16.msra.mxu0 %v3600_v63  ;;  %1499 = vmatpush1.bf16.msra.mxu1 %v3608_v3  ;;  %v4109_v63 = vld [vmem:[#allocation11 + $0x40] ss:$16 sps:$4 sm:$0xff]   ;;  %v4118_v3 = vld [vmem:[#allocation11 + $0x2c] ss:$16 sps:$4 sm:$0xff]  }
 0x2ab   :  { %1459 = vmatprep.subr.bf16.mxu0 %v3606_v2  ;;  %1500 = vmatprep.subr.bf16.mxu1 %v3610_v4  ;;  %v4115_v2 = vld [vmem:[#allocation11 + $0x24] ss:$16 sps:$4 sm:$0xff]   ;;  %v4121_v4 = vld [vmem:[#allocation11 + $0x20] ss:$16 sps:$4 sm:$0xff]  }
 0x2ac   :  { %v3106_v53 = vpop.eup %3105 }
 0x2ad   :  { %v1315_v27 = vmul.f32 %v3106_v53, %v3104_v31 }
 0x2ae   :  { %1460 = vmatpush1.bf16.msra.mxu0 %v3616_v5  ;;  %1501 = vmatpush1.bf16.msra.mxu1 %v3620_v6  ;;  %v4124_v5 = vld [vmem:[#allocation11 + $0x28] ss:$16 sps:$4 sm:$0xff]   ;;  %v4127_v6 = vld [vmem:[#allocation11 + $0x4] ss:$16 sps:$4 sm:$0xff]  }
 0x2af   :  { %v1444_v58 = vpack.c.bf16 %v1315_v27, %v1315_v27  ;;  %1569 = vmatprep.subr.bf16.mxu0 %v4079_v59  ;;  %1610 = vmatprep.subr.bf16.mxu1 %v4082_v60  ;;  %v4676_v27 = vld [vmem:[#allocation27_spill] sm:$0xff] }
 0x2b1   :  { %1478 = vmatmul.mubr.bf16.vlgmr.msra.gmra.mxu0 %v1444_v58  ;;  %1519 = vmatmul.mubr.bf16.vlgmr.msra.gmra.mxu1 %v1444_v58 }
 0x2b2   :  { %1570 = vmatpush1.bf16.msra.mxu0 %v4005_v43  ;;  %1611 = vmatpush1.bf16.msra.mxu1 %v4008_v45 }
 0x2b3   :  { %1571 = vmatprep.subr.bf16.mxu0 %v4011_v46  ;;  %1612 = vmatprep.subr.bf16.mxu1 %v4014_v47 }
 0x2b4   :  { %1601 = vmatprep.mubr.bf16.mxu0 %v4664_v17  ;;  %1642 = vmatprep.mubr.bf16.mxu1 %v4664_v17 }
 0x2b6   :  { %1572 = vmatpush1.bf16.msra.mxu0 %v4019_v49  ;;  %1613 = vmatpush1.bf16.msra.mxu1 %v4022_v50 }
 0x2b7   :  { %1573 = vmatprep.subr.bf16.mxu0 %v4025_v34  ;;  %1614 = vmatprep.subr.bf16.mxu1 %v4028_v52 }
 0x2ba   :  { %1574 = vmatpush1.bf16.msra.mxu0 %v4031_v57  ;;  %1615 = vmatpush1.bf16.msra.mxu1 %v4034_v24 }
 0x2bb   :  { %1575 = vmatprep.subr.bf16.mxu0 %v4038_v16  ;;  %1616 = vmatprep.subr.bf16.mxu1 %v4041_v32 }
 0x2be   :  { %1576 = vmatpush1.bf16.msra.mxu0 %v4046_v18  ;;  %1617 = vmatpush1.bf16.msra.mxu1 %v4049_v7 }
 0x2bf   :  { %1577 = vmatprep.subr.bf16.mxu0 %v4052_v62  ;;  %1618 = vmatprep.subr.bf16.mxu1 %v4055_v29 }
 0x2c2   :  { %1578 = vmatpush1.bf16.msra.mxu0 %v4059_v28  ;;  %1619 = vmatpush1.bf16.msra.mxu1 %v4062_v30 }
 0x2c3   :  { %1579 = vmatprep.subr.bf16.mxu0 %v4065_v25  ;;  %1620 = vmatprep.subr.bf16.mxu1 %v4106_v61 }
 0x2c6   :  { %1580 = vmatpush1.bf16.msra.mxu0 %v4109_v63  ;;  %1621 = vmatpush1.bf16.msra.mxu1 %v4112_v0 }
 0x2c7   :  { %1581 = vmatprep.subr.bf16.mxu0 %v4115_v2  ;;  %1622 = vmatprep.subr.bf16.mxu1 %v4118_v3 }
 0x2ca   :  { %1582 = vmatpush1.bf16.msra.mxu0 %v4121_v4  ;;  %1623 = vmatpush1.bf16.msra.mxu1 %v4124_v5 }
 0x2cb   :  { %1583 = vmatprep.subr.bf16.mxu0 %v4127_v6  ;;  %1624 = vmatprep.subr.bf16.mxu1 %v4130_v13 }
 0x2ce   :  { %1584 = vmatpush1.bf16.msra.mxu0 %v4133_v21  ;;  %1625 = vmatpush1.bf16.msra.mxu1 %v4136_v22 }
 0x2cf   :  { %1684 = vmatprep.subr.bf16.mxu0 %v4079_v59  ;;  %1725 = vmatprep.subr.bf16.mxu1 %v4082_v60 }
 0x351   :  { %v1364_v36 = vpop.f32.mrf.mxu0  ;;  %v1405_v19 = vpop.f32.mrf.mxu1 }
 0x352   :  { %v1412_v8 = vadd.f32 %v1364_v36, %v4672_v33  ;;  %v1414_v42 = vadd.f32 %v1405_v19, %v4675_v41  ;;  %v4678_v41 = vld [vmem:[#allocation30_spill] sm:$0xff] }
 0x353   :  { %v1366_v15 = vpop.f32.mrf.mxu0  ;;  %v1407_v23 = vpop.f32.mrf.mxu1 }
 0x354   :  { %v2887_v44 = vmul.f32 -1.442695, %v1412_v8  ;;  %v1413_v20 = vadd.f32 %v1366_v15, %v4673_v12  ;;  %v1415_v40 = vadd.f32 %v1407_v23, %v4674_v39  ;;  %v4677_v23 = vld [vmem:[#allocation29_spill] sm:$0xff] }
 0x355   :  { %v1368_v9 = vpop.f32.mrf.mxu0  ;;  %v1409_v10 = vpop.f32.mrf.mxu1 }
 0x356   :  { %3107 = vpow2.f32 %v2887_v44  ;;  %v2888_v37 = vmul.f32 -1.442695, %v1413_v20  ;;  %v2889_v48 = vmul.f32 -1.442695, %v1415_v40 }
 0x357   :  { %v1369_v38 = vpop.f32.mrf.mxu0  ;;  %v1410_v11 = vpop.f32.mrf.mxu1 }
 0x358   :  { %3109 = vpow2.f32 %v2888_v37 }
 0x359   :  { %3111 = vtanh.f32 %v1414_v42 }
 0x35a   :  { %3113 = vpow2.f32 %v2889_v48  ;;  %v4679_v48 = vld [vmem:[#allocation28_spill] sm:$0xff] }
 0x363   :  { %v3108_v51 = vpop.eup %3107 }
 0x364   :  { %v1419_v35 = vadd.f32 1.0, %v3108_v51 }
 0x365   :  { %v3110_v54 = vpop.eup %3109 }
 0x366   :  { %3115 = vrcp.f32 %v1419_v35  ;;  %v1425_v55 = vadd.f32 1.0, %v3110_v54  ;;  %v3112_v56 = vpop.eup %3111 }
 0x367   :  { %v3114_v53 = vpop.eup %3113 }
 0x368   :  { %3117 = vrcp.f32 %v1425_v55  ;;  %v1432_v20 = vadd.f32 1.0, %v3114_v53 }
 0x371   :  { %v1479_v14 = vpop.f32.mrf.mxu0  ;;  %v1520_v31 = vpop.f32.mrf.mxu1 }
 0x372   :  { %v1527_v58 = vadd.f32 %v1479_v14, %v4676_v27  ;;  %v1529_v51 = vadd.f32 %v1520_v31, %v4679_v48  ;;  %v4681_v48 = vld [vmem:[#allocation33_spill] sm:$0xff] }
 0x373   :  { %v3116_v36 = vpop.eup %3115  ;;  %v1481_v33 = vpop.f32.mrf.mxu0 }
 0x374   :  { %v1522_v8 = vpop.f32.mrf.mxu1  ;;  %v1436_v15 = vmul.f32 %v3116_v36, %v3112_v56  ;;  %v2890_v19 = vmul.f32 -1.442695, %v1527_v58  ;;  %v1528_v44 = vadd.f32 %v1481_v33, %v4677_v23 }
 0x375   :  { %v3118_v12 = vpop.eup %3117  ;;  %v1483_v9 = vpop.f32.mrf.mxu0  ;;  %v1530_v42 = vadd.f32 %v1522_v8, %v4678_v41 }
 0x376   :  { %v1524_v10 = vpop.f32.mrf.mxu1  ;;  %v1435_v37 = vmul.f32 %v3118_v12, %v4000_v1  ;;  %3119 = vpow2.f32 %v2890_v19  ;;  %v2891_v38 = vmul.f32 -1.442695, %v1528_v44 }
 0x377   :  { %v1484_v11 = vpop.f32.mrf.mxu0  ;;  %v2892_v35 = vmul.f32 -1.442695, %v1530_v42 }
 0x378   :  { %v1525_v39 = vpop.f32.mrf.mxu1  ;;  %v4148_v40 = vadd.f32 %v1436_v15, %v1435_v37  ;;  %3121 = vpow2.f32 %v2891_v38  ;;  %v4680_v38 = vld [vmem:[#allocation31_spill] sm:$0xff] }
 0x379   :  { %3123 = vrcp.f32 %v1432_v20 }
 0x37a   :  { %3125 = vtanh.f32 %v4148_v40 }
 0x37b   :  { %3127 = vtanh.f32 %v1529_v51 }
 0x37c   :  { %3129 = vpow2.f32 %v2892_v35 }
 0x383   :  { %v3120_v54 = vpop.eup %3119 }
 0x384   :  { %v1534_v55 = vadd.f32 1.0, %v3120_v54 }
 0x385   :  { %v3122_v56 = vpop.eup %3121 }
 0x386   :  { %v3124_v1 = vpop.eup %3123  ;;  %3131 = vrcp.f32 %v1534_v55  ;;  %v1540_v14 = vadd.f32 1.0, %v3122_v56 }
 0x387   :  { %v3126_v53 = vpop.eup %3125 }
 0x388   :  { %3133 = vrcp.f32 %v1540_v14  ;;  %v1439_v27 = vmul.f32 %v3126_v53, %v3124_v1  ;;  %v3128_v31 = vpop.eup %3127  ;;  %v4682_v14 = vld [vmem:[#allocation34_spill] sm:$0xff] }
 0x389   :  { %v3130_v36 = vpop.eup %3129 }
 0x38a   :  { %v1568_v58 = vpack.c.bf16 %v1439_v27, %v1439_v27  ;;  %v1547_v19 = vadd.f32 1.0, %v3130_v36  ;;  %v4683_v27 = vld [vmem:[#allocation32_spill] sm:$0xff] }
 0x38c   :  { %1602 = vmatmul.mubr.bf16.vlgmr.msra.gmra.mxu0 %v1568_v58  ;;  %1643 = vmatmul.mubr.bf16.vlgmr.msra.gmra.mxu1 %v1568_v58  ;;  %3135 = vrcp.f32 %v1547_v19 }
 0x38d   :  { %1685 = vmatpush1.bf16.msra.mxu0 %v4005_v43  ;;  %1726 = vmatpush1.bf16.msra.mxu1 %v4008_v45 }
 0x38e   :  { %1686 = vmatprep.subr.bf16.mxu0 %v4011_v46  ;;  %1727 = vmatprep.subr.bf16.mxu1 %v4014_v47 }
 0x38f   :  { %1716 = vmatprep.mubr.bf16.mxu0 %v4664_v17  ;;  %1757 = vmatprep.mubr.bf16.mxu1 %v4664_v17 }
 0x391   :  { %1687 = vmatpush1.bf16.msra.mxu0 %v4019_v49  ;;  %1728 = vmatpush1.bf16.msra.mxu1 %v4022_v50 }
 0x392   :  { %1688 = vmatprep.subr.bf16.mxu0 %v4025_v34  ;;  %1729 = vmatprep.subr.bf16.mxu1 %v4028_v52 }
 0x393   :  { %v3132_v33 = vpop.eup %3131 }
 0x394   :  { %v1551_v8 = vmul.f32 %v3132_v33, %v3128_v31 }
 0x395   :  { %v3134_v15 = vpop.eup %3133  ;;  %1689 = vmatpush1.bf16.msra.mxu0 %v4031_v57  ;;  %1730 = vmatpush1.bf16.msra.mxu1 %v4034_v24 }
 0x396   :  { %v1550_v23 = vmul.f32 %v3134_v15, %v4044_v26  ;;  %1690 = vmatprep.subr.bf16.mxu0 %v4038_v16  ;;  %1731 = vmatprep.subr.bf16.mxu1 %v4041_v32 }
 0x398   :  { %v4168_v44 = vadd.f32 %v1551_v8, %v1550_v23 }
 0x399   :  { %1691 = vmatpush1.bf16.msra.mxu0 %v4046_v18  ;;  %1732 = vmatpush1.bf16.msra.mxu1 %v4049_v7  ;;  %v3136_v26 = vpop.eup %3135 }
 0x39a   :  { %1692 = vmatprep.subr.bf16.mxu0 %v4052_v62  ;;  %1733 = vmatprep.subr.bf16.mxu1 %v4055_v29  ;;  %3137 = vtanh.f32 %v4168_v44 }
 0x39d   :  { %1693 = vmatpush1.bf16.msra.mxu0 %v4059_v28  ;;  %1734 = vmatpush1.bf16.msra.mxu1 %v4062_v30 }
 0x39e   :  { %1694 = vmatprep.subr.bf16.mxu0 %v4065_v25  ;;  %1735 = vmatprep.subr.bf16.mxu1 %v4106_v61 }
 0x3a1   :  { %1695 = vmatpush1.bf16.msra.mxu0 %v4109_v63  ;;  %1736 = vmatpush1.bf16.msra.mxu1 %v4112_v0 }
 0x3a2   :  { %1696 = vmatprep.subr.bf16.mxu0 %v4115_v2  ;;  %1737 = vmatprep.subr.bf16.mxu1 %v4118_v3 }
 0x3a5   :  { %1697 = vmatpush1.bf16.msra.mxu0 %v4121_v4  ;;  %1738 = vmatpush1.bf16.msra.mxu1 %v4124_v5 }
 0x3a6   :  { %1698 = vmatprep.subr.bf16.mxu0 %v4127_v6  ;;  %1739 = vmatprep.subr.bf16.mxu1 %v4130_v13 }
 0x3a7   :  { %v3138_v12 = vpop.eup %3137 }
 0x3a8   :  { %v1554_v20 = vmul.f32 %v3138_v12, %v3136_v26 }
 0x3a9   :  { %1699 = vmatpush1.bf16.msra.mxu0 %v4133_v21  ;;  %1740 = vmatpush1.bf16.msra.mxu1 %v4136_v22 }
 0x3aa   :  { %v1683_v9 = vpack.c.bf16 %v1554_v20, %v1554_v20  ;;  %1808 = vmatprep.subr.bf16.mxu0 %v4079_v59  ;;  %1849 = vmatprep.subr.bf16.mxu1 %v4082_v60  ;;  %v4684_v20 = vld [vmem:[#allocation35_spill] sm:$0xff] }
 0x3ac   :  { %1717 = vmatmul.mubr.bf16.vlgmr.msra.gmra.mxu0 %v1683_v9  ;;  %1758 = vmatmul.mubr.bf16.vlgmr.msra.gmra.mxu1 %v1683_v9 }
 0x3ad   :  { %1809 = vmatpush1.bf16.msra.mxu0 %v4005_v43  ;;  %1850 = vmatpush1.bf16.msra.mxu1 %v4008_v45 }
 0x3ae   :  { %1810 = vmatprep.subr.bf16.mxu0 %v4011_v46  ;;  %1851 = vmatprep.subr.bf16.mxu1 %v4014_v47 }
 0x3af   :  { %1840 = vmatprep.mubr.bf16.mxu0 %v4664_v17  ;;  %1881 = vmatprep.mubr.bf16.mxu1 %v4664_v17 }
 0x3b1   :  { %1811 = vmatpush1.bf16.msra.mxu0 %v4019_v49  ;;  %1852 = vmatpush1.bf16.msra.mxu1 %v4022_v50 }
 0x3b2   :  { %1812 = vmatprep.subr.bf16.mxu0 %v4025_v34  ;;  %1853 = vmatprep.subr.bf16.mxu1 %v4028_v52 }
 0x3b5   :  { %1813 = vmatpush1.bf16.msra.mxu0 %v4031_v57  ;;  %1854 = vmatpush1.bf16.msra.mxu1 %v4034_v24 }
 0x3b6   :  { %1814 = vmatprep.subr.bf16.mxu0 %v4038_v16  ;;  %1855 = vmatprep.subr.bf16.mxu1 %v4041_v32 }
 0x3b9   :  { %1815 = vmatpush1.bf16.msra.mxu0 %v4046_v18  ;;  %1856 = vmatpush1.bf16.msra.mxu1 %v4049_v7 }
 0x3ba   :  { %1816 = vmatprep.subr.bf16.mxu0 %v4052_v62  ;;  %1857 = vmatprep.subr.bf16.mxu1 %v4055_v29 }
 0x3bd   :  { %1817 = vmatpush1.bf16.msra.mxu0 %v4059_v28  ;;  %1858 = vmatpush1.bf16.msra.mxu1 %v4062_v30 }
 0x3be   :  { %1818 = vmatprep.subr.bf16.mxu0 %v4065_v25  ;;  %1859 = vmatprep.subr.bf16.mxu1 %v4106_v61 }
 0x3c1   :  { %1819 = vmatpush1.bf16.msra.mxu0 %v4109_v63  ;;  %1860 = vmatpush1.bf16.msra.mxu1 %v4112_v0 }
 0x3c2   :  { %1820 = vmatprep.subr.bf16.mxu0 %v4115_v2  ;;  %1861 = vmatprep.subr.bf16.mxu1 %v4118_v3 }
 0x3c5   :  { %1821 = vmatpush1.bf16.msra.mxu0 %v4121_v4  ;;  %1862 = vmatpush1.bf16.msra.mxu1 %v4124_v5 }
 0x3c6   :  { %1822 = vmatprep.subr.bf16.mxu0 %v4127_v6  ;;  %1863 = vmatprep.subr.bf16.mxu1 %v4130_v13 }
 0x3c9   :  { %1823 = vmatpush1.bf16.msra.mxu0 %v4133_v21  ;;  %1864 = vmatpush1.bf16.msra.mxu1 %v4136_v22 }
 0x3ca   :  { %1923 = vmatprep.subr.bf16.mxu0 %v4079_v59  ;;  %1964 = vmatprep.subr.bf16.mxu1 %v4082_v60 }
 0x44c   :  { %v1603_v10 = vpop.f32.mrf.mxu0  ;;  %v1644_v37 = vpop.f32.mrf.mxu1 }
 0x44d   :  { %v1651_v11 = vadd.f32 %v1603_v10, %v4680_v38  ;;  %v1653_v58 = vadd.f32 %v1644_v37, %v4683_v27  ;;  %v4686_v27 = vld [vmem:[#allocation38_spill] sm:$0xff] }
 0x44e   :  { %v1605_v39 = vpop.f32.mrf.mxu0  ;;  %v1646_v41 = vpop.f32.mrf.mxu1 }
 0x44f   :  { %v2893_v42 = vmul.f32 -1.442695, %v1651_v11  ;;  %v1652_v51 = vadd.f32 %v1605_v39, %v4681_v48  ;;  %v1654_v53 = vadd.f32 %v1646_v41, %v4682_v14  ;;  %v4685_v41 = vld [vmem:[#allocation37_spill] sm:$0xff] }
 0x450   :  { %v1607_v35 = vpop.f32.mrf.mxu0  ;;  %v1648_v54 = vpop.f32.mrf.mxu1 }
 0x451   :  { %3139 = vpow2.f32 %v2893_v42  ;;  %v2894_v55 = vmul.f32 -1.442695, %v1652_v51  ;;  %v2895_v31 = vmul.f32 -1.442695, %v1654_v53 }
 0x452   :  { %v1608_v56 = vpop.f32.mrf.mxu0  ;;  %v1649_v1 = vpop.f32.mrf.mxu1 }
 0x453   :  { %3141 = vpow2.f32 %v2894_v55 }
 0x454   :  { %3143 = vtanh.f32 %v1653_v58 }
 0x455   :  { %3145 = vpow2.f32 %v2895_v31  ;;  %v4687_v31 = vld [vmem:[#allocation36_spill] sm:$0xff] }
 0x45e   :  { %v3140_v36 = vpop.eup %3139 }
 0x45f   :  { %v1658_v33 = vadd.f32 1.0, %v3140_v36 }
 0x460   :  { %v3142_v8 = vpop.eup %3141 }
 0x461   :  { %3147 = vrcp.f32 %v1658_v33  ;;  %v1664_v15 = vadd.f32 1.0, %v3142_v8  ;;  %v3144_v19 = vpop.eup %3143 }
 0x462   :  { %v3146_v12 = vpop.eup %3145 }
 0x463   :  { %3149 = vrcp.f32 %v1664_v15  ;;  %v1671_v51 = vadd.f32 1.0, %v3146_v12 }
 0x46c   :  { %v1718_v23 = vpop.f32.mrf.mxu0  ;;  %v1759_v26 = vpop.f32.mrf.mxu1 }
 0x46d   :  { %v1766_v9 = vadd.f32 %v1718_v23, %v4684_v20  ;;  %v1768_v36 = vadd.f32 %v1759_v26, %v4687_v31  ;;  %v4689_v31 = vld [vmem:[#allocation41_spill] sm:$0xff] }
 0x46e   :  { %v3148_v10 = vpop.eup %3147  ;;  %v1720_v38 = vpop.f32.mrf.mxu0 }
 0x46f   :  { %v1761_v11 = vpop.f32.mrf.mxu1  ;;  %v1675_v39 = vmul.f32 %v3148_v10, %v3144_v19  ;;  %v2896_v37 = vmul.f32 -1.442695, %v1766_v9  ;;  %v1767_v42 = vadd.f32 %v1720_v38, %v4685_v41 }
 0x470   :  { %v3150_v48 = vpop.eup %3149  ;;  %v1722_v35 = vpop.f32.mrf.mxu0  ;;  %v1769_v58 = vadd.f32 %v1761_v11, %v4686_v27 }
 0x471   :  { %v1763_v54 = vpop.f32.mrf.mxu1  ;;  %v1674_v55 = vmul.f32 %v3150_v48, %v4148_v40  ;;  %3151 = vpow2.f32 %v2896_v37  ;;  %v2897_v56 = vmul.f32 -1.442695, %v1767_v42 }
 0x472   :  { %v1723_v1 = vpop.f32.mrf.mxu0  ;;  %v2898_v33 = vmul.f32 -1.442695, %v1769_v58 }
 0x473   :  { %v1764_v14 = vpop.f32.mrf.mxu1  ;;  %v4232_v53 = vadd.f32 %v1675_v39, %v1674_v55  ;;  %3153 = vpow2.f32 %v2897_v56  ;;  %v4688_v56 = vld [vmem:[#allocation39_spill] sm:$0xff] }
 0x474   :  { %3155 = vrcp.f32 %v1671_v51 }
 0x475   :  { %3157 = vtanh.f32 %v4232_v53 }
 0x476   :  { %3159 = vtanh.f32 %v1768_v36 }
 0x477   :  { %3161 = vpow2.f32 %v2898_v33 }
 0x47e   :  { %v3152_v8 = vpop.eup %3151 }
 0x47f   :  { %v1773_v15 = vadd.f32 1.0, %v3152_v8 }
 0x480   :  { %v3154_v19 = vpop.eup %3153 }
 0x481   :  { %v3156_v40 = vpop.eup %3155  ;;  %3163 = vrcp.f32 %v1773_v15  ;;  %v1779_v23 = vadd.f32 1.0, %v3154_v19 }
 0x482   :  { %v3158_v12 = vpop.eup %3157 }
 0x483   :  { %3165 = vrcp.f32 %v1779_v23  ;;  %v1678_v20 = vmul.f32 %v3158_v12, %v3156_v40  ;;  %v3160_v26 = vpop.eup %3159  ;;  %v4690_v23 = vld [vmem:[#allocation42_spill] sm:$0xff] }
 0x484   :  { %v3162_v10 = vpop.eup %3161 }
 0x485   :  { %v1807_v9 = vpack.c.bf16 %v1678_v20, %v1678_v20  ;;  %v1786_v37 = vadd.f32 1.0, %v3162_v10  ;;  %v4691_v20 = vld [vmem:[#allocation40_spill] sm:$0xff] }
 0x487   :  { %1841 = vmatmul.mubr.bf16.vlgmr.msra.gmra.mxu0 %v1807_v9  ;;  %1882 = vmatmul.mubr.bf16.vlgmr.msra.gmra.mxu1 %v1807_v9  ;;  %3167 = vrcp.f32 %v1786_v37 }
 0x488   :  { %1924 = vmatpush1.bf16.msra.mxu0 %v4005_v43  ;;  %1965 = vmatpush1.bf16.msra.mxu1 %v4008_v45 }
 0x489   :  { %1925 = vmatprep.subr.bf16.mxu0 %v4011_v46  ;;  %1966 = vmatprep.subr.bf16.mxu1 %v4014_v47 }
 0x48a   :  { %1955 = vmatprep.mubr.bf16.mxu0 %v4664_v17  ;;  %1996 = vmatprep.mubr.bf16.mxu1 %v4664_v17 }
 0x48c   :  { %1926 = vmatpush1.bf16.msra.mxu0 %v4019_v49  ;;  %1967 = vmatpush1.bf16.msra.mxu1 %v4022_v50 }
 0x48d   :  { %1927 = vmatprep.subr.bf16.mxu0 %v4025_v34  ;;  %1968 = vmatprep.subr.bf16.mxu1 %v4028_v52 }
 0x48e   :  { %v3164_v38 = vpop.eup %3163 }
 0x48f   :  { %v1790_v11 = vmul.f32 %v3164_v38, %v3160_v26 }
 0x490   :  { %v3166_v39 = vpop.eup %3165  ;;  %1928 = vmatpush1.bf16.msra.mxu0 %v4031_v57  ;;  %1969 = vmatpush1.bf16.msra.mxu1 %v4034_v24 }
 0x491   :  { %v1789_v41 = vmul.f32 %v3166_v39, %v4168_v44  ;;  %1929 = vmatprep.subr.bf16.mxu0 %v4038_v16  ;;  %1970 = vmatprep.subr.bf16.mxu1 %v4041_v32 }
 0x493   :  { %v4252_v42 = vadd.f32 %v1790_v11, %v1789_v41 }
 0x494   :  { %1930 = vmatpush1.bf16.msra.mxu0 %v4046_v18  ;;  %1971 = vmatpush1.bf16.msra.mxu1 %v4049_v7  ;;  %v3168_v44 = vpop.eup %3167 }
 0x495   :  { %1931 = vmatprep.subr.bf16.mxu0 %v4052_v62  ;;  %1972 = vmatprep.subr.bf16.mxu1 %v4055_v29  ;;  %3169 = vtanh.f32 %v4252_v42 }
 0x498   :  { %1932 = vmatpush1.bf16.msra.mxu0 %v4059_v28  ;;  %1973 = vmatpush1.bf16.msra.mxu1 %v4062_v30 }
 0x499   :  { %1933 = vmatprep.subr.bf16.mxu0 %v4065_v25  ;;  %1974 = vmatprep.subr.bf16.mxu1 %v4106_v61 }
 0x49c   :  { %1934 = vmatpush1.bf16.msra.mxu0 %v4109_v63  ;;  %1975 = vmatpush1.bf16.msra.mxu1 %v4112_v0 }
 0x49d   :  { %1935 = vmatprep.subr.bf16.mxu0 %v4115_v2  ;;  %1976 = vmatprep.subr.bf16.mxu1 %v4118_v3 }
 0x4a0   :  { %1936 = vmatpush1.bf16.msra.mxu0 %v4121_v4  ;;  %1977 = vmatpush1.bf16.msra.mxu1 %v4124_v5 }
 0x4a1   :  { %1937 = vmatprep.subr.bf16.mxu0 %v4127_v6  ;;  %1978 = vmatprep.subr.bf16.mxu1 %v4130_v13 }
 0x4a2   :  { %v3170_v48 = vpop.eup %3169 }
 0x4a3   :  { %v1793_v51 = vmul.f32 %v3170_v48, %v3168_v44 }
 0x4a4   :  { %1938 = vmatpush1.bf16.msra.mxu0 %v4133_v21  ;;  %1979 = vmatpush1.bf16.msra.mxu1 %v4136_v22 }
 0x4a5   :  { %v1922_v35 = vpack.c.bf16 %v1793_v51, %v1793_v51  ;;  %2047 = vmatprep.subr.bf16.mxu0 %v4079_v59  ;;  %2088 = vmatprep.subr.bf16.mxu1 %v4082_v60  ;;  %v4692_v51 = vld [vmem:[#allocation43_spill] sm:$0xff] }
 0x4a7   :  { %1956 = vmatmul.mubr.bf16.vlgmr.msra.gmra.mxu0 %v1922_v35  ;;  %1997 = vmatmul.mubr.bf16.vlgmr.msra.gmra.mxu1 %v1922_v35 }
 0x4a8   :  { %2048 = vmatpush1.bf16.msra.mxu0 %v4005_v43  ;;  %2089 = vmatpush1.bf16.msra.mxu1 %v4008_v45 }
 0x4a9   :  { %2049 = vmatprep.subr.bf16.mxu0 %v4011_v46  ;;  %2090 = vmatprep.subr.bf16.mxu1 %v4014_v47 }
 0x4aa   :  { %2079 = vmatprep.mubr.bf16.mxu0 %v4664_v17  ;;  %2120 = vmatprep.mubr.bf16.mxu1 %v4664_v17 }
 0x4ac   :  { %2050 = vmatpush1.bf16.msra.mxu0 %v4019_v49  ;;  %2091 = vmatpush1.bf16.msra.mxu1 %v4022_v50 }
 0x4ad   :  { %2051 = vmatprep.subr.bf16.mxu0 %v4025_v34  ;;  %2092 = vmatprep.subr.bf16.mxu1 %v4028_v52 }
 0x4b0   :  { %2052 = vmatpush1.bf16.msra.mxu0 %v4031_v57  ;;  %2093 = vmatpush1.bf16.msra.mxu1 %v4034_v24 }
 0x4b1   :  { %2053 = vmatprep.subr.bf16.mxu0 %v4038_v16  ;;  %2094 = vmatprep.subr.bf16.mxu1 %v4041_v32 }
 0x4b4   :  { %2054 = vmatpush1.bf16.msra.mxu0 %v4046_v18  ;;  %2095 = vmatpush1.bf16.msra.mxu1 %v4049_v7 }
 0x4b5   :  { %2055 = vmatprep.subr.bf16.mxu0 %v4052_v62  ;;  %2096 = vmatprep.subr.bf16.mxu1 %v4055_v29 }
 0x4b8   :  { %2056 = vmatpush1.bf16.msra.mxu0 %v4059_v28  ;;  %2097 = vmatpush1.bf16.msra.mxu1 %v4062_v30 }
 0x4b9   :  { %2057 = vmatprep.subr.bf16.mxu0 %v4065_v25  ;;  %2098 = vmatprep.subr.bf16.mxu1 %v4106_v61 }
 0x4bc   :  { %2058 = vmatpush1.bf16.msra.mxu0 %v4109_v63  ;;  %2099 = vmatpush1.bf16.msra.mxu1 %v4112_v0 }
 0x4bd   :  { %2059 = vmatprep.subr.bf16.mxu0 %v4115_v2  ;;  %2100 = vmatprep.subr.bf16.mxu1 %v4118_v3 }
 0x4c0   :  { %2060 = vmatpush1.bf16.msra.mxu0 %v4121_v4  ;;  %2101 = vmatpush1.bf16.msra.mxu1 %v4124_v5 }
 0x4c1   :  { %2061 = vmatprep.subr.bf16.mxu0 %v4127_v6  ;;  %2102 = vmatprep.subr.bf16.mxu1 %v4130_v13 }
 0x4c4   :  { %2062 = vmatpush1.bf16.msra.mxu0 %v4133_v21  ;;  %2103 = vmatpush1.bf16.msra.mxu1 %v4136_v22 }
 0x4c5   :  { %2162 = vmatprep.subr.bf16.mxu0 %v4079_v59  ;;  %2203 = vmatprep.subr.bf16.mxu1 %v4082_v60 }
 0x547   :  { %v1842_v54 = vpop.f32.mrf.mxu0  ;;  %v1883_v55 = vpop.f32.mrf.mxu1 }
 0x548   :  { %v1890_v1 = vadd.f32 %v1842_v54, %v4688_v56  ;;  %v1892_v9 = vadd.f32 %v1883_v55, %v4691_v20  ;;  %v4694_v20 = vld [vmem:[#allocation46_spill] sm:$0xff] }
 0x549   :  { %v1844_v14 = vpop.f32.mrf.mxu0  ;;  %v1885_v27 = vpop.f32.mrf.mxu1 }
 0x54a   :  { %v2899_v58 = vmul.f32 -1.442695, %v1890_v1  ;;  %v1891_v36 = vadd.f32 %v1844_v14, %v4689_v31  ;;  %v1893_v12 = vadd.f32 %v1885_v27, %v4690_v23  ;;  %v4693_v27 = vld [vmem:[#allocation45_spill] sm:$0xff] }
 0x54b   :  { %v1846_v33 = vpop.f32.mrf.mxu0  ;;  %v1887_v8 = vpop.f32.mrf.mxu1 }
 0x54c   :  { %3171 = vpow2.f32 %v2899_v58  ;;  %v2900_v15 = vmul.f32 -1.442695, %v1891_v36  ;;  %v2901_v26 = vmul.f32 -1.442695, %v1893_v12 }
 0x54d   :  { %v1847_v19 = vpop.f32.mrf.mxu0  ;;  %v1888_v40 = vpop.f32.mrf.mxu1 }
 0x54e   :  { %3173 = vpow2.f32 %v2900_v15 }
 0x54f   :  { %3175 = vtanh.f32 %v1892_v9 }
 0x550   :  { %3177 = vpow2.f32 %v2901_v26  ;;  %v4695_v26 = vld [vmem:[#allocation44_spill] sm:$0xff] }
 0x559   :  { %v3172_v10 = vpop.eup %3171 }
 0x55a   :  { %v1897_v38 = vadd.f32 1.0, %v3172_v10 }
 0x55b   :  { %v3174_v11 = vpop.eup %3173 }
 0x55c   :  { %3179 = vrcp.f32 %v1897_v38  ;;  %v1903_v39 = vadd.f32 1.0, %v3174_v11  ;;  %v3176_v37 = vpop.eup %3175 }
 0x55d   :  { %v3178_v48 = vpop.eup %3177 }
 0x55e   :  { %3181 = vrcp.f32 %v1903_v39  ;;  %v1910_v36 = vadd.f32 1.0, %v3178_v48 }
 0x567   :  { %v1957_v41 = vpop.f32.mrf.mxu0  ;;  %v1998_v44 = vpop.f32.mrf.mxu1 }
 0x568   :  { %v2005_v35 = vadd.f32 %v1957_v41, %v4692_v51  ;;  %v2007_v10 = vadd.f32 %v1998_v44, %v4695_v26 }
 0x569   :  { %v3180_v54 = vpop.eup %3179  ;;  %v1959_v56 = vpop.f32.mrf.mxu0 }
 0x56a   :  { %v2000_v1 = vpop.f32.mrf.mxu1  ;;  %v1914_v14 = vmul.f32 %v3180_v54, %v3176_v37  ;;  %v2902_v55 = vmul.f32 -1.442695, %v2005_v35  ;;  %v2006_v58 = vadd.f32 %v1959_v56, %v4693_v27 }
 0x56b   :  { %v3182_v31 = vpop.eup %3181  ;;  %v1961_v33 = vpop.f32.mrf.mxu0  ;;  %v2008_v9 = vadd.f32 %v2000_v1, %v4694_v20 }
 0x56c   :  { %v2002_v8 = vpop.f32.mrf.mxu1  ;;  %v1913_v15 = vmul.f32 %v3182_v31, %v4232_v53  ;;  %3183 = vpow2.f32 %v2902_v55  ;;  %v2903_v19 = vmul.f32 -1.442695, %v2006_v58 }
 0x56d   :  { %v1962_v40 = vpop.f32.mrf.mxu0  ;;  %v2904_v38 = vmul.f32 -1.442695, %v2008_v9 }
 0x56e   :  { %v2003_v23 = vpop.f32.mrf.mxu1  ;;  %v4316_v12 = vadd.f32 %v1914_v14, %v1913_v15  ;;  %3185 = vpow2.f32 %v2903_v19  ;;  %v4701_v19 = vld [vmem:[#allocation53_spill] sm:$0xff] }
 0x56f   :  { %3187 = vrcp.f32 %v1910_v36 }
 0x570   :  { %3189 = vtanh.f32 %v4316_v12 }
 0x571   :  { %3191 = vtanh.f32 %v2007_v10 }
 0x572   :  { %3193 = vpow2.f32 %v2904_v38 }
 0x579   :  { %v3184_v11 = vpop.eup %3183 }
 0x57a   :  { %v2012_v39 = vadd.f32 1.0, %v3184_v11 }
 0x57b   :  { %v3186_v37 = vpop.eup %3185 }
 0x57c   :  { %v3188_v53 = vpop.eup %3187  ;;  %3195 = vrcp.f32 %v2012_v39  ;;  %v2018_v41 = vadd.f32 1.0, %v3186_v37 }
 0x57d   :  { %v3190_v48 = vpop.eup %3189 }
 0x57e   :  { %3197 = vrcp.f32 %v2018_v41  ;;  %v1917_v51 = vmul.f32 %v3190_v48, %v3188_v53  ;;  %v3192_v44 = vpop.eup %3191  ;;  %v4702_v53 = vld [vmem:[#allocation54_spill] sm:$0xff]  ;;  %v4703_v48 = vld [vmem:[#allocation52_spill] sm:$0xff] }
 0x57f   :  { %v3194_v54 = vpop.eup %3193 }
 0x580   :  { %v2046_v35 = vpack.c.bf16 %v1917_v51, %v1917_v51  ;;  %v2025_v55 = vadd.f32 1.0, %v3194_v54 }
 0x582   :  { %2080 = vmatmul.mubr.bf16.vlgmr.msra.gmra.mxu0 %v2046_v35  ;;  %2121 = vmatmul.mubr.bf16.vlgmr.msra.gmra.mxu1 %v2046_v35  ;;  %3199 = vrcp.f32 %v2025_v55 }
 0x583   :  { %2163 = vmatpush1.bf16.msra.mxu0 %v4005_v43  ;;  %2204 = vmatpush1.bf16.msra.mxu1 %v4008_v45 }
 0x584   :  { %2164 = vmatprep.subr.bf16.mxu0 %v4011_v46  ;;  %2205 = vmatprep.subr.bf16.mxu1 %v4014_v47 }
 0x585   :  { %2194 = vmatprep.mubr.bf16.mxu0 %v4664_v17  ;;  %2235 = vmatprep.mubr.bf16.mxu1 %v4664_v17 }
 0x587   :  { %2165 = vmatpush1.bf16.msra.mxu0 %v4019_v49  ;;  %2206 = vmatpush1.bf16.msra.mxu1 %v4022_v50 }
 0x588   :  { %2166 = vmatprep.subr.bf16.mxu0 %v4025_v34  ;;  %2207 = vmatprep.subr.bf16.mxu1 %v4028_v52 }
 0x589   :  { %v3196_v56 = vpop.eup %3195 }
 0x58a   :  { %v2029_v1 = vmul.f32 %v3196_v56, %v3192_v44 }
 0x58b   :  { %v3198_v14 = vpop.eup %3197  ;;  %2167 = vmatpush1.bf16.msra.mxu0 %v4031_v57  ;;  %2208 = vmatpush1.bf16.msra.mxu1 %v4034_v24 }
 0x58c   :  { %v2028_v27 = vmul.f32 %v3198_v14, %v4252_v42  ;;  %2168 = vmatprep.subr.bf16.mxu0 %v4038_v16  ;;  %2209 = vmatprep.subr.bf16.mxu1 %v4041_v32 }
 0x58e   :  { %v4336_v58 = vadd.f32 %v2029_v1, %v2028_v27 }
 0x58f   :  { %2169 = vmatpush1.bf16.msra.mxu0 %v4046_v18  ;;  %2210 = vmatpush1.bf16.msra.mxu1 %v4049_v7  ;;  %v3200_v42 = vpop.eup %3199 }
 0x590   :  { %2170 = vmatprep.subr.bf16.mxu0 %v4052_v62  ;;  %2211 = vmatprep.subr.bf16.mxu1 %v4055_v29  ;;  %3201 = vtanh.f32 %v4336_v58 }
 0x593   :  { %2171 = vmatpush1.bf16.msra.mxu0 %v4059_v28  ;;  %2212 = vmatpush1.bf16.msra.mxu1 %v4062_v30 }
 0x594   :  { %2172 = vmatprep.subr.bf16.mxu0 %v4065_v25  ;;  %2213 = vmatprep.subr.bf16.mxu1 %v4106_v61 }
 0x597   :  { %2173 = vmatpush1.bf16.msra.mxu0 %v4109_v63  ;;  %2214 = vmatpush1.bf16.msra.mxu1 %v4112_v0 }
 0x598   :  { %2174 = vmatprep.subr.bf16.mxu0 %v4115_v2  ;;  %2215 = vmatprep.subr.bf16.mxu1 %v4118_v3 }
 0x59b   :  { %2175 = vmatpush1.bf16.msra.mxu0 %v4121_v4  ;;  %2216 = vmatpush1.bf16.msra.mxu1 %v4124_v5 }
 0x59c   :  { %2176 = vmatprep.subr.bf16.mxu0 %v4127_v6  ;;  %2217 = vmatprep.subr.bf16.mxu1 %v4130_v13 }
 0x59d   :  { %v3202_v31 = vpop.eup %3201 }
 0x59e   :  { %v2032_v36 = vmul.f32 %v3202_v31, %v3200_v42  ;;  %v4405_v42 = vld [vmem:[#allocation11 + $0xe0] ss:$16 sps:$4 sm:$0xff]   ;;  %v4408_v31 = vld [vmem:[#allocation11 + $0xe8] ss:$16 sps:$4 sm:$0xff]  }
 0x59f   :  { %2177 = vmatpush1.bf16.msra.mxu0 %v4133_v21  ;;  %2218 = vmatpush1.bf16.msra.mxu1 %v4136_v22 }
 0x5a0   :  { %v2161_v33 = vpack.c.bf16 %v2032_v36, %v2032_v36  ;;  %2286 = vmatprep.subr.bf16.mxu0 %v4079_v59  ;;  %2327 = vmatprep.subr.bf16.mxu1 %v4082_v60  ;;  %v4411_v36 = vld [vmem:[#allocation11 + $0xc4] ss:$16 sps:$4 sm:$0xff]  }
 0x5a2   :  { %2195 = vmatmul.mubr.bf16.vlgmr.msra.gmra.mxu0 %v2161_v33  ;;  %2236 = vmatmul.mubr.bf16.vlgmr.msra.gmra.mxu1 %v2161_v33  ;;  %v4414_v33 = vld [vmem:[#allocation11 + $0xcc] ss:$16 sps:$4 sm:$0xff]  }
 0x5a3   :  { %2287 = vmatpush1.bf16.msra.mxu0 %v4005_v43  ;;  %2328 = vmatpush1.bf16.msra.mxu1 %v4008_v45 }
 0x5a4   :  { %2288 = vmatprep.subr.bf16.mxu0 %v4011_v46  ;;  %2329 = vmatprep.subr.bf16.mxu1 %v4014_v47  ;;  %v4696_v46 = vld [vmem:[#allocation47_spill] sm:$0xff] }
 0x5a5   :  { %2318 = vmatprep.mubr.bf16.mxu0 %v4664_v17  ;;  %2359 = vmatprep.mubr.bf16.mxu1 %v4664_v17 }
 0x5a7   :  { %2289 = vmatpush1.bf16.msra.mxu0 %v4019_v49  ;;  %2330 = vmatpush1.bf16.msra.mxu1 %v4022_v50 }
 0x5a8   :  { %2290 = vmatprep.subr.bf16.mxu0 %v4025_v34  ;;  %2331 = vmatprep.subr.bf16.mxu1 %v4028_v52  ;;  %v4697_v52 = vld [vmem:[#allocation49_spill] sm:$0xff] }
 0x5ab   :  { %2291 = vmatpush1.bf16.msra.mxu0 %v4031_v57  ;;  %2332 = vmatpush1.bf16.msra.mxu1 %v4034_v24 }
 0x5ac   :  { %2292 = vmatprep.subr.bf16.mxu0 %v4038_v16  ;;  %2333 = vmatprep.subr.bf16.mxu1 %v4041_v32 }
 0x5af   :  { %2293 = vmatpush1.bf16.msra.mxu0 %v4046_v18  ;;  %2334 = vmatpush1.bf16.msra.mxu1 %v4049_v7 }
 0x5b0   :  { %2294 = vmatprep.subr.bf16.mxu0 %v4052_v62  ;;  %2335 = vmatprep.subr.bf16.mxu1 %v4055_v29  ;;  %v4698_v62 = vld [vmem:[#allocation50_spill] sm:$0xff] }
 0x5b3   :  { %2295 = vmatpush1.bf16.msra.mxu0 %v4059_v28  ;;  %2336 = vmatpush1.bf16.msra.mxu1 %v4062_v30  ;;  %v4699_v28 = vld [vmem:[#allocation48_spill] sm:$0xff] }
 0x5b4   :  { %2296 = vmatprep.subr.bf16.mxu0 %v4065_v25  ;;  %2337 = vmatprep.subr.bf16.mxu1 %v4106_v61 }
 0x5b7   :  { %2297 = vmatpush1.bf16.msra.mxu0 %v4109_v63  ;;  %2338 = vmatpush1.bf16.msra.mxu1 %v4112_v0 }
 0x5b8   :  { %2298 = vmatprep.subr.bf16.mxu0 %v4115_v2  ;;  %2339 = vmatprep.subr.bf16.mxu1 %v4118_v3 }
 0x5bb   :  { %2299 = vmatpush1.bf16.msra.mxu0 %v4121_v4  ;;  %2340 = vmatpush1.bf16.msra.mxu1 %v4124_v5  ;;  %v4700_v5 = vld [vmem:[#allocation51_spill] sm:$0xff] }
 0x5bc   :  { %2300 = vmatprep.subr.bf16.mxu0 %v4127_v6  ;;  %2341 = vmatprep.subr.bf16.mxu1 %v4130_v13 }
 0x5bf   :  { %2301 = vmatpush1.bf16.msra.mxu0 %v4133_v21  ;;  %2342 = vmatpush1.bf16.msra.mxu1 %v4136_v22 }
 0x5c0   :  { %2401 = vmatprep.subr.bf16.mxu0 %v4079_v59  ;;  %2442 = vmatprep.subr.bf16.mxu1 %v4082_v60 }
 0x642   :  { %v2081_v43 = vpop.f32.mrf.mxu0  ;;  %v2122_v45 = vpop.f32.mrf.mxu1 }
 0x643   :  { %v2129_v47 = vadd.f32 %v2081_v43, %v4696_v46  ;;  %v2131_v30 = vadd.f32 %v2122_v45, %v4699_v28  ;;  %v4419_v45 = vld [vmem:[#allocation11 + $0xc0] ss:$16 sps:$4 sm:$0xff]   ;;  %v4422_v46 = vld [vmem:[#allocation11 + $0xc8] ss:$16 sps:$4 sm:$0xff]  }
 0x644   :  { %v2083_v49 = vpop.f32.mrf.mxu0  ;;  %v2124_v50 = vpop.f32.mrf.mxu1  ;;  %v4446_v28 = vld [vmem:[#allocation11 + $0x80] ss:$16 sps:$4 sm:$0xff]  }
 0x645   :  { %v2905_v34 = vmul.f32 -1.442695, %v2129_v47  ;;  %v2130_v57 = vadd.f32 %v2083_v49, %v4697_v52  ;;  %v2132_v29 = vadd.f32 %v2124_v50, %v4698_v62  ;;  %v4425_v49 = vld [vmem:[#allocation11 + $0xa4] ss:$16 sps:$4 sm:$0xff]   ;;  %v4428_v50 = vld [vmem:[#allocation11 + $0xac] ss:$16 sps:$4 sm:$0xff]  }
 0x646   :  { %v2085_v24 = vpop.f32.mrf.mxu0  ;;  %v2126_v16 = vpop.f32.mrf.mxu1  ;;  %v4441_v62 = vld [vmem:[#allocation11 + $0x8c] ss:$16 sps:$4 sm:$0xff]  }
 0x647   :  { %3203 = vpow2.f32 %v2905_v34  ;;  %v2906_v32 = vmul.f32 -1.442695, %v2130_v57  ;;  %v2907_v25 = vmul.f32 -1.442695, %v2132_v29  ;;  %v4431_v16 = vld [vmem:[#allocation11 + $0xa0] ss:$16 sps:$4 sm:$0xff]  }
 0x648   :  { %v2086_v18 = vpop.f32.mrf.mxu0  ;;  %v2127_v7 = vpop.f32.mrf.mxu1 }
 0x649   :  { %3205 = vpow2.f32 %v2906_v32  ;;  %v4434_v32 = vld [vmem:[#allocation11 + $0xa8] ss:$16 sps:$4 sm:$0xff]   ;;  %v4438_v7 = vld [vmem:[#allocation11 + $0x84] ss:$16 sps:$4 sm:$0xff]  }
 0x64a   :  { %3207 = vtanh.f32 %v2131_v30  ;;  %v4449_v30 = vld [vmem:[#allocation11 + $0x88] ss:$16 sps:$4 sm:$0xff]  }
 0x64b   :  { %3209 = vpow2.f32 %v2907_v25  ;;  %v4455_v25 = vld [vmem:[#allocation11 + $0x6c] ss:$16 sps:$4 sm:$0xff]  }
 0x654   :  { %v3204_v59 = vpop.eup %3203 }
 0x655   :  { %v2136_v60 = vadd.f32 1.0, %v3204_v59  ;;  %v4459_v59 = vld [vmem:[#allocation11 + $0x60] ss:$16 sps:$4 sm:$0xff]  }
 0x656   :  { %v3206_v61 = vpop.eup %3205 }
 0x657   :  { %3211 = vrcp.f32 %v2136_v60  ;;  %v2142_v63 = vadd.f32 1.0, %v3206_v61  ;;  %v3208_v0 = vpop.eup %3207  ;;  %v4462_v60 = vld [vmem:[#allocation11 + $0x68] ss:$16 sps:$4 sm:$0xff]   ;;  %v4465_v61 = vld [vmem:[#allocation11 + $0x44] ss:$16 sps:$4 sm:$0xff]  }
 0x658   :  { %v3210_v4 = vpop.eup %3209 }
 0x659   :  { %3213 = vrcp.f32 %v2142_v63  ;;  %v2149_v20 = vadd.f32 1.0, %v3210_v4  ;;  %v4468_v63 = vld [vmem:[#allocation11 + $0x4c] ss:$16 sps:$4 sm:$0xff]  }
 0x65a   :  { %v4480_v4 = vld [vmem:[#allocation11 + $0x2c] ss:$16 sps:$4 sm:$0xff]  }
 0x662   :  { %v2196_v2 = vpop.f32.mrf.mxu0  ;;  %v2237_v3 = vpop.f32.mrf.mxu1 }
 0x663   :  { %v2244_v6 = vadd.f32 %v2196_v2, %v4700_v5  ;;  %v2246_v51 = vadd.f32 %v2237_v3, %v4703_v48  ;;  %v4474_v2 = vld [vmem:[#allocation11 + $0x48] ss:$16 sps:$4 sm:$0xff]   ;;  %v4477_v3 = vld [vmem:[#allocation11 + $0x24] ss:$16 sps:$4 sm:$0xff]   ;;  %v4483_v5 = vld [vmem:[#allocation11 + $0x20] ss:$16 sps:$4 sm:$0xff]  }
 0x664   :  { %v3212_v13 = vpop.eup %3211  ;;  %v2198_v21 = vpop.f32.mrf.mxu0  ;;  %v4705_v48 = vld [vmem:[#allocation57_spill] sm:$0xff] }
 0x665   :  { %v2239_v22 = vpop.f32.mrf.mxu1  ;;  %v2153_v8 = vmul.f32 %v3212_v13, %v3208_v0  ;;  %v2908_v15 = vmul.f32 -1.442695, %v2244_v6  ;;  %v2245_v40 = vadd.f32 %v2198_v21, %v4701_v19  ;;  %v4471_v0 = vld [vmem:[#allocation11 + $0x40] ss:$16 sps:$4 sm:$0xff]   ;;  %v4486_v6 = vld [vmem:[#allocation11 + $0x28] ss:$16 sps:$4 sm:$0xff]  }
 0x666   :  { %v3214_v23 = vpop.eup %3213  ;;  %v2200_v9 = vpop.f32.mrf.mxu0  ;;  %v2247_v41 = vadd.f32 %v2239_v22, %v4702_v53  ;;  %v4489_v21 = vld [vmem:[#allocation11 + $0x4] ss:$16 sps:$4 sm:$0xff]   ;;  %v4492_v22 = vld [vmem:[#allocation11 + $0xc] ss:$16 sps:$4 sm:$0xff]   ;;  %v4495_v19 = vld [vmem:[#allocation11] ss:$16 sps:$4 sm:$0xff]  }
 0x667   :  { %v2241_v26 = vpop.f32.mrf.mxu1  ;;  %v2152_v10 = vmul.f32 %v3214_v23, %v4316_v12  ;;  %3215 = vpow2.f32 %v2908_v15  ;;  %v2909_v38 = vmul.f32 -1.442695, %v2245_v40  ;;  %v4498_v40 = vld [vmem:[#allocation11 + $0x8] ss:$16 sps:$4 sm:$0xff]   ;;  %v3370_v9 = vld [vmem:[#allocation11 + $0xec] ss:$16 sps:$4 sm:$0xff]  }
 0x668   :  { %v2201_v11 = vpop.f32.mrf.mxu0  ;;  %v2910_v35 = vmul.f32 -1.442695, %v2247_v41 }
 0x669   :  { %v2242_v39 = vpop.f32.mrf.mxu1  ;;  %v4400_v37 = vadd.f32 %v2153_v8, %v2152_v10  ;;  %3217 = vpow2.f32 %v2909_v38  ;;  %v4704_v38 = vld [vmem:[#allocation55_spill] sm:$0xff] }
 0x66a   :  { %3219 = vrcp.f32 %v2149_v20  ;;  %v3369_v20 = vld [vmem:[#allocation11 + $0xe4] ss:$16 sps:$4 sm:$0xff]  }
 0x66b   :  { %3221 = vtanh.f32 %v4400_v37 }
 0x66c   :  { %3223 = vtanh.f32 %v2246_v51 }
 0x66d   :  { %3225 = vpow2.f32 %v2910_v35 }
 0x674   :  { %v3216_v44 = vpop.eup %3215 }
 0x675   :  { %v2251_v54 = vadd.f32 1.0, %v3216_v44 }
 0x676   :  { %v3218_v56 = vpop.eup %3217 }
 0x677   :  { %v3220_v12 = vpop.eup %3219  ;;  %3227 = vrcp.f32 %v2251_v54  ;;  %v2257_v1 = vadd.f32 1.0, %v3218_v56 }
 0x678   :  { %v3222_v14 = vpop.eup %3221 }
 0x679   :  { %3229 = vrcp.f32 %v2257_v1  ;;  %v2156_v55 = vmul.f32 %v3222_v14, %v3220_v12  ;;  %v3224_v43 = vpop.eup %3223  ;;  %v4706_v1 = vld [vmem:[#allocation58_spill] sm:$0xff] }
 0x67a   :  { %v3226_v47 = vpop.eup %3225 }
 0x67b   :  { %v2285_v27 = vpack.c.bf16 %v2156_v55, %v2156_v55  ;;  %v2264_v24 = vadd.f32 1.0, %v3226_v47  ;;  %v4707_v55 = vld [vmem:[#allocation56_spill] sm:$0xff] }
 0x67d   :  { %2319 = vmatmul.mubr.bf16.vlgmr.msra.gmra.mxu0 %v2285_v27  ;;  %2360 = vmatmul.mubr.bf16.vlgmr.msra.gmra.mxu1 %v2285_v27  ;;  %3231 = vrcp.f32 %v2264_v24 }
 0x67e   :  { %2402 = vmatpush1.bf16.msra.mxu0 %v4405_v42  ;;  %2443 = vmatpush1.bf16.msra.mxu1 %v4408_v31 }
 0x67f   :  { %2403 = vmatprep.subr.bf16.mxu0 %v4411_v36  ;;  %2444 = vmatprep.subr.bf16.mxu1 %v4414_v33 }
 0x680   :  { %2433 = vmatprep.mubr.bf16.mxu0 %v4664_v17  ;;  %2474 = vmatprep.mubr.bf16.mxu1 %v4664_v17 }
 0x682   :  { %2404 = vmatpush1.bf16.msra.mxu0 %v4419_v45  ;;  %2445 = vmatpush1.bf16.msra.mxu1 %v4422_v46 }
 0x683   :  { %2405 = vmatprep.subr.bf16.mxu0 %v4425_v49  ;;  %2446 = vmatprep.subr.bf16.mxu1 %v4428_v50 }
 0x684   :  { %v3228_v34 = vpop.eup %3227 }
 0x685   :  { %v2268_v52 = vmul.f32 %v3228_v34, %v3224_v43 }
 0x686   :  { %v3230_v57 = vpop.eup %3229  ;;  %2406 = vmatpush1.bf16.msra.mxu0 %v4431_v16  ;;  %2447 = vmatpush1.bf16.msra.mxu1 %v4434_v32 }
 0x687   :  { %v2267_v18 = vmul.f32 %v3230_v57, %v4336_v58  ;;  %2407 = vmatprep.subr.bf16.mxu0 %v4438_v7  ;;  %2448 = vmatprep.subr.bf16.mxu1 %v4441_v62  ;;  %v4452_v58 = vld [vmem:[#allocation11 + $0x64] ss:$16 sps:$4 sm:$0xff]  }
 0x689   :  { %v4444_v29 = vadd.f32 %v2268_v52, %v2267_v18 }
 0x68a   :  { %2408 = vmatpush1.bf16.msra.mxu0 %v4446_v28  ;;  %2449 = vmatpush1.bf16.msra.mxu1 %v4449_v30  ;;  %v3232_v13 = vpop.eup %3231 }
 0x68b   :  { %2409 = vmatprep.subr.bf16.mxu0 %v4452_v58  ;;  %2450 = vmatprep.subr.bf16.mxu1 %v4455_v25  ;;  %3233 = vtanh.f32 %v4444_v29 }
 0x68e   :  { %2410 = vmatpush1.bf16.msra.mxu0 %v4459_v59  ;;  %2451 = vmatpush1.bf16.msra.mxu1 %v4462_v60 }
 0x68f   :  { %2411 = vmatprep.subr.bf16.mxu0 %v4465_v61  ;;  %2452 = vmatprep.subr.bf16.mxu1 %v4468_v63 }
 0x692   :  { %2412 = vmatpush1.bf16.msra.mxu0 %v4471_v0  ;;  %2453 = vmatpush1.bf16.msra.mxu1 %v4474_v2 }
 0x693   :  { %2413 = vmatprep.subr.bf16.mxu0 %v4477_v3  ;;  %2454 = vmatprep.subr.bf16.mxu1 %v4480_v4 }
 0x696   :  { %2414 = vmatpush1.bf16.msra.mxu0 %v4483_v5  ;;  %2455 = vmatpush1.bf16.msra.mxu1 %v4486_v6 }
 0x697   :  { %2415 = vmatprep.subr.bf16.mxu0 %v4489_v21  ;;  %2456 = vmatprep.subr.bf16.mxu1 %v4492_v22 }
 0x698   :  { %v3234_v8 = vpop.eup %3233 }
 0x699   :  { %v2271_v15 = vmul.f32 %v3234_v8, %v3232_v13 }
 0x69a   :  { %2416 = vmatpush1.bf16.msra.mxu0 %v4495_v19  ;;  %2457 = vmatpush1.bf16.msra.mxu1 %v4498_v40 }
 0x69b   :  { %v2400_v23 = vpack.c.bf16 %v2271_v15, %v2271_v15  ;;  %2525 = vmatprep.subr.bf16.mxu0 %v3369_v20  ;;  %2566 = vmatprep.subr.bf16.mxu1 %v3370_v9  ;;  %v4708_v15 = vld [vmem:[#allocation59_spill] sm:$0xff] }
 0x69d   :  { %2434 = vmatmul.mubr.bf16.vlgmr.msra.gmra.mxu0 %v2400_v23  ;;  %2475 = vmatmul.mubr.bf16.vlgmr.msra.gmra.mxu1 %v2400_v23 }
 0x69e   :  { %2526 = vmatpush1.bf16.msra.mxu0 %v4405_v42  ;;  %2567 = vmatpush1.bf16.msra.mxu1 %v4408_v31 }
 0x69f   :  { %2527 = vmatprep.subr.bf16.mxu0 %v4411_v36  ;;  %2568 = vmatprep.subr.bf16.mxu1 %v4414_v33 }
 0x6a0   :  { %2557 = vmatprep.mubr.bf16.mxu0 %v4664_v17  ;;  %2598 = vmatprep.mubr.bf16.mxu1 %v4664_v17 }
 0x6a2   :  { %2528 = vmatpush1.bf16.msra.mxu0 %v4419_v45  ;;  %2569 = vmatpush1.bf16.msra.mxu1 %v4422_v46 }
 0x6a3   :  { %2529 = vmatprep.subr.bf16.mxu0 %v4425_v49  ;;  %2570 = vmatprep.subr.bf16.mxu1 %v4428_v50 }
 0x6a6   :  { %2530 = vmatpush1.bf16.msra.mxu0 %v4431_v16  ;;  %2571 = vmatpush1.bf16.msra.mxu1 %v4434_v32 }
 0x6a7   :  { %2531 = vmatprep.subr.bf16.mxu0 %v4438_v7  ;;  %2572 = vmatprep.subr.bf16.mxu1 %v4441_v62 }
 0x6aa   :  { %2532 = vmatpush1.bf16.msra.mxu0 %v4446_v28  ;;  %2573 = vmatpush1.bf16.msra.mxu1 %v4449_v30 }
 0x6ab   :  { %2533 = vmatprep.subr.bf16.mxu0 %v4452_v58  ;;  %2574 = vmatprep.subr.bf16.mxu1 %v4455_v25 }
 0x6ae   :  { %2534 = vmatpush1.bf16.msra.mxu0 %v4459_v59  ;;  %2575 = vmatpush1.bf16.msra.mxu1 %v4462_v60 }
 0x6af   :  { %2535 = vmatprep.subr.bf16.mxu0 %v4465_v61  ;;  %2576 = vmatprep.subr.bf16.mxu1 %v4468_v63 }
 0x6b2   :  { %2536 = vmatpush1.bf16.msra.mxu0 %v4471_v0  ;;  %2577 = vmatpush1.bf16.msra.mxu1 %v4474_v2 }
 0x6b3   :  { %2537 = vmatprep.subr.bf16.mxu0 %v4477_v3  ;;  %2578 = vmatprep.subr.bf16.mxu1 %v4480_v4 }
 0x6b6   :  { %2538 = vmatpush1.bf16.msra.mxu0 %v4483_v5  ;;  %2579 = vmatpush1.bf16.msra.mxu1 %v4486_v6 }
 0x6b7   :  { %2539 = vmatprep.subr.bf16.mxu0 %v4489_v21  ;;  %2580 = vmatprep.subr.bf16.mxu1 %v4492_v22 }
 0x6ba   :  { %2540 = vmatpush1.bf16.msra.mxu0 %v4495_v19  ;;  %2581 = vmatpush1.bf16.msra.mxu1 %v4498_v40 }
 0x6bb   :  { %2640 = vmatprep.subr.bf16.mxu0 %v3369_v20  ;;  %2681 = vmatprep.subr.bf16.mxu1 %v3370_v9 }
 0x73d   :  { %v2320_v26 = vpop.f32.mrf.mxu0  ;;  %v2361_v10 = vpop.f32.mrf.mxu1 }
 0x73e   :  { %v2368_v11 = vadd.f32 %v2320_v26, %v4704_v38  ;;  %v2370_v27 = vadd.f32 %v2361_v10, %v4707_v55  ;;  %v4711_v55 = vld [vmem:[#allocation60_spill] sm:$0xff] }
 0x73f   :  { %v2322_v39 = vpop.f32.mrf.mxu0  ;;  %v2363_v53 = vpop.f32.mrf.mxu1 }
 0x740   :  { %v2911_v41 = vmul.f32 -1.442695, %v2368_v11  ;;  %v2369_v51 = vadd.f32 %v2322_v39, %v4705_v48  ;;  %v2371_v14 = vadd.f32 %v2363_v53, %v4706_v1  ;;  %v4709_v11 = vld [vmem:[#allocation61_spill] sm:$0xff]  ;;  %v4710_v1 = vld [vmem:[#allocation62_spill] sm:$0xff] }
 0x741   :  { %v2324_v35 = vpop.f32.mrf.mxu0  ;;  %v2365_v44 = vpop.f32.mrf.mxu1 }
 0x742   :  { %3235 = vpow2.f32 %v2911_v41  ;;  %v2912_v54 = vmul.f32 -1.442695, %v2369_v51  ;;  %v2913_v43 = vmul.f32 -1.442695, %v2371_v14 }
 0x743   :  { %v2325_v56 = vpop.f32.mrf.mxu0  ;;  %v2366_v12 = vpop.f32.mrf.mxu1 }
 0x744   :  { %3237 = vpow2.f32 %v2912_v54 }
 0x745   :  { %3239 = vtanh.f32 %v2370_v27 }
 0x746   :  { %3241 = vpow2.f32 %v2913_v43 }
 0x74f   :  { %v3236_v47 = vpop.eup %3235 }
 0x750   :  { %v2375_v34 = vadd.f32 1.0, %v3236_v47 }
 0x751   :  { %v3238_v52 = vpop.eup %3237 }
 0x752   :  { %3243 = vrcp.f32 %v2375_v34  ;;  %v2381_v57 = vadd.f32 1.0, %v3238_v52  ;;  %v3240_v24 = vpop.eup %3239 }
 0x753   :  { %v3242_v8 = vpop.eup %3241 }
 0x754   :  { %3245 = vrcp.f32 %v2381_v57  ;;  %v2388_v41 = vadd.f32 1.0, %v3242_v8 }
 0x75d   :  { %v2435_v18 = vpop.f32.mrf.mxu0  ;;  %v2476_v13 = vpop.f32.mrf.mxu1 }
 0x75e   :  { %v2483_v23 = vadd.f32 %v2435_v18, %v4708_v15  ;;  %v2485_v27 = vadd.f32 %v2476_v13, %v4711_v55 }
 0x75f   :  { %v3244_v20 = vpop.eup %3243  ;;  %v2437_v9 = vpop.f32.mrf.mxu0 }
 0x760   :  { %v2478_v26 = vpop.f32.mrf.mxu1  ;;  %v2392_v38 = vmul.f32 %v3244_v20, %v3240_v24  ;;  %v2914_v10 = vmul.f32 -1.442695, %v2483_v23  ;;  %v2484_v39 = vadd.f32 %v2437_v9, %v4709_v11 }
 0x761   :  { %v3246_v53 = vpop.eup %3245  ;;  %v2439_v48 = vpop.f32.mrf.mxu0  ;;  %v2486_v14 = vadd.f32 %v2478_v26, %v4710_v1 }
 0x762   :  { %v2480_v51 = vpop.f32.mrf.mxu1  ;;  %v2391_v35 = vmul.f32 %v3246_v53, %v4400_v37  ;;  %3247 = vpow2.f32 %v2914_v10  ;;  %v2915_v44 = vmul.f32 -1.442695, %v2484_v39  ;;  %v4716_v10 = vld [vmem:[#allocation67_spill] sm:$0xff] }
 0x763   :  { %v2440_v54 = vpop.f32.mrf.mxu0  ;;  %v2916_v43 = vmul.f32 -1.442695, %v2486_v14 }
 0x764   :  { %v2481_v56 = vpop.f32.mrf.mxu1  ;;  %v4540_v12 = vadd.f32 %v2392_v38, %v2391_v35  ;;  %3249 = vpow2.f32 %v2915_v44  ;;  %v4717_v35 = vld [vmem:[#allocation69_spill] sm:$0xff] }
 0x765   :  { %3251 = vrcp.f32 %v2388_v41 }
 0x766   :  { %3253 = vtanh.f32 %v4540_v12 }
 0x767   :  { %3255 = vtanh.f32 %v2485_v27 }
 0x768   :  { %3257 = vpow2.f32 %v2916_v43 }
 0x76f   :  { %v3248_v47 = vpop.eup %3247 }
 0x770   :  { %v2490_v34 = vadd.f32 1.0, %v3248_v47 }
 0x771   :  { %v3250_v52 = vpop.eup %3249 }
 0x772   :  { %v3252_v37 = vpop.eup %3251  ;;  %3259 = vrcp.f32 %v2490_v34  ;;  %v2496_v57 = vadd.f32 1.0, %v3250_v52  ;;  %v4718_v52 = vld [vmem:[#allocation70_spill] sm:$0xff] }
 0x773   :  { %v3254_v24 = vpop.eup %3253 }
 0x774   :  { %3261 = vrcp.f32 %v2496_v57  ;;  %v2395_v18 = vmul.f32 %v3254_v24, %v3252_v37  ;;  %v3256_v13 = vpop.eup %3255  ;;  %v4719_v57 = vld [vmem:[#allocation68_spill] sm:$0xff] }
 0x775   :  { %v3258_v15 = vpop.eup %3257 }
 0x776   :  { %v2524_v8 = vpack.c.bf16 %v2395_v18, %v2395_v18 }
 0x778   :  { %2558 = vmatmul.mubr.bf16.vlgmr.msra.gmra.mxu0 %v2524_v8  ;;  %2599 = vmatmul.mubr.bf16.vlgmr.msra.gmra.mxu1 %v2524_v8 }
 0x779   :  { %2641 = vmatpush1.bf16.msra.mxu0 %v4405_v42  ;;  %2682 = vmatpush1.bf16.msra.mxu1 %v4408_v31 }
 0x77a   :  { %2642 = vmatprep.subr.bf16.mxu0 %v4411_v36  ;;  %2683 = vmatprep.subr.bf16.mxu1 %v4414_v33  ;;  %v2503_v36 = vadd.f32 1.0, %v3258_v15 }
 0x77b   :  { %2672 = vmatprep.mubr.bf16.mxu0 %v4664_v17  ;;  %2713 = vmatprep.mubr.bf16.mxu1 %v4664_v17 }
 0x77c   :  { %3263 = vrcp.f32 %v2503_v36 }
 0x77d   :  { %2643 = vmatpush1.bf16.msra.mxu0 %v4419_v45  ;;  %2684 = vmatpush1.bf16.msra.mxu1 %v4422_v46 }
 0x77e   :  { %2644 = vmatprep.subr.bf16.mxu0 %v4425_v49  ;;  %2685 = vmatprep.subr.bf16.mxu1 %v4428_v50 }
 0x77f   :  { %v3260_v42 = vpop.eup %3259 }
 0x780   :  { %v2507_v31 = vmul.f32 %v3260_v42, %v3256_v13 }
 0x781   :  { %v3262_v23 = vpop.eup %3261  ;;  %2645 = vmatpush1.bf16.msra.mxu0 %v4431_v16  ;;  %2686 = vmatpush1.bf16.msra.mxu1 %v4434_v32 }
 0x782   :  { %v2506_v17 = vmul.f32 %v3262_v23, %v4444_v29  ;;  %2646 = vmatprep.subr.bf16.mxu0 %v4438_v7  ;;  %2687 = vmatprep.subr.bf16.mxu1 %v4441_v62  ;;  %v4712_v7 = vld [vmem:[#allocation63_spill] sm:$0xff] }
 0x783   :  { %v2923_v23 = vld [vmem:[%s4604_s4] ss:$0 sm:$0xff] }
 0x784   :  { %v4560_v33 = vadd.f32 %v2507_v31, %v2506_v17 }
 0x785   :  { %2647 = vmatpush1.bf16.msra.mxu0 %v4446_v28  ;;  %2688 = vmatpush1.bf16.msra.mxu1 %v4449_v30 }
 0x786   :  { %2648 = vmatprep.subr.bf16.mxu0 %v4452_v58  ;;  %2689 = vmatprep.subr.bf16.mxu1 %v4455_v25  ;;  %3265 = vtanh.f32 %v4560_v33  ;;  %v4713_v58 = vld [vmem:[#allocation65_spill] sm:$0xff] }
 0x789   :  { %2649 = vmatpush1.bf16.msra.mxu0 %v4459_v59  ;;  %2690 = vmatpush1.bf16.msra.mxu1 %v4462_v60  ;;  %v3264_v45 = vpop.eup %3263 }
 0x78a   :  { %2650 = vmatprep.subr.bf16.mxu0 %v4465_v61  ;;  %2691 = vmatprep.subr.bf16.mxu1 %v4468_v63 }
 0x78d   :  { %2651 = vmatpush1.bf16.msra.mxu0 %v4471_v0  ;;  %2692 = vmatpush1.bf16.msra.mxu1 %v4474_v2  ;;  %v4714_v2 = vld [vmem:[#allocation66_spill] sm:$0xff] }
 0x78e   :  { %2652 = vmatprep.subr.bf16.mxu0 %v4477_v3  ;;  %2693 = vmatprep.subr.bf16.mxu1 %v4480_v4  ;;  %v4715_v4 = vld [vmem:[#allocation64_spill] sm:$0xff] }
 0x791   :  { %2653 = vmatpush1.bf16.msra.mxu0 %v4483_v5  ;;  %2694 = vmatpush1.bf16.msra.mxu1 %v4486_v6 }
 0x792   :  { %2654 = vmatprep.subr.bf16.mxu0 %v4489_v21  ;;  %2695 = vmatprep.subr.bf16.mxu1 %v4492_v22 }
 0x793   :  { %v3266_v46 = vpop.eup %3265 }
 0x794   :  { %v2510_v49 = vmul.f32 %v3266_v46, %v3264_v45 }
 0x795   :  { %2655 = vmatpush1.bf16.msra.mxu0 %v4495_v19  ;;  %2696 = vmatpush1.bf16.msra.mxu1 %v4498_v40 }
 0x796   :  { %v2639_v50 = vpack.c.bf16 %v2510_v49, %v2510_v49 }
 0x798   :  { %2673 = vmatmul.mubr.bf16.vlgmr.msra.gmra.mxu0 %v2639_v50  ;;  %2714 = vmatmul.mubr.bf16.vlgmr.msra.gmra.mxu1 %v2639_v50 }
 0x838   :  { %v2559_v16 = vpop.f32.mrf.mxu0  ;;  %v2600_v32 = vpop.f32.mrf.mxu1 }
 0x839   :  { %v2607_v62 = vadd.f32 %v2559_v16, %v4712_v7  ;;  %v2609_v5 = vadd.f32 %v2600_v32, %v4715_v4 }
 0x83a   :  { %v2561_v29 = vpop.f32.mrf.mxu0  ;;  %v2602_v28 = vpop.f32.mrf.mxu1 }
 0x83b   :  { %v2917_v30 = vmul.f32 -1.442695, %v2607_v62  ;;  %v2608_v25 = vadd.f32 %v2561_v29, %v4713_v58  ;;  %v2610_v3 = vadd.f32 %v2602_v28, %v4714_v2 }
 0x83c   :  { %v2563_v59 = vpop.f32.mrf.mxu0  ;;  %v2604_v60 = vpop.f32.mrf.mxu1 }
 0x83d   :  { %3267 = vpow2.f32 %v2917_v30  ;;  %v2918_v61 = vmul.f32 -1.442695, %v2608_v25  ;;  %v2919_v6 = vmul.f32 -1.442695, %v2610_v3  ;;  %v2924_v25 = vld [vmem:[#allocation5] ss:$0 sm:$0xff] }
 0x83e   :  { %v2564_v63 = vpop.f32.mrf.mxu0  ;;  %v2605_v0 = vpop.f32.mrf.mxu1 }
 0x83f   :  { %3269 = vpow2.f32 %v2918_v61 }
 0x840   :  { %3271 = vtanh.f32 %v2609_v5 }
 0x841   :  { %3273 = vpow2.f32 %v2919_v6 }
 0x84a   :  { %v3268_v21 = vpop.eup %3267 }
 0x84b   :  { %v2614_v22 = vadd.f32 1.0, %v3268_v21 }
 0x84c   :  { %v3270_v19 = vpop.eup %3269 }
 0x84d   :  { %3275 = vrcp.f32 %v2614_v22  ;;  %v2620_v40 = vadd.f32 1.0, %v3270_v19  ;;  %v3272_v20 = vpop.eup %3271 }
 0x84e   :  { %v3274_v38 = vpop.eup %3273 }
 0x84f   :  { %3277 = vrcp.f32 %v2620_v40  ;;  %v2627_v56 = vadd.f32 1.0, %v3274_v38 }
 0x858   :  { %v2674_v9 = vpop.f32.mrf.mxu0  ;;  %v2715_v26 = vpop.f32.mrf.mxu1 }
 0x859   :  { %v2722_v11 = vadd.f32 %v2674_v9, %v4716_v10  ;;  %v2724_v24 = vadd.f32 %v2715_v26, %v4719_v57 }
 0x85a   :  { %v3276_v39 = vpop.eup %3275  ;;  %v2676_v53 = vpop.f32.mrf.mxu0 }
 0x85b   :  { %v2717_v41 = vpop.f32.mrf.mxu1  ;;  %v2631_v48 = vmul.f32 %v3276_v39, %v3272_v20  ;;  %v2920_v51 = vmul.f32 -1.442695, %v2722_v11  ;;  %v2723_v44 = vadd.f32 %v2676_v53, %v4717_v35 }
 0x85c   :  { %v3278_v54 = vpop.eup %3277  ;;  %v2678_v1 = vpop.f32.mrf.mxu0  ;;  %v2725_v37 = vadd.f32 %v2717_v41, %v4718_v52 }
 0x85d   :  { %v2719_v14 = vpop.f32.mrf.mxu1  ;;  %3279 = vpow2.f32 %v2920_v51  ;;  %v2921_v55 = vmul.f32 -1.442695, %v2723_v44  ;;  %v2630_v27 = vmul.f32 %v3278_v54, %v4540_v12 }
 0x85e   :  { %v2679_v43 = vpop.f32.mrf.mxu0  ;;  %v2922_v18 = vmul.f32 -1.442695, %v2725_v37 }
 0x85f   :  { %v2720_v47 = vpop.f32.mrf.mxu1  ;;  %3281 = vpow2.f32 %v2921_v55  ;;  %v2632_v34 = vadd.f32 %v2631_v48, %v2630_v27 }
 0x860   :  { %3283 = vrcp.f32 %v2627_v56 }
 0x861   :  { %3285 = vtanh.f32 %v2632_v34 }
 0x862   :  { %3287 = vtanh.f32 %v2724_v24 }
 0x863   :  { %3289 = vpow2.f32 %v2922_v18 }
 0x86a   :  { %v3280_v8 = vpop.eup %3279 }
 0x86b   :  { %v2729_v13 = vadd.f32 1.0, %v3280_v8 }
 0x86c   :  { %v3282_v15 = vpop.eup %3281 }
 0x86d   :  { %v3284_v42 = vpop.eup %3283  ;;  %3291 = vrcp.f32 %v2729_v13  ;;  %v2735_v31 = vadd.f32 1.0, %v3282_v15 }
 0x86e   :  { %v3286_v12 = vpop.eup %3285 }
 0x86f   :  { %3293 = vrcp.f32 %v2735_v31  ;;  %v2634_v36 = vmul.f32 %v3286_v12, %v3284_v42  ;;  %v3288_v45 = vpop.eup %3287 }
 0x870   :  { %v3290_v46 = vpop.eup %3289 }
 0x871   :  { %v2766_v17 = vmul.f32 %v2923_v23, %v2634_v36  ;;  %v2742_v32 = vadd.f32 1.0, %v3290_v46 }
 0x873   :  { %2768 = vadd.xlane.f32.xlu0 %v2766_v17  ;;  %3295 = vrcp.f32 %v2742_v32 }
 0x87a   :  { %v3292_v49 = vpop.eup %3291 }
 0x87b   :  { %v2746_v50 = vmul.f32 %v3292_v49, %v3288_v45 }
 0x87c   :  { %v3294_v16 = vpop.eup %3293 }
 0x87d   :  { %v2745_v7 = vmul.f32 %v3294_v16, %v4560_v33 }
 0x87f   :  { %v2747_v62 = vadd.f32 %v2746_v50, %v2745_v7 }
 0x880   :  { %v3296_v29 = vpop.eup %3295 }
 0x881   :  { %3297 = vtanh.f32 %v2747_v62 }
 0x88e   :  { %v3298_v28 = vpop.eup %3297 }
 0x88f   :  { %v2749_v30 = vmul.f32 %v3298_v28, %v3296_v29 }
 0x891   :  { %v2767_v58 = vmul.f32 %v2923_v23, %v2749_v30 }
 0x893   :  { %2770 = vadd.xlane.f32.xlu0 %v2767_v58 }
 0x8fc   :  { %v2769_v59 = vpop.xlane.xlu0 %2768 }
 0x8fd   :  { %v2779_v60 = vadd.f32 %v2924_v25, %v2769_v59 }
 0x8ff   :  { %v2925_v61 = vmul.f32 -1.442695, %v2779_v60 }
 0x901   :  { %3299 = vpow2.f32 %v2925_v61 }
 0x90e   :  { %v3300_v63 = vpop.eup %3299 }
 0x90f   :  { %v2787_v0 = vadd.f32 1.0, %v3300_v63 }
 0x911   :  { %3301 = vrcp.f32 %v2787_v0 }
 0x91c   :  { %v2771_v2 = vpop.xlane.xlu0 %2770 }
 0x91d   :  { %v2780_v3 = vadd.f32 %v2924_v25, %v2771_v2 }
 0x91e   :  { %v3302_v33 = vpop.eup %3301 }
 0x91f   :  { %2794 = vst.msk [vmem:[%s4606_s6] sm:$0xff] %vm2793_vm0, %v3302_v33  ;;  %v2926_v4 = vmul.f32 -1.442695, %v2780_v3 }
 0x921   :  { %3303 = vpow2.f32 %v2926_v4 }
 0x92e   :  { %v3304_v5 = vpop.eup %3303 }
 0x92f   :  { %v2788_v6 = vadd.f32 1.0, %v3304_v5 }
 0x931   :  { %3305 = vrcp.f32 %v2788_v6 }
 0x93e   :  { %v3306_v21 = vpop.eup %3305 }
 0x93f   :  { %2795 = vst.msk [vmem:[%s4606_s6 + $0x8] sm:$0xff] %vm2793_vm0, %v3306_v21 }
 0x940   :  { %2800 = vsyncpa [#allocation7], 1 }
 0x941   :  { %2801 = vsyncpa [#allocation9], 1 }
 0x942   :  { %2802 = vsyncpa [#allocation12], 1 }

</bundles_post_ra>
